<compile_context>
chip_gen: v5e
topology: v5e:2x2
jax: 0.10.0
libtpu: 0.0.40
codegen_flags: <defaults>
</compile_context>

<pallas_src>
import functools
import math

import jax
import jax.numpy as jnp
import numpy as np
from jax.experimental import pallas as pl
from jax.experimental.pallas import tpu as pltpu

LEAKY_SLOPE = 0.05
GN_EPS = 1e-5
VMEM_LIMIT = 32 * 1024 * 1024   # explicit; tiny footprint, safe on v5e/v6e/v7x
_PADL = 128                     # lane-aligned offset of the activation in the pad buffer
_CIN_PAD = 8                    # input channels padded 4 -> 8 (zero weights)

# conv name -> (cin, cout, kernel)
_CONV_SPECS = {
    "inc": (4, 8, 3),                                   # input_conv
    "conv_d0": (8, 16, 3), "pool_d0": (16, 16, 3),      # UNetBlockDown 0
    "conv_d1": (16, 32, 3), "pool_d1": (32, 32, 3),     # UNetBlockDown 1
    "conv_d2": (32, 64, 3),                             # bottleneck block
    "up_0": (64, 32, 1), "conv_u0": (64, 32, 3),        # UNetBlockUp 0
    "up_1": (32, 16, 1), "conv_u1": (32, 16, 3),        # UNetBlockUp 1
    "outc": (16, 2, 1),                                 # output_conv
}
# groupnorm name -> (channels, groups)  (PyTorch GroupNorm: contiguous groups)
_GN_SPECS = {"gn_inc": (8, 8), "gn_d0": (8, 8), "gn_d1": (16, 16),
             "gn_d2": (32, 16), "gn_u0": (64, 16), "gn_u1": (32, 16)}


def _operand_names():
    names = ["x", "mask_l0", "mask_l1", "mask_l2",
             "sel_l0", "sel_l1", "ups_l2", "ups_l1"]
    for cname in _CONV_SPECS:
        names += [cname + "_w", cname + "_b"]
    for gname, (c, g) in _GN_SPECS.items():
        names += [gname + "_g", gname + "_b"]
        if c // g > 1:
            names += [gname + "_m", gname + "_mt"]
    return names


# ----------------------------------------------------------------------------
# The fused kernel (one batch item per grid step)
# ----------------------------------------------------------------------------
def _unet_kernel(names, widths, *refs):
    n_in = len(names)
    r = dict(zip(names, refs[:n_in]))
    o_ref = refs[n_in]
    pad_l0, pad_l1, pad_l2, patch = refs[n_in + 1:]

    pads = (pad_l0, pad_l1, pad_l2)
    masks = (r["mask_l0"], r["mask_l1"], r["mask_l2"])

    # Zero the zero-bordered activation buffers; only their centre columns are
    # ever rewritten below, so the 128-lane borders stay zero for every conv.
    for p in pads:
        p[...] = jnp.zeros_like(p)

    def leaky(v):
        return jnp.where(v > 0, v, LEAKY_SLOPE * v)

    def conv3x3(x, name, lvl):
        """3x3 / stride-1 / pad-1 conv (+bias) as one long-K GEMM on the MXU."""
        cin, hw = x.shape
        w_img = widths[lvl]
        pad_ref, mask_ref = pads[lvl], masks[lvl]
        pad_ref[0:cin, _PADL:_PADL + hw] = x              # lane-aligned store
        for t in range(9):                                # build im2col patches
            dy, dx = t // 3 - 1, t % 3 - 1
            off = _PADL + dy * w_img + dx
            tap = pad_ref[0:cin, off:off + hw]
            if t != 4:                                    # centre tap needs no mask
                tap = tap * mask_ref[t:t + 1, :]
            patch[t * cin:(t + 1) * cin, 0:hw] = tap
        acc = jnp.dot(r[name + "_w"][...],
                      patch[0:9 * cin, 0:hw].astype(jnp.bfloat16),
                      preferred_element_type=jnp.float32)
        return acc + r[name + "_b"][...]

    def conv1x1(x, name):
        acc = jnp.dot(r[name + "_w"][...], x.astype(jnp.bfloat16),
                      preferred_element_type=jnp.float32)
        return acc + r[name + "_b"][...]

    def groupnorm(x, name):
        cc, hw = x.shape
        _, groups = _GN_SPECS[name]
        cpg = cc // groups
        s = jnp.sum(x, axis=1, keepdims=True)             # [C, 1]
        ss = jnp.sum(x * x, axis=1, keepdims=True)        # [C, 1]
        if cpg == 1:                                      # one channel per group
            mean_c = s * (1.0 / hw)
            var_c = ss * (1.0 / hw) - mean_c * mean_c
            rstd_c = jax.lax.rsqrt(var_c + GN_EPS)
        else:                                             # contiguous channel groups
            inv = 1.0 / (cpg * hw)
            mt = r[name + "_mt"][...]                     # [G, C]
            mean_g = jnp.dot(mt, s, preferred_element_type=jnp.float32) * inv
            ex2_g = jnp.dot(mt, ss, preferred_element_type=jnp.float32) * inv
            rstd_g = jax.lax.rsqrt(ex2_g - mean_g * mean_g + GN_EPS)
            m = r[name + "_m"][...]                       # [C, G]
            mean_c = jnp.dot(m, mean_g, preferred_element_type=jnp.float32)
            rstd_c = jnp.dot(m, rstd_g, preferred_element_type=jnp.float32)
        scale = r[name + "_g"][...] * rstd_c
        shift = r[name + "_b"][...] - mean_c * scale
        return x * scale + shift

    # ---------------- forward pass for one batch item ----------------
    x = r["x"][0]                                                      # [8, HW]

    # input_conv: Conv3x3 -> GroupNorm -> LeakyReLU
    a = leaky(groupnorm(conv3x3(x, "inc", 0), "gn_inc"))               # [8, HW]

    # down block 0: GN -> Conv3x3 -> LeakyReLU, then fused stride-2 conv pool
    skip0 = leaky(conv3x3(groupnorm(a, "gn_d0"), "conv_d0", 0))        # [16, HW]
    p0 = jnp.dot(conv3x3(skip0, "pool_d0", 0), r["sel_l0"][...],
                 preferred_element_type=jnp.float32)                   # [16, HW/4]

    # down block 1
    skip1 = leaky(conv3x3(groupnorm(p0, "gn_d1"), "conv_d1", 1))       # [32, HW/4]
    p1 = jnp.dot(conv3x3(skip1, "pool_d1", 1), r["sel_l1"][...],
                 preferred_element_type=jnp.float32)                   # [32, HW/16]

    # bottleneck block (its pooled output is discarded by the UNet forward)
    bott = leaky(conv3x3(groupnorm(p1, "gn_d2"), "conv_d2", 2))        # [64, HW/16]

    # up block 0: 1x1 conv (hoisted before nearest-2x upsample) -> cat skip -> block
    u = jnp.dot(conv1x1(bott, "up_0"), r["ups_l2"][...],
                preferred_element_type=jnp.float32)                    # [32, HW/4]
    cat = jnp.concatenate([u, skip1], axis=0)                          # [64, HW/4]
    up0 = leaky(conv3x3(groupnorm(cat, "gn_u0"), "conv_u0", 1))        # [32, HW/4]

    # up block 1
    u = jnp.dot(conv1x1(up0, "up_1"), r["ups_l1"][...],
                preferred_element_type=jnp.float32)                    # [16, HW]
    cat = jnp.concatenate([u, skip0], axis=0)                          # [32, HW]
    up1 = leaky(conv3x3(groupnorm(cat, "gn_u1"), "conv_u1", 0))        # [16, HW]

    # output_conv: 1x1 conv -> Softmax over channels (sublane axis == dim 1)
    logits = conv1x1(up1, "outc")                                      # [2, HW]
    mx = jnp.max(logits, axis=0, keepdims=True)
    e = jnp.exp(logits - mx)
    o_ref[0] = (e / jnp.sum(e, axis=0, keepdims=True)).astype(o_ref.dtype)


# ----------------------------------------------------------------------------
# Trace-time constants (pure numpy -> baked into the jaxpr, zero runtime glue)
# ----------------------------------------------------------------------------
def _border_masks(h, w):
    """[9, h*w] 0/1 mask per 3x3 tap killing out-of-image (wrap / pad) reads."""
    yy, xx = np.divmod(np.arange(h * w), w)
    rows = []
    for dy in (-1, 0, 1):
        for dx in (-1, 0, 1):
            rows.append((yy + dy >= 0) & (yy + dy < h) & (xx + dx >= 0) & (xx + dx < w))
    return np.stack(rows).astype(np.float32)


def _downsample_matrix(h, w):
    """[h*w, (h//2)*(w//2)] 0/1 column selector == stride-2 subsampling."""
    ho, wo = h // 2, w // 2
    s = np.zeros((h * w, ho * wo), np.float32)
    for yo in range(ho):
        for xo in range(wo):
            s[2 * yo * w + 2 * xo, yo * wo + xo] = 1.0
    return s


def _upsample_matrix(h, w):
    """[h*w, 4*h*w] 0/1 matrix == nearest-neighbour 2x upsampling."""
    ho, wo = 2 * h, 2 * w
    u = np.zeros((h * w, ho * wo), np.float32)
    for yo in range(ho):
        for xo in range(wo):
            u[(yo // 2) * w + xo // 2, yo * wo + xo] = 1.0
    return u


# ----------------------------------------------------------------------------
# Parameters (conv ~ kaiming_uniform, bias = 0; GroupNorm weight = 1, bias = 0)
# ----------------------------------------------------------------------------
def make_conv(key, cin, cout, k, cin_pad=None):
    fan_in = cin * k * k
    bound = math.sqrt(6.0 / fan_in)
    # weight layout: [Cout, K] with K index = (tap * Cin + cin); bf16 MXU operand
    w = jax.random.uniform(key, (cout, k * k, cin), jnp.float32, -bound, bound)
    if cin_pad is not None and cin_pad > cin:
        w = jnp.pad(w, ((0, 0), (0, 0), (0, cin_pad - cin)))   # zero weight columns
    return (w.reshape(cout, -1).astype(jnp.bfloat16),
            jnp.zeros((cout, 1), jnp.float32))


def build_params(key):
    params = {}
    for k_, (name, (cin, cout, ks)) in zip(jax.random.split(key, len(_CONV_SPECS)),
                                           _CONV_SPECS.items()):
        w, b = make_conv(k_, cin, cout, ks,
                         cin_pad=_CIN_PAD if name == "inc" else None)
        params[name + "_w"], params[name + "_b"] = w, b
    for name, (c, g) in _GN_SPECS.items():
        params[name + "_g"] = jnp.ones((c, 1), jnp.float32)     # GroupNorm weight
        params[name + "_b"] = jnp.zeros((c, 1), jnp.float32)    # GroupNorm bias
        if c // g > 1:                                          # grouped layers only
            idx = np.arange(c) // (c // g)
            m = (idx[:, None] == np.arange(g)[None, :]).astype(np.float32)
            params[name + "_m"] = jnp.asarray(m)                # [C, G] one-hot
            params[name + "_mt"] = jnp.asarray(m.T)             # [G, C]
    return params


# ----------------------------------------------------------------------------
# Scaffold_UNet forward: one fused pallas_call
# ----------------------------------------------------------------------------
def scaffold_unet_forward(params, x_nchw):
    n, c, h, w = x_nchw.shape
    hw = h * w
    x = x_nchw.reshape(n, c, hw)                  # lane-dense [N, C, H*W]
    if c < _CIN_PAD:                              # zero channel pad (zero weights)
        x = jnp.pad(x, ((0, 0), (0, _CIN_PAD - c), (0, 0)))

    consts = {
        "mask_l0": _border_masks(h, w),
        "mask_l1": _border_masks(h // 2, w // 2),
        "mask_l2": _border_masks(h // 4, w // 4),
        "sel_l0": _downsample_matrix(h, w),
        "sel_l1": _downsample_matrix(h // 2, w // 2),
        "ups_l2": _upsample_matrix(h // 4, w // 4),
        "ups_l1": _upsample_matrix(h // 2, w // 2),
    }
    operands = {**params, **consts, "x": x}
    names = _operand_names()
    arrays = [operands[nm] for nm in names]

    in_specs = []
    for nm, arr in zip(names, arrays):
        if nm == "x":
            in_specs.append(pl.BlockSpec((1,) + x.shape[1:], lambda i: (i, 0, 0)))
        else:                                     # parameters / constants: resident
            in_specs.append(pl.BlockSpec(arr.shape, lambda i: (0, 0)))

    # Zero-bordered activation buffers (rows = max Cin per level) + im2col patches.
    scratch = [
        pltpu.VMEM((32, hw + 2 * _PADL), jnp.float32),        # 16x16 level
        pltpu.VMEM((64, hw // 4 + 2 * _PADL), jnp.float32),   # 8x8 level
        pltpu.VMEM((32, hw // 16 + 2 * _PADL), jnp.float32),  # 4x4 level
        pltpu.VMEM((576, hw), jnp.float32),                   # patches (max K=576)
    ]

    out = pl.pallas_call(
        functools.partial(_unet_kernel, tuple(names), (w, w // 2, w // 4)),
        out_shape=jax.ShapeDtypeStruct((n, 2, hw), jnp.float32),
        grid=(n,),
        in_specs=in_specs,
        out_specs=pl.BlockSpec((1, 2, hw), lambda i: (i, 0, 0)),
        scratch_shapes=scratch,
        compiler_params=pltpu.CompilerParams(
            dimension_semantics=("parallel",), vmem_limit_bytes=VMEM_LIMIT),
    )(*arrays)
    return out.reshape(n, 2, h, w), None          # (segmentation, auxiliaries=None)


if __name__ == "__main__":
    key = jax.random.PRNGKey(0)
    k_x, k_p = jax.random.split(key)
    params = build_params(k_p)
    x = jax.random.normal(k_x, (2, 4, 16, 16), jnp.float32)   # NCHW like PyTorch

    out, aux = jax.jit(scaffold_unet_forward)(params, x)
    out = jax.block_until_ready(out)

    assert out.shape == (2, 2, 16, 16), out.shape
    assert aux is None
    assert bool(jnp.all(jnp.isfinite(out)))
    # softmax over the class dim must sum to 1
    assert bool(jnp.allclose(out.sum(axis=1), 1.0, atol=1e-5))
    print("KERNEL_OK")
</pallas_src>

<mosaic_0001>
module attributes {stable_mosaic.version = 11 : i64} {
  func.func @_unet_kernel(%arg0: i32, %arg1: memref<1x8x256xf32, #tpu.memory_space<vmem>>, %arg2: memref<9x256xf32, #tpu.memory_space<vmem>>, %arg3: memref<9x64xf32, #tpu.memory_space<vmem>>, %arg4: memref<9x16xf32, #tpu.memory_space<vmem>>, %arg5: memref<256x64xf32, #tpu.memory_space<vmem>>, %arg6: memref<64x16xf32, #tpu.memory_space<vmem>>, %arg7: memref<16x64xf32, #tpu.memory_space<vmem>>, %arg8: memref<64x256xf32, #tpu.memory_space<vmem>>, %arg9: memref<8x72xbf16, #tpu.memory_space<vmem>>, %arg10: memref<8x1xf32, #tpu.memory_space<vmem>>, %arg11: memref<16x72xbf16, #tpu.memory_space<vmem>>, %arg12: memref<16x1xf32, #tpu.memory_space<vmem>>, %arg13: memref<16x144xbf16, #tpu.memory_space<vmem>>, %arg14: memref<16x1xf32, #tpu.memory_space<vmem>>, %arg15: memref<32x144xbf16, #tpu.memory_space<vmem>>, %arg16: memref<32x1xf32, #tpu.memory_space<vmem>>, %arg17: memref<32x288xbf16, #tpu.memory_space<vmem>>, %arg18: memref<32x1xf32, #tpu.memory_space<vmem>>, %arg19: memref<64x288xbf16, #tpu.memory_space<vmem>>, %arg20: memref<64x1xf32, #tpu.memory_space<vmem>>, %arg21: memref<32x64xbf16, #tpu.memory_space<vmem>>, %arg22: memref<32x1xf32, #tpu.memory_space<vmem>>, %arg23: memref<32x576xbf16, #tpu.memory_space<vmem>>, %arg24: memref<32x1xf32, #tpu.memory_space<vmem>>, %arg25: memref<16x32xbf16, #tpu.memory_space<vmem>>, %arg26: memref<16x1xf32, #tpu.memory_space<vmem>>, %arg27: memref<16x288xbf16, #tpu.memory_space<vmem>>, %arg28: memref<16x1xf32, #tpu.memory_space<vmem>>, %arg29: memref<2x16xbf16, #tpu.memory_space<vmem>>, %arg30: memref<2x1xf32, #tpu.memory_space<vmem>>, %arg31: memref<8x1xf32, #tpu.memory_space<vmem>>, %arg32: memref<8x1xf32, #tpu.memory_space<vmem>>, %arg33: memref<8x1xf32, #tpu.memory_space<vmem>>, %arg34: memref<8x1xf32, #tpu.memory_space<vmem>>, %arg35: memref<16x1xf32, #tpu.memory_space<vmem>>, %arg36: memref<16x1xf32, #tpu.memory_space<vmem>>, %arg37: memref<32x1xf32, #tpu.memory_space<vmem>>, %arg38: memref<32x1xf32, #tpu.memory_space<vmem>>, %arg39: memref<32x16xf32, #tpu.memory_space<vmem>>, %arg40: memref<16x32xf32, #tpu.memory_space<vmem>>, %arg41: memref<64x1xf32, #tpu.memory_space<vmem>>, %arg42: memref<64x1xf32, #tpu.memory_space<vmem>>, %arg43: memref<64x16xf32, #tpu.memory_space<vmem>>, %arg44: memref<16x64xf32, #tpu.memory_space<vmem>>, %arg45: memref<32x1xf32, #tpu.memory_space<vmem>>, %arg46: memref<32x1xf32, #tpu.memory_space<vmem>>, %arg47: memref<32x16xf32, #tpu.memory_space<vmem>>, %arg48: memref<16x32xf32, #tpu.memory_space<vmem>>, %arg49: memref<1x2x256xf32, #tpu.memory_space<vmem>>, %arg50: memref<32x512xf32, #tpu.memory_space<vmem>>, %arg51: memref<64x320xf32, #tpu.memory_space<vmem>>, %arg52: memref<32x272xf32, #tpu.memory_space<vmem>>, %arg53: memref<576x256xf32, #tpu.memory_space<vmem>>) attributes {dimension_semantics = [#tpu.dimension_semantics<parallel>], iteration_bounds = array<i64: 2>, scalar_prefetch = 0 : i64, scratch_operands = 4 : i64, tpu.core_type = #tpu.core_type<tc>, window_params = [{transform_indices = @transform_0, window_bounds = array<i64: 1, 8, 256>}, {pipeline_mode = #tpu.pipeline_mode<synchronous>, transform_indices = @transform_1, window_bounds = array<i64: 9, 256>}, {pipeline_mode = #tpu.pipeline_mode<synchronous>, transform_indices = @transform_2, window_bounds = array<i64: 9, 64>}, {pipeline_mode = #tpu.pipeline_mode<synchronous>, transform_indices = @transform_3, window_bounds = array<i64: 9, 16>}, {pipeline_mode = #tpu.pipeline_mode<synchronous>, transform_indices = @transform_4, window_bounds = array<i64: 256, 64>}, {pipeline_mode = #tpu.pipeline_mode<synchronous>, transform_indices = @transform_5, window_bounds = array<i64: 64, 16>}, {pipeline_mode = #tpu.pipeline_mode<synchronous>, transform_indices = @transform_6, window_bounds = array<i64: 16, 64>}, {pipeline_mode = #tpu.pipeline_mode<synchronous>, transform_indices = @transform_7, window_bounds = array<i64: 64, 256>}, {pipeline_mode = #tpu.pipeline_mode<synchronous>, transform_indices = @transform_8, window_bounds = array<i64: 8, 72>}, {pipeline_mode = #tpu.pipeline_mode<synchronous>, transform_indices = @transform_9, window_bounds = array<i64: 8, 1>}, {pipeline_mode = #tpu.pipeline_mode<synchronous>, transform_indices = @transform_10, window_bounds = array<i64: 16, 72>}, {pipeline_mode = #tpu.pipeline_mode<synchronous>, transform_indices = @transform_11, window_bounds = array<i64: 16, 1>}, {pipeline_mode = #tpu.pipeline_mode<synchronous>, transform_indices = @transform_12, window_bounds = array<i64: 16, 144>}, {pipeline_mode = #tpu.pipeline_mode<synchronous>, transform_indices = @transform_13, window_bounds = array<i64: 16, 1>}, {pipeline_mode = #tpu.pipeline_mode<synchronous>, transform_indices = @transform_14, window_bounds = array<i64: 32, 144>}, {pipeline_mode = #tpu.pipeline_mode<synchronous>, transform_indices = @transform_15, window_bounds = array<i64: 32, 1>}, {pipeline_mode = #tpu.pipeline_mode<synchronous>, transform_indices = @transform_16, window_bounds = array<i64: 32, 288>}, {pipeline_mode = #tpu.pipeline_mode<synchronous>, transform_indices = @transform_17, window_bounds = array<i64: 32, 1>}, {pipeline_mode = #tpu.pipeline_mode<synchronous>, transform_indices = @transform_18, window_bounds = array<i64: 64, 288>}, {pipeline_mode = #tpu.pipeline_mode<synchronous>, transform_indices = @transform_19, window_bounds = array<i64: 64, 1>}, {pipeline_mode = #tpu.pipeline_mode<synchronous>, transform_indices = @transform_20, window_bounds = array<i64: 32, 64>}, {pipeline_mode = #tpu.pipeline_mode<synchronous>, transform_indices = @transform_21, window_bounds = array<i64: 32, 1>}, {pipeline_mode = #tpu.pipeline_mode<synchronous>, transform_indices = @transform_22, window_bounds = array<i64: 32, 576>}, {pipeline_mode = #tpu.pipeline_mode<synchronous>, transform_indices = @transform_23, window_bounds = array<i64: 32, 1>}, {pipeline_mode = #tpu.pipeline_mode<synchronous>, transform_indices = @transform_24, window_bounds = array<i64: 16, 32>}, {pipeline_mode = #tpu.pipeline_mode<synchronous>, transform_indices = @transform_25, window_bounds = array<i64: 16, 1>}, {pipeline_mode = #tpu.pipeline_mode<synchronous>, transform_indices = @transform_26, window_bounds = array<i64: 16, 288>}, {pipeline_mode = #tpu.pipeline_mode<synchronous>, transform_indices = @transform_27, window_bounds = array<i64: 16, 1>}, {pipeline_mode = #tpu.pipeline_mode<synchronous>, transform_indices = @transform_28, window_bounds = array<i64: 2, 16>}, {pipeline_mode = #tpu.pipeline_mode<synchronous>, transform_indices = @transform_29, window_bounds = array<i64: 2, 1>}, {pipeline_mode = #tpu.pipeline_mode<synchronous>, transform_indices = @transform_30, window_bounds = array<i64: 8, 1>}, {pipeline_mode = #tpu.pipeline_mode<synchronous>, transform_indices = @transform_31, window_bounds = array<i64: 8, 1>}, {pipeline_mode = #tpu.pipeline_mode<synchronous>, transform_indices = @transform_32, window_bounds = array<i64: 8, 1>}, {pipeline_mode = #tpu.pipeline_mode<synchronous>, transform_indices = @transform_33, window_bounds = array<i64: 8, 1>}, {pipeline_mode = #tpu.pipeline_mode<synchronous>, transform_indices = @transform_34, window_bounds = array<i64: 16, 1>}, {pipeline_mode = #tpu.pipeline_mode<synchronous>, transform_indices = @transform_35, window_bounds = array<i64: 16, 1>}, {pipeline_mode = #tpu.pipeline_mode<synchronous>, transform_indices = @transform_36, window_bounds = array<i64: 32, 1>}, {pipeline_mode = #tpu.pipeline_mode<synchronous>, transform_indices = @transform_37, window_bounds = array<i64: 32, 1>}, {pipeline_mode = #tpu.pipeline_mode<synchronous>, transform_indices = @transform_38, window_bounds = array<i64: 32, 16>}, {pipeline_mode = #tpu.pipeline_mode<synchronous>, transform_indices = @transform_39, window_bounds = array<i64: 16, 32>}, {pipeline_mode = #tpu.pipeline_mode<synchronous>, transform_indices = @transform_40, window_bounds = array<i64: 64, 1>}, {pipeline_mode = #tpu.pipeline_mode<synchronous>, transform_indices = @transform_41, window_bounds = array<i64: 64, 1>}, {pipeline_mode = #tpu.pipeline_mode<synchronous>, transform_indices = @transform_42, window_bounds = array<i64: 64, 16>}, {pipeline_mode = #tpu.pipeline_mode<synchronous>, transform_indices = @transform_43, window_bounds = array<i64: 16, 64>}, {pipeline_mode = #tpu.pipeline_mode<synchronous>, transform_indices = @transform_44, window_bounds = array<i64: 32, 1>}, {pipeline_mode = #tpu.pipeline_mode<synchronous>, transform_indices = @transform_45, window_bounds = array<i64: 32, 1>}, {pipeline_mode = #tpu.pipeline_mode<synchronous>, transform_indices = @transform_46, window_bounds = array<i64: 32, 16>}, {pipeline_mode = #tpu.pipeline_mode<synchronous>, transform_indices = @transform_47, window_bounds = array<i64: 16, 32>}, {transform_indices = @transform_48, window_bounds = array<i64: 1, 2, 256>}]} {
    %cst = arith.constant 0.000000e+00 : f32
    %0 = vector.broadcast %cst : f32 to vector<32x512xf32>
    %c0 = arith.constant 0 : index
    %c0_0 = arith.constant 0 : index
    %1 = vector.load %arg50[%c0, %c0_0] : memref<32x512xf32, #tpu.memory_space<vmem>>, vector<32x512xf32>
    tpu.vector_store %arg50[%c0, %c0_0], %0 {strides = array<i32>} : memref<32x512xf32, #tpu.memory_space<vmem>>, vector<32x512xf32>,
    %cst_1 = arith.constant 0.000000e+00 : f32
    %2 = vector.broadcast %cst_1 : f32 to vector<64x320xf32>
    %c0_2 = arith.constant 0 : index
    %c0_3 = arith.constant 0 : index
    %3 = vector.load %arg51[%c0_2, %c0_3] : memref<64x320xf32, #tpu.memory_space<vmem>>, vector<64x320xf32>
    tpu.vector_store %arg51[%c0_2, %c0_3], %2 {strides = array<i32>} : memref<64x320xf32, #tpu.memory_space<vmem>>, vector<64x320xf32>,
    %cst_4 = arith.constant 0.000000e+00 : f32
    %4 = vector.broadcast %cst_4 : f32 to vector<32x272xf32>
    %c0_5 = arith.constant 0 : index
    %c0_6 = arith.constant 0 : index
    %5 = vector.load %arg52[%c0_5, %c0_6] : memref<32x272xf32, #tpu.memory_space<vmem>>, vector<32x272xf32>
    tpu.vector_store %arg52[%c0_5, %c0_6], %4 {strides = array<i32>} : memref<32x272xf32, #tpu.memory_space<vmem>>, vector<32x272xf32>,
    %c0_7 = arith.constant 0 : index
    %c0_8 = arith.constant 0 : index
    %c0_9 = arith.constant 0 : index
    %6 = vector.load %arg1[%c0_7, %c0_8, %c0_9] : memref<1x8x256xf32, #tpu.memory_space<vmem>>, vector<1x8x256xf32>
    %7 = vector.shape_cast %6 : vector<1x8x256xf32> to vector<8x256xf32>
    %c0_10 = arith.constant 0 : index
    %c128 = arith.constant 128 : index
    %8 = vector.load %arg50[%c0_10, %c128] : memref<32x512xf32, #tpu.memory_space<vmem>>, vector<8x256xf32>
    tpu.vector_store %arg50[%c0_10, %c128], %7 {strides = array<i32>} : memref<32x512xf32, #tpu.memory_space<vmem>>, vector<8x256xf32>,
    %c0_11 = arith.constant 0 : index
    %c111 = arith.constant 111 : index
    %9 = vector.load %arg50[%c0_11, %c111] : memref<32x512xf32, #tpu.memory_space<vmem>>, vector<8x256xf32>
    %c0_12 = arith.constant 0 : index
    %c0_13 = arith.constant 0 : index
    %10 = vector.load %arg2[%c0_12, %c0_13] : memref<9x256xf32, #tpu.memory_space<vmem>>, vector<1x256xf32>
    %11 = vector.broadcast %10 : vector<1x256xf32> to vector<8x256xf32>
    %12 = arith.mulf %9, %11 : vector<8x256xf32>
    %c0_14 = arith.constant 0 : index
    %c0_15 = arith.constant 0 : index
    %13 = vector.load %arg53[%c0_14, %c0_15] : memref<576x256xf32, #tpu.memory_space<vmem>>, vector<8x256xf32>
    tpu.vector_store %arg53[%c0_14, %c0_15], %12 {strides = array<i32>} : memref<576x256xf32, #tpu.memory_space<vmem>>, vector<8x256xf32>,
    %c0_16 = arith.constant 0 : index
    %c112 = arith.constant 112 : index
    %14 = vector.load %arg50[%c0_16, %c112] : memref<32x512xf32, #tpu.memory_space<vmem>>, vector<8x256xf32>
    %c1 = arith.constant 1 : index
    %c0_17 = arith.constant 0 : index
    %15 = vector.load %arg2[%c1, %c0_17] : memref<9x256xf32, #tpu.memory_space<vmem>>, vector<1x256xf32>
    %16 = vector.broadcast %15 : vector<1x256xf32> to vector<8x256xf32>
    %17 = arith.mulf %14, %16 : vector<8x256xf32>
    %c8 = arith.constant 8 : index
    %c0_18 = arith.constant 0 : index
    %18 = vector.load %arg53[%c8, %c0_18] : memref<576x256xf32, #tpu.memory_space<vmem>>, vector<8x256xf32>
    tpu.vector_store %arg53[%c8, %c0_18], %17 {strides = array<i32>} : memref<576x256xf32, #tpu.memory_space<vmem>>, vector<8x256xf32>,
    %c0_19 = arith.constant 0 : index
    %c113 = arith.constant 113 : index
    %19 = vector.load %arg50[%c0_19, %c113] : memref<32x512xf32, #tpu.memory_space<vmem>>, vector<8x256xf32>
    %c2 = arith.constant 2 : index
    %c0_20 = arith.constant 0 : index
    %20 = vector.load %arg2[%c2, %c0_20] : memref<9x256xf32, #tpu.memory_space<vmem>>, vector<1x256xf32>
    %21 = vector.broadcast %20 : vector<1x256xf32> to vector<8x256xf32>
    %22 = arith.mulf %19, %21 : vector<8x256xf32>
    %c16 = arith.constant 16 : index
    %c0_21 = arith.constant 0 : index
    %23 = vector.load %arg53[%c16, %c0_21] : memref<576x256xf32, #tpu.memory_space<vmem>>, vector<8x256xf32>
    tpu.vector_store %arg53[%c16, %c0_21], %22 {strides = array<i32>} : memref<576x256xf32, #tpu.memory_space<vmem>>, vector<8x256xf32>,
    %c0_22 = arith.constant 0 : index
    %c127 = arith.constant 127 : index
    %24 = vector.load %arg50[%c0_22, %c127] : memref<32x512xf32, #tpu.memory_space<vmem>>, vector<8x256xf32>
    %c3 = arith.constant 3 : index
    %c0_23 = arith.constant 0 : index
    %25 = vector.load %arg2[%c3, %c0_23] : memref<9x256xf32, #tpu.memory_space<vmem>>, vector<1x256xf32>
    %26 = vector.broadcast %25 : vector<1x256xf32> to vector<8x256xf32>
    %27 = arith.mulf %24, %26 : vector<8x256xf32>
    %c24 = arith.constant 24 : index
    %c0_24 = arith.constant 0 : index
    %28 = vector.load %arg53[%c24, %c0_24] : memref<576x256xf32, #tpu.memory_space<vmem>>, vector<8x256xf32>
    tpu.vector_store %arg53[%c24, %c0_24], %27 {strides = array<i32>} : memref<576x256xf32, #tpu.memory_space<vmem>>, vector<8x256xf32>,
    %c0_25 = arith.constant 0 : index
    %c128_26 = arith.constant 128 : index
    %29 = vector.load %arg50[%c0_25, %c128_26] : memref<32x512xf32, #tpu.memory_space<vmem>>, vector<8x256xf32>
    %c32 = arith.constant 32 : index
    %c0_27 = arith.constant 0 : index
    %30 = vector.load %arg53[%c32, %c0_27] : memref<576x256xf32, #tpu.memory_space<vmem>>, vector<8x256xf32>
    tpu.vector_store %arg53[%c32, %c0_27], %29 {strides = array<i32>} : memref<576x256xf32, #tpu.memory_space<vmem>>, vector<8x256xf32>,
    %c0_28 = arith.constant 0 : index
    %c129 = arith.constant 129 : index
    %31 = vector.load %arg50[%c0_28, %c129] : memref<32x512xf32, #tpu.memory_space<vmem>>, vector<8x256xf32>
    %c5 = arith.constant 5 : index
    %c0_29 = arith.constant 0 : index
    %32 = vector.load %arg2[%c5, %c0_29] : memref<9x256xf32, #tpu.memory_space<vmem>>, vector<1x256xf32>
    %33 = vector.broadcast %32 : vector<1x256xf32> to vector<8x256xf32>
    %34 = arith.mulf %31, %33 : vector<8x256xf32>
    %c40 = arith.constant 40 : index
    %c0_30 = arith.constant 0 : index
    %35 = vector.load %arg53[%c40, %c0_30] : memref<576x256xf32, #tpu.memory_space<vmem>>, vector<8x256xf32>
    tpu.vector_store %arg53[%c40, %c0_30], %34 {strides = array<i32>} : memref<576x256xf32, #tpu.memory_space<vmem>>, vector<8x256xf32>,
    %c0_31 = arith.constant 0 : index
    %c143 = arith.constant 143 : index
    %36 = vector.load %arg50[%c0_31, %c143] : memref<32x512xf32, #tpu.memory_space<vmem>>, vector<8x256xf32>
    %c6 = arith.constant 6 : index
    %c0_32 = arith.constant 0 : index
    %37 = vector.load %arg2[%c6, %c0_32] : memref<9x256xf32, #tpu.memory_space<vmem>>, vector<1x256xf32>
    %38 = vector.broadcast %37 : vector<1x256xf32> to vector<8x256xf32>
    %39 = arith.mulf %36, %38 : vector<8x256xf32>
    %c48 = arith.constant 48 : index
    %c0_33 = arith.constant 0 : index
    %40 = vector.load %arg53[%c48, %c0_33] : memref<576x256xf32, #tpu.memory_space<vmem>>, vector<8x256xf32>
    tpu.vector_store %arg53[%c48, %c0_33], %39 {strides = array<i32>} : memref<576x256xf32, #tpu.memory_space<vmem>>, vector<8x256xf32>,
    %c0_34 = arith.constant 0 : index
    %c144 = arith.constant 144 : index
    %41 = vector.load %arg50[%c0_34, %c144] : memref<32x512xf32, #tpu.memory_space<vmem>>, vector<8x256xf32>
    %c7 = arith.constant 7 : index
    %c0_35 = arith.constant 0 : index
    %42 = vector.load %arg2[%c7, %c0_35] : memref<9x256xf32, #tpu.memory_space<vmem>>, vector<1x256xf32>
    %43 = vector.broadcast %42 : vector<1x256xf32> to vector<8x256xf32>
    %44 = arith.mulf %41, %43 : vector<8x256xf32>
    %c56 = arith.constant 56 : index
    %c0_36 = arith.constant 0 : index
    %45 = vector.load %arg53[%c56, %c0_36] : memref<576x256xf32, #tpu.memory_space<vmem>>, vector<8x256xf32>
    tpu.vector_store %arg53[%c56, %c0_36], %44 {strides = array<i32>} : memref<576x256xf32, #tpu.memory_space<vmem>>, vector<8x256xf32>,
    %c0_37 = arith.constant 0 : index
    %c145 = arith.constant 145 : index
    %46 = vector.load %arg50[%c0_37, %c145] : memref<32x512xf32, #tpu.memory_space<vmem>>, vector<8x256xf32>
    %c8_38 = arith.constant 8 : index
    %c0_39 = arith.constant 0 : index
    %47 = vector.load %arg2[%c8_38, %c0_39] : memref<9x256xf32, #tpu.memory_space<vmem>>, vector<1x256xf32>
    %48 = vector.broadcast %47 : vector<1x256xf32> to vector<8x256xf32>
    %49 = arith.mulf %46, %48 : vector<8x256xf32>
    %c64 = arith.constant 64 : index
    %c0_40 = arith.constant 0 : index
    %50 = vector.load %arg53[%c64, %c0_40] : memref<576x256xf32, #tpu.memory_space<vmem>>, vector<8x256xf32>
    tpu.vector_store %arg53[%c64, %c0_40], %49 {strides = array<i32>} : memref<576x256xf32, #tpu.memory_space<vmem>>, vector<8x256xf32>,
    %c0_41 = arith.constant 0 : index
    %c0_42 = arith.constant 0 : index
    %51 = vector.load %arg9[%c0_41, %c0_42] : memref<8x72xbf16, #tpu.memory_space<vmem>>, vector<8x72xbf16>
    %c0_43 = arith.constant 0 : index
    %c0_44 = arith.constant 0 : index
    %52 = vector.load %arg53[%c0_43, %c0_44] : memref<576x256xf32, #tpu.memory_space<vmem>>, vector<72x256xf32>
    %53 = arith.truncf %52 : vector<72x256xf32> to vector<72x256xbf16>
    %cst_45 = arith.constant dense<0.000000e+00> : vector<8x256xf32>
    %54 = tpu.matmul %51, %53, %cst_45 {dimension_numbers = #tpu.dot_dimension_numbers<[1], [0], [0], [1], [0, 0, 1, 1], [], []>} : vector<8x72xbf16>, vector<72x256xbf16>, vector<8x256xf32> -> vector<8x256xf32>
    %c0_46 = arith.constant 0 : index
    %c0_47 = arith.constant 0 : index
    %55 = vector.load %arg10[%c0_46, %c0_47] : memref<8x1xf32, #tpu.memory_space<vmem>>, vector<8x1xf32>
    %56 = vector.broadcast %55 : vector<8x1xf32> to vector<8x256xf32>
    %57 = arith.addf %54, %56 : vector<8x256xf32>
    %cst_48 = arith.constant dense<0.000000e+00> : vector<8xf32>
    %58 = vector.multi_reduction <add>, %57, %cst_48 [1] : vector<8x256xf32> to vector<8xf32>
    %59 = vector.shape_cast %58 : vector<8xf32> to vector<8x1xf32>
    %60 = arith.mulf %57, %57 : vector<8x256xf32>
    %cst_49 = arith.constant dense<0.000000e+00> : vector<8xf32>
    %61 = vector.multi_reduction <add>, %60, %cst_49 [1] : vector<8x256xf32> to vector<8xf32>
    %62 = vector.shape_cast %61 : vector<8xf32> to vector<8x1xf32>
    %cst_50 = arith.constant 3.906250e-03 : f32
    %63 = vector.broadcast %cst_50 : f32 to vector<8x1xf32>
    %64 = arith.mulf %59, %63 : vector<8x1xf32>
    %cst_51 = arith.constant 3.906250e-03 : f32
    %65 = vector.broadcast %cst_51 : f32 to vector<8x1xf32>
    %66 = arith.mulf %62, %65 : vector<8x1xf32>
    %67 = arith.mulf %64, %64 : vector<8x1xf32>
    %68 = arith.subf %66, %67 : vector<8x1xf32>
    %cst_52 = arith.constant 9.99999974E-6 : f32
    %69 = vector.broadcast %cst_52 : f32 to vector<8x1xf32>
    %70 = arith.addf %68, %69 : vector<8x1xf32>
    %71 = math.rsqrt %70 : vector<8x1xf32>
    %c0_53 = arith.constant 0 : index
    %c0_54 = arith.constant 0 : index
    %72 = vector.load %arg31[%c0_53, %c0_54] : memref<8x1xf32, #tpu.memory_space<vmem>>, vector<8x1xf32>
    %73 = arith.mulf %72, %71 : vector<8x1xf32>
    %c0_55 = arith.constant 0 : index
    %c0_56 = arith.constant 0 : index
    %74 = vector.load %arg32[%c0_55, %c0_56] : memref<8x1xf32, #tpu.memory_space<vmem>>, vector<8x1xf32>
    %75 = arith.mulf %64, %73 : vector<8x1xf32>
    %76 = arith.subf %74, %75 : vector<8x1xf32>
    %77 = vector.broadcast %73 : vector<8x1xf32> to vector<8x256xf32>
    %78 = arith.mulf %57, %77 : vector<8x256xf32>
    %79 = vector.broadcast %76 : vector<8x1xf32> to vector<8x256xf32>
    %80 = arith.addf %78, %79 : vector<8x256xf32>
    %cst_57 = arith.constant 0.000000e+00 : f32
    %81 = vector.broadcast %cst_57 : f32 to vector<8x256xf32>
    %82 = arith.cmpf ogt, %80, %81 : vector<8x256xf32>
    %cst_58 = arith.constant 5.000000e-02 : f32
    %83 = vector.broadcast %cst_58 : f32 to vector<8x256xf32>
    %84 = arith.mulf %83, %80 : vector<8x256xf32>
    %85 = arith.select %82, %80, %84 : vector<8x256xi1>, vector<8x256xf32>
    %cst_59 = arith.constant dense<0.000000e+00> : vector<8xf32>
    %86 = vector.multi_reduction <add>, %85, %cst_59 [1] : vector<8x256xf32> to vector<8xf32>
    %87 = vector.shape_cast %86 : vector<8xf32> to vector<8x1xf32>
    %88 = arith.mulf %85, %85 : vector<8x256xf32>
    %cst_60 = arith.constant dense<0.000000e+00> : vector<8xf32>
    %89 = vector.multi_reduction <add>, %88, %cst_60 [1] : vector<8x256xf32> to vector<8xf32>
    %90 = vector.shape_cast %89 : vector<8xf32> to vector<8x1xf32>
    %cst_61 = arith.constant 3.906250e-03 : f32
    %91 = vector.broadcast %cst_61 : f32 to vector<8x1xf32>
    %92 = arith.mulf %87, %91 : vector<8x1xf32>
    %cst_62 = arith.constant 3.906250e-03 : f32
    %93 = vector.broadcast %cst_62 : f32 to vector<8x1xf32>
    %94 = arith.mulf %90, %93 : vector<8x1xf32>
    %95 = arith.mulf %92, %92 : vector<8x1xf32>
    %96 = arith.subf %94, %95 : vector<8x1xf32>
    %cst_63 = arith.constant 9.99999974E-6 : f32
    %97 = vector.broadcast %cst_63 : f32 to vector<8x1xf32>
    %98 = arith.addf %96, %97 : vector<8x1xf32>
    %99 = math.rsqrt %98 : vector<8x1xf32>
    %c0_64 = arith.constant 0 : index
    %c0_65 = arith.constant 0 : index
    %100 = vector.load %arg33[%c0_64, %c0_65] : memref<8x1xf32, #tpu.memory_space<vmem>>, vector<8x1xf32>
    %101 = arith.mulf %100, %99 : vector<8x1xf32>
    %c0_66 = arith.constant 0 : index
    %c0_67 = arith.constant 0 : index
    %102 = vector.load %arg34[%c0_66, %c0_67] : memref<8x1xf32, #tpu.memory_space<vmem>>, vector<8x1xf32>
    %103 = arith.mulf %92, %101 : vector<8x1xf32>
    %104 = arith.subf %102, %103 : vector<8x1xf32>
    %105 = vector.broadcast %101 : vector<8x1xf32> to vector<8x256xf32>
    %106 = arith.mulf %85, %105 : vector<8x256xf32>
    %107 = vector.broadcast %104 : vector<8x1xf32> to vector<8x256xf32>
    %108 = arith.addf %106, %107 : vector<8x256xf32>
    %c0_68 = arith.constant 0 : index
    %c128_69 = arith.constant 128 : index
    %109 = vector.load %arg50[%c0_68, %c128_69] : memref<32x512xf32, #tpu.memory_space<vmem>>, vector<8x256xf32>
    tpu.vector_store %arg50[%c0_68, %c128_69], %108 {strides = array<i32>} : memref<32x512xf32, #tpu.memory_space<vmem>>, vector<8x256xf32>,
    %c0_70 = arith.constant 0 : index
    %c111_71 = arith.constant 111 : index
    %110 = vector.load %arg50[%c0_70, %c111_71] : memref<32x512xf32, #tpu.memory_space<vmem>>, vector<8x256xf32>
    %c0_72 = arith.constant 0 : index
    %c0_73 = arith.constant 0 : index
    %111 = vector.load %arg2[%c0_72, %c0_73] : memref<9x256xf32, #tpu.memory_space<vmem>>, vector<1x256xf32>
    %112 = vector.broadcast %111 : vector<1x256xf32> to vector<8x256xf32>
    %113 = arith.mulf %110, %112 : vector<8x256xf32>
    %c0_74 = arith.constant 0 : index
    %c0_75 = arith.constant 0 : index
    %114 = vector.load %arg53[%c0_74, %c0_75] : memref<576x256xf32, #tpu.memory_space<vmem>>, vector<8x256xf32>
    tpu.vector_store %arg53[%c0_74, %c0_75], %113 {strides = array<i32>} : memref<576x256xf32, #tpu.memory_space<vmem>>, vector<8x256xf32>,
    %c0_76 = arith.constant 0 : index
    %c112_77 = arith.constant 112 : index
    %115 = vector.load %arg50[%c0_76, %c112_77] : memref<32x512xf32, #tpu.memory_space<vmem>>, vector<8x256xf32>
    %c1_78 = arith.constant 1 : index
    %c0_79 = arith.constant 0 : index
    %116 = vector.load %arg2[%c1_78, %c0_79] : memref<9x256xf32, #tpu.memory_space<vmem>>, vector<1x256xf32>
    %117 = vector.broadcast %116 : vector<1x256xf32> to vector<8x256xf32>
    %118 = arith.mulf %115, %117 : vector<8x256xf32>
    %c8_80 = arith.constant 8 : index
    %c0_81 = arith.constant 0 : index
    %119 = vector.load %arg53[%c8_80, %c0_81] : memref<576x256xf32, #tpu.memory_space<vmem>>, vector<8x256xf32>
    tpu.vector_store %arg53[%c8_80, %c0_81], %118 {strides = array<i32>} : memref<576x256xf32, #tpu.memory_space<vmem>>, vector<8x256xf32>,
    %c0_82 = arith.constant 0 : index
    %c113_83 = arith.constant 113 : index
    %120 = vector.load %arg50[%c0_82, %c113_83] : memref<32x512xf32, #tpu.memory_space<vmem>>, vector<8x256xf32>
    %c2_84 = arith.constant 2 : index
    %c0_85 = arith.constant 0 : index
    %121 = vector.load %arg2[%c2_84, %c0_85] : memref<9x256xf32, #tpu.memory_space<vmem>>, vector<1x256xf32>
    %122 = vector.broadcast %121 : vector<1x256xf32> to vector<8x256xf32>
    %123 = arith.mulf %120, %122 : vector<8x256xf32>
    %c16_86 = arith.constant 16 : index
    %c0_87 = arith.constant 0 : index
    %124 = vector.load %arg53[%c16_86, %c0_87] : memref<576x256xf32, #tpu.memory_space<vmem>>, vector<8x256xf32>
    tpu.vector_store %arg53[%c16_86, %c0_87], %123 {strides = array<i32>} : memref<576x256xf32, #tpu.memory_space<vmem>>, vector<8x256xf32>,
    %c0_88 = arith.constant 0 : index
    %c127_89 = arith.constant 127 : index
    %125 = vector.load %arg50[%c0_88, %c127_89] : memref<32x512xf32, #tpu.memory_space<vmem>>, vector<8x256xf32>
    %c3_90 = arith.constant 3 : index
    %c0_91 = arith.constant 0 : index
    %126 = vector.load %arg2[%c3_90, %c0_91] : memref<9x256xf32, #tpu.memory_space<vmem>>, vector<1x256xf32>
    %127 = vector.broadcast %126 : vector<1x256xf32> to vector<8x256xf32>
    %128 = arith.mulf %125, %127 : vector<8x256xf32>
    %c24_92 = arith.constant 24 : index
    %c0_93 = arith.constant 0 : index
    %129 = vector.load %arg53[%c24_92, %c0_93] : memref<576x256xf32, #tpu.memory_space<vmem>>, vector<8x256xf32>
    tpu.vector_store %arg53[%c24_92, %c0_93], %128 {strides = array<i32>} : memref<576x256xf32, #tpu.memory_space<vmem>>, vector<8x256xf32>,
    %c0_94 = arith.constant 0 : index
    %c128_95 = arith.constant 128 : index
    %130 = vector.load %arg50[%c0_94, %c128_95] : memref<32x512xf32, #tpu.memory_space<vmem>>, vector<8x256xf32>
    %c32_96 = arith.constant 32 : index
    %c0_97 = arith.constant 0 : index
    %131 = vector.load %arg53[%c32_96, %c0_97] : memref<576x256xf32, #tpu.memory_space<vmem>>, vector<8x256xf32>
    tpu.vector_store %arg53[%c32_96, %c0_97], %130 {strides = array<i32>} : memref<576x256xf32, #tpu.memory_space<vmem>>, vector<8x256xf32>,
    %c0_98 = arith.constant 0 : index
    %c129_99 = arith.constant 129 : index
    %132 = vector.load %arg50[%c0_98, %c129_99] : memref<32x512xf32, #tpu.memory_space<vmem>>, vector<8x256xf32>
    %c5_100 = arith.constant 5 : index
    %c0_101 = arith.constant 0 : index
    %133 = vector.load %arg2[%c5_100, %c0_101] : memref<9x256xf32, #tpu.memory_space<vmem>>, vector<1x256xf32>
    %134 = vector.broadcast %133 : vector<1x256xf32> to vector<8x256xf32>
    %135 = arith.mulf %132, %134 : vector<8x256xf32>
    %c40_102 = arith.constant 40 : index
    %c0_103 = arith.constant 0 : index
    %136 = vector.load %arg53[%c40_102, %c0_103] : memref<576x256xf32, #tpu.memory_space<vmem>>, vector<8x256xf32>
    tpu.vector_store %arg53[%c40_102, %c0_103], %135 {strides = array<i32>} : memref<576x256xf32, #tpu.memory_space<vmem>>, vector<8x256xf32>,
    %c0_104 = arith.constant 0 : index
    %c143_105 = arith.constant 143 : index
    %137 = vector.load %arg50[%c0_104, %c143_105] : memref<32x512xf32, #tpu.memory_space<vmem>>, vector<8x256xf32>
    %c6_106 = arith.constant 6 : index
    %c0_107 = arith.constant 0 : index
    %138 = vector.load %arg2[%c6_106, %c0_107] : memref<9x256xf32, #tpu.memory_space<vmem>>, vector<1x256xf32>
    %139 = vector.broadcast %138 : vector<1x256xf32> to vector<8x256xf32>
    %140 = arith.mulf %137, %139 : vector<8x256xf32>
    %c48_108 = arith.constant 48 : index
    %c0_109 = arith.constant 0 : index
    %141 = vector.load %arg53[%c48_108, %c0_109] : memref<576x256xf32, #tpu.memory_space<vmem>>, vector<8x256xf32>
    tpu.vector_store %arg53[%c48_108, %c0_109], %140 {strides = array<i32>} : memref<576x256xf32, #tpu.memory_space<vmem>>, vector<8x256xf32>,
    %c0_110 = arith.constant 0 : index
    %c144_111 = arith.constant 144 : index
    %142 = vector.load %arg50[%c0_110, %c144_111] : memref<32x512xf32, #tpu.memory_space<vmem>>, vector<8x256xf32>
    %c7_112 = arith.constant 7 : index
    %c0_113 = arith.constant 0 : index
    %143 = vector.load %arg2[%c7_112, %c0_113] : memref<9x256xf32, #tpu.memory_space<vmem>>, vector<1x256xf32>
    %144 = vector.broadcast %143 : vector<1x256xf32> to vector<8x256xf32>
    %145 = arith.mulf %142, %144 : vector<8x256xf32>
    %c56_114 = arith.constant 56 : index
    %c0_115 = arith.constant 0 : index
    %146 = vector.load %arg53[%c56_114, %c0_115] : memref<576x256xf32, #tpu.memory_space<vmem>>, vector<8x256xf32>
    tpu.vector_store %arg53[%c56_114, %c0_115], %145 {strides = array<i32>} : memref<576x256xf32, #tpu.memory_space<vmem>>, vector<8x256xf32>,
    %c0_116 = arith.constant 0 : index
    %c145_117 = arith.constant 145 : index
    %147 = vector.load %arg50[%c0_116, %c145_117] : memref<32x512xf32, #tpu.memory_space<vmem>>, vector<8x256xf32>
    %c8_118 = arith.constant 8 : index
    %c0_119 = arith.constant 0 : index
    %148 = vector.load %arg2[%c8_118, %c0_119] : memref<9x256xf32, #tpu.memory_space<vmem>>, vector<1x256xf32>
    %149 = vector.broadcast %148 : vector<1x256xf32> to vector<8x256xf32>
    %150 = arith.mulf %147, %149 : vector<8x256xf32>
    %c64_120 = arith.constant 64 : index
    %c0_121 = arith.constant 0 : index
    %151 = vector.load %arg53[%c64_120, %c0_121] : memref<576x256xf32, #tpu.memory_space<vmem>>, vector<8x256xf32>
    tpu.vector_store %arg53[%c64_120, %c0_121], %150 {strides = array<i32>} : memref<576x256xf32, #tpu.memory_space<vmem>>, vector<8x256xf32>,
    %c0_122 = arith.constant 0 : index
    %c0_123 = arith.constant 0 : index
    %152 = vector.load %arg11[%c0_122, %c0_123] : memref<16x72xbf16, #tpu.memory_space<vmem>>, vector<16x72xbf16>
    %c0_124 = arith.constant 0 : index
    %c0_125 = arith.constant 0 : index
    %153 = vector.load %arg53[%c0_124, %c0_125] : memref<576x256xf32, #tpu.memory_space<vmem>>, vector<72x256xf32>
    %154 = arith.truncf %153 : vector<72x256xf32> to vector<72x256xbf16>
    %cst_126 = arith.constant dense<0.000000e+00> : vector<16x256xf32>
    %155 = tpu.matmul %152, %154, %cst_126 {dimension_numbers = #tpu.dot_dimension_numbers<[1], [0], [0], [1], [0, 0, 1, 1], [], []>} : vector<16x72xbf16>, vector<72x256xbf16>, vector<16x256xf32> -> vector<16x256xf32>
    %c0_127 = arith.constant 0 : index
    %c0_128 = arith.constant 0 : index
    %156 = vector.load %arg12[%c0_127, %c0_128] : memref<16x1xf32, #tpu.memory_space<vmem>>, vector<16x1xf32>
    %157 = vector.broadcast %156 : vector<16x1xf32> to vector<16x256xf32>
    %158 = arith.addf %155, %157 : vector<16x256xf32>
    %cst_129 = arith.constant 0.000000e+00 : f32
    %159 = vector.broadcast %cst_129 : f32 to vector<16x256xf32>
    %160 = arith.cmpf ogt, %158, %159 : vector<16x256xf32>
    %cst_130 = arith.constant 5.000000e-02 : f32
    %161 = vector.broadcast %cst_130 : f32 to vector<16x256xf32>
    %162 = arith.mulf %161, %158 : vector<16x256xf32>
    %163 = arith.select %160, %158, %162 : vector<16x256xi1>, vector<16x256xf32>
    %c0_131 = arith.constant 0 : index
    %c128_132 = arith.constant 128 : index
    %164 = vector.load %arg50[%c0_131, %c128_132] : memref<32x512xf32, #tpu.memory_space<vmem>>, vector<16x256xf32>
    tpu.vector_store %arg50[%c0_131, %c128_132], %163 {strides = array<i32>} : memref<32x512xf32, #tpu.memory_space<vmem>>, vector<16x256xf32>,
    %c0_133 = arith.constant 0 : index
    %c111_134 = arith.constant 111 : index
    %165 = vector.load %arg50[%c0_133, %c111_134] : memref<32x512xf32, #tpu.memory_space<vmem>>, vector<16x256xf32>
    %c0_135 = arith.constant 0 : index
    %c0_136 = arith.constant 0 : index
    %166 = vector.load %arg2[%c0_135, %c0_136] : memref<9x256xf32, #tpu.memory_space<vmem>>, vector<1x256xf32>
    %167 = vector.broadcast %166 : vector<1x256xf32> to vector<16x256xf32>
    %168 = arith.mulf %165, %167 : vector<16x256xf32>
    %c0_137 = arith.constant 0 : index
    %c0_138 = arith.constant 0 : index
    %169 = vector.load %arg53[%c0_137, %c0_138] : memref<576x256xf32, #tpu.memory_space<vmem>>, vector<16x256xf32>
    tpu.vector_store %arg53[%c0_137, %c0_138], %168 {strides = array<i32>} : memref<576x256xf32, #tpu.memory_space<vmem>>, vector<16x256xf32>,
    %c0_139 = arith.constant 0 : index
    %c112_140 = arith.constant 112 : index
    %170 = vector.load %arg50[%c0_139, %c112_140] : memref<32x512xf32, #tpu.memory_space<vmem>>, vector<16x256xf32>
    %c1_141 = arith.constant 1 : index
    %c0_142 = arith.constant 0 : index
    %171 = vector.load %arg2[%c1_141, %c0_142] : memref<9x256xf32, #tpu.memory_space<vmem>>, vector<1x256xf32>
    %172 = vector.broadcast %171 : vector<1x256xf32> to vector<16x256xf32>
    %173 = arith.mulf %170, %172 : vector<16x256xf32>
    %c16_143 = arith.constant 16 : index
    %c0_144 = arith.constant 0 : index
    %174 = vector.load %arg53[%c16_143, %c0_144] : memref<576x256xf32, #tpu.memory_space<vmem>>, vector<16x256xf32>
    tpu.vector_store %arg53[%c16_143, %c0_144], %173 {strides = array<i32>} : memref<576x256xf32, #tpu.memory_space<vmem>>, vector<16x256xf32>,
    %c0_145 = arith.constant 0 : index
    %c113_146 = arith.constant 113 : index
    %175 = vector.load %arg50[%c0_145, %c113_146] : memref<32x512xf32, #tpu.memory_space<vmem>>, vector<16x256xf32>
    %c2_147 = arith.constant 2 : index
    %c0_148 = arith.constant 0 : index
    %176 = vector.load %arg2[%c2_147, %c0_148] : memref<9x256xf32, #tpu.memory_space<vmem>>, vector<1x256xf32>
    %177 = vector.broadcast %176 : vector<1x256xf32> to vector<16x256xf32>
    %178 = arith.mulf %175, %177 : vector<16x256xf32>
    %c32_149 = arith.constant 32 : index
    %c0_150 = arith.constant 0 : index
    %179 = vector.load %arg53[%c32_149, %c0_150] : memref<576x256xf32, #tpu.memory_space<vmem>>, vector<16x256xf32>
    tpu.vector_store %arg53[%c32_149, %c0_150], %178 {strides = array<i32>} : memref<576x256xf32, #tpu.memory_space<vmem>>, vector<16x256xf32>,
    %c0_151 = arith.constant 0 : index
    %c127_152 = arith.constant 127 : index
    %180 = vector.load %arg50[%c0_151, %c127_152] : memref<32x512xf32, #tpu.memory_space<vmem>>, vector<16x256xf32>
    %c3_153 = arith.constant 3 : index
    %c0_154 = arith.constant 0 : index
    %181 = vector.load %arg2[%c3_153, %c0_154] : memref<9x256xf32, #tpu.memory_space<vmem>>, vector<1x256xf32>
    %182 = vector.broadcast %181 : vector<1x256xf32> to vector<16x256xf32>
    %183 = arith.mulf %180, %182 : vector<16x256xf32>
    %c48_155 = arith.constant 48 : index
    %c0_156 = arith.constant 0 : index
    %184 = vector.load %arg53[%c48_155, %c0_156] : memref<576x256xf32, #tpu.memory_space<vmem>>, vector<16x256xf32>
    tpu.vector_store %arg53[%c48_155, %c0_156], %183 {strides = array<i32>} : memref<576x256xf32, #tpu.memory_space<vmem>>, vector<16x256xf32>,
    %c0_157 = arith.constant 0 : index
    %c128_158 = arith.constant 128 : index
    %185 = vector.load %arg50[%c0_157, %c128_158] : memref<32x512xf32, #tpu.memory_space<vmem>>, vector<16x256xf32>
    %c64_159 = arith.constant 64 : index
    %c0_160 = arith.constant 0 : index
    %186 = vector.load %arg53[%c64_159, %c0_160] : memref<576x256xf32, #tpu.memory_space<vmem>>, vector<16x256xf32>
    tpu.vector_store %arg53[%c64_159, %c0_160], %185 {strides = array<i32>} : memref<576x256xf32, #tpu.memory_space<vmem>>, vector<16x256xf32>,
    %c0_161 = arith.constant 0 : index
    %c129_162 = arith.constant 129 : index
    %187 = vector.load %arg50[%c0_161, %c129_162] : memref<32x512xf32, #tpu.memory_space<vmem>>, vector<16x256xf32>
    %c5_163 = arith.constant 5 : index
    %c0_164 = arith.constant 0 : index
    %188 = vector.load %arg2[%c5_163, %c0_164] : memref<9x256xf32, #tpu.memory_space<vmem>>, vector<1x256xf32>
    %189 = vector.broadcast %188 : vector<1x256xf32> to vector<16x256xf32>
    %190 = arith.mulf %187, %189 : vector<16x256xf32>
    %c80 = arith.constant 80 : index
    %c0_165 = arith.constant 0 : index
    %191 = vector.load %arg53[%c80, %c0_165] : memref<576x256xf32, #tpu.memory_space<vmem>>, vector<16x256xf32>
    tpu.vector_store %arg53[%c80, %c0_165], %190 {strides = array<i32>} : memref<576x256xf32, #tpu.memory_space<vmem>>, vector<16x256xf32>,
    %c0_166 = arith.constant 0 : index
    %c143_167 = arith.constant 143 : index
    %192 = vector.load %arg50[%c0_166, %c143_167] : memref<32x512xf32, #tpu.memory_space<vmem>>, vector<16x256xf32>
    %c6_168 = arith.constant 6 : index
    %c0_169 = arith.constant 0 : index
    %193 = vector.load %arg2[%c6_168, %c0_169] : memref<9x256xf32, #tpu.memory_space<vmem>>, vector<1x256xf32>
    %194 = vector.broadcast %193 : vector<1x256xf32> to vector<16x256xf32>
    %195 = arith.mulf %192, %194 : vector<16x256xf32>
    %c96 = arith.constant 96 : index
    %c0_170 = arith.constant 0 : index
    %196 = vector.load %arg53[%c96, %c0_170] : memref<576x256xf32, #tpu.memory_space<vmem>>, vector<16x256xf32>
    tpu.vector_store %arg53[%c96, %c0_170], %195 {strides = array<i32>} : memref<576x256xf32, #tpu.memory_space<vmem>>, vector<16x256xf32>,
    %c0_171 = arith.constant 0 : index
    %c144_172 = arith.constant 144 : index
    %197 = vector.load %arg50[%c0_171, %c144_172] : memref<32x512xf32, #tpu.memory_space<vmem>>, vector<16x256xf32>
    %c7_173 = arith.constant 7 : index
    %c0_174 = arith.constant 0 : index
    %198 = vector.load %arg2[%c7_173, %c0_174] : memref<9x256xf32, #tpu.memory_space<vmem>>, vector<1x256xf32>
    %199 = vector.broadcast %198 : vector<1x256xf32> to vector<16x256xf32>
    %200 = arith.mulf %197, %199 : vector<16x256xf32>
    %c112_175 = arith.constant 112 : index
    %c0_176 = arith.constant 0 : index
    %201 = vector.load %arg53[%c112_175, %c0_176] : memref<576x256xf32, #tpu.memory_space<vmem>>, vector<16x256xf32>
    tpu.vector_store %arg53[%c112_175, %c0_176], %200 {strides = array<i32>} : memref<576x256xf32, #tpu.memory_space<vmem>>, vector<16x256xf32>,
    %c0_177 = arith.constant 0 : index
    %c145_178 = arith.constant 145 : index
    %202 = vector.load %arg50[%c0_177, %c145_178] : memref<32x512xf32, #tpu.memory_space<vmem>>, vector<16x256xf32>
    %c8_179 = arith.constant 8 : index
    %c0_180 = arith.constant 0 : index
    %203 = vector.load %arg2[%c8_179, %c0_180] : memref<9x256xf32, #tpu.memory_space<vmem>>, vector<1x256xf32>
    %204 = vector.broadcast %203 : vector<1x256xf32> to vector<16x256xf32>
    %205 = arith.mulf %202, %204 : vector<16x256xf32>
    %c128_181 = arith.constant 128 : index
    %c0_182 = arith.constant 0 : index
    %206 = vector.load %arg53[%c128_181, %c0_182] : memref<576x256xf32, #tpu.memory_space<vmem>>, vector<16x256xf32>
    tpu.vector_store %arg53[%c128_181, %c0_182], %205 {strides = array<i32>} : memref<576x256xf32, #tpu.memory_space<vmem>>, vector<16x256xf32>,
    %c0_183 = arith.constant 0 : index
    %c0_184 = arith.constant 0 : index
    %207 = vector.load %arg13[%c0_183, %c0_184] : memref<16x144xbf16, #tpu.memory_space<vmem>>, vector<16x144xbf16>
    %c0_185 = arith.constant 0 : index
    %c0_186 = arith.constant 0 : index
    %208 = vector.load %arg53[%c0_185, %c0_186] : memref<576x256xf32, #tpu.memory_space<vmem>>, vector<144x256xf32>
    %209 = arith.truncf %208 : vector<144x256xf32> to vector<144x256xbf16>
    %cst_187 = arith.constant dense<0.000000e+00> : vector<16x256xf32>
    %210 = tpu.matmul %207, %209, %cst_187 {dimension_numbers = #tpu.dot_dimension_numbers<[1], [0], [0], [1], [0, 0, 1, 1], [], []>} : vector<16x144xbf16>, vector<144x256xbf16>, vector<16x256xf32> -> vector<16x256xf32>
    %c0_188 = arith.constant 0 : index
    %c0_189 = arith.constant 0 : index
    %211 = vector.load %arg14[%c0_188, %c0_189] : memref<16x1xf32, #tpu.memory_space<vmem>>, vector<16x1xf32>
    %212 = vector.broadcast %211 : vector<16x1xf32> to vector<16x256xf32>
    %213 = arith.addf %210, %212 : vector<16x256xf32>
    %c0_190 = arith.constant 0 : index
    %c0_191 = arith.constant 0 : index
    %214 = vector.load %arg5[%c0_190, %c0_191] : memref<256x64xf32, #tpu.memory_space<vmem>>, vector<256x64xf32>
    %cst_192 = arith.constant dense<0.000000e+00> : vector<16x64xf32>
    %215 = tpu.matmul %213, %214, %cst_192 {dimension_numbers = #tpu.dot_dimension_numbers<[1], [0], [0], [1], [0, 0, 1, 1], [], []>} : vector<16x256xf32>, vector<256x64xf32>, vector<16x64xf32> -> vector<16x64xf32>
    %cst_193 = arith.constant dense<0.000000e+00> : vector<16xf32>
    %216 = vector.multi_reduction <add>, %215, %cst_193 [1] : vector<16x64xf32> to vector<16xf32>
    %217 = vector.shape_cast %216 : vector<16xf32> to vector<16x1xf32>
    %218 = arith.mulf %215, %215 : vector<16x64xf32>
    %cst_194 = arith.constant dense<0.000000e+00> : vector<16xf32>
    %219 = vector.multi_reduction <add>, %218, %cst_194 [1] : vector<16x64xf32> to vector<16xf32>
    %220 = vector.shape_cast %219 : vector<16xf32> to vector<16x1xf32>
    %cst_195 = arith.constant 1.562500e-02 : f32
    %221 = vector.broadcast %cst_195 : f32 to vector<16x1xf32>
    %222 = arith.mulf %217, %221 : vector<16x1xf32>
    %cst_196 = arith.constant 1.562500e-02 : f32
    %223 = vector.broadcast %cst_196 : f32 to vector<16x1xf32>
    %224 = arith.mulf %220, %223 : vector<16x1xf32>
    %225 = arith.mulf %222, %222 : vector<16x1xf32>
    %226 = arith.subf %224, %225 : vector<16x1xf32>
    %cst_197 = arith.constant 9.99999974E-6 : f32
    %227 = vector.broadcast %cst_197 : f32 to vector<16x1xf32>
    %228 = arith.addf %226, %227 : vector<16x1xf32>
    %229 = math.rsqrt %228 : vector<16x1xf32>
    %c0_198 = arith.constant 0 : index
    %c0_199 = arith.constant 0 : index
    %230 = vector.load %arg35[%c0_198, %c0_199] : memref<16x1xf32, #tpu.memory_space<vmem>>, vector<16x1xf32>
    %231 = arith.mulf %230, %229 : vector<16x1xf32>
    %c0_200 = arith.constant 0 : index
    %c0_201 = arith.constant 0 : index
    %232 = vector.load %arg36[%c0_200, %c0_201] : memref<16x1xf32, #tpu.memory_space<vmem>>, vector<16x1xf32>
    %233 = arith.mulf %222, %231 : vector<16x1xf32>
    %234 = arith.subf %232, %233 : vector<16x1xf32>
    %235 = vector.broadcast %231 : vector<16x1xf32> to vector<16x64xf32>
    %236 = arith.mulf %215, %235 : vector<16x64xf32>
    %237 = vector.broadcast %234 : vector<16x1xf32> to vector<16x64xf32>
    %238 = arith.addf %236, %237 : vector<16x64xf32>
    %c0_202 = arith.constant 0 : index
    %c128_203 = arith.constant 128 : index
    %239 = vector.load %arg51[%c0_202, %c128_203] : memref<64x320xf32, #tpu.memory_space<vmem>>, vector<16x64xf32>
    tpu.vector_store %arg51[%c0_202, %c128_203], %238 {strides = array<i32>} : memref<64x320xf32, #tpu.memory_space<vmem>>, vector<16x64xf32>,
    %c0_204 = arith.constant 0 : index
    %c119 = arith.constant 119 : index
    %240 = vector.load %arg51[%c0_204, %c119] : memref<64x320xf32, #tpu.memory_space<vmem>>, vector<16x64xf32>
    %c0_205 = arith.constant 0 : index
    %c0_206 = arith.constant 0 : index
    %241 = vector.load %arg3[%c0_205, %c0_206] : memref<9x64xf32, #tpu.memory_space<vmem>>, vector<1x64xf32>
    %242 = vector.broadcast %241 : vector<1x64xf32> to vector<16x64xf32>
    %243 = arith.mulf %240, %242 : vector<16x64xf32>
    %c0_207 = arith.constant 0 : index
    %c0_208 = arith.constant 0 : index
    %244 = vector.load %arg53[%c0_207, %c0_208] : memref<576x256xf32, #tpu.memory_space<vmem>>, vector<16x64xf32>
    tpu.vector_store %arg53[%c0_207, %c0_208], %243 {strides = array<i32>} : memref<576x256xf32, #tpu.memory_space<vmem>>, vector<16x64xf32>,
    %c0_209 = arith.constant 0 : index
    %c120 = arith.constant 120 : index
    %245 = vector.load %arg51[%c0_209, %c120] : memref<64x320xf32, #tpu.memory_space<vmem>>, vector<16x64xf32>
    %c1_210 = arith.constant 1 : index
    %c0_211 = arith.constant 0 : index
    %246 = vector.load %arg3[%c1_210, %c0_211] : memref<9x64xf32, #tpu.memory_space<vmem>>, vector<1x64xf32>
    %247 = vector.broadcast %246 : vector<1x64xf32> to vector<16x64xf32>
    %248 = arith.mulf %245, %247 : vector<16x64xf32>
    %c16_212 = arith.constant 16 : index
    %c0_213 = arith.constant 0 : index
    %249 = vector.load %arg53[%c16_212, %c0_213] : memref<576x256xf32, #tpu.memory_space<vmem>>, vector<16x64xf32>
    tpu.vector_store %arg53[%c16_212, %c0_213], %248 {strides = array<i32>} : memref<576x256xf32, #tpu.memory_space<vmem>>, vector<16x64xf32>,
    %c0_214 = arith.constant 0 : index
    %c121 = arith.constant 121 : index
    %250 = vector.load %arg51[%c0_214, %c121] : memref<64x320xf32, #tpu.memory_space<vmem>>, vector<16x64xf32>
    %c2_215 = arith.constant 2 : index
    %c0_216 = arith.constant 0 : index
    %251 = vector.load %arg3[%c2_215, %c0_216] : memref<9x64xf32, #tpu.memory_space<vmem>>, vector<1x64xf32>
    %252 = vector.broadcast %251 : vector<1x64xf32> to vector<16x64xf32>
    %253 = arith.mulf %250, %252 : vector<16x64xf32>
    %c32_217 = arith.constant 32 : index
    %c0_218 = arith.constant 0 : index
    %254 = vector.load %arg53[%c32_217, %c0_218] : memref<576x256xf32, #tpu.memory_space<vmem>>, vector<16x64xf32>
    tpu.vector_store %arg53[%c32_217, %c0_218], %253 {strides = array<i32>} : memref<576x256xf32, #tpu.memory_space<vmem>>, vector<16x64xf32>,
    %c0_219 = arith.constant 0 : index
    %c127_220 = arith.constant 127 : index
    %255 = vector.load %arg51[%c0_219, %c127_220] : memref<64x320xf32, #tpu.memory_space<vmem>>, vector<16x64xf32>
    %c3_221 = arith.constant 3 : index
    %c0_222 = arith.constant 0 : index
    %256 = vector.load %arg3[%c3_221, %c0_222] : memref<9x64xf32, #tpu.memory_space<vmem>>, vector<1x64xf32>
    %257 = vector.broadcast %256 : vector<1x64xf32> to vector<16x64xf32>
    %258 = arith.mulf %255, %257 : vector<16x64xf32>
    %c48_223 = arith.constant 48 : index
    %c0_224 = arith.constant 0 : index
    %259 = vector.load %arg53[%c48_223, %c0_224] : memref<576x256xf32, #tpu.memory_space<vmem>>, vector<16x64xf32>
    tpu.vector_store %arg53[%c48_223, %c0_224], %258 {strides = array<i32>} : memref<576x256xf32, #tpu.memory_space<vmem>>, vector<16x64xf32>,
    %c0_225 = arith.constant 0 : index
    %c128_226 = arith.constant 128 : index
    %260 = vector.load %arg51[%c0_225, %c128_226] : memref<64x320xf32, #tpu.memory_space<vmem>>, vector<16x64xf32>
    %c64_227 = arith.constant 64 : index
    %c0_228 = arith.constant 0 : index
    %261 = vector.load %arg53[%c64_227, %c0_228] : memref<576x256xf32, #tpu.memory_space<vmem>>, vector<16x64xf32>
    tpu.vector_store %arg53[%c64_227, %c0_228], %260 {strides = array<i32>} : memref<576x256xf32, #tpu.memory_space<vmem>>, vector<16x64xf32>,
    %c0_229 = arith.constant 0 : index
    %c129_230 = arith.constant 129 : index
    %262 = vector.load %arg51[%c0_229, %c129_230] : memref<64x320xf32, #tpu.memory_space<vmem>>, vector<16x64xf32>
    %c5_231 = arith.constant 5 : index
    %c0_232 = arith.constant 0 : index
    %263 = vector.load %arg3[%c5_231, %c0_232] : memref<9x64xf32, #tpu.memory_space<vmem>>, vector<1x64xf32>
    %264 = vector.broadcast %263 : vector<1x64xf32> to vector<16x64xf32>
    %265 = arith.mulf %262, %264 : vector<16x64xf32>
    %c80_233 = arith.constant 80 : index
    %c0_234 = arith.constant 0 : index
    %266 = vector.load %arg53[%c80_233, %c0_234] : memref<576x256xf32, #tpu.memory_space<vmem>>, vector<16x64xf32>
    tpu.vector_store %arg53[%c80_233, %c0_234], %265 {strides = array<i32>} : memref<576x256xf32, #tpu.memory_space<vmem>>, vector<16x64xf32>,
    %c0_235 = arith.constant 0 : index
    %c135 = arith.constant 135 : index
    %267 = vector.load %arg51[%c0_235, %c135] : memref<64x320xf32, #tpu.memory_space<vmem>>, vector<16x64xf32>
    %c6_236 = arith.constant 6 : index
    %c0_237 = arith.constant 0 : index
    %268 = vector.load %arg3[%c6_236, %c0_237] : memref<9x64xf32, #tpu.memory_space<vmem>>, vector<1x64xf32>
    %269 = vector.broadcast %268 : vector<1x64xf32> to vector<16x64xf32>
    %270 = arith.mulf %267, %269 : vector<16x64xf32>
    %c96_238 = arith.constant 96 : index
    %c0_239 = arith.constant 0 : index
    %271 = vector.load %arg53[%c96_238, %c0_239] : memref<576x256xf32, #tpu.memory_space<vmem>>, vector<16x64xf32>
    tpu.vector_store %arg53[%c96_238, %c0_239], %270 {strides = array<i32>} : memref<576x256xf32, #tpu.memory_space<vmem>>, vector<16x64xf32>,
    %c0_240 = arith.constant 0 : index
    %c136 = arith.constant 136 : index
    %272 = vector.load %arg51[%c0_240, %c136] : memref<64x320xf32, #tpu.memory_space<vmem>>, vector<16x64xf32>
    %c7_241 = arith.constant 7 : index
    %c0_242 = arith.constant 0 : index
    %273 = vector.load %arg3[%c7_241, %c0_242] : memref<9x64xf32, #tpu.memory_space<vmem>>, vector<1x64xf32>
    %274 = vector.broadcast %273 : vector<1x64xf32> to vector<16x64xf32>
    %275 = arith.mulf %272, %274 : vector<16x64xf32>
    %c112_243 = arith.constant 112 : index
    %c0_244 = arith.constant 0 : index
    %276 = vector.load %arg53[%c112_243, %c0_244] : memref<576x256xf32, #tpu.memory_space<vmem>>, vector<16x64xf32>
    tpu.vector_store %arg53[%c112_243, %c0_244], %275 {strides = array<i32>} : memref<576x256xf32, #tpu.memory_space<vmem>>, vector<16x64xf32>,
    %c0_245 = arith.constant 0 : index
    %c137 = arith.constant 137 : index
    %277 = vector.load %arg51[%c0_245, %c137] : memref<64x320xf32, #tpu.memory_space<vmem>>, vector<16x64xf32>
    %c8_246 = arith.constant 8 : index
    %c0_247 = arith.constant 0 : index
    %278 = vector.load %arg3[%c8_246, %c0_247] : memref<9x64xf32, #tpu.memory_space<vmem>>, vector<1x64xf32>
    %279 = vector.broadcast %278 : vector<1x64xf32> to vector<16x64xf32>
    %280 = arith.mulf %277, %279 : vector<16x64xf32>
    %c128_248 = arith.constant 128 : index
    %c0_249 = arith.constant 0 : index
    %281 = vector.load %arg53[%c128_248, %c0_249] : memref<576x256xf32, #tpu.memory_space<vmem>>, vector<16x64xf32>
    tpu.vector_store %arg53[%c128_248, %c0_249], %280 {strides = array<i32>} : memref<576x256xf32, #tpu.memory_space<vmem>>, vector<16x64xf32>,
    %c0_250 = arith.constant 0 : index
    %c0_251 = arith.constant 0 : index
    %282 = vector.load %arg15[%c0_250, %c0_251] : memref<32x144xbf16, #tpu.memory_space<vmem>>, vector<32x144xbf16>
    %c0_252 = arith.constant 0 : index
    %c0_253 = arith.constant 0 : index
    %283 = vector.load %arg53[%c0_252, %c0_253] : memref<576x256xf32, #tpu.memory_space<vmem>>, vector<144x64xf32>
    %284 = arith.truncf %283 : vector<144x64xf32> to vector<144x64xbf16>
    %cst_254 = arith.constant dense<0.000000e+00> : vector<32x64xf32>
    %285 = tpu.matmul %282, %284, %cst_254 {dimension_numbers = #tpu.dot_dimension_numbers<[1], [0], [0], [1], [0, 0, 1, 1], [], []>} : vector<32x144xbf16>, vector<144x64xbf16>, vector<32x64xf32> -> vector<32x64xf32>
    %c0_255 = arith.constant 0 : index
    %c0_256 = arith.constant 0 : index
    %286 = vector.load %arg16[%c0_255, %c0_256] : memref<32x1xf32, #tpu.memory_space<vmem>>, vector<32x1xf32>
    %287 = vector.broadcast %286 : vector<32x1xf32> to vector<32x64xf32>
    %288 = arith.addf %285, %287 : vector<32x64xf32>
    %cst_257 = arith.constant 0.000000e+00 : f32
    %289 = vector.broadcast %cst_257 : f32 to vector<32x64xf32>
    %290 = arith.cmpf ogt, %288, %289 : vector<32x64xf32>
    %cst_258 = arith.constant 5.000000e-02 : f32
    %291 = vector.broadcast %cst_258 : f32 to vector<32x64xf32>
    %292 = arith.mulf %291, %288 : vector<32x64xf32>
    %293 = arith.select %290, %288, %292 : vector<32x64xi1>, vector<32x64xf32>
    %c0_259 = arith.constant 0 : index
    %c128_260 = arith.constant 128 : index
    %294 = vector.load %arg51[%c0_259, %c128_260] : memref<64x320xf32, #tpu.memory_space<vmem>>, vector<32x64xf32>
    tpu.vector_store %arg51[%c0_259, %c128_260], %293 {strides = array<i32>} : memref<64x320xf32, #tpu.memory_space<vmem>>, vector<32x64xf32>,
    %c0_261 = arith.constant 0 : index
    %c119_262 = arith.constant 119 : index
    %295 = vector.load %arg51[%c0_261, %c119_262] : memref<64x320xf32, #tpu.memory_space<vmem>>, vector<32x64xf32>
    %c0_263 = arith.constant 0 : index
    %c0_264 = arith.constant 0 : index
    %296 = vector.load %arg3[%c0_263, %c0_264] : memref<9x64xf32, #tpu.memory_space<vmem>>, vector<1x64xf32>
    %297 = vector.broadcast %296 : vector<1x64xf32> to vector<32x64xf32>
    %298 = arith.mulf %295, %297 : vector<32x64xf32>
    %c0_265 = arith.constant 0 : index
    %c0_266 = arith.constant 0 : index
    %299 = vector.load %arg53[%c0_265, %c0_266] : memref<576x256xf32, #tpu.memory_space<vmem>>, vector<32x64xf32>
    tpu.vector_store %arg53[%c0_265, %c0_266], %298 {strides = array<i32>} : memref<576x256xf32, #tpu.memory_space<vmem>>, vector<32x64xf32>,
    %c0_267 = arith.constant 0 : index
    %c120_268 = arith.constant 120 : index
    %300 = vector.load %arg51[%c0_267, %c120_268] : memref<64x320xf32, #tpu.memory_space<vmem>>, vector<32x64xf32>
    %c1_269 = arith.constant 1 : index
    %c0_270 = arith.constant 0 : index
    %301 = vector.load %arg3[%c1_269, %c0_270] : memref<9x64xf32, #tpu.memory_space<vmem>>, vector<1x64xf32>
    %302 = vector.broadcast %301 : vector<1x64xf32> to vector<32x64xf32>
    %303 = arith.mulf %300, %302 : vector<32x64xf32>
    %c32_271 = arith.constant 32 : index
    %c0_272 = arith.constant 0 : index
    %304 = vector.load %arg53[%c32_271, %c0_272] : memref<576x256xf32, #tpu.memory_space<vmem>>, vector<32x64xf32>
    tpu.vector_store %arg53[%c32_271, %c0_272], %303 {strides = array<i32>} : memref<576x256xf32, #tpu.memory_space<vmem>>, vector<32x64xf32>,
    %c0_273 = arith.constant 0 : index
    %c121_274 = arith.constant 121 : index
    %305 = vector.load %arg51[%c0_273, %c121_274] : memref<64x320xf32, #tpu.memory_space<vmem>>, vector<32x64xf32>
    %c2_275 = arith.constant 2 : index
    %c0_276 = arith.constant 0 : index
    %306 = vector.load %arg3[%c2_275, %c0_276] : memref<9x64xf32, #tpu.memory_space<vmem>>, vector<1x64xf32>
    %307 = vector.broadcast %306 : vector<1x64xf32> to vector<32x64xf32>
    %308 = arith.mulf %305, %307 : vector<32x64xf32>
    %c64_277 = arith.constant 64 : index
    %c0_278 = arith.constant 0 : index
    %309 = vector.load %arg53[%c64_277, %c0_278] : memref<576x256xf32, #tpu.memory_space<vmem>>, vector<32x64xf32>
    tpu.vector_store %arg53[%c64_277, %c0_278], %308 {strides = array<i32>} : memref<576x256xf32, #tpu.memory_space<vmem>>, vector<32x64xf32>,
    %c0_279 = arith.constant 0 : index
    %c127_280 = arith.constant 127 : index
    %310 = vector.load %arg51[%c0_279, %c127_280] : memref<64x320xf32, #tpu.memory_space<vmem>>, vector<32x64xf32>
    %c3_281 = arith.constant 3 : index
    %c0_282 = arith.constant 0 : index
    %311 = vector.load %arg3[%c3_281, %c0_282] : memref<9x64xf32, #tpu.memory_space<vmem>>, vector<1x64xf32>
    %312 = vector.broadcast %311 : vector<1x64xf32> to vector<32x64xf32>
    %313 = arith.mulf %310, %312 : vector<32x64xf32>
    %c96_283 = arith.constant 96 : index
    %c0_284 = arith.constant 0 : index
    %314 = vector.load %arg53[%c96_283, %c0_284] : memref<576x256xf32, #tpu.memory_space<vmem>>, vector<32x64xf32>
    tpu.vector_store %arg53[%c96_283, %c0_284], %313 {strides = array<i32>} : memref<576x256xf32, #tpu.memory_space<vmem>>, vector<32x64xf32>,
    %c0_285 = arith.constant 0 : index
    %c128_286 = arith.constant 128 : index
    %315 = vector.load %arg51[%c0_285, %c128_286] : memref<64x320xf32, #tpu.memory_space<vmem>>, vector<32x64xf32>
    %c128_287 = arith.constant 128 : index
    %c0_288 = arith.constant 0 : index
    %316 = vector.load %arg53[%c128_287, %c0_288] : memref<576x256xf32, #tpu.memory_space<vmem>>, vector<32x64xf32>
    tpu.vector_store %arg53[%c128_287, %c0_288], %315 {strides = array<i32>} : memref<576x256xf32, #tpu.memory_space<vmem>>, vector<32x64xf32>,
    %c0_289 = arith.constant 0 : index
    %c129_290 = arith.constant 129 : index
    %317 = vector.load %arg51[%c0_289, %c129_290] : memref<64x320xf32, #tpu.memory_space<vmem>>, vector<32x64xf32>
    %c5_291 = arith.constant 5 : index
    %c0_292 = arith.constant 0 : index
    %318 = vector.load %arg3[%c5_291, %c0_292] : memref<9x64xf32, #tpu.memory_space<vmem>>, vector<1x64xf32>
    %319 = vector.broadcast %318 : vector<1x64xf32> to vector<32x64xf32>
    %320 = arith.mulf %317, %319 : vector<32x64xf32>
    %c160 = arith.constant 160 : index
    %c0_293 = arith.constant 0 : index
    %321 = vector.load %arg53[%c160, %c0_293] : memref<576x256xf32, #tpu.memory_space<vmem>>, vector<32x64xf32>
    tpu.vector_store %arg53[%c160, %c0_293], %320 {strides = array<i32>} : memref<576x256xf32, #tpu.memory_space<vmem>>, vector<32x64xf32>,
    %c0_294 = arith.constant 0 : index
    %c135_295 = arith.constant 135 : index
    %322 = vector.load %arg51[%c0_294, %c135_295] : memref<64x320xf32, #tpu.memory_space<vmem>>, vector<32x64xf32>
    %c6_296 = arith.constant 6 : index
    %c0_297 = arith.constant 0 : index
    %323 = vector.load %arg3[%c6_296, %c0_297] : memref<9x64xf32, #tpu.memory_space<vmem>>, vector<1x64xf32>
    %324 = vector.broadcast %323 : vector<1x64xf32> to vector<32x64xf32>
    %325 = arith.mulf %322, %324 : vector<32x64xf32>
    %c192 = arith.constant 192 : index
    %c0_298 = arith.constant 0 : index
    %326 = vector.load %arg53[%c192, %c0_298] : memref<576x256xf32, #tpu.memory_space<vmem>>, vector<32x64xf32>
    tpu.vector_store %arg53[%c192, %c0_298], %325 {strides = array<i32>} : memref<576x256xf32, #tpu.memory_space<vmem>>, vector<32x64xf32>,
    %c0_299 = arith.constant 0 : index
    %c136_300 = arith.constant 136 : index
    %327 = vector.load %arg51[%c0_299, %c136_300] : memref<64x320xf32, #tpu.memory_space<vmem>>, vector<32x64xf32>
    %c7_301 = arith.constant 7 : index
    %c0_302 = arith.constant 0 : index
    %328 = vector.load %arg3[%c7_301, %c0_302] : memref<9x64xf32, #tpu.memory_space<vmem>>, vector<1x64xf32>
    %329 = vector.broadcast %328 : vector<1x64xf32> to vector<32x64xf32>
    %330 = arith.mulf %327, %329 : vector<32x64xf32>
    %c224 = arith.constant 224 : index
    %c0_303 = arith.constant 0 : index
    %331 = vector.load %arg53[%c224, %c0_303] : memref<576x256xf32, #tpu.memory_space<vmem>>, vector<32x64xf32>
    tpu.vector_store %arg53[%c224, %c0_303], %330 {strides = array<i32>} : memref<576x256xf32, #tpu.memory_space<vmem>>, vector<32x64xf32>,
    %c0_304 = arith.constant 0 : index
    %c137_305 = arith.constant 137 : index
    %332 = vector.load %arg51[%c0_304, %c137_305] : memref<64x320xf32, #tpu.memory_space<vmem>>, vector<32x64xf32>
    %c8_306 = arith.constant 8 : index
    %c0_307 = arith.constant 0 : index
    %333 = vector.load %arg3[%c8_306, %c0_307] : memref<9x64xf32, #tpu.memory_space<vmem>>, vector<1x64xf32>
    %334 = vector.broadcast %333 : vector<1x64xf32> to vector<32x64xf32>
    %335 = arith.mulf %332, %334 : vector<32x64xf32>
    %c256 = arith.constant 256 : index
    %c0_308 = arith.constant 0 : index
    %336 = vector.load %arg53[%c256, %c0_308] : memref<576x256xf32, #tpu.memory_space<vmem>>, vector<32x64xf32>
    tpu.vector_store %arg53[%c256, %c0_308], %335 {strides = array<i32>} : memref<576x256xf32, #tpu.memory_space<vmem>>, vector<32x64xf32>,
    %c0_309 = arith.constant 0 : index
    %c0_310 = arith.constant 0 : index
    %337 = vector.load %arg17[%c0_309, %c0_310] : memref<32x288xbf16, #tpu.memory_space<vmem>>, vector<32x288xbf16>
    %c0_311 = arith.constant 0 : index
    %c0_312 = arith.constant 0 : index
    %338 = vector.load %arg53[%c0_311, %c0_312] : memref<576x256xf32, #tpu.memory_space<vmem>>, vector<288x64xf32>
    %339 = arith.truncf %338 : vector<288x64xf32> to vector<288x64xbf16>
    %cst_313 = arith.constant dense<0.000000e+00> : vector<32x64xf32>
    %340 = tpu.matmul %337, %339, %cst_313 {dimension_numbers = #tpu.dot_dimension_numbers<[1], [0], [0], [1], [0, 0, 1, 1], [], []>} : vector<32x288xbf16>, vector<288x64xbf16>, vector<32x64xf32> -> vector<32x64xf32>
    %c0_314 = arith.constant 0 : index
    %c0_315 = arith.constant 0 : index
    %341 = vector.load %arg18[%c0_314, %c0_315] : memref<32x1xf32, #tpu.memory_space<vmem>>, vector<32x1xf32>
    %342 = vector.broadcast %341 : vector<32x1xf32> to vector<32x64xf32>
    %343 = arith.addf %340, %342 : vector<32x64xf32>
    %c0_316 = arith.constant 0 : index
    %c0_317 = arith.constant 0 : index
    %344 = vector.load %arg6[%c0_316, %c0_317] : memref<64x16xf32, #tpu.memory_space<vmem>>, vector<64x16xf32>
    %cst_318 = arith.constant dense<0.000000e+00> : vector<32x16xf32>
    %345 = tpu.matmul %343, %344, %cst_318 {dimension_numbers = #tpu.dot_dimension_numbers<[1], [0], [0], [1], [0, 0, 1, 1], [], []>} : vector<32x64xf32>, vector<64x16xf32>, vector<32x16xf32> -> vector<32x16xf32>
    %cst_319 = arith.constant dense<0.000000e+00> : vector<32xf32>
    %346 = vector.multi_reduction <add>, %345, %cst_319 [1] : vector<32x16xf32> to vector<32xf32>
    %347 = vector.shape_cast %346 : vector<32xf32> to vector<32x1xf32>
    %348 = arith.mulf %345, %345 : vector<32x16xf32>
    %cst_320 = arith.constant dense<0.000000e+00> : vector<32xf32>
    %349 = vector.multi_reduction <add>, %348, %cst_320 [1] : vector<32x16xf32> to vector<32xf32>
    %350 = vector.shape_cast %349 : vector<32xf32> to vector<32x1xf32>
    %c0_321 = arith.constant 0 : index
    %c0_322 = arith.constant 0 : index
    %351 = vector.load %arg40[%c0_321, %c0_322] : memref<16x32xf32, #tpu.memory_space<vmem>>, vector<16x32xf32>
    %cst_323 = arith.constant dense<0.000000e+00> : vector<16x1xf32>
    %352 = tpu.matmul %351, %347, %cst_323 {dimension_numbers = #tpu.dot_dimension_numbers<[1], [0], [0], [1], [0, 0, 1, 1], [], []>} : vector<16x32xf32>, vector<32x1xf32>, vector<16x1xf32> -> vector<16x1xf32>
    %cst_324 = arith.constant 3.125000e-02 : f32
    %353 = vector.broadcast %cst_324 : f32 to vector<16x1xf32>
    %354 = arith.mulf %352, %353 : vector<16x1xf32>
    %cst_325 = arith.constant dense<0.000000e+00> : vector<16x1xf32>
    %355 = tpu.matmul %351, %350, %cst_325 {dimension_numbers = #tpu.dot_dimension_numbers<[1], [0], [0], [1], [0, 0, 1, 1], [], []>} : vector<16x32xf32>, vector<32x1xf32>, vector<16x1xf32> -> vector<16x1xf32>
    %cst_326 = arith.constant 3.125000e-02 : f32
    %356 = vector.broadcast %cst_326 : f32 to vector<16x1xf32>
    %357 = arith.mulf %355, %356 : vector<16x1xf32>
    %358 = arith.mulf %354, %354 : vector<16x1xf32>
    %359 = arith.subf %357, %358 : vector<16x1xf32>
    %cst_327 = arith.constant 9.99999974E-6 : f32
    %360 = vector.broadcast %cst_327 : f32 to vector<16x1xf32>
    %361 = arith.addf %359, %360 : vector<16x1xf32>
    %362 = math.rsqrt %361 : vector<16x1xf32>
    %c0_328 = arith.constant 0 : index
    %c0_329 = arith.constant 0 : index
    %363 = vector.load %arg39[%c0_328, %c0_329] : memref<32x16xf32, #tpu.memory_space<vmem>>, vector<32x16xf32>
    %cst_330 = arith.constant dense<0.000000e+00> : vector<32x1xf32>
    %364 = tpu.matmul %363, %354, %cst_330 {dimension_numbers = #tpu.dot_dimension_numbers<[1], [0], [0], [1], [0, 0, 1, 1], [], []>} : vector<32x16xf32>, vector<16x1xf32>, vector<32x1xf32> -> vector<32x1xf32>
    %cst_331 = arith.constant dense<0.000000e+00> : vector<32x1xf32>
    %365 = tpu.matmul %363, %362, %cst_331 {dimension_numbers = #tpu.dot_dimension_numbers<[1], [0], [0], [1], [0, 0, 1, 1], [], []>} : vector<32x16xf32>, vector<16x1xf32>, vector<32x1xf32> -> vector<32x1xf32>
    %c0_332 = arith.constant 0 : index
    %c0_333 = arith.constant 0 : index
    %366 = vector.load %arg37[%c0_332, %c0_333] : memref<32x1xf32, #tpu.memory_space<vmem>>, vector<32x1xf32>
    %367 = arith.mulf %366, %365 : vector<32x1xf32>
    %c0_334 = arith.constant 0 : index
    %c0_335 = arith.constant 0 : index
    %368 = vector.load %arg38[%c0_334, %c0_335] : memref<32x1xf32, #tpu.memory_space<vmem>>, vector<32x1xf32>
    %369 = arith.mulf %364, %367 : vector<32x1xf32>
    %370 = arith.subf %368, %369 : vector<32x1xf32>
    %371 = vector.broadcast %367 : vector<32x1xf32> to vector<32x16xf32>
    %372 = arith.mulf %345, %371 : vector<32x16xf32>
    %373 = vector.broadcast %370 : vector<32x1xf32> to vector<32x16xf32>
    %374 = arith.addf %372, %373 : vector<32x16xf32>
    %c0_336 = arith.constant 0 : index
    %c128_337 = arith.constant 128 : index
    %375 = vector.load %arg52[%c0_336, %c128_337] : memref<32x272xf32, #tpu.memory_space<vmem>>, vector<32x16xf32>
    tpu.vector_store %arg52[%c0_336, %c128_337], %374 {strides = array<i32>} : memref<32x272xf32, #tpu.memory_space<vmem>>, vector<32x16xf32>,
    %c0_338 = arith.constant 0 : index
    %c123 = arith.constant 123 : index
    %376 = vector.load %arg52[%c0_338, %c123] : memref<32x272xf32, #tpu.memory_space<vmem>>, vector<32x16xf32>
    %c0_339 = arith.constant 0 : index
    %c0_340 = arith.constant 0 : index
    %377 = vector.load %arg4[%c0_339, %c0_340] : memref<9x16xf32, #tpu.memory_space<vmem>>, vector<1x16xf32>
    %378 = vector.broadcast %377 : vector<1x16xf32> to vector<32x16xf32>
    %379 = arith.mulf %376, %378 : vector<32x16xf32>
    %c0_341 = arith.constant 0 : index
    %c0_342 = arith.constant 0 : index
    %380 = vector.load %arg53[%c0_341, %c0_342] : memref<576x256xf32, #tpu.memory_space<vmem>>, vector<32x16xf32>
    tpu.vector_store %arg53[%c0_341, %c0_342], %379 {strides = array<i32>} : memref<576x256xf32, #tpu.memory_space<vmem>>, vector<32x16xf32>,
    %c0_343 = arith.constant 0 : index
    %c124 = arith.constant 124 : index
    %381 = vector.load %arg52[%c0_343, %c124] : memref<32x272xf32, #tpu.memory_space<vmem>>, vector<32x16xf32>
    %c1_344 = arith.constant 1 : index
    %c0_345 = arith.constant 0 : index
    %382 = vector.load %arg4[%c1_344, %c0_345] : memref<9x16xf32, #tpu.memory_space<vmem>>, vector<1x16xf32>
    %383 = vector.broadcast %382 : vector<1x16xf32> to vector<32x16xf32>
    %384 = arith.mulf %381, %383 : vector<32x16xf32>
    %c32_346 = arith.constant 32 : index
    %c0_347 = arith.constant 0 : index
    %385 = vector.load %arg53[%c32_346, %c0_347] : memref<576x256xf32, #tpu.memory_space<vmem>>, vector<32x16xf32>
    tpu.vector_store %arg53[%c32_346, %c0_347], %384 {strides = array<i32>} : memref<576x256xf32, #tpu.memory_space<vmem>>, vector<32x16xf32>,
    %c0_348 = arith.constant 0 : index
    %c125 = arith.constant 125 : index
    %386 = vector.load %arg52[%c0_348, %c125] : memref<32x272xf32, #tpu.memory_space<vmem>>, vector<32x16xf32>
    %c2_349 = arith.constant 2 : index
    %c0_350 = arith.constant 0 : index
    %387 = vector.load %arg4[%c2_349, %c0_350] : memref<9x16xf32, #tpu.memory_space<vmem>>, vector<1x16xf32>
    %388 = vector.broadcast %387 : vector<1x16xf32> to vector<32x16xf32>
    %389 = arith.mulf %386, %388 : vector<32x16xf32>
    %c64_351 = arith.constant 64 : index
    %c0_352 = arith.constant 0 : index
    %390 = vector.load %arg53[%c64_351, %c0_352] : memref<576x256xf32, #tpu.memory_space<vmem>>, vector<32x16xf32>
    tpu.vector_store %arg53[%c64_351, %c0_352], %389 {strides = array<i32>} : memref<576x256xf32, #tpu.memory_space<vmem>>, vector<32x16xf32>,
    %c0_353 = arith.constant 0 : index
    %c127_354 = arith.constant 127 : index
    %391 = vector.load %arg52[%c0_353, %c127_354] : memref<32x272xf32, #tpu.memory_space<vmem>>, vector<32x16xf32>
    %c3_355 = arith.constant 3 : index
    %c0_356 = arith.constant 0 : index
    %392 = vector.load %arg4[%c3_355, %c0_356] : memref<9x16xf32, #tpu.memory_space<vmem>>, vector<1x16xf32>
    %393 = vector.broadcast %392 : vector<1x16xf32> to vector<32x16xf32>
    %394 = arith.mulf %391, %393 : vector<32x16xf32>
    %c96_357 = arith.constant 96 : index
    %c0_358 = arith.constant 0 : index
    %395 = vector.load %arg53[%c96_357, %c0_358] : memref<576x256xf32, #tpu.memory_space<vmem>>, vector<32x16xf32>
    tpu.vector_store %arg53[%c96_357, %c0_358], %394 {strides = array<i32>} : memref<576x256xf32, #tpu.memory_space<vmem>>, vector<32x16xf32>,
    %c0_359 = arith.constant 0 : index
    %c128_360 = arith.constant 128 : index
    %396 = vector.load %arg52[%c0_359, %c128_360] : memref<32x272xf32, #tpu.memory_space<vmem>>, vector<32x16xf32>
    %c128_361 = arith.constant 128 : index
    %c0_362 = arith.constant 0 : index
    %397 = vector.load %arg53[%c128_361, %c0_362] : memref<576x256xf32, #tpu.memory_space<vmem>>, vector<32x16xf32>
    tpu.vector_store %arg53[%c128_361, %c0_362], %396 {strides = array<i32>} : memref<576x256xf32, #tpu.memory_space<vmem>>, vector<32x16xf32>,
    %c0_363 = arith.constant 0 : index
    %c129_364 = arith.constant 129 : index
    %398 = vector.load %arg52[%c0_363, %c129_364] : memref<32x272xf32, #tpu.memory_space<vmem>>, vector<32x16xf32>
    %c5_365 = arith.constant 5 : index
    %c0_366 = arith.constant 0 : index
    %399 = vector.load %arg4[%c5_365, %c0_366] : memref<9x16xf32, #tpu.memory_space<vmem>>, vector<1x16xf32>
    %400 = vector.broadcast %399 : vector<1x16xf32> to vector<32x16xf32>
    %401 = arith.mulf %398, %400 : vector<32x16xf32>
    %c160_367 = arith.constant 160 : index
    %c0_368 = arith.constant 0 : index
    %402 = vector.load %arg53[%c160_367, %c0_368] : memref<576x256xf32, #tpu.memory_space<vmem>>, vector<32x16xf32>
    tpu.vector_store %arg53[%c160_367, %c0_368], %401 {strides = array<i32>} : memref<576x256xf32, #tpu.memory_space<vmem>>, vector<32x16xf32>,
    %c0_369 = arith.constant 0 : index
    %c131 = arith.constant 131 : index
    %403 = vector.load %arg52[%c0_369, %c131] : memref<32x272xf32, #tpu.memory_space<vmem>>, vector<32x16xf32>
    %c6_370 = arith.constant 6 : index
    %c0_371 = arith.constant 0 : index
    %404 = vector.load %arg4[%c6_370, %c0_371] : memref<9x16xf32, #tpu.memory_space<vmem>>, vector<1x16xf32>
    %405 = vector.broadcast %404 : vector<1x16xf32> to vector<32x16xf32>
    %406 = arith.mulf %403, %405 : vector<32x16xf32>
    %c192_372 = arith.constant 192 : index
    %c0_373 = arith.constant 0 : index
    %407 = vector.load %arg53[%c192_372, %c0_373] : memref<576x256xf32, #tpu.memory_space<vmem>>, vector<32x16xf32>
    tpu.vector_store %arg53[%c192_372, %c0_373], %406 {strides = array<i32>} : memref<576x256xf32, #tpu.memory_space<vmem>>, vector<32x16xf32>,
    %c0_374 = arith.constant 0 : index
    %c132 = arith.constant 132 : index
    %408 = vector.load %arg52[%c0_374, %c132] : memref<32x272xf32, #tpu.memory_space<vmem>>, vector<32x16xf32>
    %c7_375 = arith.constant 7 : index
    %c0_376 = arith.constant 0 : index
    %409 = vector.load %arg4[%c7_375, %c0_376] : memref<9x16xf32, #tpu.memory_space<vmem>>, vector<1x16xf32>
    %410 = vector.broadcast %409 : vector<1x16xf32> to vector<32x16xf32>
    %411 = arith.mulf %408, %410 : vector<32x16xf32>
    %c224_377 = arith.constant 224 : index
    %c0_378 = arith.constant 0 : index
    %412 = vector.load %arg53[%c224_377, %c0_378] : memref<576x256xf32, #tpu.memory_space<vmem>>, vector<32x16xf32>
    tpu.vector_store %arg53[%c224_377, %c0_378], %411 {strides = array<i32>} : memref<576x256xf32, #tpu.memory_space<vmem>>, vector<32x16xf32>,
    %c0_379 = arith.constant 0 : index
    %c133 = arith.constant 133 : index
    %413 = vector.load %arg52[%c0_379, %c133] : memref<32x272xf32, #tpu.memory_space<vmem>>, vector<32x16xf32>
    %c8_380 = arith.constant 8 : index
    %c0_381 = arith.constant 0 : index
    %414 = vector.load %arg4[%c8_380, %c0_381] : memref<9x16xf32, #tpu.memory_space<vmem>>, vector<1x16xf32>
    %415 = vector.broadcast %414 : vector<1x16xf32> to vector<32x16xf32>
    %416 = arith.mulf %413, %415 : vector<32x16xf32>
    %c256_382 = arith.constant 256 : index
    %c0_383 = arith.constant 0 : index
    %417 = vector.load %arg53[%c256_382, %c0_383] : memref<576x256xf32, #tpu.memory_space<vmem>>, vector<32x16xf32>
    tpu.vector_store %arg53[%c256_382, %c0_383], %416 {strides = array<i32>} : memref<576x256xf32, #tpu.memory_space<vmem>>, vector<32x16xf32>,
    %c0_384 = arith.constant 0 : index
    %c0_385 = arith.constant 0 : index
    %418 = vector.load %arg19[%c0_384, %c0_385] : memref<64x288xbf16, #tpu.memory_space<vmem>>, vector<64x288xbf16>
    %c0_386 = arith.constant 0 : index
    %c0_387 = arith.constant 0 : index
    %419 = vector.load %arg53[%c0_386, %c0_387] : memref<576x256xf32, #tpu.memory_space<vmem>>, vector<288x16xf32>
    %420 = arith.truncf %419 : vector<288x16xf32> to vector<288x16xbf16>
    %cst_388 = arith.constant dense<0.000000e+00> : vector<64x16xf32>
    %421 = tpu.matmul %418, %420, %cst_388 {dimension_numbers = #tpu.dot_dimension_numbers<[1], [0], [0], [1], [0, 0, 1, 1], [], []>} : vector<64x288xbf16>, vector<288x16xbf16>, vector<64x16xf32> -> vector<64x16xf32>
    %c0_389 = arith.constant 0 : index
    %c0_390 = arith.constant 0 : index
    %422 = vector.load %arg20[%c0_389, %c0_390] : memref<64x1xf32, #tpu.memory_space<vmem>>, vector<64x1xf32>
    %423 = vector.broadcast %422 : vector<64x1xf32> to vector<64x16xf32>
    %424 = arith.addf %421, %423 : vector<64x16xf32>
    %cst_391 = arith.constant 0.000000e+00 : f32
    %425 = vector.broadcast %cst_391 : f32 to vector<64x16xf32>
    %426 = arith.cmpf ogt, %424, %425 : vector<64x16xf32>
    %cst_392 = arith.constant 5.000000e-02 : f32
    %427 = vector.broadcast %cst_392 : f32 to vector<64x16xf32>
    %428 = arith.mulf %427, %424 : vector<64x16xf32>
    %429 = arith.select %426, %424, %428 : vector<64x16xi1>, vector<64x16xf32>
    %c0_393 = arith.constant 0 : index
    %c0_394 = arith.constant 0 : index
    %430 = vector.load %arg21[%c0_393, %c0_394] : memref<32x64xbf16, #tpu.memory_space<vmem>>, vector<32x64xbf16>
    %431 = arith.truncf %429 : vector<64x16xf32> to vector<64x16xbf16>
    %cst_395 = arith.constant dense<0.000000e+00> : vector<32x16xf32>
    %432 = tpu.matmul %430, %431, %cst_395 {dimension_numbers = #tpu.dot_dimension_numbers<[1], [0], [0], [1], [0, 0, 1, 1], [], []>} : vector<32x64xbf16>, vector<64x16xbf16>, vector<32x16xf32> -> vector<32x16xf32>
    %c0_396 = arith.constant 0 : index
    %c0_397 = arith.constant 0 : index
    %433 = vector.load %arg22[%c0_396, %c0_397] : memref<32x1xf32, #tpu.memory_space<vmem>>, vector<32x1xf32>
    %434 = vector.broadcast %433 : vector<32x1xf32> to vector<32x16xf32>
    %435 = arith.addf %432, %434 : vector<32x16xf32>
    %c0_398 = arith.constant 0 : index
    %c0_399 = arith.constant 0 : index
    %436 = vector.load %arg7[%c0_398, %c0_399] : memref<16x64xf32, #tpu.memory_space<vmem>>, vector<16x64xf32>
    %cst_400 = arith.constant dense<0.000000e+00> : vector<32x64xf32>
    %437 = tpu.matmul %435, %436, %cst_400 {dimension_numbers = #tpu.dot_dimension_numbers<[1], [0], [0], [1], [0, 0, 1, 1], [], []>} : vector<32x16xf32>, vector<16x64xf32>, vector<32x64xf32> -> vector<32x64xf32>
    %438 = tpu.concatenate %437, %293 in 0 : vector<32x64xf32>, vector<32x64xf32> -> vector<64x64xf32>
    %cst_401 = arith.constant dense<0.000000e+00> : vector<64xf32>
    %439 = vector.multi_reduction <add>, %438, %cst_401 [1] : vector<64x64xf32> to vector<64xf32>
    %440 = vector.shape_cast %439 : vector<64xf32> to vector<64x1xf32>
    %441 = arith.mulf %438, %438 : vector<64x64xf32>
    %cst_402 = arith.constant dense<0.000000e+00> : vector<64xf32>
    %442 = vector.multi_reduction <add>, %441, %cst_402 [1] : vector<64x64xf32> to vector<64xf32>
    %443 = vector.shape_cast %442 : vector<64xf32> to vector<64x1xf32>
    %c0_403 = arith.constant 0 : index
    %c0_404 = arith.constant 0 : index
    %444 = vector.load %arg44[%c0_403, %c0_404] : memref<16x64xf32, #tpu.memory_space<vmem>>, vector<16x64xf32>
    %cst_405 = arith.constant dense<0.000000e+00> : vector<16x1xf32>
    %445 = tpu.matmul %444, %440, %cst_405 {dimension_numbers = #tpu.dot_dimension_numbers<[1], [0], [0], [1], [0, 0, 1, 1], [], []>} : vector<16x64xf32>, vector<64x1xf32>, vector<16x1xf32> -> vector<16x1xf32>
    %cst_406 = arith.constant 3.906250e-03 : f32
    %446 = vector.broadcast %cst_406 : f32 to vector<16x1xf32>
    %447 = arith.mulf %445, %446 : vector<16x1xf32>
    %cst_407 = arith.constant dense<0.000000e+00> : vector<16x1xf32>
    %448 = tpu.matmul %444, %443, %cst_407 {dimension_numbers = #tpu.dot_dimension_numbers<[1], [0], [0], [1], [0, 0, 1, 1], [], []>} : vector<16x64xf32>, vector<64x1xf32>, vector<16x1xf32> -> vector<16x1xf32>
    %cst_408 = arith.constant 3.906250e-03 : f32
    %449 = vector.broadcast %cst_408 : f32 to vector<16x1xf32>
    %450 = arith.mulf %448, %449 : vector<16x1xf32>
    %451 = arith.mulf %447, %447 : vector<16x1xf32>
    %452 = arith.subf %450, %451 : vector<16x1xf32>
    %cst_409 = arith.constant 9.99999974E-6 : f32
    %453 = vector.broadcast %cst_409 : f32 to vector<16x1xf32>
    %454 = arith.addf %452, %453 : vector<16x1xf32>
    %455 = math.rsqrt %454 : vector<16x1xf32>
    %c0_410 = arith.constant 0 : index
    %c0_411 = arith.constant 0 : index
    %456 = vector.load %arg43[%c0_410, %c0_411] : memref<64x16xf32, #tpu.memory_space<vmem>>, vector<64x16xf32>
    %cst_412 = arith.constant dense<0.000000e+00> : vector<64x1xf32>
    %457 = tpu.matmul %456, %447, %cst_412 {dimension_numbers = #tpu.dot_dimension_numbers<[1], [0], [0], [1], [0, 0, 1, 1], [], []>} : vector<64x16xf32>, vector<16x1xf32>, vector<64x1xf32> -> vector<64x1xf32>
    %cst_413 = arith.constant dense<0.000000e+00> : vector<64x1xf32>
    %458 = tpu.matmul %456, %455, %cst_413 {dimension_numbers = #tpu.dot_dimension_numbers<[1], [0], [0], [1], [0, 0, 1, 1], [], []>} : vector<64x16xf32>, vector<16x1xf32>, vector<64x1xf32> -> vector<64x1xf32>
    %c0_414 = arith.constant 0 : index
    %c0_415 = arith.constant 0 : index
    %459 = vector.load %arg41[%c0_414, %c0_415] : memref<64x1xf32, #tpu.memory_space<vmem>>, vector<64x1xf32>
    %460 = arith.mulf %459, %458 : vector<64x1xf32>
    %c0_416 = arith.constant 0 : index
    %c0_417 = arith.constant 0 : index
    %461 = vector.load %arg42[%c0_416, %c0_417] : memref<64x1xf32, #tpu.memory_space<vmem>>, vector<64x1xf32>
    %462 = arith.mulf %457, %460 : vector<64x1xf32>
    %463 = arith.subf %461, %462 : vector<64x1xf32>
    %464 = vector.broadcast %460 : vector<64x1xf32> to vector<64x64xf32>
    %465 = arith.mulf %438, %464 : vector<64x64xf32>
    %466 = vector.broadcast %463 : vector<64x1xf32> to vector<64x64xf32>
    %467 = arith.addf %465, %466 : vector<64x64xf32>
    %c0_418 = arith.constant 0 : index
    %c128_419 = arith.constant 128 : index
    %468 = vector.load %arg51[%c0_418, %c128_419] : memref<64x320xf32, #tpu.memory_space<vmem>>, vector<64x64xf32>
    tpu.vector_store %arg51[%c0_418, %c128_419], %467 {strides = array<i32>} : memref<64x320xf32, #tpu.memory_space<vmem>>, vector<64x64xf32>,
    %c0_420 = arith.constant 0 : index
    %c119_421 = arith.constant 119 : index
    %469 = vector.load %arg51[%c0_420, %c119_421] : memref<64x320xf32, #tpu.memory_space<vmem>>, vector<64x64xf32>
    %c0_422 = arith.constant 0 : index
    %c0_423 = arith.constant 0 : index
    %470 = vector.load %arg3[%c0_422, %c0_423] : memref<9x64xf32, #tpu.memory_space<vmem>>, vector<1x64xf32>
    %471 = vector.broadcast %470 : vector<1x64xf32> to vector<64x64xf32>
    %472 = arith.mulf %469, %471 : vector<64x64xf32>
    %c0_424 = arith.constant 0 : index
    %c0_425 = arith.constant 0 : index
    %473 = vector.load %arg53[%c0_424, %c0_425] : memref<576x256xf32, #tpu.memory_space<vmem>>, vector<64x64xf32>
    tpu.vector_store %arg53[%c0_424, %c0_425], %472 {strides = array<i32>} : memref<576x256xf32, #tpu.memory_space<vmem>>, vector<64x64xf32>,
    %c0_426 = arith.constant 0 : index
    %c120_427 = arith.constant 120 : index
    %474 = vector.load %arg51[%c0_426, %c120_427] : memref<64x320xf32, #tpu.memory_space<vmem>>, vector<64x64xf32>
    %c1_428 = arith.constant 1 : index
    %c0_429 = arith.constant 0 : index
    %475 = vector.load %arg3[%c1_428, %c0_429] : memref<9x64xf32, #tpu.memory_space<vmem>>, vector<1x64xf32>
    %476 = vector.broadcast %475 : vector<1x64xf32> to vector<64x64xf32>
    %477 = arith.mulf %474, %476 : vector<64x64xf32>
    %c64_430 = arith.constant 64 : index
    %c0_431 = arith.constant 0 : index
    %478 = vector.load %arg53[%c64_430, %c0_431] : memref<576x256xf32, #tpu.memory_space<vmem>>, vector<64x64xf32>
    tpu.vector_store %arg53[%c64_430, %c0_431], %477 {strides = array<i32>} : memref<576x256xf32, #tpu.memory_space<vmem>>, vector<64x64xf32>,
    %c0_432 = arith.constant 0 : index
    %c121_433 = arith.constant 121 : index
    %479 = vector.load %arg51[%c0_432, %c121_433] : memref<64x320xf32, #tpu.memory_space<vmem>>, vector<64x64xf32>
    %c2_434 = arith.constant 2 : index
    %c0_435 = arith.constant 0 : index
    %480 = vector.load %arg3[%c2_434, %c0_435] : memref<9x64xf32, #tpu.memory_space<vmem>>, vector<1x64xf32>
    %481 = vector.broadcast %480 : vector<1x64xf32> to vector<64x64xf32>
    %482 = arith.mulf %479, %481 : vector<64x64xf32>
    %c128_436 = arith.constant 128 : index
    %c0_437 = arith.constant 0 : index
    %483 = vector.load %arg53[%c128_436, %c0_437] : memref<576x256xf32, #tpu.memory_space<vmem>>, vector<64x64xf32>
    tpu.vector_store %arg53[%c128_436, %c0_437], %482 {strides = array<i32>} : memref<576x256xf32, #tpu.memory_space<vmem>>, vector<64x64xf32>,
    %c0_438 = arith.constant 0 : index
    %c127_439 = arith.constant 127 : index
    %484 = vector.load %arg51[%c0_438, %c127_439] : memref<64x320xf32, #tpu.memory_space<vmem>>, vector<64x64xf32>
    %c3_440 = arith.constant 3 : index
    %c0_441 = arith.constant 0 : index
    %485 = vector.load %arg3[%c3_440, %c0_441] : memref<9x64xf32, #tpu.memory_space<vmem>>, vector<1x64xf32>
    %486 = vector.broadcast %485 : vector<1x64xf32> to vector<64x64xf32>
    %487 = arith.mulf %484, %486 : vector<64x64xf32>
    %c192_442 = arith.constant 192 : index
    %c0_443 = arith.constant 0 : index
    %488 = vector.load %arg53[%c192_442, %c0_443] : memref<576x256xf32, #tpu.memory_space<vmem>>, vector<64x64xf32>
    tpu.vector_store %arg53[%c192_442, %c0_443], %487 {strides = array<i32>} : memref<576x256xf32, #tpu.memory_space<vmem>>, vector<64x64xf32>,
    %c0_444 = arith.constant 0 : index
    %c128_445 = arith.constant 128 : index
    %489 = vector.load %arg51[%c0_444, %c128_445] : memref<64x320xf32, #tpu.memory_space<vmem>>, vector<64x64xf32>
    %c256_446 = arith.constant 256 : index
    %c0_447 = arith.constant 0 : index
    %490 = vector.load %arg53[%c256_446, %c0_447] : memref<576x256xf32, #tpu.memory_space<vmem>>, vector<64x64xf32>
    tpu.vector_store %arg53[%c256_446, %c0_447], %489 {strides = array<i32>} : memref<576x256xf32, #tpu.memory_space<vmem>>, vector<64x64xf32>,
    %c0_448 = arith.constant 0 : index
    %c129_449 = arith.constant 129 : index
    %491 = vector.load %arg51[%c0_448, %c129_449] : memref<64x320xf32, #tpu.memory_space<vmem>>, vector<64x64xf32>
    %c5_450 = arith.constant 5 : index
    %c0_451 = arith.constant 0 : index
    %492 = vector.load %arg3[%c5_450, %c0_451] : memref<9x64xf32, #tpu.memory_space<vmem>>, vector<1x64xf32>
    %493 = vector.broadcast %492 : vector<1x64xf32> to vector<64x64xf32>
    %494 = arith.mulf %491, %493 : vector<64x64xf32>
    %c320 = arith.constant 320 : index
    %c0_452 = arith.constant 0 : index
    %495 = vector.load %arg53[%c320, %c0_452] : memref<576x256xf32, #tpu.memory_space<vmem>>, vector<64x64xf32>
    tpu.vector_store %arg53[%c320, %c0_452], %494 {strides = array<i32>} : memref<576x256xf32, #tpu.memory_space<vmem>>, vector<64x64xf32>,
    %c0_453 = arith.constant 0 : index
    %c135_454 = arith.constant 135 : index
    %496 = vector.load %arg51[%c0_453, %c135_454] : memref<64x320xf32, #tpu.memory_space<vmem>>, vector<64x64xf32>
    %c6_455 = arith.constant 6 : index
    %c0_456 = arith.constant 0 : index
    %497 = vector.load %arg3[%c6_455, %c0_456] : memref<9x64xf32, #tpu.memory_space<vmem>>, vector<1x64xf32>
    %498 = vector.broadcast %497 : vector<1x64xf32> to vector<64x64xf32>
    %499 = arith.mulf %496, %498 : vector<64x64xf32>
    %c384 = arith.constant 384 : index
    %c0_457 = arith.constant 0 : index
    %500 = vector.load %arg53[%c384, %c0_457] : memref<576x256xf32, #tpu.memory_space<vmem>>, vector<64x64xf32>
    tpu.vector_store %arg53[%c384, %c0_457], %499 {strides = array<i32>} : memref<576x256xf32, #tpu.memory_space<vmem>>, vector<64x64xf32>,
    %c0_458 = arith.constant 0 : index
    %c136_459 = arith.constant 136 : index
    %501 = vector.load %arg51[%c0_458, %c136_459] : memref<64x320xf32, #tpu.memory_space<vmem>>, vector<64x64xf32>
    %c7_460 = arith.constant 7 : index
    %c0_461 = arith.constant 0 : index
    %502 = vector.load %arg3[%c7_460, %c0_461] : memref<9x64xf32, #tpu.memory_space<vmem>>, vector<1x64xf32>
    %503 = vector.broadcast %502 : vector<1x64xf32> to vector<64x64xf32>
    %504 = arith.mulf %501, %503 : vector<64x64xf32>
    %c448 = arith.constant 448 : index
    %c0_462 = arith.constant 0 : index
    %505 = vector.load %arg53[%c448, %c0_462] : memref<576x256xf32, #tpu.memory_space<vmem>>, vector<64x64xf32>
    tpu.vector_store %arg53[%c448, %c0_462], %504 {strides = array<i32>} : memref<576x256xf32, #tpu.memory_space<vmem>>, vector<64x64xf32>,
    %c0_463 = arith.constant 0 : index
    %c137_464 = arith.constant 137 : index
    %506 = vector.load %arg51[%c0_463, %c137_464] : memref<64x320xf32, #tpu.memory_space<vmem>>, vector<64x64xf32>
    %c8_465 = arith.constant 8 : index
    %c0_466 = arith.constant 0 : index
    %507 = vector.load %arg3[%c8_465, %c0_466] : memref<9x64xf32, #tpu.memory_space<vmem>>, vector<1x64xf32>
    %508 = vector.broadcast %507 : vector<1x64xf32> to vector<64x64xf32>
    %509 = arith.mulf %506, %508 : vector<64x64xf32>
    %c512 = arith.constant 512 : index
    %c0_467 = arith.constant 0 : index
    %510 = vector.load %arg53[%c512, %c0_467] : memref<576x256xf32, #tpu.memory_space<vmem>>, vector<64x64xf32>
    tpu.vector_store %arg53[%c512, %c0_467], %509 {strides = array<i32>} : memref<576x256xf32, #tpu.memory_space<vmem>>, vector<64x64xf32>,
    %c0_468 = arith.constant 0 : index
    %c0_469 = arith.constant 0 : index
    %511 = vector.load %arg23[%c0_468, %c0_469] : memref<32x576xbf16, #tpu.memory_space<vmem>>, vector<32x576xbf16>
    %c0_470 = arith.constant 0 : index
    %c0_471 = arith.constant 0 : index
    %512 = vector.load %arg53[%c0_470, %c0_471] : memref<576x256xf32, #tpu.memory_space<vmem>>, vector<576x64xf32>
    %513 = arith.truncf %512 : vector<576x64xf32> to vector<576x64xbf16>
    %cst_472 = arith.constant dense<0.000000e+00> : vector<32x64xf32>
    %514 = tpu.matmul %511, %513, %cst_472 {dimension_numbers = #tpu.dot_dimension_numbers<[1], [0], [0], [1], [0, 0, 1, 1], [], []>} : vector<32x576xbf16>, vector<576x64xbf16>, vector<32x64xf32> -> vector<32x64xf32>
    %c0_473 = arith.constant 0 : index
    %c0_474 = arith.constant 0 : index
    %515 = vector.load %arg24[%c0_473, %c0_474] : memref<32x1xf32, #tpu.memory_space<vmem>>, vector<32x1xf32>
    %516 = vector.broadcast %515 : vector<32x1xf32> to vector<32x64xf32>
    %517 = arith.addf %514, %516 : vector<32x64xf32>
    %cst_475 = arith.constant 0.000000e+00 : f32
    %518 = vector.broadcast %cst_475 : f32 to vector<32x64xf32>
    %519 = arith.cmpf ogt, %517, %518 : vector<32x64xf32>
    %cst_476 = arith.constant 5.000000e-02 : f32
    %520 = vector.broadcast %cst_476 : f32 to vector<32x64xf32>
    %521 = arith.mulf %520, %517 : vector<32x64xf32>
    %522 = arith.select %519, %517, %521 : vector<32x64xi1>, vector<32x64xf32>
    %c0_477 = arith.constant 0 : index
    %c0_478 = arith.constant 0 : index
    %523 = vector.load %arg25[%c0_477, %c0_478] : memref<16x32xbf16, #tpu.memory_space<vmem>>, vector<16x32xbf16>
    %524 = arith.truncf %522 : vector<32x64xf32> to vector<32x64xbf16>
    %cst_479 = arith.constant dense<0.000000e+00> : vector<16x64xf32>
    %525 = tpu.matmul %523, %524, %cst_479 {dimension_numbers = #tpu.dot_dimension_numbers<[1], [0], [0], [1], [0, 0, 1, 1], [], []>} : vector<16x32xbf16>, vector<32x64xbf16>, vector<16x64xf32> -> vector<16x64xf32>
    %c0_480 = arith.constant 0 : index
    %c0_481 = arith.constant 0 : index
    %526 = vector.load %arg26[%c0_480, %c0_481] : memref<16x1xf32, #tpu.memory_space<vmem>>, vector<16x1xf32>
    %527 = vector.broadcast %526 : vector<16x1xf32> to vector<16x64xf32>
    %528 = arith.addf %525, %527 : vector<16x64xf32>
    %c0_482 = arith.constant 0 : index
    %c0_483 = arith.constant 0 : index
    %529 = vector.load %arg8[%c0_482, %c0_483] : memref<64x256xf32, #tpu.memory_space<vmem>>, vector<64x256xf32>
    %cst_484 = arith.constant dense<0.000000e+00> : vector<16x256xf32>
    %530 = tpu.matmul %528, %529, %cst_484 {dimension_numbers = #tpu.dot_dimension_numbers<[1], [0], [0], [1], [0, 0, 1, 1], [], []>} : vector<16x64xf32>, vector<64x256xf32>, vector<16x256xf32> -> vector<16x256xf32>
    %531 = tpu.concatenate %530, %163 in 0 : vector<16x256xf32>, vector<16x256xf32> -> vector<32x256xf32>
    %cst_485 = arith.constant dense<0.000000e+00> : vector<32xf32>
    %532 = vector.multi_reduction <add>, %531, %cst_485 [1] : vector<32x256xf32> to vector<32xf32>
    %533 = vector.shape_cast %532 : vector<32xf32> to vector<32x1xf32>
    %534 = arith.mulf %531, %531 : vector<32x256xf32>
    %cst_486 = arith.constant dense<0.000000e+00> : vector<32xf32>
    %535 = vector.multi_reduction <add>, %534, %cst_486 [1] : vector<32x256xf32> to vector<32xf32>
    %536 = vector.shape_cast %535 : vector<32xf32> to vector<32x1xf32>
    %c0_487 = arith.constant 0 : index
    %c0_488 = arith.constant 0 : index
    %537 = vector.load %arg48[%c0_487, %c0_488] : memref<16x32xf32, #tpu.memory_space<vmem>>, vector<16x32xf32>
    %cst_489 = arith.constant dense<0.000000e+00> : vector<16x1xf32>
    %538 = tpu.matmul %537, %533, %cst_489 {dimension_numbers = #tpu.dot_dimension_numbers<[1], [0], [0], [1], [0, 0, 1, 1], [], []>} : vector<16x32xf32>, vector<32x1xf32>, vector<16x1xf32> -> vector<16x1xf32>
    %cst_490 = arith.constant 0.001953125 : f32
    %539 = vector.broadcast %cst_490 : f32 to vector<16x1xf32>
    %540 = arith.mulf %538, %539 : vector<16x1xf32>
    %cst_491 = arith.constant dense<0.000000e+00> : vector<16x1xf32>
    %541 = tpu.matmul %537, %536, %cst_491 {dimension_numbers = #tpu.dot_dimension_numbers<[1], [0], [0], [1], [0, 0, 1, 1], [], []>} : vector<16x32xf32>, vector<32x1xf32>, vector<16x1xf32> -> vector<16x1xf32>
    %cst_492 = arith.constant 0.001953125 : f32
    %542 = vector.broadcast %cst_492 : f32 to vector<16x1xf32>
    %543 = arith.mulf %541, %542 : vector<16x1xf32>
    %544 = arith.mulf %540, %540 : vector<16x1xf32>
    %545 = arith.subf %543, %544 : vector<16x1xf32>
    %cst_493 = arith.constant 9.99999974E-6 : f32
    %546 = vector.broadcast %cst_493 : f32 to vector<16x1xf32>
    %547 = arith.addf %545, %546 : vector<16x1xf32>
    %548 = math.rsqrt %547 : vector<16x1xf32>
    %c0_494 = arith.constant 0 : index
    %c0_495 = arith.constant 0 : index
    %549 = vector.load %arg47[%c0_494, %c0_495] : memref<32x16xf32, #tpu.memory_space<vmem>>, vector<32x16xf32>
    %cst_496 = arith.constant dense<0.000000e+00> : vector<32x1xf32>
    %550 = tpu.matmul %549, %540, %cst_496 {dimension_numbers = #tpu.dot_dimension_numbers<[1], [0], [0], [1], [0, 0, 1, 1], [], []>} : vector<32x16xf32>, vector<16x1xf32>, vector<32x1xf32> -> vector<32x1xf32>
    %cst_497 = arith.constant dense<0.000000e+00> : vector<32x1xf32>
    %551 = tpu.matmul %549, %548, %cst_497 {dimension_numbers = #tpu.dot_dimension_numbers<[1], [0], [0], [1], [0, 0, 1, 1], [], []>} : vector<32x16xf32>, vector<16x1xf32>, vector<32x1xf32> -> vector<32x1xf32>
    %c0_498 = arith.constant 0 : index
    %c0_499 = arith.constant 0 : index
    %552 = vector.load %arg45[%c0_498, %c0_499] : memref<32x1xf32, #tpu.memory_space<vmem>>, vector<32x1xf32>
    %553 = arith.mulf %552, %551 : vector<32x1xf32>
    %c0_500 = arith.constant 0 : index
    %c0_501 = arith.constant 0 : index
    %554 = vector.load %arg46[%c0_500, %c0_501] : memref<32x1xf32, #tpu.memory_space<vmem>>, vector<32x1xf32>
    %555 = arith.mulf %550, %553 : vector<32x1xf32>
    %556 = arith.subf %554, %555 : vector<32x1xf32>
    %557 = vector.broadcast %553 : vector<32x1xf32> to vector<32x256xf32>
    %558 = arith.mulf %531, %557 : vector<32x256xf32>
    %559 = vector.broadcast %556 : vector<32x1xf32> to vector<32x256xf32>
    %560 = arith.addf %558, %559 : vector<32x256xf32>
    %c0_502 = arith.constant 0 : index
    %c128_503 = arith.constant 128 : index
    %561 = vector.load %arg50[%c0_502, %c128_503] : memref<32x512xf32, #tpu.memory_space<vmem>>, vector<32x256xf32>
    tpu.vector_store %arg50[%c0_502, %c128_503], %560 {strides = array<i32>} : memref<32x512xf32, #tpu.memory_space<vmem>>, vector<32x256xf32>,
    %c0_504 = arith.constant 0 : index
    %c111_505 = arith.constant 111 : index
    %562 = vector.load %arg50[%c0_504, %c111_505] : memref<32x512xf32, #tpu.memory_space<vmem>>, vector<32x256xf32>
    %c0_506 = arith.constant 0 : index
    %c0_507 = arith.constant 0 : index
    %563 = vector.load %arg2[%c0_506, %c0_507] : memref<9x256xf32, #tpu.memory_space<vmem>>, vector<1x256xf32>
    %564 = vector.broadcast %563 : vector<1x256xf32> to vector<32x256xf32>
    %565 = arith.mulf %562, %564 : vector<32x256xf32>
    %c0_508 = arith.constant 0 : index
    %c0_509 = arith.constant 0 : index
    %566 = vector.load %arg53[%c0_508, %c0_509] : memref<576x256xf32, #tpu.memory_space<vmem>>, vector<32x256xf32>
    tpu.vector_store %arg53[%c0_508, %c0_509], %565 {strides = array<i32>} : memref<576x256xf32, #tpu.memory_space<vmem>>, vector<32x256xf32>,
    %c0_510 = arith.constant 0 : index
    %c112_511 = arith.constant 112 : index
    %567 = vector.load %arg50[%c0_510, %c112_511] : memref<32x512xf32, #tpu.memory_space<vmem>>, vector<32x256xf32>
    %c1_512 = arith.constant 1 : index
    %c0_513 = arith.constant 0 : index
    %568 = vector.load %arg2[%c1_512, %c0_513] : memref<9x256xf32, #tpu.memory_space<vmem>>, vector<1x256xf32>
    %569 = vector.broadcast %568 : vector<1x256xf32> to vector<32x256xf32>
    %570 = arith.mulf %567, %569 : vector<32x256xf32>
    %c32_514 = arith.constant 32 : index
    %c0_515 = arith.constant 0 : index
    %571 = vector.load %arg53[%c32_514, %c0_515] : memref<576x256xf32, #tpu.memory_space<vmem>>, vector<32x256xf32>
    tpu.vector_store %arg53[%c32_514, %c0_515], %570 {strides = array<i32>} : memref<576x256xf32, #tpu.memory_space<vmem>>, vector<32x256xf32>,
    %c0_516 = arith.constant 0 : index
    %c113_517 = arith.constant 113 : index
    %572 = vector.load %arg50[%c0_516, %c113_517] : memref<32x512xf32, #tpu.memory_space<vmem>>, vector<32x256xf32>
    %c2_518 = arith.constant 2 : index
    %c0_519 = arith.constant 0 : index
    %573 = vector.load %arg2[%c2_518, %c0_519] : memref<9x256xf32, #tpu.memory_space<vmem>>, vector<1x256xf32>
    %574 = vector.broadcast %573 : vector<1x256xf32> to vector<32x256xf32>
    %575 = arith.mulf %572, %574 : vector<32x256xf32>
    %c64_520 = arith.constant 64 : index
    %c0_521 = arith.constant 0 : index
    %576 = vector.load %arg53[%c64_520, %c0_521] : memref<576x256xf32, #tpu.memory_space<vmem>>, vector<32x256xf32>
    tpu.vector_store %arg53[%c64_520, %c0_521], %575 {strides = array<i32>} : memref<576x256xf32, #tpu.memory_space<vmem>>, vector<32x256xf32>,
    %c0_522 = arith.constant 0 : index
    %c127_523 = arith.constant 127 : index
    %577 = vector.load %arg50[%c0_522, %c127_523] : memref<32x512xf32, #tpu.memory_space<vmem>>, vector<32x256xf32>
    %c3_524 = arith.constant 3 : index
    %c0_525 = arith.constant 0 : index
    %578 = vector.load %arg2[%c3_524, %c0_525] : memref<9x256xf32, #tpu.memory_space<vmem>>, vector<1x256xf32>
    %579 = vector.broadcast %578 : vector<1x256xf32> to vector<32x256xf32>
    %580 = arith.mulf %577, %579 : vector<32x256xf32>
    %c96_526 = arith.constant 96 : index
    %c0_527 = arith.constant 0 : index
    %581 = vector.load %arg53[%c96_526, %c0_527] : memref<576x256xf32, #tpu.memory_space<vmem>>, vector<32x256xf32>
    tpu.vector_store %arg53[%c96_526, %c0_527], %580 {strides = array<i32>} : memref<576x256xf32, #tpu.memory_space<vmem>>, vector<32x256xf32>,
    %c0_528 = arith.constant 0 : index
    %c128_529 = arith.constant 128 : index
    %582 = vector.load %arg50[%c0_528, %c128_529] : memref<32x512xf32, #tpu.memory_space<vmem>>, vector<32x256xf32>
    %c128_530 = arith.constant 128 : index
    %c0_531 = arith.constant 0 : index
    %583 = vector.load %arg53[%c128_530, %c0_531] : memref<576x256xf32, #tpu.memory_space<vmem>>, vector<32x256xf32>
    tpu.vector_store %arg53[%c128_530, %c0_531], %582 {strides = array<i32>} : memref<576x256xf32, #tpu.memory_space<vmem>>, vector<32x256xf32>,
    %c0_532 = arith.constant 0 : index
    %c129_533 = arith.constant 129 : index
    %584 = vector.load %arg50[%c0_532, %c129_533] : memref<32x512xf32, #tpu.memory_space<vmem>>, vector<32x256xf32>
    %c5_534 = arith.constant 5 : index
    %c0_535 = arith.constant 0 : index
    %585 = vector.load %arg2[%c5_534, %c0_535] : memref<9x256xf32, #tpu.memory_space<vmem>>, vector<1x256xf32>
    %586 = vector.broadcast %585 : vector<1x256xf32> to vector<32x256xf32>
    %587 = arith.mulf %584, %586 : vector<32x256xf32>
    %c160_536 = arith.constant 160 : index
    %c0_537 = arith.constant 0 : index
    %588 = vector.load %arg53[%c160_536, %c0_537] : memref<576x256xf32, #tpu.memory_space<vmem>>, vector<32x256xf32>
    tpu.vector_store %arg53[%c160_536, %c0_537], %587 {strides = array<i32>} : memref<576x256xf32, #tpu.memory_space<vmem>>, vector<32x256xf32>,
    %c0_538 = arith.constant 0 : index
    %c143_539 = arith.constant 143 : index
    %589 = vector.load %arg50[%c0_538, %c143_539] : memref<32x512xf32, #tpu.memory_space<vmem>>, vector<32x256xf32>
    %c6_540 = arith.constant 6 : index
    %c0_541 = arith.constant 0 : index
    %590 = vector.load %arg2[%c6_540, %c0_541] : memref<9x256xf32, #tpu.memory_space<vmem>>, vector<1x256xf32>
    %591 = vector.broadcast %590 : vector<1x256xf32> to vector<32x256xf32>
    %592 = arith.mulf %589, %591 : vector<32x256xf32>
    %c192_542 = arith.constant 192 : index
    %c0_543 = arith.constant 0 : index
    %593 = vector.load %arg53[%c192_542, %c0_543] : memref<576x256xf32, #tpu.memory_space<vmem>>, vector<32x256xf32>
    tpu.vector_store %arg53[%c192_542, %c0_543], %592 {strides = array<i32>} : memref<576x256xf32, #tpu.memory_space<vmem>>, vector<32x256xf32>,
    %c0_544 = arith.constant 0 : index
    %c144_545 = arith.constant 144 : index
    %594 = vector.load %arg50[%c0_544, %c144_545] : memref<32x512xf32, #tpu.memory_space<vmem>>, vector<32x256xf32>
    %c7_546 = arith.constant 7 : index
    %c0_547 = arith.constant 0 : index
    %595 = vector.load %arg2[%c7_546, %c0_547] : memref<9x256xf32, #tpu.memory_space<vmem>>, vector<1x256xf32>
    %596 = vector.broadcast %595 : vector<1x256xf32> to vector<32x256xf32>
    %597 = arith.mulf %594, %596 : vector<32x256xf32>
    %c224_548 = arith.constant 224 : index
    %c0_549 = arith.constant 0 : index
    %598 = vector.load %arg53[%c224_548, %c0_549] : memref<576x256xf32, #tpu.memory_space<vmem>>, vector<32x256xf32>
    tpu.vector_store %arg53[%c224_548, %c0_549], %597 {strides = array<i32>} : memref<576x256xf32, #tpu.memory_space<vmem>>, vector<32x256xf32>,
    %c0_550 = arith.constant 0 : index
    %c145_551 = arith.constant 145 : index
    %599 = vector.load %arg50[%c0_550, %c145_551] : memref<32x512xf32, #tpu.memory_space<vmem>>, vector<32x256xf32>
    %c8_552 = arith.constant 8 : index
    %c0_553 = arith.constant 0 : index
    %600 = vector.load %arg2[%c8_552, %c0_553] : memref<9x256xf32, #tpu.memory_space<vmem>>, vector<1x256xf32>
    %601 = vector.broadcast %600 : vector<1x256xf32> to vector<32x256xf32>
    %602 = arith.mulf %599, %601 : vector<32x256xf32>
    %c256_554 = arith.constant 256 : index
    %c0_555 = arith.constant 0 : index
    %603 = vector.load %arg53[%c256_554, %c0_555] : memref<576x256xf32, #tpu.memory_space<vmem>>, vector<32x256xf32>
    tpu.vector_store %arg53[%c256_554, %c0_555], %602 {strides = array<i32>} : memref<576x256xf32, #tpu.memory_space<vmem>>, vector<32x256xf32>,
    %c0_556 = arith.constant 0 : index
    %c0_557 = arith.constant 0 : index
    %604 = vector.load %arg27[%c0_556, %c0_557] : memref<16x288xbf16, #tpu.memory_space<vmem>>, vector<16x288xbf16>
    %c0_558 = arith.constant 0 : index
    %c0_559 = arith.constant 0 : index
    %605 = vector.load %arg53[%c0_558, %c0_559] : memref<576x256xf32, #tpu.memory_space<vmem>>, vector<288x256xf32>
    %606 = arith.truncf %605 : vector<288x256xf32> to vector<288x256xbf16>
    %cst_560 = arith.constant dense<0.000000e+00> : vector<16x256xf32>
    %607 = tpu.matmul %604, %606, %cst_560 {dimension_numbers = #tpu.dot_dimension_numbers<[1], [0], [0], [1], [0, 0, 1, 1], [], []>} : vector<16x288xbf16>, vector<288x256xbf16>, vector<16x256xf32> -> vector<16x256xf32>
    %c0_561 = arith.constant 0 : index
    %c0_562 = arith.constant 0 : index
    %608 = vector.load %arg28[%c0_561, %c0_562] : memref<16x1xf32, #tpu.memory_space<vmem>>, vector<16x1xf32>
    %609 = vector.broadcast %608 : vector<16x1xf32> to vector<16x256xf32>
    %610 = arith.addf %607, %609 : vector<16x256xf32>
    %cst_563 = arith.constant 0.000000e+00 : f32
    %611 = vector.broadcast %cst_563 : f32 to vector<16x256xf32>
    %612 = arith.cmpf ogt, %610, %611 : vector<16x256xf32>
    %cst_564 = arith.constant 5.000000e-02 : f32
    %613 = vector.broadcast %cst_564 : f32 to vector<16x256xf32>
    %614 = arith.mulf %613, %610 : vector<16x256xf32>
    %615 = arith.select %612, %610, %614 : vector<16x256xi1>, vector<16x256xf32>
    %c0_565 = arith.constant 0 : index
    %c0_566 = arith.constant 0 : index
    %616 = vector.load %arg29[%c0_565, %c0_566] : memref<2x16xbf16, #tpu.memory_space<vmem>>, vector<2x16xbf16>
    %617 = arith.truncf %615 : vector<16x256xf32> to vector<16x256xbf16>
    %cst_567 = arith.constant dense<0.000000e+00> : vector<2x256xf32>
    %618 = tpu.matmul %616, %617, %cst_567 {dimension_numbers = #tpu.dot_dimension_numbers<[1], [0], [0], [1], [0, 0, 1, 1], [], []>} : vector<2x16xbf16>, vector<16x256xbf16>, vector<2x256xf32> -> vector<2x256xf32>
    %c0_568 = arith.constant 0 : index
    %c0_569 = arith.constant 0 : index
    %619 = vector.load %arg30[%c0_568, %c0_569] : memref<2x1xf32, #tpu.memory_space<vmem>>, vector<2x1xf32>
    %620 = vector.broadcast %619 : vector<2x1xf32> to vector<2x256xf32>
    %621 = arith.addf %618, %620 : vector<2x256xf32>
    %cst_570 = arith.constant dense<0xFF800000> : vector<256xf32>
    %622 = vector.multi_reduction <maximumf>, %621, %cst_570 [0] : vector<2x256xf32> to vector<256xf32>
    %623 = vector.shape_cast %622 : vector<256xf32> to vector<1x256xf32>
    %624 = vector.broadcast %623 : vector<1x256xf32> to vector<2x256xf32>
    %625 = arith.subf %621, %624 : vector<2x256xf32>
    %626 = math.exp %625 : vector<2x256xf32>
    %cst_571 = arith.constant dense<0.000000e+00> : vector<256xf32>
    %627 = vector.multi_reduction <add>, %626, %cst_571 [0] : vector<2x256xf32> to vector<256xf32>
    %628 = vector.shape_cast %627 : vector<256xf32> to vector<1x256xf32>
    %629 = vector.broadcast %628 : vector<1x256xf32> to vector<2x256xf32>
    %630 = arith.divf %626, %629 : vector<2x256xf32>
    %c0_572 = arith.constant 0 : index
    %c0_573 = arith.constant 0 : index
    %c0_574 = arith.constant 0 : index
    %631 = vector.load %arg49[%c0_572, %c0_573, %c0_574] : memref<1x2x256xf32, #tpu.memory_space<vmem>>, vector<1x2x256xf32>
    %632 = vector.shape_cast %631 : vector<1x2x256xf32> to vector<2x256xf32>
    %633 = vector.shape_cast %630 : vector<2x256xf32> to vector<1x2x256xf32>
    tpu.vector_store %arg49[%c0_572, %c0_573, %c0_574], %633 {strides = array<i32>} : memref<1x2x256xf32, #tpu.memory_space<vmem>>, vector<1x2x256xf32>,
    return
  }
  func.func @transform_0(%arg0: i32) -> (i32, i32, i32) {
    %c0_i32 = arith.constant 0 : i32
    %c0_i32_0 = arith.constant 0 : i32
    %c0_i32_1 = arith.constant 0 : i32
    return %arg0, %c0_i32, %c0_i32_0 : i32, i32, i32
  }
  func.func @transform_1(%arg0: i32) -> (i32, i32) {
    %c0_i32 = arith.constant 0 : i32
    %c0_i32_0 = arith.constant 0 : i32
    %c0_i32_1 = arith.constant 0 : i32
    return %c0_i32, %c0_i32_0 : i32, i32
  }
  func.func @transform_2(%arg0: i32) -> (i32, i32) {
    %c0_i32 = arith.constant 0 : i32
    %c0_i32_0 = arith.constant 0 : i32
    %c0_i32_1 = arith.constant 0 : i32
    return %c0_i32, %c0_i32_0 : i32, i32
  }
  func.func @transform_3(%arg0: i32) -> (i32, i32) {
    %c0_i32 = arith.constant 0 : i32
    %c0_i32_0 = arith.constant 0 : i32
    %c0_i32_1 = arith.constant 0 : i32
    return %c0_i32, %c0_i32_0 : i32, i32
  }
  func.func @transform_4(%arg0: i32) -> (i32, i32) {
    %c0_i32 = arith.constant 0 : i32
    %c0_i32_0 = arith.constant 0 : i32
    %c0_i32_1 = arith.constant 0 : i32
    return %c0_i32, %c0_i32_0 : i32, i32
  }
  func.func @transform_5(%arg0: i32) -> (i32, i32) {
    %c0_i32 = arith.constant 0 : i32
    %c0_i32_0 = arith.constant 0 : i32
    %c0_i32_1 = arith.constant 0 : i32
    return %c0_i32, %c0_i32_0 : i32, i32
  }
  func.func @transform_6(%arg0: i32) -> (i32, i32) {
    %c0_i32 = arith.constant 0 : i32
    %c0_i32_0 = arith.constant 0 : i32
    %c0_i32_1 = arith.constant 0 : i32
    return %c0_i32, %c0_i32_0 : i32, i32
  }
  func.func @transform_7(%arg0: i32) -> (i32, i32) {
    %c0_i32 = arith.constant 0 : i32
    %c0_i32_0 = arith.constant 0 : i32
    %c0_i32_1 = arith.constant 0 : i32
    return %c0_i32, %c0_i32_0 : i32, i32
  }
  func.func @transform_8(%arg0: i32) -> (i32, i32) {
    %c0_i32 = arith.constant 0 : i32
    %c0_i32_0 = arith.constant 0 : i32
    %c0_i32_1 = arith.constant 0 : i32
    return %c0_i32, %c0_i32_0 : i32, i32
  }
  func.func @transform_9(%arg0: i32) -> (i32, i32) {
    %c0_i32 = arith.constant 0 : i32
    %c0_i32_0 = arith.constant 0 : i32
    %c0_i32_1 = arith.constant 0 : i32
    return %c0_i32, %c0_i32_0 : i32, i32
  }
  func.func @transform_10(%arg0: i32) -> (i32, i32) {
    %c0_i32 = arith.constant 0 : i32
    %c0_i32_0 = arith.constant 0 : i32
    %c0_i32_1 = arith.constant 0 : i32
    return %c0_i32, %c0_i32_0 : i32, i32
  }
  func.func @transform_11(%arg0: i32) -> (i32, i32) {
    %c0_i32 = arith.constant 0 : i32
    %c0_i32_0 = arith.constant 0 : i32
    %c0_i32_1 = arith.constant 0 : i32
    return %c0_i32, %c0_i32_0 : i32, i32
  }
  func.func @transform_12(%arg0: i32) -> (i32, i32) {
    %c0_i32 = arith.constant 0 : i32
    %c0_i32_0 = arith.constant 0 : i32
    %c0_i32_1 = arith.constant 0 : i32
    return %c0_i32, %c0_i32_0 : i32, i32
  }
  func.func @transform_13(%arg0: i32) -> (i32, i32) {
    %c0_i32 = arith.constant 0 : i32
    %c0_i32_0 = arith.constant 0 : i32
    %c0_i32_1 = arith.constant 0 : i32
    return %c0_i32, %c0_i32_0 : i32, i32
  }
  func.func @transform_14(%arg0: i32) -> (i32, i32) {
    %c0_i32 = arith.constant 0 : i32
    %c0_i32_0 = arith.constant 0 : i32
    %c0_i32_1 = arith.constant 0 : i32
    return %c0_i32, %c0_i32_0 : i32, i32
  }
  func.func @transform_15(%arg0: i32) -> (i32, i32) {
    %c0_i32 = arith.constant 0 : i32
    %c0_i32_0 = arith.constant 0 : i32
    %c0_i32_1 = arith.constant 0 : i32
    return %c0_i32, %c0_i32_0 : i32, i32
  }
  func.func @transform_16(%arg0: i32) -> (i32, i32) {
    %c0_i32 = arith.constant 0 : i32
    %c0_i32_0 = arith.constant 0 : i32
    %c0_i32_1 = arith.constant 0 : i32
    return %c0_i32, %c0_i32_0 : i32, i32
  }
  func.func @transform_17(%arg0: i32) -> (i32, i32) {
    %c0_i32 = arith.constant 0 : i32
    %c0_i32_0 = arith.constant 0 : i32
    %c0_i32_1 = arith.constant 0 : i32
    return %c0_i32, %c0_i32_0 : i32, i32
  }
  func.func @transform_18(%arg0: i32) -> (i32, i32) {
    %c0_i32 = arith.constant 0 : i32
    %c0_i32_0 = arith.constant 0 : i32
    %c0_i32_1 = arith.constant 0 : i32
    return %c0_i32, %c0_i32_0 : i32, i32
  }
  func.func @transform_19(%arg0: i32) -> (i32, i32) {
    %c0_i32 = arith.constant 0 : i32
    %c0_i32_0 = arith.constant 0 : i32
    %c0_i32_1 = arith.constant 0 : i32
    return %c0_i32, %c0_i32_0 : i32, i32
  }
  func.func @transform_20(%arg0: i32) -> (i32, i32) {
    %c0_i32 = arith.constant 0 : i32
    %c0_i32_0 = arith.constant 0 : i32
    %c0_i32_1 = arith.constant 0 : i32
    return %c0_i32, %c0_i32_0 : i32, i32
  }
  func.func @transform_21(%arg0: i32) -> (i32, i32) {
    %c0_i32 = arith.constant 0 : i32
    %c0_i32_0 = arith.constant 0 : i32
    %c0_i32_1 = arith.constant 0 : i32
    return %c0_i32, %c0_i32_0 : i32, i32
  }
  func.func @transform_22(%arg0: i32) -> (i32, i32) {
    %c0_i32 = arith.constant 0 : i32
    %c0_i32_0 = arith.constant 0 : i32
    %c0_i32_1 = arith.constant 0 : i32
    return %c0_i32, %c0_i32_0 : i32, i32
  }
  func.func @transform_23(%arg0: i32) -> (i32, i32) {
    %c0_i32 = arith.constant 0 : i32
    %c0_i32_0 = arith.constant 0 : i32
    %c0_i32_1 = arith.constant 0 : i32
    return %c0_i32, %c0_i32_0 : i32, i32
  }
  func.func @transform_24(%arg0: i32) -> (i32, i32) {
    %c0_i32 = arith.constant 0 : i32
    %c0_i32_0 = arith.constant 0 : i32
    %c0_i32_1 = arith.constant 0 : i32
    return %c0_i32, %c0_i32_0 : i32, i32
  }
  func.func @transform_25(%arg0: i32) -> (i32, i32) {
    %c0_i32 = arith.constant 0 : i32
    %c0_i32_0 = arith.constant 0 : i32
    %c0_i32_1 = arith.constant 0 : i32
    return %c0_i32, %c0_i32_0 : i32, i32
  }
  func.func @transform_26(%arg0: i32) -> (i32, i32) {
    %c0_i32 = arith.constant 0 : i32
    %c0_i32_0 = arith.constant 0 : i32
    %c0_i32_1 = arith.constant 0 : i32
    return %c0_i32, %c0_i32_0 : i32, i32
  }
  func.func @transform_27(%arg0: i32) -> (i32, i32) {
    %c0_i32 = arith.constant 0 : i32
    %c0_i32_0 = arith.constant 0 : i32
    %c0_i32_1 = arith.constant 0 : i32
    return %c0_i32, %c0_i32_0 : i32, i32
  }
  func.func @transform_28(%arg0: i32) -> (i32, i32) {
    %c0_i32 = arith.constant 0 : i32
    %c0_i32_0 = arith.constant 0 : i32
    %c0_i32_1 = arith.constant 0 : i32
    return %c0_i32, %c0_i32_0 : i32, i32
  }
  func.func @transform_29(%arg0: i32) -> (i32, i32) {
    %c0_i32 = arith.constant 0 : i32
    %c0_i32_0 = arith.constant 0 : i32
    %c0_i32_1 = arith.constant 0 : i32
    return %c0_i32, %c0_i32_0 : i32, i32
  }
  func.func @transform_30(%arg0: i32) -> (i32, i32) {
    %c0_i32 = arith.constant 0 : i32
    %c0_i32_0 = arith.constant 0 : i32
    %c0_i32_1 = arith.constant 0 : i32
    return %c0_i32, %c0_i32_0 : i32, i32
  }
  func.func @transform_31(%arg0: i32) -> (i32, i32) {
    %c0_i32 = arith.constant 0 : i32
    %c0_i32_0 = arith.constant 0 : i32
    %c0_i32_1 = arith.constant 0 : i32
    return %c0_i32, %c0_i32_0 : i32, i32
  }
  func.func @transform_32(%arg0: i32) -> (i32, i32) {
    %c0_i32 = arith.constant 0 : i32
    %c0_i32_0 = arith.constant 0 : i32
    %c0_i32_1 = arith.constant 0 : i32
    return %c0_i32, %c0_i32_0 : i32, i32
  }
  func.func @transform_33(%arg0: i32) -> (i32, i32) {
    %c0_i32 = arith.constant 0 : i32
    %c0_i32_0 = arith.constant 0 : i32
    %c0_i32_1 = arith.constant 0 : i32
    return %c0_i32, %c0_i32_0 : i32, i32
  }
  func.func @transform_34(%arg0: i32) -> (i32, i32) {
    %c0_i32 = arith.constant 0 : i32
    %c0_i32_0 = arith.constant 0 : i32
    %c0_i32_1 = arith.constant 0 : i32
    return %c0_i32, %c0_i32_0 : i32, i32
  }
  func.func @transform_35(%arg0: i32) -> (i32, i32) {
    %c0_i32 = arith.constant 0 : i32
    %c0_i32_0 = arith.constant 0 : i32
    %c0_i32_1 = arith.constant 0 : i32
    return %c0_i32, %c0_i32_0 : i32, i32
  }
  func.func @transform_36(%arg0: i32) -> (i32, i32) {
    %c0_i32 = arith.constant 0 : i32
    %c0_i32_0 = arith.constant 0 : i32
    %c0_i32_1 = arith.constant 0 : i32
    return %c0_i32, %c0_i32_0 : i32, i32
  }
  func.func @transform_37(%arg0: i32) -> (i32, i32) {
    %c0_i32 = arith.constant 0 : i32
    %c0_i32_0 = arith.constant 0 : i32
    %c0_i32_1 = arith.constant 0 : i32
    return %c0_i32, %c0_i32_0 : i32, i32
  }
  func.func @transform_38(%arg0: i32) -> (i32, i32) {
    %c0_i32 = arith.constant 0 : i32
    %c0_i32_0 = arith.constant 0 : i32
    %c0_i32_1 = arith.constant 0 : i32
    return %c0_i32, %c0_i32_0 : i32, i32
  }
  func.func @transform_39(%arg0: i32) -> (i32, i32) {
    %c0_i32 = arith.constant 0 : i32
    %c0_i32_0 = arith.constant 0 : i32
    %c0_i32_1 = arith.constant 0 : i32
    return %c0_i32, %c0_i32_0 : i32, i32
  }
  func.func @transform_40(%arg0: i32) -> (i32, i32) {
    %c0_i32 = arith.constant 0 : i32
    %c0_i32_0 = arith.constant 0 : i32
    %c0_i32_1 = arith.constant 0 : i32
    return %c0_i32, %c0_i32_0 : i32, i32
  }
  func.func @transform_41(%arg0: i32) -> (i32, i32) {
    %c0_i32 = arith.constant 0 : i32
    %c0_i32_0 = arith.constant 0 : i32
    %c0_i32_1 = arith.constant 0 : i32
    return %c0_i32, %c0_i32_0 : i32, i32
  }
  func.func @transform_42(%arg0: i32) -> (i32, i32) {
    %c0_i32 = arith.constant 0 : i32
    %c0_i32_0 = arith.constant 0 : i32
    %c0_i32_1 = arith.constant 0 : i32
    return %c0_i32, %c0_i32_0 : i32, i32
  }
  func.func @transform_43(%arg0: i32) -> (i32, i32) {
    %c0_i32 = arith.constant 0 : i32
    %c0_i32_0 = arith.constant 0 : i32
    %c0_i32_1 = arith.constant 0 : i32
    return %c0_i32, %c0_i32_0 : i32, i32
  }
  func.func @transform_44(%arg0: i32) -> (i32, i32) {
    %c0_i32 = arith.constant 0 : i32
    %c0_i32_0 = arith.constant 0 : i32
    %c0_i32_1 = arith.constant 0 : i32
    return %c0_i32, %c0_i32_0 : i32, i32
  }
  func.func @transform_45(%arg0: i32) -> (i32, i32) {
    %c0_i32 = arith.constant 0 : i32
    %c0_i32_0 = arith.constant 0 : i32
    %c0_i32_1 = arith.constant 0 : i32
    return %c0_i32, %c0_i32_0 : i32, i32
  }
  func.func @transform_46(%arg0: i32) -> (i32, i32) {
    %c0_i32 = arith.constant 0 : i32
    %c0_i32_0 = arith.constant 0 : i32
    %c0_i32_1 = arith.constant 0 : i32
    return %c0_i32, %c0_i32_0 : i32, i32
  }
  func.func @transform_47(%arg0: i32) -> (i32, i32) {
    %c0_i32 = arith.constant 0 : i32
    %c0_i32_0 = arith.constant 0 : i32
    %c0_i32_1 = arith.constant 0 : i32
    return %c0_i32, %c0_i32_0 : i32, i32
  }
  func.func @transform_48(%arg0: i32) -> (i32, i32, i32) {
    %c0_i32 = arith.constant 0 : i32
    %c0_i32_0 = arith.constant 0 : i32
    %c0_i32_1 = arith.constant 0 : i32
    return %arg0, %c0_i32, %c0_i32_0 : i32, i32, i32
  }
}

</mosaic_0001>

<bundles_post_ra>
// kernel: scaffold_unet_forward.1
= control target key start
LH: loop header
LB: loop body
LE: loop exit
PB: predicated region body
PF: predicated region fallthrough
CT: control target
= control target key end

     0   :  { %s8621_s6 = smov 1   ;;  %s8622_s10 = smov 2   ;;  %s11764_s0 = inlined_call_operand.smem [shape: u32[49], index: -1, kind: input, shape index: {}] }
   0x1   :  { %s8702_s5 = sld [smem:[%s11764_s0]]   ;;  %s8623_s14 = smov 3  }
   0x2   :  { %s8707_s9 = sld [smem:[%s11764_s0 + %s8621_s6]]   ;;  %s8624_s18 = smov 4  }
   0x3   :  { %s8712_s13 = sld [smem:[%s11764_s0 + %s8622_s10]]   ;;  %s8625_s22 = smov 5  }
   0x4   :  { %s8717_s17 = sld [smem:[%s11764_s0 + %s8623_s14]]   ;;  %s8626_s26 = smov 6  }
   0x5   :  { %s8722_s21 = sld [smem:[%s11764_s0 + %s8624_s18]]   ;;  %s8627_s30 = smov 7  }
   0x6   :  { %s8727_s25 = sld [smem:[%s11764_s0 + %s8625_s22]]   ;;  %s8628_s4 = smov 8  }
   0x7   :  { %11856 = sst [smem:[#allocation9_spill]] %s8702_s5  ;;  %s8629_s10 = smov 9  }
   0x8   :  { %s8732_s29 = sld [smem:[%s11764_s0 + %s8626_s26]]   ;;  %s8630_s15 = smov 10  }
   0x9   :  { %s8737_s3 = sld [smem:[%s11764_s0 + %s8627_s30]]   ;;  %s8631_s20 = smov 11  }
   0xa   :  { %11857 = sst [smem:[#allocation10_spill]] %s8717_s17  ;;  %s8632_s26 = smov 12  }
   0xb   :  { %s8742_s8 = sld [smem:[%s11764_s0 + %s8628_s4]]   ;;  %s8633_s1 = smov 13  }
   0xc   :  { %11858 = sst [smem:[#allocation11_spill]] %s8727_s25  ;;  %s8634_s7 = smov 14  }
   0xd   :  { %s8747_s14 = sld [smem:[%s11764_s0 + %s8629_s10]]   ;;  %s8636_s22 = smov 16  }
   0xe   :  { %11859 = sst [smem:[#allocation12_spill]] %s8732_s29  ;;  %s8637_s28 = smov 17  }
   0xf   :  { %11860 = sst [smem:[#allocation13_spill]] %s8737_s3 }
  0x10   :  { %s8752_s19 = sld [smem:[%s11764_s0 + %s8630_s15]]   ;;  %s8635_s15 = smov 15  }
  0x11   :  { %11861 = sst [smem:[#allocation14_spill]] %s8742_s8 }
  0x12   :  { %s8757_s24 = sld [smem:[%s11764_s0 + %s8631_s20]]  }
  0x13   :  { %11862 = sst [smem:[#allocation15_spill]] %s8747_s14 }
  0x14   :  { %s8762_s30 = sld [smem:[%s11764_s0 + %s8632_s26]]  }
  0x15   :  { %s8767_s6 = sld [smem:[%s11764_s0 + %s8633_s1]]  }
  0x16   :  { %s8772_s12 = sld [smem:[%s11764_s0 + %s8634_s7]]   ;;  %s8638_s7 = smov 18  }
  0x17   :  { %s8777_s20 = sld [smem:[%s11764_s0 + %s8635_s15]]   ;;  %s8639_s15 = smov 19  }
  0x18   :  { %s8782_s27 = sld [smem:[%s11764_s0 + %s8636_s22]]   ;;  %s8640_s22 = smov 20  }
  0x19   :  { %s8787_s4 = sld [smem:[%s11764_s0 + %s8637_s28]]   ;;  %s8641_s28 = smov 21  }
  0x1a   :  { %s8792_s3 = sld [smem:[%s11764_s0 + %s8638_s7]]   ;;  %s8642_s7 = smov 22  }
  0x1b   :  { %11863 = sst [smem:[#allocation16_spill]] %s8767_s6 }
  0x1c   :  { %11864 = sst [smem:[#allocation17_spill]] %s8772_s12 }
  0x1d   :  { %11865 = sst [smem:[#allocation18_spill]] %s8777_s20 }
  0x1e   :  { %11866 = sst [smem:[#allocation19_spill]] %s8782_s27 }
  0x1f   :  { %11867 = sst [smem:[#allocation20_spill]] %s8787_s4 }
  0x20   :  { %11868 = sst [smem:[#allocation21_spill]] %s8792_s3 }
  0x21   :  { %s8797_s29 = sld [smem:[%s11764_s0 + %s8639_s15]]   ;;  %s8643_s15 = smov 23  }
  0x22   :  { %s8802_s17 = sld [smem:[%s11764_s0 + %s8640_s22]]   ;;  %s8644_s22 = smov 24  }
  0x23   :  { %s8807_s25 = sld [smem:[%s11764_s0 + %s8641_s28]]   ;;  %s8645_s28 = smov 25  }
  0x24   :  { %s8812_s3 = sld [smem:[%s11764_s0 + %s8642_s7]]   ;;  %s8646_s7 = smov 26  }
  0x27   :  { %11869 = sst [smem:[#allocation22_spill]] %s8797_s29 }
  0x28   :  { %11870 = sst [smem:[#allocation23_spill]] %s8802_s17 }
  0x29   :  { %11871 = sst [smem:[#allocation24_spill]] %s8807_s25 }
  0x2a   :  { %11872 = sst [smem:[#allocation25_spill]] %s8812_s3 }
  0x2b   :  { %s8817_s29 = sld [smem:[%s11764_s0 + %s8643_s15]]   ;;  %s8647_s15 = smov 27  }
  0x2c   :  { %s8822_s17 = sld [smem:[%s11764_s0 + %s8644_s22]]   ;;  %s8648_s22 = smov 28  }
  0x2d   :  { %s8827_s25 = sld [smem:[%s11764_s0 + %s8645_s28]]   ;;  %s8649_s28 = smov 29  }
  0x2e   :  { %s8832_s3 = sld [smem:[%s11764_s0 + %s8646_s7]]   ;;  %s8650_s7 = smov 30  }
  0x31   :  { %11873 = sst [smem:[#allocation26_spill]] %s8817_s29 }
  0x32   :  { %11874 = sst [smem:[#allocation27_spill]] %s8822_s17 }
  0x33   :  { %11875 = sst [smem:[#allocation28_spill]] %s8827_s25 }
  0x34   :  { %11876 = sst [smem:[#allocation29_spill]] %s8832_s3 }
  0x35   :  { %s8837_s29 = sld [smem:[%s11764_s0 + %s8647_s15]]   ;;  %s8651_s15 = smov 31  }
  0x36   :  { %s8842_s17 = sld [smem:[%s11764_s0 + %s8648_s22]]   ;;  %s8652_s22 = smov 32  }
  0x37   :  { %s8847_s25 = sld [smem:[%s11764_s0 + %s8649_s28]]   ;;  %s8653_s28 = smov 33  }
  0x38   :  { %s8852_s3 = sld [smem:[%s11764_s0 + %s8650_s7]]   ;;  %s8654_s7 = smov 34  }
  0x39   :  { %s8872_s27 = sld [smem:[%s11764_s0 + %s8654_s7]]   ;;  %s8658_s7 = smov 38  }
  0x3b   :  { %11877 = sst [smem:[#allocation30_spill]] %s8837_s29 }
  0x3c   :  { %11878 = sst [smem:[#allocation31_spill]] %s8842_s17 }
  0x3d   :  { %11879 = sst [smem:[#allocation32_spill]] %s8847_s25 }
  0x3e   :  { %11880 = sst [smem:[#allocation33_spill]] %s8852_s3 }
  0x3f   :  { %s8857_s29 = sld [smem:[%s11764_s0 + %s8651_s15]]   ;;  %s8655_s15 = smov 35  }
  0x40   :  { %s8862_s17 = sld [smem:[%s11764_s0 + %s8652_s22]]   ;;  %s8656_s22 = smov 36  }
  0x41   :  { %s8867_s25 = sld [smem:[%s11764_s0 + %s8653_s28]]   ;;  %s8657_s28 = smov 37  }
  0x42   :  { %11881 = sst [smem:[#allocation34_spill]] %s8872_s27 }
  0x43   :  { %s8877_s4 = sld [smem:[%s11764_s0 + %s8655_s15]]   ;;  %s8659_s15 = smov 39  }
  0x44   :  { %s8882_s12 = sld [smem:[%s11764_s0 + %s8656_s22]]   ;;  %s8660_s22 = smov 40  }
  0x45   :  { %s8887_s20 = sld [smem:[%s11764_s0 + %s8657_s28]]   ;;  %s8661_s28 = smov 41  }
  0x46   :  { %s8892_s27 = sld [smem:[%s11764_s0 + %s8658_s7]]   ;;  %s8662_s7 = smov 42  }
  0x49   :  { %11882 = sst [smem:[#allocation35_spill]] %s8877_s4 }
  0x4a   :  { %11883 = sst [smem:[#allocation36_spill]] %s8882_s12 }
  0x4b   :  { %11884 = sst [smem:[#allocation37_spill]] %s8887_s20 }
  0x4c   :  { %11885 = sst [smem:[#allocation38_spill]] %s8892_s27 }
  0x4d   :  { %s8897_s4 = sld [smem:[%s11764_s0 + %s8659_s15]]   ;;  %s8663_s15 = smov 43  }
  0x4e   :  { %s8902_s12 = sld [smem:[%s11764_s0 + %s8660_s22]]   ;;  %s8664_s22 = smov 44  }
  0x4f   :  { %s8907_s20 = sld [smem:[%s11764_s0 + %s8661_s28]]   ;;  %s8665_s28 = smov 45  }
  0x50   :  { %s8912_s27 = sld [smem:[%s11764_s0 + %s8662_s7]]   ;;  %s8666_s7 = smov 46  }
  0x53   :  { %11886 = sst [smem:[#allocation39_spill]] %s8897_s4 }
  0x54   :  { %11887 = sst [smem:[#allocation40_spill]] %s8902_s12 }
  0x55   :  { %11888 = sst [smem:[#allocation41_spill]] %s8907_s20 }
  0x56   :  { %11889 = sst [smem:[#allocation42_spill]] %s8912_s27 }
  0x57   :  { %s8917_s4 = sld [smem:[%s11764_s0 + %s8663_s15]]   ;;  %s8667_s15 = smov 47  }
  0x58   :  { %s8922_s12 = sld [smem:[%s11764_s0 + %s8664_s22]]   ;;  %s8668_s22 = smov 48  }
  0x59   :  { %s8927_s20 = sld [smem:[%s11764_s0 + %s8665_s28]]  }
  0x5a   :  { %s8932_s27 = sld [smem:[%s11764_s0 + %s8666_s7]]  }
  0x5d   :  { %11890 = sst [smem:[#allocation43_spill]] %s8917_s4 }
  0x5e   :  { %11891 = sst [smem:[#allocation44_spill]] %s8922_s12 }
  0x5f   :  { %s8937_s4 = sld [smem:[%s11764_s0 + %s8667_s15]]  }
  0x60   :  { %s8942_s12 = sld [smem:[%s11764_s0 + %s8668_s22]]  }
  0x65   :  { %11892 = sst [smem:[#allocation45_spill]] %s8937_s4 }
  0x66   :  { %102 = vsyncpa [#allocation7], 0  ;;  %s8944_s28 = smov 0  }
  0x67 LB: > { %s11893_s4 = sld [smem:[#allocation45_spill]]  ;;  %s1172_s1 = sshll.u32 %s8722_s21, 4  ;;  %s8619_s28 = sphi %s8944_s28, %s108_s28   ;;  %s1173_s1 = int_to_ptr.hbm [resolvable:$true] %s1172_s1 }
  0x68   : > { %s11894_s6 = sld [smem:[#allocation16_spill]]  ;;  %s8951_s2 = sadd.s32 4294967295, %s8619_s28  }
  0x69   : > { %p8097_p0 = scmp.ge.s32.totalorder %s8619_s28, 1  ;;  %p1152_p1 = scmp.lt.s32.totalorder %s8619_s28, 3 }
  0x6a   : > { %p8430_p2 = scmp.eq.s32.totalorder %s8951_s2, 0  ;;  %s8669_s7 = smov [#allocation6]  }
  0x6b   : > { %p8956_p3 = pnand %p8097_p0, %p1152_p1  ;;  %s1174_s10 = sshll.u32 %s8669_s7, 4  ;;  %s1175_s10 = int_to_ptr.vmem [resolvable:$true] %s1174_s10 }
  0x6c   : > { %s8579_s15 = sshra.s32 %s1173_s1, 4  ;;  %s8586_s18 = scalar_lea.hbm %s8722_s21, 256  ;;  %s8580_s15 = int_to_ptr.hbm [resolvable:$true] %s8579_s15 }
  0x6d   : > { %p8426_p4 = pneg %p8956_p3  ;;  %s8581_s16 = scalar_lea.hbm %s8580_s15, 256 }
  0x6e   : > { %p8582_p6 = scmp.ne.s32.totalorder %s8580_s15, %s8581_s16  ;;  %p8587_p10 = scmp.lt.s32.totalorder %s8580_s15, %s8722_s21 }
  0x6f   : > { %p8964_p5 = pnand %p8430_p2, %p8426_p4  ;;  %p8588_p11 = scmp.lt.s32.totalorder %s8586_s18, %s8581_s16 }
  0x71   : > { %p8583_p7 = pneg %p8964_p5  ;;  %p8589_p12 = por %p8588_p11, %p8587_p10 }
  0x73   : > { %p8584_p8 = pnand %p8583_p7, %p8582_p6 }
  0x75   : > { %p8585_p9 = pneg %p8584_p8 }
  0x77   : > { %p8590_p13 = pnand %p8589_p12, %p8585_p9 }
  0x79   : > { %8593 = shalt.err (!%p8590_p13)
}
  0x7a   : > { %s8670_s22 = smov 128   ;;  %s8671_s23 = smov 8  }
  0x7b   : > { %8429 = dma.hbm_to_vmem [thread:$0]  (!%p8964_p5), %s1173_s1, 4096, %s1175_s10, [#allocation7], %s8670_s22, %s8670_s22, %s8671_s23  }
  0x7c   : > { %1327 = sbr.rel (%p8956_p3) target bundleno = 6838 (0x1ab6), region = 212 }
  0x81   : > { %8614 = dma.done.wait (%p8430_p2), [#allocation7], 4096  }
  0x82   : > { %8616 = vsyncadd (%p8430_p2), [#allocation7], 4294963200  ;;  %vm1471_vm0 = vcmask 523264   ;;  %vm1496_vm1 = vcmask 130048   ;;  %s11793_s26 = smov 17   ;;  %s11795_s1 = smov 15  }
  0x83   : > { %v8112_v0 = vld [vmem:[%s8707_s9 + $0x10] ss:$8 sm:$0x3]  ;;  %v8110_v2 = vld [vmem:[%s8707_s9 + $0x6] ss:$8 sm:$0x3] }
  0x84   : > { %v1765_v1 = vperm.slane %v8112_v0, 0  ;;  %v1697_v3 = vperm.slane %v8110_v2, 0  ;;  %v8111_v4 = vld [vmem:[%s8707_s9 + $0x7] ss:$8 sm:$0x3]  ;;  %v8674_v6 = vmov 0.0  }
  0x85   : > { %v1731_v5 = vperm.slane %v8111_v4, 0  ;;  %1469 = vst [vmem:[#allocation3] sm:$0xff] %v8674_v6  ;;  %s11801_s0 = smov 16   ;;  %v1766_v7 = vperm.slane %v8112_v0, 1  ;;  %v1698_v8 = vperm.slane %v8110_v2, 1  ;;  %v1732_v9 = vperm.slane %v8111_v4, 1 }
  0x86   : > { %1767 = vrot.lane.b32.xlu0 %v1765_v1, %s11793_s26  ;;  %1699 = vrot.lane.b32.xlu1 %v1697_v3, %s11795_s1  ;;  %1470 = vst [vmem:[#allocation3 + $0x8] sm:$0xff] %v8674_v6  ;;  %v8109_v10 = vld [vmem:[%s8707_s9 + $0x5] ss:$8 sm:$0x3]  ;;  %s11819_s7 = smov 1   ;;  %s11803_s10 = smov 113  }
  0x87   : > { %1733 = vrot.lane.b32.xlu2 %v1731_v5, %s11801_s0  ;;  %1474 = vst [vmem:[#allocation3 + $0x20] sm:$0xff] %v8674_v6  ;;  %v1663_v11 = vperm.slane %v8109_v10, 0  ;;  %v8107_v12 = vld [vmem:[%s8707_s9 + $0x2] ss:$8 sm:$0x3]  ;;  %v1664_v13 = vperm.slane %v8109_v10, 1 }
  0x88   : > { %1477 = vst [vmem:[#allocation3 + $0x38] sm:$0xff] %v8674_v6  ;;  %v1587_v14 = vperm.slane %v8107_v12, 0  ;;  %v8108_v15 = vld [vmem:[%s8707_s9 + $0x3] ss:$8 sm:$0x3]  ;;  %v1588_v16 = vperm.slane %v8107_v12, 1 }
  0x89   : > { %1480 = vst [vmem:[#allocation3 + $0x50] sm:$0xff] %v8674_v6  ;;  %v1623_v17 = vperm.slane %v8108_v15, 0  ;;  %v1624_v18 = vperm.slane %v8108_v15, 1  ;;  %s11805_s11 = smov 127   ;;  %s11897_s5 = sld [smem:[#allocation9_spill]]  ;;  %vm11831_vm2 = vcmask 138240  }
  0x8a   : > { %1483 = vst [vmem:[#allocation3 + $0x68] sm:$0xff] %v8674_v6  ;;  %v1514_v19 = vld [vmem:[%s8707_s9] ss:$8 sm:$0x3]  ;;  %s11797_s15 = smov 111   ;;  %s11799_s16 = smov 112  }
  0x8b   : > { %1486 = vst [vmem:[#allocation3 + $0x80] sm:$0xff] %v8674_v6  ;;  %v1516_v20 = vperm.slane %v1514_v19, 0  ;;  %v1517_v21 = vperm.slane %v1514_v19, 1  ;;  %v8106_v22 = vld [vmem:[%s8707_s9 + $0x1] ss:$8 sm:$0x3] }
  0x8c   : > { %1489 = vst [vmem:[#allocation3 + $0x98] sm:$0xff] %v8674_v6  ;;  %v1552_v23 = vperm.slane %v8106_v22, 0  ;;  %v1553_v24 = vperm.slane %v8106_v22, 1  ;;  %p1442_p0 = scmp.lt.s32.totalorder %s8951_s2, 1  ;;  %vm11846_vm3 = vcmask 121856   ;;  %vm1646_vm4 = vcmask 7168  }
  0x8d   : > { %1492 = vst [vmem:[#allocation3 + $0xb0] sm:$0xff] %v8674_v6  ;;  %vm1593_vm5 = vcmask 924672   ;;  %vm1629_vm6 = vcmask 1039360   ;;  %vm11829_vm7 = vcmask 908288   ;;  %vm11830_vm8 = vcmask 916480   ;;  %s11898_s14 = sld [smem:[#allocation15_spill]] }
  0x8e   : > { %1769 = vrot.lane.b32.xlu0 %v1766_v7, %s11793_s26  ;;  %1701 = vrot.lane.b32.xlu1 %v1698_v8, %s11795_s1  ;;  %1495 = vst [vmem:[#allocation4 + $0x8] sm:$0xff] %v8674_v6  ;;  %s12014_s2 = smov (!%p1442_p0, %s8951_s2), 1  ;;  %vm1832_vm9 = vcmask 1043456   ;;  %s11899_s8 = sld [smem:[#allocation14_spill]]  ;;  %vm1828_vm10 = vcmask 588800  }
  0x8f   : > { %1735 = vrot.lane.b32.xlu2 %v1732_v9, %s11801_s0  ;;  %1499 = vst [vmem:[#allocation4 + $0x20] sm:$0xff] %v8674_v6  ;;  %s8379_s18 = sshll.u32 %s12014_s2, 4  ;;  %s11900_s3 = sld [smem:[#allocation33_spill]] }
  0x90   : > { %1502 = vst [vmem:[#allocation4 + $0x38] sm:$0xff] %v8674_v6  ;;  %s1446_s22 = scalar_lea.vmem %s11897_s5, %s8379_s18  ;;  %s11809_s23 = smov 7  }
  0x91   : > { %1505 = vst [vmem:[#allocation4 + $0x50] sm:$0xff] %v8674_v6  ;;  %v9010_v25 = vld [vmem:[%s1446_s22] sm:$0xff]  ;;  %v9015_v30 = vld [vmem:[%s1446_s22 + $0x8] sm:$0xff]  ;;  %s11813_s18 = smov 8   ;;  %s11901_s22 = sld [smem:[#allocation34_spill]] }
  0x92   : > { %s11914_s5 = sld [smem:[#allocation10_spill]] }
  0x96   : > { %1665 = vrot.lane.b32.xlu0 %v1663_v11, %s11819_s7  ;;  %1667 = vrot.lane.b32.xlu1 %v1664_v13, %s11819_s7 }
  0x97   : > { %1589 = vrot.lane.b32.xlu2 %v1587_v14, %s11803_s10 }
  0x9e   : > { %1591 = vrot.lane.b32.xlu0 %v1588_v16, %s11803_s10  ;;  %1625 = vrot.lane.b32.xlu1 %v1623_v17, %s11805_s11 }
  0x9f   : > { %1627 = vrot.lane.b32.xlu2 %v1624_v18, %s11805_s11 }
  0xa6   : > { %1518 = vrot.lane.b32.xlu0 %v1516_v20, %s11797_s15  ;;  %1520 = vrot.lane.b32.xlu1 %v1517_v21, %s11797_s15 }
  0xa7   : > { %1554 = vrot.lane.b32.xlu2 %v1552_v23, %s11799_s16 }
  0xae   : > { %1556 = vrot.lane.b32.xlu0 %v1553_v24, %s11799_s16 }
  0xe1   : > { %v1734_v34 = vpop.permute.xlu2 %1733 }
  0xe2   : > { %v1741_v37 = vmul.f32 %v1734_v34, %v9010_v25 }
  0xe9   : > { %v1736_v41 = vpop.permute.xlu2 %1735 }
  0xea   : > { %v1737_v43 = vsel %vm1496_vm1, %v1734_v34, %v1736_v41  ;;  %v1743_v44 = vmul.f32 0.0, %v1736_v41 }
  0xeb   : > { %v1742_v46 = vmul.f32 %v1737_v43, %v9015_v30 }
  0xf1   : > { %v1590_v48 = vpop.permute.xlu2 %1589 }
  0xf2   : > { %v1598_v51 = vmul.f32 0.0, %v1590_v48 }
  0xf8   : > { %v1768_v26 = vpop.permute.xlu0 %1767  ;;  %v1700_v28 = vpop.permute.xlu1 %1699 }
  0xf9   : > { %v1775_v27 = vmul.f32 %v1768_v26, %v9010_v25  ;;  %v1707_v29 = vmul.f32 %v1700_v28, %v9010_v25  ;;  %v1628_v59 = vpop.permute.xlu2 %1627 }
  0xfa   : > { %v1636_v62 = vmul.f32 %v1628_v59, %v9015_v30 }
  0xfb   : > { %1781 = vrot.lane.b32.xlu1 %v1775_v27, %s11797_s15 }
 0x100   : > { %v1770_v31 = vpop.permute.xlu0 %1769  ;;  %v1702_v36 = vpop.permute.xlu1 %1701 }
 0x101   : > { %v1771_v32 = vsel %vm11831_vm2, %v1768_v26, %v1770_v31  ;;  %v1777_v33 = vmul.f32 0.0, %v1770_v31  ;;  %v1703_v38 = vsel %vm11846_vm3, %v1700_v28, %v1702_v36  ;;  %v1709_v39 = vmul.f32 0.0, %v1702_v36  ;;  %v1555_v2 = vpop.permute.xlu2 %1554 }
 0x102   : > { %v1776_v35 = vmul.f32 %v1771_v32, %v9015_v30  ;;  %v1708_v40 = vmul.f32 %v1703_v38, %v9015_v30  ;;  %v1563_v4 = vmul.f32 0.0, %v1555_v2 }
 0x103   : > { %1785 = vrot.lane.b32.xlu0 %v1777_v33, %s11797_s15  ;;  %1713 = vrot.lane.b32.xlu1 %v1707_v29, %s11803_s10 }
 0x104   : > { %1783 = vrot.lane.b32.xlu2 %v1776_v35, %s11797_s15 }
 0x108   : > { %v1666_v42 = vpop.permute.xlu0 %1665  ;;  %v1668_v47 = vpop.permute.xlu1 %1667 }
 0x109   : > { %v1673_v45 = vmul.f32 %v1666_v42, %v9010_v25  ;;  %v1669_v49 = vsel %vm1646_vm4, %v1666_v42, %v1668_v47  ;;  %v1675_v50 = vmul.f32 0.0, %v1668_v47  ;;  %v8681_v47 = vmov 0  }
 0x10a   : > { %v1674_v52 = vmul.f32 %v1669_v49, %v9015_v30  ;;  %8513 = vset.pattern.permute.xlu1 %v8681_v47  ;;  %8514 = vset.pattern.permute.xlu2 %v8681_v47 }
 0x10b   : > { %1717 = vrot.lane.b32.xlu0 %v1709_v39, %s11803_s10  ;;  %1747 = vrot.lane.b32.xlu1 %v1741_v37, %s11799_s16 }
 0x10c   : > { %1715 = vrot.lane.b32.xlu2 %v1708_v40, %s11803_s10  ;;  %8515 = vset.pattern.permute.xlu0 %v8681_v47 }
 0x110   : > { %v1592_v53 = vpop.permute.xlu0 %1591  ;;  %v1626_v54 = vpop.permute.xlu1 %1625 }
 0x111   : > { %v1594_v55 = vsel %vm1593_vm5, %v1590_v48, %v1592_v53  ;;  %v1634_v56 = vmul.f32 0.0, %v1626_v54  ;;  %v1600_v57 = vmul.f32 %v1592_v53, %v9015_v30  ;;  %v1630_v61 = vsel %vm1629_vm6, %v1626_v54, %v1628_v59 }
 0x112   : > { %v1599_v58 = vmul.f32 %v1594_v55, %v9010_v25  ;;  %v1635_v0 = vmul.f32 %v1630_v61, %v9010_v25  ;;  %v1793_v61 = vld [vmem:[%s11899_s8] sm:$0xf]  ;;  %s11916_s8 = smov 1  }
 0x113   : > { %1751 = vrot.lane.b32.xlu0 %v1743_v44, %s11799_s16  ;;  %1679 = vrot.lane.b32.xlu1 %v1673_v45, %s11805_s11  ;;  %v1822_v44 = vld [vmem:[%s11898_s14] sm:$0xff]  ;;  %s11925_s14 = smov 3  }
 0x114   : > { %1749 = vrot.lane.b32.xlu2 %v1742_v46, %s11799_s16 }
 0x118   : > { %v1519_v60 = vpop.permute.xlu0 %1518  ;;  %v1521_v1 = vpop.permute.xlu1 %1520 }
 0x119   : > { %v1527_v63 = vmul.f32 0.0, %v1519_v60  ;;  %v1523_v3 = vsel %vm11829_vm7, %v1519_v60, %v1521_v1  ;;  %v1529_v5 = vmul.f32 %v1521_v1, %v9015_v30 }
 0x11a   : > { %v1528_v6 = vmul.f32 %v1523_v3, %v9010_v25 }
 0x11b   : > { %1683 = vrot.lane.b32.xlu0 %v1675_v50, %s11805_s11  ;;  %1604 = vrot.lane.b32.xlu1 %v1598_v51, %s11795_s1 }
 0x11c   : > { %1681 = vrot.lane.b32.xlu2 %v1674_v52, %s11805_s11 }
 0x120   : > { %v1557_v7 = vpop.permute.xlu0 %1556 }
 0x121   : > { %v1559_v8 = vsel %vm11830_vm8, %v1555_v2, %v1557_v7  ;;  %v1565_v9 = vmul.f32 %v1557_v7, %v9015_v30 }
 0x122   : > { %v1564_v10 = vmul.f32 %v1559_v8, %v9010_v25 }
 0x123   : > { %1608 = vrot.lane.b32.xlu0 %v1600_v57, %s11795_s1  ;;  %1640 = vrot.lane.b32.xlu1 %v1634_v56, %s11819_s7 }
 0x124   : > { %1606 = vrot.lane.b32.xlu2 %v1599_v58, %s11795_s1 }
 0x12b   : > { %1644 = vrot.lane.b32.xlu0 %v1636_v62, %s11819_s7  ;;  %1533 = vrot.lane.b32.xlu1 %v1527_v63, %s11793_s26 }
 0x12c   : > { %1642 = vrot.lane.b32.xlu2 %v1635_v0, %s11819_s7 }
 0x133   : > { %1537 = vrot.lane.b32.xlu0 %v1529_v5, %s11793_s26  ;;  %1569 = vrot.lane.b32.xlu1 %v1563_v4, %s11801_s0 }
 0x134   : > { %1535 = vrot.lane.b32.xlu2 %v1528_v6, %s11793_s26 }
 0x13b   : > { %1573 = vrot.lane.b32.xlu0 %v1565_v9, %s11801_s0  ;;  %1825 = vperm.xlu1 %8513, %v1822_v44  }
 0x13c   : > { %1571 = vrot.lane.b32.xlu2 %v1564_v10, %s11801_s0 }
 0x15e   : > { %v1784_v11 = vpop.permute.xlu2 %1783 }
 0x166   : > { %v1716_v12 = vpop.permute.xlu2 %1715 }
 0x16d   : > { %v1782_v13 = vpop.permute.xlu1 %1781 }
 0x16e   : > { %v1787_v14 = vsel %vm11829_vm7, %v1782_v13, %v1784_v11  ;;  %v1750_v17 = vpop.permute.xlu2 %1749 }
 0x16f   : > { %v1820_v15 = vpack.c.bf16 %v1787_v14, %v1787_v14 }
 0x171   : > { %v1834_v16 = vsel %vm1832_vm9, %v1820_v15, 0 }
 0x172   : > { %1842 = vmatpush.bf16.msra.mxu0 %v1834_v16 }
 0x175   : > { %v1786_v18 = vpop.permute.xlu0 %1785  ;;  %v1714_v19 = vpop.permute.xlu1 %1713 }
 0x176   : > { %v1788_v20 = vsel %vm11829_vm7, %v1784_v11, %v1786_v18  ;;  %v1682_v23 = vpop.permute.xlu2 %1681  ;;  %v1719_v27 = vsel %vm1593_vm5, %v1714_v19, %v1716_v12  ;;  %v8121_v19 = vld [vmem:[%s8707_s9 + $0x10] ss:$8 sm:$0x3] }
 0x177   : > { %v1821_v21 = vpack.c.bf16 %v1788_v20, %v1788_v20  ;;  %v2198_v20 = vperm.slane %v8121_v19, 1 }
 0x179   : > { %v1837_v22 = vsel %vm1832_vm9, %v1821_v21, 0 }
 0x17a   : > { %1855 = vmatpush.bf16.msra.mxu1 %v1837_v22  ;;  %v8119_v22 = vld [vmem:[%s8707_s9 + $0x6] ss:$8 sm:$0x3] }
 0x17d   : > { %v1718_v24 = vpop.permute.xlu0 %1717  ;;  %v1748_v26 = vpop.permute.xlu1 %1747 }
 0x17e   : > { %v1753_v28 = vsel %vm11830_vm8, %v1748_v26, %v1750_v17  ;;  %v1720_v33 = vsel %vm1593_vm5, %v1716_v12, %v1718_v24  ;;  %v1607_v34 = vpop.permute.xlu2 %1606 }
 0x17f   : > { %v1818_v29 = vpack.c.bf16 %v1753_v28, %v1719_v27 }
 0x181   : > { %1843 = vmatpush.bf16.msra.mxu0 %v1818_v29 }
 0x185   : > { %v1752_v31 = vpop.permute.xlu0 %1751  ;;  %v1680_v32 = vpop.permute.xlu1 %1679 }
 0x186   : > { %v1754_v35 = vsel %vm11830_vm8, %v1750_v17, %v1752_v31  ;;  %v1685_v36 = vsel %vm1629_vm6, %v1680_v32, %v1682_v23  ;;  %v1643_v43 = vpop.permute.xlu2 %1642  ;;  %v1888_v32 = vld [vmem:[%s11900_s3] sm:$0xff]  ;;  %s11912_s3 = sld [smem:[#allocation11_spill]] }
 0x187   : > { %v1816_v37 = vpack.c.bf16 %v1685_v36, %v9010_v25  ;;  %v1819_v38 = vpack.c.bf16 %v1754_v35, %v1720_v33  ;;  %v1890_v36 = vld [vmem:[%s8857_s29] sm:$0xff] }
 0x189   : > { %1844 = vmatpush.bf16.msra.mxu0 %v1816_v37  ;;  %1856 = vmatpush.bf16.msra.mxu1 %v1819_v38 }
 0x18d   : > { %v1684_v39 = vpop.permute.xlu0 %1683  ;;  %v1605_v40 = vpop.permute.xlu1 %1604 }
 0x18e   : > { %v1686_v41 = vsel %vm1629_vm6, %v1682_v23, %v1684_v39  ;;  %v1611_v48 = vsel %vm11846_vm3, %v1605_v40, %v1607_v34  ;;  %v1536_v50 = vpop.permute.xlu2 %1535  ;;  %v2131_v23 = vperm.slane %v8119_v22, 0 }
 0x18f   : > { %v1817_v42 = vpack.c.bf16 %v1686_v41, %v9015_v30 }
 0x191   : > { %1857 = vmatpush.bf16.msra.mxu1 %v1817_v42 }
 0x195   : > { %v1609_v45 = vpop.permute.xlu0 %1608  ;;  %v1641_v46 = vpop.permute.xlu1 %1640 }
 0x196   : > { %v1647_v25 = vsel %vm1646_vm4, %v1641_v46, %v1643_v43  ;;  %v1612_v52 = vsel %vm11846_vm3, %v1607_v34, %v1609_v45  ;;  %v1572_v55 = vpop.permute.xlu2 %1571 }
 0x197   : > { %v1814_v49 = vpack.c.bf16 %v1647_v25, %v1611_v48 }
 0x199   : > { %1845 = vmatpush.bf16.msra.mxu0 %v1814_v49 }
 0x19d   : > { %v1645_v51 = vpop.permute.xlu0 %1644  ;;  %v1534_v30 = vpop.permute.xlu1 %1533 }
 0x19e   : > { %v1648_v53 = vsel %vm1646_vm4, %v1643_v43, %v1645_v51  ;;  %v1540_v58 = vsel %vm11831_vm2, %v1534_v30, %v1536_v50  ;;  %v2197_v51 = vperm.slane %v8121_v19, 0  ;;  %v2132_v30 = vperm.slane %v8119_v22, 1 }
 0x19f   : > { %v1815_v54 = vpack.c.bf16 %v1648_v53, %v1612_v52  ;;  %v8120_v52 = vld [vmem:[%s8707_s9 + $0x7] ss:$8 sm:$0x3] }
 0x1a0   : > { %v2165_v53 = vperm.slane %v8120_v52, 1 }
 0x1a1   : > { %1858 = vmatpush.bf16.msra.mxu1 %v1815_v54  ;;  %v8116_v54 = vld [vmem:[%s8707_s9 + $0x2] ss:$8 sm:$0x3] }
 0x1a5   : > { %v1538_v56 = vpop.permute.xlu0 %1537  ;;  %v1570_v57 = vpop.permute.xlu1 %1569 }
 0x1a6   : > { %v1575_v59 = vsel %vm1496_vm1, %v1570_v57, %v1572_v55  ;;  %v1541_v63 = vsel %vm11831_vm2, %v1536_v50, %v1538_v56  ;;  %v8117_v56 = vld [vmem:[%s8707_s9 + $0x3] ss:$8 sm:$0x3] }
 0x1a7   : > { %v1812_v60 = vpack.c.bf16 %v1575_v59, %v1540_v58  ;;  %v2062_v57 = vperm.slane %v8117_v56, 1  ;;  %v8115_v58 = vld [vmem:[%s8707_s9 + $0x1] ss:$8 sm:$0x3] }
 0x1a8   : > { %v1995_v59 = vperm.slane %v8115_v58, 0 }
 0x1a9   : > { %1846 = vmatpush.bf16.msra.mxu0 %v1812_v60 }
 0x1ac   : > { %8113 = vmatmul.msk.bf16.vlgmr.msra.gmra.mxu0 %vm1828_vm10, %v1793_v61 }
 0x1ad   : > { %v1574_v62 = vpop.permute.xlu0 %1573  ;;  %v1826_v3 = vpop.permute.xlu1 %1825 }
 0x1ae   : > { %v1576_v0 = vsel %vm1496_vm1, %v1572_v55, %v1574_v62  ;;  %v2028_v55 = vperm.slane %v8116_v54, 0  ;;  %v2164_v62 = vperm.slane %v8120_v52, 0 }
 0x1af   : > { %v1813_v1 = vpack.c.bf16 %v1576_v0, %v1541_v63  ;;  %v8118_v63 = vld [vmem:[%s8707_s9 + $0x5] ss:$8 sm:$0x3] }
 0x1b0   : > { %v2098_v0 = vperm.slane %v8118_v63, 0 }
 0x1b1   : > { %1859 = vmatpush.bf16.msra.mxu1 %v1813_v1  ;;  %v2099_v1 = vperm.slane %v8118_v63, 1 }
 0x1b4   : > { %8114 = vmatmul.msk.bf16.vlgmr.msra.gmra.mxu1 %vm1828_vm10, %v1793_v61 }
 0x229   : > { %v1848_v2 = vpop.f32.mrf.mxu0 }
 0x22a   : > { %v1849_v4 = vadd.f32 %v1848_v2, %v1826_v3  ;;  %v2029_v2 = vperm.slane %v8116_v54, 1 }
 0x22c   : > { %v1868_v8 = vmul.f32 %v1849_v4, %v1849_v4 }
 0x231   : > { %v1850_v5 = vpop.f32.mrf.mxu0  ;;  %v1861_v6 = vpop.f32.mrf.mxu1 }
 0x232   : > { %v1862_v7 = vadd.f32 %v1861_v6, %v1826_v3  ;;  %v2061_v3 = vperm.slane %v8117_v56, 0 }
 0x234   : > { %v1865_v9 = vadd.f32 %v1862_v7, %v1849_v4  ;;  %v1869_v10 = vmul.f32 %v1862_v7, %v1862_v7 }
 0x236   : > { %1866 = vadd.xlane.f32.xlu2 %v1865_v9  ;;  %v1870_v11 = vadd.f32 %v1869_v10, %v1868_v8 }
 0x238   : > { %1871 = vadd.xlane.f32.xlu0 %v1870_v11 }
 0x239   : > { %v1863_v12 = vpop.f32.mrf.mxu1 }
 0x24c   : > { %2166 = vrot.lane.b32.xlu0 %v2164_v62, %s11801_s0 }
 0x24e   : > { %2201 = vrot.lane.b32.xlu2 %v2198_v20, %s11793_s26 }
 0x254   : > { %2102 = vrot.lane.b32.xlu0 %v2099_v1, %s11819_s7 }
 0x256   : > { %2133 = vrot.lane.b32.xlu2 %v2131_v23, %s11795_s1 }
 0x25c   : > { %2063 = vrot.lane.b32.xlu0 %v2061_v3, %s11805_s11 }
 0x2a9   : > { %v1867_v13 = vpop.xlane.xlu2 %1866 }
 0x2aa   : > { %v1873_v14 = vmul.f32 0.00390625, %v1867_v13 }
 0x2ab   : > { %v1872_v15 = vpop.xlane.xlu0 %1871 }
 0x2ac   : > { %v1875_v16 = vmul.f32 %v1873_v14, %v1873_v14  ;;  %v1874_v17 = vmul.f32 0.00390625, %v1872_v15 }
 0x2ae   : > { %v1876_v18 = vsub.f32 %v1874_v17, %v1875_v16 }
 0x2b0   : > { %v1877_v21 = vadd.f32 1e-05, %v1876_v18  ;;  %v1936_v18 = vld [vmem:[%s8862_s17] sm:$0xff] }
 0x2b1   : > { %v9112_v60 = vpop.permute.xlu2 %2201 }
 0x2b2   : > { %8548 = vrsqrt.f32 %v1877_v21  ;;  %vm1884_vm12 = vweird.f32 %v1877_v21  ;;  %v2209_v61 = vmul.f32 0.0, %v9112_v60 }
 0x2b8   : > { %v8549_v24 = vpop.eup %8548 }
 0x2b9   : > { %v1879_v26 = vmul.f32 %v8549_v24, %v1877_v21  ;;  %vm1885_vm11 = vweird.f32 %v8549_v24  ;;  %v1938_v21 = vld [vmem:[%s8867_s25] sm:$0xff] }
 0x2ba   : > { %vm1886_vm13 = vmor %vm1884_vm12, %vm1885_vm11 }
 0x2bb   : > { %v1880_v27 = vmul.f32 %v8549_v24, %v1879_v26 }
 0x2bd   : > { %v1881_v28 = vmul.f32 0.5, %v1880_v27 }
 0x2bf   : > { %v1882_v29 = vsub.f32 1.5, %v1881_v28 }
 0x2c1   : > { %v1883_v31 = vmul.f32 %v8549_v24, %v1882_v29  ;;  %v1996_v29 = vperm.slane %v8115_v58, 1 }
 0x2c3   : > { %v1887_v33 = vsel %vm1886_vm13, %v8549_v24, %v1883_v31  ;;  %v1960_v24 = vld [vmem:[%s8707_s9] ss:$8 sm:$0x3] }
 0x2c4   : > { %v1889_v34 = vmul.f32 %v1888_v32, %v1887_v33  ;;  %v1962_v26 = vperm.slane %v1960_v24, 0  ;;  %v1963_v27 = vperm.slane %v1960_v24, 1  ;;  %v8133_v24 = vld [vmem:[%s8707_s9 + $0x7] ss:$8 sm:$0x3] }
 0x2c6   : > { %1895 = vperm.xlu1 %8513, %v1889_v34   ;;  %v1891_v35 = vmul.f32 %v1889_v34, %v1873_v14 }
 0x2c8   : > { %v1892_v37 = vsub.f32 %v1890_v36, %v1891_v35  ;;  %v2167_v35 = vpop.permute.xlu0 %2166 }
 0x2ce   : > { %1902 = vperm.xlu1 %8513, %v1892_v37  }
 0x2d0   : > { %v2103_v36 = vpop.permute.xlu0 %2102 }
 0x2d1   : > { %v2110_v37 = vmul.f32 0.0, %v2103_v36 }
 0x338   : > { %v1896_v38 = vpop.permute.xlu1 %1895 }
 0x339   : > { %v1898_v39 = vmul.f32 %v1896_v38, %v1849_v4  ;;  %v1899_v40 = vmul.f32 %v1896_v38, %v1862_v7  ;;  %v9121_v4 = vpop.permute.xlu2 %2133 }
 0x340   : > { %v1903_v41 = vpop.permute.xlu1 %1902 }
 0x341   : > { %v1905_v42 = vadd.f32 %v1903_v41, %v1898_v39  ;;  %v1906_v43 = vadd.f32 %v1903_v41, %v1899_v40  ;;  %v2064_v40 = vpop.permute.xlu0 %2063 }
 0x343   : > { %v1909_v44 = vmul.f32 0.05, %v1905_v42  ;;  %v1910_v45 = vmul.f32 0.05, %v1906_v43  ;;  %vm1907_vm14 = vcmp.gt.f32.partialorder %v1905_v42, 0.0  ;;  %vm1908_vm15 = vcmp.gt.f32.partialorder %v1906_v43, 0.0 }
 0x345   : > { %v9092_v46 = vsel %vm1907_vm14, %v1905_v42, %v1909_v44  ;;  %v9094_v47 = vsel %vm1908_vm15, %v1906_v43, %v1910_v45 }
 0x346   : > { %v1913_v48 = vadd.f32 %v9094_v47, %v9092_v46  ;;  %v1916_v25 = vmul.f32 %v9092_v46, %v9092_v46  ;;  %v1917_v49 = vmul.f32 %v9094_v47, %v9094_v47 }
 0x348   : > { %1914 = vadd.xlane.f32.xlu1 %v1913_v48  ;;  %v1918_v50 = vadd.f32 %v1917_v49, %v1916_v25 }
 0x34a   : > { %1919 = vadd.xlane.f32.xlu2 %v1918_v50 }
 0x361   : > { %2199 = vrot.lane.b32.xlu1 %v2197_v51, %s11793_s26 }
 0x362   : > { %2135 = vrot.lane.b32.xlu2 %v2132_v30, %s11795_s1 }
 0x369   : > { %2168 = vrot.lane.b32.xlu1 %v2165_v53, %s11801_s0 }
 0x36a   : > { %2100 = vrot.lane.b32.xlu2 %v2098_v0, %s11819_s7 }
 0x371   : > { %2030 = vrot.lane.b32.xlu1 %v2028_v55, %s11803_s10 }
 0x372   : > { %2032 = vrot.lane.b32.xlu2 %v2029_v2, %s11803_s10 }
 0x379   : > { %2065 = vrot.lane.b32.xlu1 %v2062_v57, %s11805_s11 }
 0x381   : > { %1997 = vrot.lane.b32.xlu1 %v1995_v59, %s11799_s16 }
 0x389   : > { %2217 = vrot.lane.b32.xlu1 %v2209_v61, %s11797_s15 }
 0x391   : > { %2118 = vrot.lane.b32.xlu1 %v2110_v37, %s11805_s11 }
 0x3bb   : > { %v1915_v5 = vpop.xlane.xlu1 %1914 }
 0x3bc   : > { %v1921_v6 = vmul.f32 0.00390625, %v1915_v5 }
 0x3bd   : > { %v1920_v7 = vpop.xlane.xlu2 %1919 }
 0x3be   : > { %v1923_v8 = vmul.f32 %v1921_v6, %v1921_v6  ;;  %v1922_v9 = vmul.f32 0.00390625, %v1920_v7 }
 0x3c0   : > { %v1924_v10 = vsub.f32 %v1922_v9, %v1923_v8 }
 0x3c2   : > { %v1925_v11 = vadd.f32 1e-05, %v1924_v10 }
 0x3c4   : > { %8550 = vrsqrt.f32 %v1925_v11  ;;  %vm1932_vm12 = vweird.f32 %v1925_v11 }
 0x3c5   : > { %v2136_v31 = vpop.permute.xlu2 %2135 }
 0x3c6   : > { %v2143_v32 = vmul.f32 0.0, %v2136_v31  ;;  %v2137_v45 = vsel %vm11846_vm3, %v9121_v4, %v2136_v31 }
 0x3ca   : > { %v8551_v12 = vpop.eup %8550 }
 0x3cb   : > { %v1927_v13 = vmul.f32 %v8551_v12, %v1925_v11  ;;  %vm1933_vm11 = vweird.f32 %v8551_v12 }
 0x3cc   : > { %vm1934_vm13 = vmor %vm1932_vm12, %vm1933_vm11 }
 0x3cd   : > { %v1928_v14 = vmul.f32 %v8551_v12, %v1927_v13  ;;  %v2101_v38 = vpop.permute.xlu2 %2100 }
 0x3ce   : > { %v2104_v53 = vsel %vm1646_vm4, %v2101_v38, %v2103_v36 }
 0x3cf   : > { %v1929_v15 = vmul.f32 0.5, %v1928_v14  ;;  %v2071_v14 = vmul.f32 0.0, %v2064_v40 }
 0x3d1   : > { %v1930_v16 = vsub.f32 1.5, %v1929_v15 }
 0x3d3   : > { %v1931_v17 = vmul.f32 %v8551_v12, %v1930_v16  ;;  %v2200_v28 = vpop.permute.xlu1 %2199  ;;  %v2255_v16 = vld [vmem:[%s8757_s24] sm:$0xff] }
 0x3d4   : > { %v2203_v48 = vsel %vm11831_vm2, %v2200_v28, %v9112_v60 }
 0x3d5   : > { %v1935_v19 = vsel %vm1934_vm13, %v8551_v12, %v1931_v17  ;;  %v2033_v39 = vpop.permute.xlu2 %2032 }
 0x3d6   : > { %v1937_v20 = vmul.f32 %v1936_v18, %v1935_v19 }
 0x3d8   : > { %1943 = vperm.xlu2 %8514, %v1937_v20   ;;  %v1939_v22 = vmul.f32 %v1937_v20, %v1921_v6 }
 0x3da   : > { %v1940_v23 = vsub.f32 %v1938_v21, %v1939_v22  ;;  %v8132_v22 = vld [vmem:[%s8707_s9 + $0x6] ss:$8 sm:$0x3] }
 0x3db   : > { %v2169_v33 = vpop.permute.xlu1 %2168 }
 0x3dc   : > { %1950 = vperm.xlu0 %8515, %v1940_v23   ;;  %v2176_v34 = vmul.f32 0.0, %v2169_v33  ;;  %v2170_v25 = vsel %vm1496_vm1, %v2167_v35, %v2169_v33  ;;  %v2611_v23 = vperm.slane %v8132_v22, 0 }
 0x3e0   : > { %1964 = vrot.lane.b32.xlu2 %v1962_v26, %s11797_s15  ;;  %v2666_v26 = vperm.slane %v8133_v24, 1 }
 0x3e3   : > { %v2031_v30 = vpop.permute.xlu1 %2030 }
 0x3e4   : > { %1966 = vrot.lane.b32.xlu0 %v1963_v27, %s11797_s15  ;;  %v2034_v60 = vsel %vm1593_vm5, %v2031_v30, %v2033_v39  ;;  %v2038_v13 = vmul.f32 0.0, %v2031_v30  ;;  %v8130_v30 = vld [vmem:[%s8707_s9 + $0x3] ss:$8 sm:$0x3] }
 0x3e8   : > { %1999 = vrot.lane.b32.xlu2 %v1996_v29, %s11799_s16 }
 0x3eb   : > { %v2066_v59 = vpop.permute.xlu1 %2065 }
 0x3ec   : > { %2151 = vrot.lane.b32.xlu0 %v2143_v32, %s11803_s10  ;;  %v2067_v61 = vsel %vm1629_vm6, %v2064_v40, %v2066_v59 }
 0x3f0   : > { %2184 = vrot.lane.b32.xlu2 %v2176_v34, %s11799_s16 }
 0x3f3   : > { %v1998_v6 = vpop.permute.xlu1 %1997 }
 0x3f4   : > { %v2005_v15 = vmul.f32 0.0, %v1998_v6 }
 0x3fb   : > { %v2218_v18 = vpop.permute.xlu1 %2217 }
 0x403   : > { %v2119_v21 = vpop.permute.xlu1 %2118 }
 0x432   : > { %v1944_v41 = vpop.permute.xlu2 %1943 }
 0x433   : > { %v1947_v42 = vmul.f32 %v1944_v41, %v9094_v47  ;;  %v1946_v47 = vmul.f32 %v1944_v41, %v9092_v46 }
 0x43a   : > { %v1965_v58 = vpop.permute.xlu2 %1964 }
 0x43b   : > { %v1972_v11 = vmul.f32 0.0, %v1965_v58 }
 0x442   : > { %v2000_v1 = vpop.permute.xlu2 %1999 }
 0x443   : > { %v2001_v7 = vsel %vm11830_vm8, %v1998_v6, %v2000_v1 }
 0x44a   : > { %v2185_v17 = vpop.permute.xlu2 %2184 }
 0x44e   : > { %v1951_v43 = vpop.permute.xlu0 %1950 }
 0x44f   : > { %v9134_v44 = vadd.f32 %v1951_v43, %v1947_v42  ;;  %v9148_v52 = vadd.f32 %v1951_v43, %v1946_v47 }
 0x451   : > { %v2208_v49 = vmul.f32 %v2203_v48, %v9134_v44  ;;  %v2175_v50 = vmul.f32 %v2170_v25, %v9134_v44  ;;  %v2142_v51 = vmul.f32 %v2137_v45, %v9134_v44  ;;  %v2109_v54 = vmul.f32 %v2104_v53, %v9134_v44 }
 0x452   : > { %v2040_v55 = vmul.f32 %v2033_v39, %v9134_v44  ;;  %v2207_v56 = vmul.f32 %v2200_v28, %v9148_v52  ;;  %v2039_v62 = vmul.f32 %v2034_v60, %v9148_v52  ;;  %v2072_v0 = vmul.f32 %v2067_v61, %v9148_v52 }
 0x453   : > { %2215 = vrot.lane.b32.xlu0 %v2208_v49, %s11797_s15  ;;  %2182 = vrot.lane.b32.xlu1 %v2175_v50, %s11799_s16  ;;  %v2007_v2 = vmul.f32 %v2000_v1, %v9134_v44  ;;  %v2073_v3 = vmul.f32 %v2066_v59, %v9134_v44  ;;  %v2108_v8 = vmul.f32 %v2101_v38, %v9148_v52  ;;  %v8131_v38 = vld [vmem:[%s8707_s9 + $0x5] ss:$8 sm:$0x3]  ;;  %v8129_v50 = vld [vmem:[%s8707_s9 + $0x2] ss:$8 sm:$0x3] }
 0x454   : > { %2149 = vrot.lane.b32.xlu2 %v2142_v51, %s11803_s10  ;;  %v2006_v9 = vmul.f32 %v2001_v7, %v9148_v52  ;;  %v2141_v10 = vmul.f32 %v9121_v4, %v9148_v52  ;;  %v2174_v12 = vmul.f32 %v2167_v35, %v9148_v52  ;;  %v2256_v4 = vld [vmem:[%s8757_s24 + $0x8] sm:$0xff]  ;;  %v2558_v39 = vperm.slane %v8131_v38, 1 }
 0x455   : > { %v2557_v41 = vperm.slane %v8131_v38, 0  ;;  %v2665_v51 = vperm.slane %v8133_v24, 0  ;;  %v2441_v47 = vperm.slane %v8129_v50, 0  ;;  %v2496_v53 = vperm.slane %v8130_v30, 1 }
 0x456   : > { %v1967_v57 = vpop.permute.xlu0 %1966 }
 0x457   : > { %v1968_v46 = vsel %vm11829_vm7, %v1965_v58, %v1967_v57  ;;  %v1974_v5 = vmul.f32 %v1967_v57, %v9134_v44  ;;  %v2612_v57 = vperm.slane %v8132_v22, 1 }
 0x458   : > { %v1973_v63 = vmul.f32 %v1968_v46, %v9148_v52 }
 0x45b   : > { %2116 = vrot.lane.b32.xlu0 %v2109_v54, %s11805_s11  ;;  %2048 = vrot.lane.b32.xlu1 %v2040_v55, %s11795_s1 }
 0x45c   : > { %2213 = vrot.lane.b32.xlu2 %v2207_v56, %s11797_s15  ;;  %v8128_v56 = vld [vmem:[%s8707_s9 + $0x1] ss:$8 sm:$0x3] }
 0x45d   : > { %v2387_v46 = vperm.slane %v8128_v56, 0 }
 0x45e   : > { %v2152_v20 = vpop.permute.xlu0 %2151 }
 0x463   : > { %2046 = vrot.lane.b32.xlu0 %v2039_v62, %s11795_s1  ;;  %1980 = vrot.lane.b32.xlu1 %v1973_v63, %s11793_s26  ;;  %v2495_v63 = vperm.slane %v8130_v30, 0 }
 0x464   : > { %2079 = vrot.lane.b32.xlu2 %v2072_v0, %s11819_s7  ;;  %v8134_v0 = vld [vmem:[%s8707_s9 + $0x10] ss:$8 sm:$0x3] }
 0x46b   : > { %2081 = vrot.lane.b32.xlu0 %v2073_v3, %s11819_s7  ;;  %2015 = vrot.lane.b32.xlu1 %v2007_v2, %s11801_s0  ;;  %v2719_v2 = vperm.slane %v8134_v0, 0  ;;  %v2331_v3 = vld [vmem:[%s8707_s9] ss:$8 sm:$0x3] }
 0x46c   : > { %1982 = vrot.lane.b32.xlu2 %v1974_v5, %s11793_s26  ;;  %v2334_v5 = vperm.slane %v2331_v3, 1 }
 0x473   : > { %2114 = vrot.lane.b32.xlu1 %v2108_v8, %s11805_s11  ;;  %2013 = vrot.lane.b32.xlu0 %v2006_v9, %s11801_s0 }
 0x474   : > { %2147 = vrot.lane.b32.xlu2 %v2141_v10, %s11803_s10 }
 0x47b   : > { %1978 = vrot.lane.b32.xlu1 %v1972_v11, %s11793_s26  ;;  %2180 = vrot.lane.b32.xlu0 %v2174_v12, %s11799_s16  ;;  %v8381_v11 = vld [vmem:[%s8752_s19] sm:$0xff]  ;;  %v2442_v12 = vperm.slane %v8129_v50, 1 }
 0x47c   : > { %2044 = vrot.lane.b32.xlu2 %v2038_v13, %s11795_s1 }
 0x483   : > { %2264 = vperm.xlu1 %8513, %v2256_v4   ;;  %2077 = vrot.lane.b32.xlu0 %v2071_v14, %s11819_s7 }
 0x484   : > { %2011 = vrot.lane.b32.xlu2 %v2005_v15, %s11801_s0 }
 0x48b   : > { %2259 = vperm.xlu0 %8515, %v2255_v16   ;;  %2613 = vrot.lane.b32.xlu1 %v2611_v23, %s11795_s1 }
 0x48c   : > { %2667 = vrot.lane.b32.xlu2 %v2665_v51, %s11801_s0 }
 0x493   : > { %2669 = vrot.lane.b32.xlu0 %v2666_v26, %s11801_s0  ;;  %2561 = vrot.lane.b32.xlu1 %v2558_v39, %s11819_s7 }
 0x494   : > { %2615 = vrot.lane.b32.xlu2 %v2612_v57, %s11795_s1 }
 0x49b   : > { %2559 = vrot.lane.b32.xlu0 %v2557_v41, %s11819_s7  ;;  %2443 = vrot.lane.b32.xlu1 %v2441_v47, %s11803_s10 }
 0x49c   : > { %2497 = vrot.lane.b32.xlu2 %v2495_v63, %s11805_s11 }
 0x4a3   : > { %2499 = vrot.lane.b32.xlu0 %v2496_v53, %s11805_s11 }
 0x4a4   : > { %2445 = vrot.lane.b32.xlu2 %v2442_v12, %s11803_s10 }
 0x4ab   : > { %2389 = vrot.lane.b32.xlu0 %v2387_v46, %s11799_s16 }
 0x4ae   : > { %v9188_v19 = vpop.permute.xlu2 %2149 }
 0x4af   : > { %v2154_v40 = vsel %vm1593_vm5, %v9188_v19, %v2152_v20  ;;  %v2333_v20 = vperm.slane %v2331_v3, 0 }
 0x4b1   : > { %2335 = vrot.lane.b32.xlu2 %v2333_v20, %s11797_s15 }
 0x4b3   : > { %2337 = vrot.lane.b32.xlu0 %v2334_v5, %s11797_s15 }
 0x4b6   : > { %v2214_v27 = vpop.permute.xlu2 %2213 }
 0x4be   : > { %v2080_v49 = vpop.permute.xlu2 %2079 }
 0x4c5   : > { %v2216_v28 = vpop.permute.xlu0 %2215  ;;  %v9193_v29 = vpop.permute.xlu1 %2182 }
 0x4c6   : > { %v2219_v31 = vsel %vm11829_vm7, %v2214_v27, %v2216_v28  ;;  %v2220_v32 = vsel %vm11829_vm7, %v2216_v28, %v2218_v18  ;;  %v2187_v35 = vsel %vm11830_vm8, %v9193_v29, %v2185_v17  ;;  %v1983_v58 = vpop.permute.xlu2 %1982  ;;  %v2720_v28 = vperm.slane %v8134_v0, 1 }
 0x4c7   : > { %v2253_v33 = vpack.c.bf16 %v2219_v31, %v2219_v31  ;;  %v2254_v34 = vpack.c.bf16 %v2220_v32, %v2220_v32  ;;  %v2252_v42 = vpack.c.bf16 %v2187_v35, %v2154_v40 }
 0x4c8   : > { %2723 = vrot.lane.b32.xlu2 %v2720_v28, %s11793_s26 }
 0x4c9   : > { %v2276_v36 = vsel %vm1832_vm9, %v2253_v33, 0  ;;  %v2279_v37 = vsel %vm1832_vm9, %v2254_v34, 0 }
 0x4ca   : > { %2284 = vmatpush.bf16.msra.mxu2 %v2276_v36  ;;  %2298 = vmatpush.bf16.msra.mxu3 %v2279_v37 }
 0x4cd   : > { %v2117_v43 = vpop.permute.xlu0 %2116  ;;  %v2049_v45 = vpop.permute.xlu1 %2048 }
 0x4ce   : > { %v2121_v48 = vsel %vm1629_vm6, %v2117_v43, %v2119_v21  ;;  %2299 = vmatpush.bf16.msra.mxu3 %v2252_v42  ;;  %v2148_v6 = vpop.permute.xlu2 %2147 }
 0x4cf   : > { %v2250_v25 = vpack.c.bf16 %v2121_v48, %v9134_v44  ;;  %v2388_v44 = vperm.slane %v8128_v56, 1  ;;  %v2153_v14 = vsel %vm1593_vm5, %v2148_v6, %v9188_v19 }
 0x4d1   : > { %2391 = vrot.lane.b32.xlu1 %v2388_v44, %s11799_s16 }
 0x4d2   : > { %2300 = vmatpush.bf16.msra.mxu3 %v2250_v25 }
 0x4d5   : > { %v2047_v54 = vpop.permute.xlu0 %2046  ;;  %v1981_v55 = vpop.permute.xlu1 %1980 }
 0x4d6   : > { %v2051_v60 = vsel %vm11846_vm3, %v2047_v54, %v2049_v45  ;;  %v1985_v8 = vsel %vm11831_vm2, %v1981_v55, %v1983_v58  ;;  %v2045_v16 = vpop.permute.xlu2 %2044 }
 0x4d7   : > { %v2050_v24 = vsel %vm11846_vm3, %v2045_v16, %v2047_v54 }
 0x4d9   : > { %2721 = vrot.lane.b32.xlu1 %v2719_v2, %s11793_s26 }
 0x4dd   : > { %v2082_v59 = vpop.permute.xlu0 %2081  ;;  %v2016_v1 = vpop.permute.xlu1 %2015 }
 0x4de   : > { %v2084_v61 = vsel %vm1646_vm4, %v2080_v49, %v2082_v59 }
 0x4df   : > { %v2248_v62 = vpack.c.bf16 %v2084_v61, %v2051_v60 }
 0x4e1   : > { %2301 = vmatpush.bf16.msra.mxu3 %v2248_v62 }
 0x4e5   : > { %v2014_v7 = vpop.permute.xlu0 %2013  ;;  %v2115_v13 = vpop.permute.xlu1 %2114 }
 0x4e6   : > { %v2018_v9 = vsel %vm1496_vm1, %v2014_v7, %v2016_v1  ;;  %v2120_v18 = vsel %vm1629_vm6, %v2115_v13, %v2117_v43 }
 0x4e7   : > { %v2246_v10 = vpack.c.bf16 %v2018_v9, %v1985_v8  ;;  %v2249_v21 = vpack.c.bf16 %v2120_v18, %v9148_v52 }
 0x4e9   : > { %2302 = vmatpush.bf16.msra.mxu3 %v2246_v10 }
 0x4ec   : > { %8127 = vmatmul.msk.bf16.vlgmr.msra.gmra.mxu3 %vm1828_vm10, %v8381_v11 }
 0x4ed   : > { %v2181_v4 = vpop.permute.xlu0 %2180  ;;  %v1979_v22 = vpop.permute.xlu1 %1978 }
 0x4ee   : > { %v2186_v15 = vsel %vm11830_vm8, %v2181_v4, %v9193_v29  ;;  %v1984_v27 = vsel %vm11831_vm2, %v1979_v22, %v1981_v55  ;;  %v2012_v29 = vpop.permute.xlu2 %2011 }
 0x4ef   : > { %v2251_v17 = vpack.c.bf16 %v2186_v15, %v2153_v14  ;;  %v2017_v31 = vsel %vm1496_vm1, %v2012_v29, %v2014_v7 }
 0x4f0   : > { %v2245_v32 = vpack.c.bf16 %v2017_v31, %v1984_v27 }
 0x4f1   : > { %2285 = vmatpush.bf16.msra.mxu2 %v2251_v17 }
 0x4f5   : > { %v2078_v23 = vpop.permute.xlu0 %2077  ;;  %2286 = vmatpush.bf16.msra.mxu2 %v2249_v21  ;;  %v9243_v52 = vpop.permute.xlu1 %2264 }
 0x4f6   : > { %v2083_v19 = vsel %vm1646_vm4, %v2078_v23, %v2080_v49  ;;  %v9245_v33 = vpop.permute.xlu2 %2667 }
 0x4f7   : > { %v2247_v26 = vpack.c.bf16 %v2083_v19, %v2050_v24 }
 0x4f9   : > { %2287 = vmatpush.bf16.msra.mxu2 %v2247_v26 }
 0x4fd   : > { %2288 = vmatpush.bf16.msra.mxu2 %v2245_v32  ;;  %v2260_v34 = vpop.permute.xlu0 %2259  ;;  %v9247_v35 = vpop.permute.xlu1 %2613 }
 0x4fe   : > { %v2616_v36 = vpop.permute.xlu2 %2615 }
 0x4ff   : > { %v2623_v37 = vmul.f32 0.0, %v2616_v36  ;;  %v9269_v53 = vsel %vm11846_vm3, %v9247_v35, %v2616_v36 }
 0x500   : > { %8126 = vmatmul.msk.bf16.vlgmr.msra.gmra.mxu2 %vm1828_vm10, %v8381_v11 }
 0x501   : > { %2637 = vrot.lane.b32.xlu2 %v2623_v37, %s11803_s10 }
 0x505   : > { %v2670_v38 = vpop.permute.xlu0 %2669  ;;  %v2562_v40 = vpop.permute.xlu1 %2561 }
 0x506   : > { %v2677_v39 = vmul.f32 0.0, %v2670_v38  ;;  %v2569_v41 = vmul.f32 0.0, %v2562_v40  ;;  %v2498_v42 = vpop.permute.xlu2 %2497  ;;  %v2671_v54 = vsel %vm1496_vm1, %v9245_v33, %v2670_v38 }
 0x507   : > { %v2505_v43 = vmul.f32 0.0, %v2498_v42 }
 0x508   : > { %2697 = vrot.lane.b32.xlu0 %v2677_v39, %s11799_s16  ;;  %2691 = vrot.lane.b32.xlu1 %v2677_v39, %s11799_s16 }
 0x509   : > { %2589 = vrot.lane.b32.xlu2 %v2569_v41, %s11805_s11 }
 0x50d   : > { %v9257_v45 = vpop.permute.xlu0 %2559  ;;  %v2444_v9 = vpop.permute.xlu1 %2443 }
 0x50e   : > { %v9261_v25 = vpop.permute.xlu2 %2445  ;;  %v2563_v30 = vsel %vm1646_vm4, %v9257_v45, %v2562_v40 }
 0x50f   : > { %v2447_v14 = vsel %vm1593_vm5, %v2444_v9, %v9261_v25 }
 0x510   : > { %2583 = vrot.lane.b32.xlu0 %v2569_v41, %s11805_s11  ;;  %2643 = vrot.lane.b32.xlu1 %v2623_v37, %s11803_s10 }
 0x511   : > { %2523 = vrot.lane.b32.xlu2 %v2505_v43, %s11819_s7 }
 0x515   : > { %v9259_v48 = vpop.permute.xlu0 %2499 }
 0x516   : > { %v9282_v58 = vpop.permute.xlu2 %2335  ;;  %v2501_v6 = vsel %vm1629_vm6, %v2498_v42, %v9259_v48 }
 0x518   : > { %2517 = vrot.lane.b32.xlu1 %v2505_v43, %s11819_s7 }
 0x51d   : > { %v9263_v51 = vpop.permute.xlu0 %2389 }
 0x522   : > { %v9289_v61 = vpop.permute.xlu2 %2723 }
 0x523   : > { %v9293_v0 = vmul.f32 0.0, %v9289_v61 }
 0x525   : > { %v9284_v46 = vpop.permute.xlu0 %2337 }
 0x543   : > { %v2392_v18 = vpop.permute.xlu1 %2391 }
 0x544   : > { %v2393_v20 = vsel %vm11830_vm8, %v9263_v51, %v2392_v18 }
 0x54b   : > { %v2722_v41 = vpop.permute.xlu1 %2721 }
 0x54c   : > { %v2725_v42 = vsel %vm11831_vm2, %v2722_v41, %v9289_v61 }
 0x55b   : > { %v9365_v38 = vpop.permute.xlu2 %2637 }
 0x56f   : > { %v2304_v49 = vpop.f32.mrf.mxu3 }
 0x570   : > { %v2305_v50 = vadd.f32 %v2304_v49, %v2260_v34  ;;  %v2397_v49 = vmul.f32 0.0, %v9263_v51 }
 0x572   : > { %vm2310_vm9 = vcmp.gt.f32.partialorder %v2305_v50, 0.0  ;;  %v2314_v47 = vmul.f32 0.05, %v2305_v50 }
 0x574   : > { %v9273_v55 = vsel %vm2310_vm9, %v2305_v50, %v2314_v47 }
 0x575   : > { %v2676_v56 = vmul.f32 %v2671_v54, %v9273_v55  ;;  %v2568_v57 = vmul.f32 %v2563_v30, %v9273_v55  ;;  %v2622_v44 = vmul.f32 %v9269_v53, %v9273_v55  ;;  %v2345_v59 = vmul.f32 %v9284_v46, %v9273_v55 }
 0x576   : > { %v2507_v16 = vmul.f32 %v9259_v48, %v9273_v55  ;;  %v2453_v19 = vmul.f32 %v9261_v25, %v9273_v55  ;;  %v2399_v32 = vmul.f32 %v2392_v18, %v9273_v55 }
 0x577   : > { %2689 = vrot.lane.b32.xlu0 %v2676_v56, %s11799_s16  ;;  %2581 = vrot.lane.b32.xlu2 %v2568_v57, %s11805_s11  ;;  %v2306_v60 = vpop.f32.mrf.mxu3  ;;  %v2822_v57 = vld [vmem:[%s11894_s6 + $0x8] sm:$0xff] }
 0x578   : > { %2635 = vrot.lane.b32.xlu1 %v2622_v44, %s11803_s10  ;;  %v2307_v62 = vadd.f32 %v2306_v60, %v9243_v52 }
 0x57a   : > { %v2316_v3 = vmul.f32 0.05, %v2307_v62  ;;  %vm2312_vm14 = vcmp.gt.f32.partialorder %v2307_v62, 0.0  ;;  %v2698_v60 = vpop.permute.xlu0 %2697 }
 0x57c   : > { %v9305_v10 = vsel %vm2312_vm14, %v2307_v62, %v2316_v3 }
 0x57d   : > { %v2571_v4 = vmul.f32 %v2563_v30, %v9305_v10  ;;  %v2679_v26 = vmul.f32 %v2671_v54, %v9305_v10  ;;  %v2510_v29 = vmul.f32 %v9259_v48, %v9305_v10  ;;  %v2402_v39 = vmul.f32 %v2392_v18, %v9305_v10 }
 0x57e   : > { %v2625_v40 = vmul.f32 %v9269_v53, %v9305_v10  ;;  %v2730_v48 = vmul.f32 %v2725_v42, %v9273_v55  ;;  %v2733_v50 = vmul.f32 %v2725_v42, %v9305_v10  ;;  %v2343_v54 = vmul.f32 0.0, %v9282_v58 }
 0x57f   : > { %v2348_v51 = vmul.f32 %v9284_v46, %v9305_v10 }
 0x580   : > { %2359 = vrot.lane.b32.xlu1 %v2345_v59, %s11793_s26 }
 0x582   : > { %v9411_v62 = vpop.permute.xlu0 %2583 }
 0x583   : > { %v2290_v63 = vpop.f32.mrf.mxu2 }
 0x584   : > { %v2291_v1 = vadd.f32 %v2290_v63, %v2260_v34  ;;  %v2339_v34 = vsel %vm11829_vm7, %v9282_v58, %v9284_v46 }
 0x586   : > { %vm2309_vm10 = vcmp.gt.f32.partialorder %v2291_v1, 0.0  ;;  %v2313_v2 = vmul.f32 0.05, %v2291_v1 }
 0x588   : > { %v9295_v5 = vsel %vm2309_vm10, %v2291_v1, %v2313_v2  ;;  %2745 = vrot.lane.b32.xlu1 %v9293_v0, %s11797_s15 }
 0x589   : > { %2545 = vst [vmem:[#allocation5 + $0x80] sm:$0xff] %v9295_v5  ;;  %v2675_v7 = vmul.f32 %v9245_v33, %v9295_v5  ;;  %v2506_v8 = vmul.f32 %v2501_v6, %v9295_v5  ;;  %v2452_v17 = vmul.f32 %v2447_v14, %v9295_v5  ;;  %v2621_v22 = vmul.f32 %v9247_v35, %v9295_v5 }
 0x58a   : > { %v2398_v23 = vmul.f32 %v2393_v20, %v9295_v5  ;;  %v2567_v28 = vmul.f32 %v9257_v45, %v9295_v5  ;;  %v2344_v36 = vmul.f32 %v2339_v34, %v9295_v5  ;;  %v2729_v30 = vmul.f32 %v2722_v41, %v9295_v5 }
 0x58b   : > { %v2292_v11 = vpop.f32.mrf.mxu2  ;;  %2687 = vrot.lane.b32.xlu0 %v2675_v7, %s11799_s16  ;;  %2519 = vrot.lane.b32.xlu2 %v2506_v8, %s11819_s7 }
 0x58c   : > { %v2293_v12 = vadd.f32 %v2292_v11, %v9243_v52  ;;  %v2456_v52 = vmul.f32 %v9261_v25, %v9305_v10  ;;  %v2692_v25 = vpop.permute.xlu1 %2691 }
 0x58e   : > { %vm2311_vm15 = vcmp.gt.f32.partialorder %v2293_v12, 0.0  ;;  %v2315_v13 = vmul.f32 0.05, %v2293_v12 }
 0x590   : > { %v9313_v15 = vsel %vm2311_vm15, %v2293_v12, %v2315_v13  ;;  %2587 = vrot.lane.b32.xlu1 %v2571_v4, %s11805_s11  ;;  %vm3118_vm15 = vcmask 64512  }
 0x591   : > { %2547 = vst [vmem:[#allocation5 + $0x90] sm:$0xff] %v9313_v15  ;;  %v2678_v21 = vmul.f32 %v9245_v33, %v9313_v15  ;;  %v2509_v24 = vmul.f32 %v2501_v6, %v9313_v15  ;;  %v2624_v27 = vmul.f32 %v9247_v35, %v9313_v15  ;;  %v2455_v31 = vmul.f32 %v2447_v14, %v9313_v15 }
 0x592   : > { %v2570_v33 = vmul.f32 %v9257_v45, %v9313_v15  ;;  %v2451_v35 = vmul.f32 0.0, %v2444_v9  ;;  %v2401_v37 = vmul.f32 %v2393_v20, %v9313_v15  ;;  %v2347_v43 = vmul.f32 %v2339_v34, %v9313_v15  ;;  %v9377_v45 = vpop.permute.xlu2 %2589 }
 0x593   : > { %2521 = vrot.lane.b32.xlu0 %v2507_v16, %s11819_s7  ;;  %2465 = vrot.lane.b32.xlu2 %v2452_v17, %s11795_s1  ;;  %v2732_v59 = vmul.f32 %v2722_v41, %v9313_v15 }
 0x594   : > { %v9389_v53 = vpop.permute.xlu1 %2643 }
 0x598   : > { %2693 = vrot.lane.b32.xlu1 %v2678_v21, %s11799_s16 }
 0x59a   : > { %v2524_v47 = vpop.permute.xlu2 %2523 }
 0x59b   : > { %2633 = vrot.lane.b32.xlu0 %v2621_v22, %s11803_s10  ;;  %2411 = vrot.lane.b32.xlu2 %v2398_v23, %s11801_s0 }
 0x59c   : > { %v2518_v44 = vpop.permute.xlu1 %2517 }
 0x5a0   : > { %2525 = vrot.lane.b32.xlu1 %v2509_v24, %s11819_s7 }
 0x5a3   : > { %2467 = vrot.lane.b32.xlu0 %v2453_v19, %s11795_s1  ;;  %2695 = vrot.lane.b32.xlu2 %v2679_v26, %s11799_s16  ;;  %s11807_s16 = smov 9  }
 0x5a8   : > { %2639 = vrot.lane.b32.xlu1 %v2624_v27, %s11803_s10 }
 0x5ab   : > { %2579 = vrot.lane.b32.xlu0 %v2567_v28, %s11805_s11  ;;  %2527 = vrot.lane.b32.xlu2 %v2510_v29, %s11819_s7 }
 0x5b0   : > { %2471 = vrot.lane.b32.xlu1 %v2455_v31, %s11795_s1 }
 0x5b3   : > { %2413 = vrot.lane.b32.xlu0 %v2399_v32, %s11801_s0  ;;  %2473 = vrot.lane.b32.xlu2 %v2456_v52, %s11795_s1 }
 0x5b8   : > { %2585 = vrot.lane.b32.xlu1 %v2570_v33, %s11805_s11 }
 0x5bb   : > { %2469 = vrot.lane.b32.xlu2 %v2451_v35, %s11795_s1  ;;  %2357 = vrot.lane.b32.xlu0 %v2344_v36, %s11793_s26 }
 0x5c0   : > { %2417 = vrot.lane.b32.xlu1 %v2401_v37, %s11801_s0 }
 0x5c3   : > { %2419 = vrot.lane.b32.xlu2 %v2402_v39, %s11801_s0  ;;  %2641 = vrot.lane.b32.xlu0 %v2625_v40, %s11803_s10  ;;  %s11903_s10 = sld [smem:[#allocation18_spill]] }
 0x5c8   : > { %2463 = vrot.lane.b32.xlu1 %v2451_v35, %s11795_s1  ;;  %s11817_s1 = smov 121  }
 0x5cb   : > { %2363 = vrot.lane.b32.xlu2 %v2347_v43, %s11793_s26  ;;  %2743 = vrot.lane.b32.xlu0 %v2730_v48, %s11797_s15 }
 0x5d0   : > { %2415 = vrot.lane.b32.xlu1 %v2397_v49, %s11801_s0 }
 0x5d1   : > { %v9397_v56 = vpop.permute.xlu2 %2581 }
 0x5d3   : > { %2749 = vrot.lane.b32.xlu2 %v2733_v50, %s11797_s15  ;;  %2751 = vrot.lane.b32.xlu0 %v9293_v0, %s11797_s15  ;;  %v2821_v0 = vld [vmem:[%s11894_s6] sm:$0xff]  ;;  %s11824_s6 = smov 125  }
 0x5d8   : > { %2741 = vrot.lane.b32.xlu1 %v2729_v30, %s11797_s15 }
 0x5db   : > { %2355 = vrot.lane.b32.xlu2 %v2343_v54, %s11793_s26  ;;  %2365 = vrot.lane.b32.xlu0 %v2348_v51, %s11793_s26 }
 0x5e0   : > { %2830 = vperm.xlu1 %8513, %v2822_v57  }
 0x5e3   : > { %2747 = vrot.lane.b32.xlu2 %v2732_v59, %s11797_s15  ;;  %2409 = vrot.lane.b32.xlu0 %v2397_v49, %s11801_s0  ;;  %s11815_s15 = smov 120   ;;  %s11811_s0 = smov 119  }
 0x5e5   : > { %v9403_v58 = vpop.permute.xlu2 %2519 }
 0x5e6   : > { %v9407_v46 = vsel %vm1646_vm4, %v2518_v44, %v9403_v58 }
 0x5e7   : > { %2537 = vst [vmem:[#allocation5 + $0x60] sm:$0xff] %v9407_v46 }
 0x5e9   : > { %v2690_v2 = vpop.permute.xlu0 %2689 }
 0x5ea   : > { %v2636_v61 = vpop.permute.xlu1 %2635  ;;  %v2700_v9 = vsel %vm11830_vm8, %v2690_v2, %v2692_v25 }
 0x5eb   : > { %2361 = vrot.lane.b32.xlu0 %v2343_v54, %s11793_s26  ;;  %v2646_v48 = vsel %vm1593_vm5, %v2636_v61, %v9365_v38  ;;  %v2592_v38 = vsel %vm1629_vm6, %v9397_v56, %v9411_v62  ;;  %s11902_s26 = sld [smem:[#allocation35_spill]] }
 0x5ed   : > { %v9413_v63 = vpop.permute.xlu2 %2465 }
 0x5f2   : > { %v9416_v1 = vpop.permute.xlu1 %2359 }
 0x5f3   : > { %2825 = vperm.xlu0 %8515, %v2821_v0  }
 0x5f5   : > { %v9418_v3 = vpop.permute.xlu2 %2411 }
 0x5fa   : > { %v9420_v6 = vpop.permute.xlu1 %2745 }
 0x5fd   : > { %v2688_v7 = vpop.permute.xlu0 %2687  ;;  %v2696_v8 = vpop.permute.xlu2 %2695 }
 0x5fe   : > { %v2699_v11 = vsel %vm11830_vm8, %v2688_v7, %v2690_v2  ;;  %v2702_v12 = vsel %vm11830_vm8, %v2696_v8, %v2698_v60 }
 0x5ff   : > { %2707 = vst [vmem:[#allocation5 + $0xe0] sm:$0xff] %v2699_v11  ;;  %v2818_v13 = vpack.c.bf16 %v2702_v12, %v2700_v9 }
 0x601   : > { %2873 = vmatpush.bf16.msrb.mxu2 %v2818_v13 }
 0x602   : > { %v2588_v4 = vpop.permute.xlu1 %2587 }
 0x603   : > { %v2594_v54 = vsel %vm1629_vm6, %v2588_v4, %v9377_v45 }
 0x604   : > { %v2814_v44 = vpack.c.bf16 %v2594_v54, %v2592_v38  ;;  %v2911_v54 = vld [vmem:[#allocation6 + $0x50] sm:$0xff]  ;;  %v2924_v38 = vld [vmem:[#allocation6 + $0xb8] sm:$0xff] }
 0x605   : > { %v9425_v14 = vpop.permute.xlu0 %2521  ;;  %v2528_v16 = vpop.permute.xlu2 %2527 }
 0x606   : > { %v2530_v0 = vsel %vm1646_vm4, %v9403_v58, %v9425_v14  ;;  %v8382_v14 = vld [vmem:[%s8762_s30 + $0x4] sm:$0xf] }
 0x60a   : > { %v2694_v17 = vpop.permute.xlu1 %2693 }
 0x60b   : > { %v2701_v18 = vsel %vm11830_vm8, %v2694_v17, %v2696_v8 }
 0x60c   : > { %2709 = vst [vmem:[#allocation5 + $0xf0] sm:$0xff] %v2701_v18  ;;  %v2817_v20 = vpack.c.bf16 %v2701_v18, %v2699_v11 }
 0x60d   : > { %v2634_v21 = vpop.permute.xlu0 %2633  ;;  %v2474_v22 = vpop.permute.xlu2 %2473 }
 0x60e   : > { %v2645_v23 = vsel %vm1593_vm5, %v2634_v21, %v2636_v61  ;;  %2845 = vmatpush.bf16.msrb.mxu0 %v2817_v20  ;;  %v2811_v61 = vpack.c.bf16 %v9313_v15, %v9295_v5  ;;  %v2932_v21 = vld [vmem:[#allocation6 + $0xf8] sm:$0xff] }
 0x60f   : > { %2653 = vst [vmem:[#allocation5 + $0xc0] sm:$0xff] %v2645_v23 }
 0x612   : > { %v2526_v24 = vpop.permute.xlu1 %2525 }
 0x613   : > { %v2531_v19 = vsel %vm1646_vm4, %v2524_v47, %v2526_v24  ;;  %v2532_v62 = vsel %vm1646_vm4, %v2526_v24, %v2528_v16  ;;  %v8139_v16 = vld [vmem:[%s8762_s30 + $0x8] sm:$0xf0] }
 0x614   : > { %2539 = vst [vmem:[#allocation5 + $0x70] sm:$0xff] %v2531_v19  ;;  %v2809_v8 = vpack.c.bf16 %v2531_v19, %v9407_v46  ;;  %v2810_v9 = vpack.c.bf16 %v2532_v62, %v2530_v0  ;;  %v2931_v19 = vld [vmem:[#allocation6 + $0xf0] sm:$0xff] }
 0x615   : > { %v2468_v26 = vpop.permute.xlu0 %2467  ;;  %v2470_v27 = vpop.permute.xlu2 %2469  ;;  %v2919_v62 = vld [vmem:[#allocation6 + $0x90] sm:$0xff] }
 0x616   : > { %v2476_v13 = vsel %vm11846_vm3, %v9413_v63, %v2468_v26  ;;  %v2907_v0 = vld [vmem:[#allocation6 + $0x30] sm:$0xff] }
 0x61a   : > { %v2640_v28 = vpop.permute.xlu1 %2639 }
 0x61d   : > { %v2580_v29 = vpop.permute.xlu0 %2579  ;;  %v9430_v31 = vpop.permute.xlu2 %2419 }
 0x61e   : > { %v2591_v32 = vsel %vm1629_vm6, %v2580_v29, %v9397_v56  ;;  %v2812_v56 = vpack.c.bf16 %v9305_v10, %v9273_v55  ;;  %v8137_v29 = vld [vmem:[%s8762_s30] sm:$0xf] }
 0x61f   : > { %2599 = vst [vmem:[#allocation5 + $0xa0] sm:$0xff] %v2591_v32 }
 0x622   : > { %v2472_v52 = vpop.permute.xlu1 %2471 }
 0x623   : > { %v2477_v33 = vsel %vm11846_vm3, %v2470_v27, %v2472_v52  ;;  %v2478_v11 = vsel %vm11846_vm3, %v2472_v52, %v2474_v22  ;;  %v8142_v22 = vor.u32 %v8382_v14, %v8139_v16  ;;  %v2916_v27 = vld [vmem:[#allocation6 + $0x78] sm:$0xff] }
 0x624   : > { %2485 = vst [vmem:[#allocation5 + $0x50] sm:$0xff] %v2477_v33  ;;  %v2808_v46 = vpack.c.bf16 %v2478_v11, %v2476_v13  ;;  %v2902_v11 = vld [vmem:[#allocation6 + $0x8] sm:$0xff] }
 0x625   : > { %v2414_v34 = vpop.permute.xlu0 %2413  ;;  %v9435_v35 = vpop.permute.xlu2 %2363 }
 0x62a   : > { %v2586_v36 = vpop.permute.xlu1 %2585 }
 0x62b   : > { %v2593_v37 = vsel %vm1629_vm6, %v2586_v36, %v2588_v4  ;;  %v2929_v36 = vld [vmem:[#allocation6 + $0xe0] sm:$0xff] }
 0x62c   : > { %2601 = vst [vmem:[#allocation5 + $0xb0] sm:$0xff] %v2593_v37  ;;  %v2813_v57 = vpack.c.bf16 %v2593_v37, %v2591_v32  ;;  %v2930_v32 = vld [vmem:[#allocation6 + $0xe8] sm:$0xff]  ;;  %v2915_v37 = vld [vmem:[#allocation6 + $0x70] sm:$0xff] }
 0x62d   : > { %v9438_v39 = vpop.permute.xlu0 %2357  ;;  %v2750_v40 = vpop.permute.xlu2 %2749 }
 0x62e   : > { %v2368_v52 = vsel %vm11831_vm2, %v9438_v39, %v9416_v1  ;;  %v2913_v1 = vld [vmem:[#allocation6 + $0x60] sm:$0xff] }
 0x632   : > { %v2418_v41 = vpop.permute.xlu1 %2417 }
 0x633   : > { %v2424_v20 = vsel %vm1496_vm1, %v2418_v41, %v9430_v31  ;;  %v8383_v31 = vld [vmem:[%s8762_s30 + $0x4] sm:$0xf0] }
 0x635   : > { %v2642_v42 = vpop.permute.xlu0 %2641  ;;  %v2356_v43 = vpop.permute.xlu2 %2355 }
 0x636   : > { %v2647_v25 = vsel %vm1593_vm5, %v2640_v28, %v2642_v42  ;;  %v2648_v49 = vsel %vm1593_vm5, %v2642_v42, %v9389_v53  ;;  %v9447_v50 = vsel %vm11831_vm2, %v2356_v43, %v9438_v39  ;;  %v2914_v42 = vld [vmem:[#allocation6 + $0x68] sm:$0xff]  ;;  %v2927_v43 = vld [vmem:[#allocation6 + $0xd0] sm:$0xff] }
 0x637   : > { %2655 = vst [vmem:[#allocation5 + $0xd0] sm:$0xff] %v2647_v25  ;;  %v2815_v47 = vpack.c.bf16 %v2647_v25, %v2645_v23  ;;  %v2816_v30 = vpack.c.bf16 %v2648_v49, %v2646_v48  ;;  %v2926_v48 = vld [vmem:[#allocation6 + $0xc8] sm:$0xff]  ;;  %v2912_v49 = vld [vmem:[#allocation6 + $0x58] sm:$0xff] }
 0x638   : > { %2375 = vst [vmem:[#allocation5] sm:$0xff] %v9447_v50 }
 0x639   : > { %2846 = vmatpush.bf16.msrb.mxu0 %v2815_v47  ;;  %2874 = vmatpush.bf16.msrb.mxu2 %v2816_v30  ;;  %v2925_v30 = vld [vmem:[#allocation6 + $0xc0] sm:$0xff] }
 0x63a   : > { %v2464_v51 = vpop.permute.xlu1 %2463 }
 0x63b   : > { %v2475_v53 = vsel %vm11846_vm3, %v2464_v51, %v9413_v63  ;;  %v2422_v63 = vsel %vm1496_vm1, %v9418_v3, %v2414_v34  ;;  %v2910_v51 = vld [vmem:[#allocation6 + $0x48] sm:$0xff] }
 0x63c   : > { %2483 = vst [vmem:[#allocation5 + $0x40] sm:$0xff] %v2475_v53  ;;  %v2807_v17 = vpack.c.bf16 %v2477_v33, %v2475_v53  ;;  %v2806_v24 = vpack.c.bf16 %v2424_v20, %v2422_v63  ;;  %v2923_v53 = vld [vmem:[#allocation6 + $0xb0] sm:$0xff] }
 0x63d   : > { %v2744_v59 = vpop.permute.xlu0 %2743  ;;  %v2748_v60 = vpop.permute.xlu2 %2747  ;;  %2847 = vmatpush.bf16.msrb.mxu0 %v2813_v57  ;;  %2875 = vmatpush.bf16.msrb.mxu2 %v2814_v44  ;;  %v2922_v44 = vld [vmem:[#allocation6 + $0xa8] sm:$0xff] }
 0x63e   : > { %v2755_v45 = vsel %vm11829_vm7, %v2748_v60, %v2750_v40  ;;  %v2754_v58 = vsel %vm11829_vm7, %v2744_v59, %v9420_v6  ;;  %v2921_v60 = vld [vmem:[#allocation6 + $0xa0] sm:$0xff] }
 0x63f   : > { %2763 = vst [vmem:[#allocation5 + $0x110] sm:$0xff] %v2755_v45 }
 0x641   : > { %2848 = vmatpush.bf16.msrb.mxu0 %v2811_v61  ;;  %2876 = vmatpush.bf16.msrb.mxu2 %v2812_v56  ;;  %v2920_v61 = vld [vmem:[#allocation6 + $0x98] sm:$0xff] }
 0x642   : > { %v2416_v2 = vpop.permute.xlu1 %2415  ;;  %v2908_v56 = vld [vmem:[#allocation6 + $0x38] sm:$0xff] }
 0x643   : > { %v9467_v7 = vsel %vm1496_vm1, %v2416_v2, %v2418_v41  ;;  %v2928_v41 = vld [vmem:[#allocation6 + $0xd8] sm:$0xff]  ;;  %v2918_v2 = vld [vmem:[#allocation6 + $0x88] sm:$0xff] }
 0x644   : > { %2431 = vst [vmem:[#allocation5 + $0x30] sm:$0xff] %v9467_v7 }
 0x645   : > { %v2752_v12 = vpop.permute.xlu0 %2751  ;;  %2849 = vmatpush.bf16.msrb.mxu0 %v2809_v8  ;;  %2877 = vmatpush.bf16.msrb.mxu2 %v2810_v9  ;;  %v2904_v8 = vld [vmem:[#allocation6 + $0x18] sm:$0xff]  ;;  %v2903_v9 = vld [vmem:[#allocation6 + $0x10] sm:$0xff] }
 0x646   : > { %v2756_v4 = vsel %vm11829_vm7, %v2750_v40, %v2752_v12  ;;  %v8138_v40 = vor.u32 %v8383_v31, %v8137_v29  ;;  %v2901_v12 = vld [vmem:[#allocation6] sm:$0xff] }
 0x647   : > { %v2820_v18 = vpack.c.bf16 %v2756_v4, %v2754_v58 }
 0x649   : > { %2850 = vmatpush.bf16.msrb.mxu0 %v2807_v17  ;;  %2878 = vmatpush.bf16.msrb.mxu2 %v2808_v46 }
 0x64a   : > { %v2742_v6 = vpop.permute.xlu1 %2741  ;;  %2894 = vmatpush.bf16.msrb.mxu3 %v2820_v18 }
 0x64b   : > { %v2753_v23 = vsel %vm11829_vm7, %v2742_v6, %v2744_v59 }
 0x64c   : > { %2761 = vst [vmem:[#allocation5 + $0x100] sm:$0xff] %v2753_v23  ;;  %v2819_v26 = vpack.c.bf16 %v2755_v45, %v2753_v23  ;;  %v2909_v45 = vld [vmem:[#allocation6 + $0x40] sm:$0xff] }
 0x64d   : > { %v2366_v28 = vpop.permute.xlu0 %2365  ;;  %2879 = vmatpush.bf16.msrb.mxu2 %v2806_v24  ;;  %8144 = vmatmul.msk.bf16.vlgmr.msrb.gmra.mxu3 %vm1496_vm1, %v8142_v22 }
 0x64e   : > { %2956 = vmatpush.msra.mxu3 %v2932_v21  ;;  %v2370_v33 = vsel %vm11831_vm2, %v9435_v35, %v2366_v28  ;;  %2866 = vmatpush.bf16.msrb.mxu1 %v2819_v26 }
 0x64f   : > { %v2804_v34 = vpack.c.bf16 %v2370_v33, %v2368_v52 }
 0x650   : > { %2957 = vmatpush.msra.mxu3 %v2931_v19 }
 0x651   : > { %2880 = vmatpush.bf16.msrb.mxu2 %v2804_v34  ;;  %8143 = vmatmul.msk.bf16.vlgmr.msrb.gmra.mxu1 %vm1496_vm1, %v8142_v22 }
 0x652   : > { %2933 = vmatpush.msra.mxu1 %v2916_v27  ;;  %2958 = vmatpush.msra.mxu3 %v2930_v32  ;;  %v2831_v17 = vpop.permute.xlu1 %2830 }
 0x654   : > { %2959 = vmatpush.msra.mxu3 %v2929_v36  ;;  %2934 = vmatpush.msra.mxu1 %v2915_v37 }
 0x655   : > { %2881 = vmatmul.bf16.vlgmr.msrb.gmra.mxu2 %v8138_v40  ;;  %v2410_v39 = vpop.permute.xlu0 %2409 }
 0x656   : > { %2960 = vmatpush.msra.mxu3 %v2928_v41  ;;  %2935 = vmatpush.msra.mxu1 %v2914_v42  ;;  %v2421_v25 = vsel %vm1496_vm1, %v2410_v39, %v9418_v3 }
 0x657   : > { %2429 = vst [vmem:[#allocation5 + $0x20] sm:$0xff] %v2421_v25  ;;  %v2805_v47 = vpack.c.bf16 %v9467_v7, %v2421_v25  ;;  %v2917_v7 = vld [vmem:[#allocation6 + $0x80] sm:$0xff] }
 0x658   : > { %2961 = vmatpush.msra.mxu3 %v2927_v43  ;;  %2936 = vmatpush.msra.mxu1 %v2913_v1  ;;  %v8516_v43 = vld [vmem:[%s8712_s13 + $0x6] ss:$0 sm:$0xff]  ;;  %v8517_v1 = vld [vmem:[%s8712_s13 + $0x7] ss:$0 sm:$0xff] }
 0x659   : > { %2851 = vmatpush.bf16.msrb.mxu0 %v2805_v47 }
 0x65a   : > { %2962 = vmatpush.msra.mxu3 %v2926_v48  ;;  %2937 = vmatpush.msra.mxu1 %v2912_v49 }
 0x65c   : > { %2963 = vmatpush.msra.mxu3 %v2925_v30  ;;  %2938 = vmatpush.msra.mxu1 %v2911_v54 }
 0x65d   : > { %v2362_v57 = vpop.permute.xlu0 %2361 }
 0x65e   : > { %2964 = vmatpush.msra.mxu3 %v2924_v38  ;;  %2939 = vmatpush.msra.mxu1 %v2910_v51  ;;  %v2369_v3 = vsel %vm11831_vm2, %v2362_v57, %v9435_v35  ;;  %v2906_v35 = vld [vmem:[#allocation6 + $0x28] sm:$0xff] }
 0x65f   : > { %2377 = vst [vmem:[#allocation5 + $0x10] sm:$0xff] %v2369_v3  ;;  %v2803_v59 = vpack.c.bf16 %v2369_v3, %v9447_v50  ;;  %v2905_v50 = vld [vmem:[#allocation6 + $0x20] sm:$0xff] }
 0x660   : > { %2965 = vmatpush.msra.mxu3 %v2923_v53  ;;  %2940 = vmatpush.msra.mxu1 %v2909_v45 }
 0x661   : > { %2852 = vmatpush.bf16.msrb.mxu0 %v2803_v59 }
 0x662   : > { %2966 = vmatpush.msra.mxu3 %v2922_v44  ;;  %2941 = vmatpush.msra.mxu1 %v2908_v56 }
 0x664   : > { %2967 = vmatpush.msra.mxu3 %v2921_v60  ;;  %2853 = vmatmul.bf16.vlgmr.msrb.gmra.mxu0 %v8138_v40 }
 0x665   : > { %2942 = vmatpush.msra.mxu1 %v2907_v0  ;;  %v2826_v13 = vpop.permute.xlu0 %2825 }
 0x666   : > { %2968 = vmatpush.msra.mxu3 %v2920_v61 }
 0x667   : > { %2943 = vmatpush.msra.mxu1 %v2906_v35 }
 0x668   : > { %2969 = vmatpush.msra.mxu3 %v2919_v62 }
 0x669   : > { %2944 = vmatpush.msra.mxu1 %v2905_v50 }
 0x66a   : > { %2970 = vmatpush.msra.mxu3 %v2918_v2 }
 0x66b   : > { %2945 = vmatpush.msra.mxu1 %v2904_v8 }
 0x66c   : > { %2971 = vmatpush.msra.mxu3 %v2917_v7  ;;  %v3023_v7 = vld [vmem:[%s11901_s22] sm:$0xff] }
 0x66d   : > { %2946 = vmatpush.msra.mxu1 %v2903_v9 }
 0x66f   : > { %2947 = vmatpush.msra.mxu1 %v2902_v11 }
 0x671   : > { %2948 = vmatpush.msra.mxu1 %v2901_v12  ;;  %v3027_v12 = vld [vmem:[%s11902_s26] sm:$0xff] }
 0x6ce   : > { %v2868_v18 = vpop.f32.mrf.mxu1 }
 0x6d0   : > { %v2896_v58 = vpop.f32.mrf.mxu3 }
 0x6d6   : > { %v2870_v26 = vpop.f32.mrf.mxu1 }
 0x6d8   : > { %v2882_v4 = vpop.f32.mrf.mxu2  ;;  %v2898_v21 = vpop.f32.mrf.mxu3 }
 0x6d9   : > { %v2883_v14 = vadd.f32 %v2882_v4, %v2826_v13 }
 0x6db   : > { %v2897_v16 = vadd.f32 %v2896_v58, %v2883_v14 }
 0x6dd   : > { %2972 = vmatmul.f32.vlgmr.msra.gmra.mxu3 %v2897_v16  ;;  %v3024_v16 = vld [vmem:[%s11901_s22 + $0x8] sm:$0xff] }
 0x6e0   : > { %v2884_v46 = vpop.f32.mrf.mxu2 }
 0x6e1   : > { %v2885_v20 = vadd.f32 %v2884_v46, %v2831_v17  ;;  %v2854_v22 = vpop.f32.mrf.mxu0 }
 0x6e2   : > { %v2855_v63 = vadd.f32 %v2854_v22, %v2826_v13 }
 0x6e3   : > { %v2899_v6 = vadd.f32 %v2898_v21, %v2885_v20  ;;  %v8521_v21 = vld [vmem:[%s8712_s13 + $0x5] ss:$0 sm:$0xff] }
 0x6e4   : > { %v2869_v23 = vadd.f32 %v2868_v18, %v2855_v63  ;;  %v3028_v18 = vld [vmem:[%s11902_s26 + $0x8] sm:$0xff]  ;;  %v8518_v63 = vld [vmem:[%s8712_s13 + $0x3] ss:$0 sm:$0xff] }
 0x6e5   : > { %2975 = vmatmul.f32.gmra.mxu3 %v2899_v6  ;;  %v8519_v6 = vld [vmem:[%s8712_s13 + $0x2] ss:$0 sm:$0xff] }
 0x6e6   : > { %2949 = vmatmul.f32.vlgmr.msra.gmra.mxu1 %v2869_v23  ;;  %v8523_v23 = vld [vmem:[%s8712_s13 + $0x1] ss:$0 sm:$0xff] }
 0x6e9   : > { %v2856_v24 = vpop.f32.mrf.mxu0 }
 0x6ea   : > { %v2857_v19 = vadd.f32 %v2856_v24, %v2831_v17  ;;  %v8520_v24 = vld [vmem:[%s8712_s13 + $0x8] ss:$0 sm:$0xff] }
 0x6ec   : > { %v2871_v27 = vadd.f32 %v2870_v26, %v2857_v19  ;;  %v8522_v19 = vld [vmem:[%s8712_s13] ss:$0 sm:$0xff] }
 0x6ee   : > { %2952 = vmatmul.f32.gmra.mxu1 %v2871_v27 }
 0x760   : > { %v2973_v28 = vpop.f32.mrf.mxu3 }
 0x763   : > { %v2950_v29 = vpop.f32.mrf.mxu1 }
 0x764   : > { %v9499_v31 = vadd.f32 %v2973_v28, %v2950_v29 }
 0x766   : > { %v2979_v32 = vsel %vm1471_vm0, %v9499_v31, 0.0  ;;  %v2985_v52 = vmul.f32 %v9499_v31, %v9499_v31 }
 0x767   : > { %2980 = vadd.xlane.f32.xlu2 %v2979_v32 }
 0x768   : > { %v2987_v33 = vsel %vm1471_vm0, %v2985_v52, 0.0  ;;  %v2976_v34 = vpop.f32.mrf.mxu3 }
 0x769   : > { %2988 = vadd.xlane.f32.xlu1 %v2987_v33 }
 0x76b   : > { %v2953_v36 = vpop.f32.mrf.mxu1 }
 0x76c   : > { %v9506_v37 = vadd.f32 %v2976_v34, %v2953_v36 }
 0x76e   : > { %v2982_v40 = vsel %vm1471_vm0, %v9506_v37, 0.0  ;;  %v2986_v41 = vmul.f32 %v9506_v37, %v9506_v37 }
 0x76f   : > { %2983 = vadd.xlane.f32.xlu0 %v2982_v40 }
 0x770   : > { %v2990_v42 = vsel %vm1471_vm0, %v2986_v41, 0.0 }
 0x771   : > { %2991 = vadd.xlane.f32.xlu2 %v2990_v42 }
 0x782   : > { %3239 = vrot.lane.b32.xlu1 %v8517_v1, %s11813_s18  ;;  %v9538_v1 = vld [vmem:[#allocation3] sm:$0xff] }
 0x783   : > { %3219 = vrot.lane.b32.xlu0 %v8516_v43, %s11809_s23 }
 0x7da   : > { %v2981_v39 = vpop.xlane.xlu2 %2980 }
 0x7db   : > { %v2993_v48 = vmul.f32 0.015625, %v2981_v39 }
 0x7dc   : > { %v2989_v25 = vpop.xlane.xlu1 %2988 }
 0x7dd   : > { %v2997_v49 = vmul.f32 %v2993_v48, %v2993_v48  ;;  %v2995_v47 = vmul.f32 0.015625, %v2989_v25 }
 0x7df   : > { %v2999_v30 = vsub.f32 %v2995_v47, %v2997_v49 }
 0x7e1   : > { %v3001_v54 = vadd.f32 1e-05, %v2999_v30 }
 0x7e2   : > { %v2984_v38 = vpop.xlane.xlu0 %2983 }
 0x7e3   : > { %8552 = vrsqrt.f32 %v3001_v54  ;;  %v2994_v51 = vmul.f32 0.015625, %v2984_v38  ;;  %vm3009_vm12 = vweird.f32 %v3001_v54 }
 0x7e4   : > { %v2992_v53 = vpop.xlane.xlu2 %2991 }
 0x7e5   : > { %v2998_v57 = vmul.f32 %v2994_v51, %v2994_v51  ;;  %v2996_v44 = vmul.f32 0.015625, %v2992_v53 }
 0x7e7   : > { %v3000_v3 = vsub.f32 %v2996_v44, %v2998_v57 }
 0x7e9   : > { %v8553_v59 = vpop.eup %8552  ;;  %v3002_v60 = vadd.f32 1e-05, %v3000_v3 }
 0x7ea   : > { %v3004_v45 = vmul.f32 %v8553_v59, %v3001_v54  ;;  %vm3010_vm11 = vweird.f32 %v8553_v59 }
 0x7eb   : > { %8554 = vrsqrt.f32 %v3002_v60  ;;  %vm3011_vm13 = vmor %vm3009_vm12, %vm3010_vm11  ;;  %vm3019_vm10 = vweird.f32 %v3002_v60  ;;  %vm3151_vm11 = vcmask 56320   ;;  %vm3085_vm12 = vcmask 72704  }
 0x7ec   : > { %v3005_v61 = vmul.f32 %v8553_v59, %v3004_v45 }
 0x7ee   : > { %v3006_v56 = vmul.f32 0.5, %v3005_v61 }
 0x7f0   : > { %v3007_v62 = vsub.f32 1.5, %v3006_v56 }
 0x7f1   : > { %v8555_v0 = vpop.eup %8554 }
 0x7f2   : > { %v3014_v2 = vmul.f32 %v8555_v0, %v3002_v60  ;;  %v3008_v35 = vmul.f32 %v8553_v59, %v3007_v62  ;;  %vm3020_vm9 = vweird.f32 %v8555_v0 }
 0x7f3   : > { %vm3021_vm14 = vmor %vm3019_vm10, %vm3020_vm9 }
 0x7f4   : > { %v3015_v50 = vmul.f32 %v8555_v0, %v3014_v2  ;;  %v3012_v8 = vsel %vm3011_vm13, %v8553_v59, %v3008_v35  ;;  %v3240_v27 = vpop.permute.xlu1 %3239 }
 0x7f5   : > { %v3025_v9 = vmul.f32 %v3023_v7, %v3012_v8  ;;  %v3220_v26 = vpop.permute.xlu0 %3219  ;;  %v3305_v8 = vld [vmem:[%s11903_s10] sm:$0xff] }
 0x7f6   : > { %v3016_v11 = vmul.f32 0.5, %v3015_v50  ;;  %v3307_v50 = vld [vmem:[%s11903_s10 + $0x10] sm:$0xff] }
 0x7f7   : > { %3035 = vperm.xlu0 %8515, %v3025_v9   ;;  %v3029_v13 = vmul.f32 %v3025_v9, %v2993_v48  ;;  %v3308_v9 = vld [vmem:[%s11903_s10 + $0x18] sm:$0xff] }
 0x7f8   : > { %v3017_v58 = vsub.f32 1.5, %v3016_v11  ;;  %v3306_v11 = vld [vmem:[%s11903_s10 + $0x8] sm:$0xff]  ;;  %s11919_s10 = smov 4  }
 0x7f9   : > { %v3031_v4 = vsub.f32 %v3027_v12, %v3029_v13 }
 0x7fa   : > { %v3018_v14 = vmul.f32 %v8555_v0, %v3017_v58 }
 0x7fb   : > { %3047 = vperm.xlu2 %8514, %v3031_v4  }
 0x7fc   : > { %v3022_v17 = vsel %vm3021_vm14, %v8555_v0, %v3018_v14 }
 0x7fd   : > { %v3026_v46 = vmul.f32 %v3024_v16, %v3022_v17 }
 0x7ff   : > { %3040 = vperm.xlu1 %8513, %v3026_v46   ;;  %v3030_v20 = vmul.f32 %v3026_v46, %v2994_v51 }
 0x801   : > { %v3032_v22 = vsub.f32 %v3028_v18, %v3030_v20 }
 0x803   : > { %3052 = vperm.xlu0 %8515, %v3032_v22   ;;  %3199 = vrot.lane.b32.xlu2 %v8521_v21, %s11819_s7  ;;  %v8524_v21 = vld [vmem:[%s8712_s13 + $0x3] ss:$0 sm:$0xff] }
 0x807   : > { %3165 = vrot.lane.b32.xlu1 %v8518_v63, %s11805_s11 }
 0x80b   : > { %3132 = vrot.lane.b32.xlu0 %v8519_v6, %s11817_s1  ;;  %3099 = vrot.lane.b32.xlu2 %v8523_v23, %s11815_s15 }
 0x80f   : > { %3259 = vrot.lane.b32.xlu1 %v8520_v24, %s11807_s16 }
 0x813   : > { %3066 = vrot.lane.b32.xlu0 %v8522_v19, %s11811_s0  ;;  %v8525_v19 = vld [vmem:[%s8712_s13 + $0x7] ss:$0 sm:$0xff] }
 0x855   : > { %v3048_v32 = vpop.permute.xlu2 %3047 }
 0x85d   : > { %v3200_v36 = vpop.permute.xlu2 %3199 }
 0x865   : > { %v3100_v48 = vpop.permute.xlu2 %3099 }
 0x866   : > { %v3102_v49 = vmul.f32 %v9538_v1, %v3100_v48 }
 0x869   : > { %v3036_v28 = vpop.permute.xlu0 %3035 }
 0x86a   : > { %v3043_v29 = vmul.f32 %v3036_v28, %v9499_v31 }
 0x86c   : > { %v3055_v52 = vadd.f32 %v3048_v32, %v3043_v29  ;;  %v8526_v32 = vld [vmem:[%s8712_s13 + $0x2] ss:$0 sm:$0xff] }
 0x86e   : > { %3057 = vst.msk [vmem:[#allocation3 + $0x8] sm:$0xff] %vm1471_vm0, %v3055_v52 }
 0x871   : > { %v3041_v33 = vpop.permute.xlu1 %3040 }
 0x872   : > { %v3044_v34 = vmul.f32 %v3041_v33, %v9506_v37 }
 0x875   : > { %v3194_v40 = vld [vmem:[#allocation3 + $0x8] sm:$0xff]  ;;  %v3053_v41 = vpop.permute.xlu0 %3052 }
 0x876   : > { %v3056_v42 = vadd.f32 %v3053_v41, %v3044_v34  ;;  %3192 = vst.msk [vmem:[#allocation5 + $0x80] sm:$0xff] %vm1471_vm0, %v3194_v40  ;;  %v3202_v47 = vmul.f32 %v3200_v36, %v3194_v40  ;;  %v3242_v30 = vmul.f32 %v3240_v27, %v3194_v40  ;;  %v3222_v54 = vmul.f32 %v3220_v26, %v3194_v40 }
 0x877   : > { %v3103_v51 = vmul.f32 %v3194_v40, %v3100_v48 }
 0x878   : > { %3058 = vst.msk [vmem:[#allocation3 + $0x20] sm:$0xff] %vm1471_vm0, %v3056_v42 }
 0x879   : > { %v3166_v43 = vpop.permute.xlu1 %3165 }
 0x87a   : > { %v3170_v31 = vmul.f32 %v9538_v1, %v3166_v43  ;;  %v3169_v38 = vmul.f32 %v3194_v40, %v3166_v43 }
 0x87c   : > { %3180 = vrot.lane.b32.xlu0 %v3170_v31, %s11819_s7  ;;  %3176 = vrot.lane.b32.xlu2 %v3170_v31, %s11819_s7 }
 0x87d   : > { %v3133_v39 = vpop.permute.xlu0 %3132 }
 0x87e   : > { %v3135_v37 = vmul.f32 %v9538_v1, %v3133_v39  ;;  %v3136_v53 = vmul.f32 %v3194_v40, %v3133_v39 }
 0x87f   : > { %v3191_v25 = vld [vmem:[#allocation3 + $0x20] sm:$0xff] }
 0x880   : > { %3193 = vst.msk [vmem:[#allocation5 + $0x90] sm:$0xff] %vm1471_vm0, %v3191_v25  ;;  %3143 = vrot.lane.b32.xlu1 %v3135_v37, %s11809_s23  ;;  %v3243_v57 = vmul.f32 %v3240_v27, %v3191_v25  ;;  %v3223_v44 = vmul.f32 %v3220_v26, %v3191_v25  ;;  %v3203_v3 = vmul.f32 %v3200_v36, %v3191_v25 }
 0x881   : > { %v3171_v45 = vmul.f32 %v3191_v25, %v3166_v43  ;;  %v3138_v61 = vmul.f32 %v3191_v25, %v3133_v39  ;;  %v3260_v56 = vpop.permute.xlu1 %3259  ;;  %v3105_v0 = vmul.f32 %v3191_v25, %v3100_v48 }
 0x882   : > { %v3262_v62 = vmul.f32 %v3260_v56, %v3194_v40  ;;  %v3263_v2 = vmul.f32 %v3260_v56, %v3191_v25 }
 0x884   : > { %3147 = vrot.lane.b32.xlu2 %v3135_v37, %s11809_s23  ;;  %3110 = vrot.lane.b32.xlu0 %v3102_v49, %s11813_s18 }
 0x885   : > { %v3067_v59 = vpop.permute.xlu0 %3066 }
 0x886   : > { %v3069_v60 = vmul.f32 %v9538_v1, %v3067_v59  ;;  %v3070_v35 = vmul.f32 %v3194_v40, %v3067_v59  ;;  %v3072_v7 = vmul.f32 %v3191_v25, %v3067_v59  ;;  %v8527_v25 = vld [vmem:[%s8712_s13 + $0x5] ss:$0 sm:$0xff] }
 0x888   : > { %3206 = vrot.lane.b32.xlu1 %v3202_v47, %s11805_s11 }
 0x88c   : > { %3246 = vrot.lane.b32.xlu2 %v3242_v30, %s11815_s15  ;;  %3226 = vrot.lane.b32.xlu0 %v3222_v54, %s11817_s1 }
 0x890   : > { %3178 = vrot.lane.b32.xlu1 %v3169_v38, %s11819_s7  ;;  %v3287_v38 = vld [vmem:[#allocation5 + $0x90] sm:$0xff] }
 0x894   : > { %3112 = vrot.lane.b32.xlu2 %v3103_v51, %s11813_s18  ;;  %3145 = vrot.lane.b32.xlu0 %v3136_v53, %s11809_s23  ;;  %v3286_v53 = vld [vmem:[#allocation5 + $0x80] sm:$0xff] }
 0x898   : > { %3248 = vrot.lane.b32.xlu1 %v3243_v57, %s11815_s15 }
 0x89c   : > { %3228 = vrot.lane.b32.xlu2 %v3223_v44, %s11817_s1  ;;  %3208 = vrot.lane.b32.xlu0 %v3203_v3, %s11805_s11  ;;  %v3300_v44 = vpack.c.bf16 %v3287_v38, %v3286_v53 }
 0x8a0   : > { %3114 = vrot.lane.b32.xlu1 %v3102_v49, %s11813_s18 }
 0x8a4   : > { %3182 = vrot.lane.b32.xlu2 %v3171_v45, %s11819_s7  ;;  %3077 = vrot.lane.b32.xlu0 %v3069_v60, %s11807_s16 }
 0x8a8   : > { %3149 = vrot.lane.b32.xlu1 %v3138_v61, %s11809_s23 }
 0x8ac   : > { %3266 = vrot.lane.b32.xlu2 %v3262_v62, %s11811_s0  ;;  %3116 = vrot.lane.b32.xlu0 %v3105_v0, %s11813_s18 }
 0x8b0   : > { %3268 = vrot.lane.b32.xlu1 %v3263_v2, %s11811_s0 }
 0x8b4   : > { %3079 = vrot.lane.b32.xlu2 %v3070_v35, %s11807_s16  ;;  %3083 = vrot.lane.b32.xlu0 %v3072_v7, %s11807_s16 }
 0x8b8   : > { %3081 = vrot.lane.b32.xlu1 %v3069_v60, %s11807_s16 }
 0x8bc   : > { %3321 = vperm.xlu2 %8514, %v3307_v50   ;;  %3311 = vperm.xlu0 %8515, %v3305_v8   ;;  %v8528_v50 = vld [vmem:[%s8712_s13 + $0x6] ss:$0 sm:$0xff]  ;;  %v8529_v8 = vld [vmem:[%s8712_s13] ss:$0 sm:$0xff] }
 0x8c0   : > { %3326 = vperm.xlu1 %8513, %v3308_v9  }
 0x8c4   : > { %3316 = vperm.xlu2 %8514, %v3306_v11   ;;  %3592 = vrot.lane.b32.xlu0 %v8524_v21, %s11805_s11  ;;  %s11904_s11 = sld [smem:[#allocation17_spill]] }
 0x8c8   : > { %3722 = vrot.lane.b32.xlu1 %v8525_v19, %s11813_s18 }
 0x8ca   : > { %v8384_v35 = vld [vmem:[%s11904_s11 + $0x4] sm:$0xf]  ;;  %v8149_v7 = vld [vmem:[%s11904_s11 + $0x8] sm:$0xf0] }
 0x8cc   : > { %3654 = vrot.lane.b32.xlu0 %v8527_v25, %s11819_s7  ;;  %3688 = vrot.lane.b32.xlu2 %v8528_v50, %s11809_s23 }
 0x8d0   : > { %3534 = vrot.lane.b32.xlu1 %v8526_v32, %s11817_s1 }
 0x8d4   : > { %3418 = vrot.lane.b32.xlu0 %v8529_v8, %s11811_s0 }
 0x8d6   : > { %v3177_v12 = vpop.permute.xlu2 %3176 }
 0x8de   : > { %v3148_v13 = vpop.permute.xlu2 %3147 }
 0x8e6   : > { %v3247_v58 = vpop.permute.xlu2 %3246 }
 0x8e7   : > { %3252 = vst.msk [vmem:[#allocation5 + $0xe0] sm:$0xff] %vm1471_vm0, %v3247_v58  ;;  %v8531_v58 = vld [vmem:[%s8712_s13 + $0x8] ss:$0 sm:$0xff] }
 0x8e8   : > { %3756 = vrot.lane.b32.xlu1 %v8531_v58, %s11807_s16 }
 0x8ee   : > { %v3181_v4 = vpop.permute.xlu0 %3180  ;;  %v3113_v14 = vpop.permute.xlu2 %3112  ;;  %v3292_v34 = vld [vmem:[#allocation5 + $0xe0] sm:$0xff] }
 0x8f2   : > { %v3144_v16 = vpop.permute.xlu1 %3143 }
 0x8f6   : > { %v3229_v17 = vpop.permute.xlu2 %3228  ;;  %v3111_v46 = vpop.permute.xlu0 %3110 }
 0x8f7   : > { %3233 = vst.msk [vmem:[#allocation5 + $0xd0] sm:$0xff] %vm1471_vm0, %v3229_v17  ;;  %v3119_v18 = vsel %vm3118_vm15, %v3111_v46, %v3113_v14  ;;  %v8152_v17 = vor.u32 %v8384_v35, %v8149_v7  ;;  %v8530_v46 = vld [vmem:[%s8712_s13 + $0x1] ss:$0 sm:$0xff] }
 0x8f8   : > { %3123 = vst.msk [vmem:[#allocation5 + $0x20] sm:$0xff] %vm1471_vm0, %v3119_v18  ;;  %v8147_v18 = vld [vmem:[%s11904_s11] sm:$0xf]  ;;  %3476 = vrot.lane.b32.xlu2 %v8530_v46, %s11815_s15 }
 0x8fa   : > { %v3207_v20 = vpop.permute.xlu1 %3206 }
 0x8fb   : > { %3212 = vst.msk [vmem:[#allocation5 + $0xa0] sm:$0xff] %vm1471_vm0, %v3207_v20  ;;  %v8385_v20 = vld [vmem:[%s11904_s11 + $0x4] sm:$0xf0] }
 0x8fe   : > { %v3183_v22 = vpop.permute.xlu2 %3182  ;;  %v3227_v63 = vpop.permute.xlu0 %3226  ;;  %v3291_v31 = vld [vmem:[#allocation5 + $0xd0] sm:$0xff] }
 0x8ff   : > { %v3185_v6 = vsel %vm1646_vm4, %v3181_v4, %v3183_v22  ;;  %3232 = vst.msk [vmem:[#allocation5 + $0xc0] sm:$0xff] %vm1471_vm0, %v3227_v63  ;;  %v3280_v0 = vld [vmem:[#allocation5 + $0x20] sm:$0xff] }
 0x900   : > { %3189 = vst.msk [vmem:[#allocation5 + $0x70] sm:$0xff] %vm1471_vm0, %v3185_v6  ;;  %v8148_v6 = vor.u32 %v8385_v20, %v8147_v18 }
 0x902   : > { %v3179_v23 = vpop.permute.xlu1 %3178  ;;  %v3288_v47 = vld [vmem:[#allocation5 + $0xa0] sm:$0xff] }
 0x903   : > { %v3184_v24 = vsel %vm1646_vm4, %v3177_v12, %v3179_v23  ;;  %v8386_v23 = vld [vmem:[%s11904_s11 + $0x14] sm:$0xf] }
 0x904   : > { %3188 = vst.msk [vmem:[#allocation5 + $0x60] sm:$0xff] %vm1471_vm0, %v3184_v24  ;;  %v8157_v24 = vld [vmem:[%s11904_s11 + $0x18] sm:$0xf0] }
 0x905   : > { %v8160_v19 = vor.u32 %v8386_v23, %v8157_v24 }
 0x906   : > { %v3267_v26 = vpop.permute.xlu2 %3266  ;;  %v3146_v27 = vpop.permute.xlu0 %3145  ;;  %v3290_v41 = vld [vmem:[#allocation5 + $0xc0] sm:$0xff] }
 0x907   : > { %3272 = vst.msk [vmem:[#allocation5 + $0x100] sm:$0xff] %vm1471_vm0, %v3267_v26  ;;  %v3152_v28 = vsel %vm3151_vm11, %v3144_v16, %v3146_v27  ;;  %v3302_v37 = vpack.c.bf16 %v3291_v31, %v3290_v41  ;;  %v3285_v60 = vld [vmem:[#allocation5 + $0x70] sm:$0xff]  ;;  %v8387_v27 = vld [vmem:[%s11904_s11 + $0x14] sm:$0xf0] }
 0x908   : > { %3156 = vst.msk [vmem:[#allocation5 + $0x40] sm:$0xff] %vm1471_vm0, %v3152_v28  ;;  %v8155_v26 = vld [vmem:[%s11904_s11 + $0x10] sm:$0xf]  ;;  %s11839_s11 = smov 5  }
 0x909   : > { %v8156_v28 = vor.u32 %v8387_v27, %v8155_v26 }
 0x90a   : > { %v3249_v29 = vpop.permute.xlu1 %3248 }
 0x90b   : > { %3253 = vst.msk [vmem:[#allocation5 + $0xf0] sm:$0xff] %vm1471_vm0, %v3249_v29  ;;  %v3284_v3 = vld [vmem:[#allocation5 + $0x60] sm:$0xff] }
 0x90c   : > { %v3299_v45 = vpack.c.bf16 %v3285_v60, %v3284_v3 }
 0x90e   : > { %v3209_v52 = vpop.permute.xlu0 %3208  ;;  %v3080_v42 = vpop.permute.xlu2 %3079  ;;  %v3294_v12 = vld [vmem:[#allocation5 + $0x100] sm:$0xff] }
 0x90f   : > { %3213 = vst.msk [vmem:[#allocation5 + $0xb0] sm:$0xff] %vm1471_vm0, %v3209_v52  ;;  %v3282_v56 = vld [vmem:[#allocation5 + $0x40] sm:$0xff] }
 0x912   : > { %v3115_v33 = vpop.permute.xlu1 %3114  ;;  %v3293_v36 = vld [vmem:[#allocation5 + $0xf0] sm:$0xff] }
 0x913   : > { %v3303_v40 = vpack.c.bf16 %v3293_v36, %v3292_v34 }
 0x915   : > { %3353 = vmatpush.bf16.msra.mxu0 %v3303_v40 }
 0x916   : > { %v3078_v43 = vpop.permute.xlu0 %3077  ;;  %v3289_v48 = vld [vmem:[#allocation5 + $0xb0] sm:$0xff]  ;;  %v3322_v34 = vpop.permute.xlu2 %3321 }
 0x917   : > { %v3086_v39 = vsel %vm3085_vm12, %v3078_v43, %v3080_v42  ;;  %v3301_v54 = vpack.c.bf16 %v3289_v48, %v3288_v47 }
 0x918   : > { %3090 = vst.msk [vmem:[#allocation5] sm:$0xff] %vm1471_vm0, %v3086_v39 }
 0x919   : > { %3354 = vmatpush.bf16.msra.mxu0 %v3302_v37 }
 0x91a   : > { %v3150_v49 = vpop.permute.xlu1 %3149 }
 0x91b   : > { %v3153_v30 = vsel %vm3151_vm11, %v3148_v13, %v3150_v49 }
 0x91c   : > { %3157 = vst.msk [vmem:[#allocation5 + $0x50] sm:$0xff] %vm1471_vm0, %v3153_v30 }
 0x91d   : > { %3355 = vmatpush.bf16.msra.mxu0 %v3301_v54 }
 0x91e   : > { %v3117_v51 = vpop.permute.xlu0 %3116  ;;  %v3317_v40 = vpop.permute.xlu2 %3316 }
 0x91f   : > { %v3120_v57 = vsel %vm3118_vm15, %v3115_v33, %v3117_v51  ;;  %v3278_v21 = vld [vmem:[#allocation5] sm:$0xff] }
 0x920   : > { %3124 = vst.msk [vmem:[#allocation5 + $0x30] sm:$0xff] %vm1471_vm0, %v3120_v57 }
 0x921   : > { %3356 = vmatpush.bf16.msra.mxu0 %v3300_v44 }
 0x922   : > { %v3269_v59 = vpop.permute.xlu1 %3268 }
 0x923   : > { %3273 = vst.msk [vmem:[#allocation5 + $0x110] sm:$0xff] %vm1471_vm0, %v3269_v59  ;;  %v3283_v61 = vld [vmem:[#allocation5 + $0x50] sm:$0xff] }
 0x924   : > { %v3298_v62 = vpack.c.bf16 %v3283_v61, %v3282_v56 }
 0x925   : > { %3357 = vmatpush.bf16.msra.mxu0 %v3299_v45 }
 0x926   : > { %v3084_v9 = vpop.permute.xlu0 %3083  ;;  %v9641_v43 = vpop.permute.xlu2 %3688 }
 0x927   : > { %v3281_v2 = vld [vmem:[#allocation5 + $0x30] sm:$0xff] }
 0x928   : > { %v3297_v14 = vpack.c.bf16 %v3281_v2, %v3280_v0 }
 0x929   : > { %3358 = vmatpush.bf16.msra.mxu0 %v3298_v62 }
 0x92a   : > { %v3082_v11 = vpop.permute.xlu1 %3081  ;;  %v3295_v13 = vld [vmem:[#allocation5 + $0x110] sm:$0xff] }
 0x92b   : > { %v3087_v4 = vsel %vm3085_vm12, %v3082_v11, %v3084_v9  ;;  %v3304_v16 = vpack.c.bf16 %v3295_v13, %v3294_v12 }
 0x92c   : > { %3091 = vst.msk [vmem:[#allocation5 + $0x10] sm:$0xff] %vm1471_vm0, %v3087_v4 }
 0x92d   : > { %3359 = vmatpush.bf16.msra.mxu0 %v3297_v14  ;;  %3379 = vmatpush.bf16.msra.mxu2 %v3304_v16 }
 0x92e   : > { %v3312_v29 = vpop.permute.xlu0 %3311 }
 0x930   : > { %8161 = vmatmul.msk.bf16.vlgmr.msra.gmra.mxu2 %vm1496_vm1, %v8152_v17 }
 0x932   : > { %v9623_v32 = vpop.permute.xlu1 %3326 }
 0x933   : > { %v3279_v22 = vld [vmem:[#allocation5 + $0x10] sm:$0xff] }
 0x934   : > { %v3296_v63 = vpack.c.bf16 %v3279_v22, %v3278_v21 }
 0x936   : > { %3360 = vmatpush.bf16.msra.mxu0 %v3296_v63  ;;  %v9625_v52 = vpop.permute.xlu0 %3592 }
 0x937   : > { %v3599_v33 = vmul.f32 %v9538_v1, %v9625_v52 }
 0x939   : > { %3361 = vmatmul.bf16.vlgmr.msra.gmra.mxu0 %v8148_v6  ;;  %3619 = vrot.lane.b32.xlu0 %v3599_v33, %s11819_s7 }
 0x93a   : > { %3623 = vrot.lane.b32.xlu1 %v3599_v33, %s11819_s7  ;;  %v9631_v36 = vpop.permute.xlu1 %3722 }
 0x93e   : > { %v9651_v37 = vpop.permute.xlu0 %3654 }
 0x940   : > { %8162 = vmatmul.msk.bf16.gmra.mxu2 %vm1496_vm1, %v8160_v19 }
 0x941   : > { %3611 = vrot.lane.b32.xlu0 %v3599_v33, %s11819_s7 }
 0x942   : > { %3615 = vrot.lane.b32.xlu1 %v3599_v33, %s11819_s7  ;;  %v9635_v41 = vpop.permute.xlu1 %3534 }
 0x943   : > { %v3541_v42 = vmul.f32 %v9538_v1, %v9635_v41 }
 0x946   : > { %v9655_v48 = vpop.permute.xlu0 %3418 }
 0x947   : > { %v9659_v25 = vmul.f32 %v9538_v1, %v9655_v48 }
 0x949   : > { %3366 = vmatmul.bf16.gmra.mxu0 %v8156_v28  ;;  %3561 = vrot.lane.b32.xlu0 %v3541_v42, %s11809_s23 }
 0x94a   : > { %3565 = vrot.lane.b32.xlu1 %v3541_v42, %s11809_s23 }
 0x951   : > { %3553 = vrot.lane.b32.xlu0 %v3541_v42, %s11809_s23 }
 0x952   : > { %3557 = vrot.lane.b32.xlu1 %v3541_v42, %s11809_s23  ;;  %v9645_v31 = vpop.permute.xlu2 %3476 }
 0x953   : > { %v3483_v39 = vmul.f32 %v9538_v1, %v9645_v31 }
 0x959   : > { %3503 = vrot.lane.b32.xlu0 %v3483_v39, %s11813_s18 }
 0x95a   : > { %3507 = vrot.lane.b32.xlu1 %v3483_v39, %s11813_s18  ;;  %v3757_v6 = vpop.permute.xlu1 %3756 }
 0x961   : > { %3495 = vrot.lane.b32.xlu0 %v3483_v39, %s11813_s18 }
 0x962   : > { %3499 = vrot.lane.b32.xlu1 %v3483_v39, %s11813_s18 }
 0x969   : > { %3445 = vrot.lane.b32.xlu0 %v9659_v25, %s11807_s16 }
 0x96a   : > { %3449 = vrot.lane.b32.xlu1 %v9659_v25, %s11807_s16 }
 0x971   : > { %3437 = vrot.lane.b32.xlu0 %v9659_v25, %s11807_s16  ;;  %s11905_s16 = smov 127  }
 0x9b3   : > { %v3381_v49 = vpop.f32.mrf.mxu2 }
 0x9b6   : > { %v3362_v47 = vpop.f32.mrf.mxu0 }
 0x9b7   : > { %v3363_v30 = vadd.f32 %v3362_v47, %v3312_v29  ;;  %v9741_v29 = vpop.permute.xlu0 %3619 }
 0x9b9   : > { %v3382_v54 = vadd.f32 %v3381_v49, %v3363_v30 }
 0x9bb   : > { %vm3391_vm13 = vcmp.gt.f32.partialorder %v3382_v54, 0.0  ;;  %v3395_v38 = vmul.f32 0.05, %v3382_v54  ;;  %v3383_v51 = vpop.f32.mrf.mxu2 }
 0x9bd   : > { %v9667_v53 = vsel %vm3391_vm13, %v3382_v54, %v3395_v38  ;;  %vm3899_vm13 = vcmask 261120  }
 0x9be   : > { %3403 = vst.msk [vmem:[#allocation3 + $0x8] sm:$0xff] %vm1471_vm0, %v9667_v53  ;;  %v3364_v1 = vpop.f32.mrf.mxu0 }
 0x9bf   : > { %v3365_v57 = vadd.f32 %v3364_v1, %v3317_v40  ;;  %v9749_v40 = vpop.permute.xlu1 %3623  ;;  %v3612_v42 = vpop.permute.xlu0 %3611 }
 0x9c1   : > { %v3384_v44 = vadd.f32 %v3383_v51, %v3365_v57 }
 0x9c3   : > { %vm3392_vm9 = vcmp.gt.f32.partialorder %v3384_v44, 0.0  ;;  %v3396_v3 = vmul.f32 0.05, %v3384_v44  ;;  %v3386_v59 = vpop.f32.mrf.mxu2 }
 0x9c5   : > { %v9671_v60 = vsel %vm3392_vm9, %v3384_v44, %v3396_v3  ;;  %v9673_v45 = vld [vmem:[#allocation3 + $0x8] sm:$0xff] }
 0x9c6   : > { %3404 = vst.msk [vmem:[#allocation3 + $0x20] sm:$0xff] %vm1471_vm0, %v9671_v60  ;;  %v3367_v61 = vpop.f32.mrf.mxu0  ;;  %v3725_v56 = vmul.f32 %v9631_v36, %v9673_v45  ;;  %v3596_v9 = vmul.f32 %v9673_v45, %v9625_v52  ;;  %v3691_v17 = vmul.f32 %v9673_v45, %v9641_v43  ;;  %v3538_v21 = vmul.f32 %v9673_v45, %v9635_v41 }
 0x9c7   : > { %v3368_v62 = vadd.f32 %v3367_v61, %v3322_v34  ;;  %3643 = vst.msk [vmem:[#allocation5 + $0x100] sm:$0xff] %vm1471_vm0, %v9673_v45  ;;  %v3657_v23 = vmul.f32 %v9673_v45, %v9651_v37  ;;  %v3480_v26 = vmul.f32 %v9673_v45, %v9645_v31  ;;  %v3616_v38 = vpop.permute.xlu1 %3615 }
 0x9c8   : > { %3733 = vrot.lane.b32.xlu2 %v3725_v56, %s11815_s15 }
 0x9c9   : > { %v3387_v0 = vadd.f32 %v3386_v59, %v3368_v62 }
 0x9cb   : > { %vm3393_vm10 = vcmp.gt.f32.partialorder %v3387_v0, 0.0  ;;  %v3397_v2 = vmul.f32 0.05, %v3387_v0  ;;  %v3388_v8 = vpop.f32.mrf.mxu2 }
 0x9cd   : > { %v9682_v35 = vsel %vm3393_vm10, %v3387_v0, %v3397_v2  ;;  %v9684_v7 = vld [vmem:[#allocation3 + $0x20] sm:$0xff] }
 0x9ce   : > { %3405 = vst.msk [vmem:[#allocation3 + $0x38] sm:$0xff] %vm1471_vm0, %v9682_v35  ;;  %v3369_v50 = vpop.f32.mrf.mxu0  ;;  %v3726_v11 = vmul.f32 %v9631_v36, %v9684_v7  ;;  %v3598_v12 = vmul.f32 %v9684_v7, %v9625_v52  ;;  %v3692_v46 = vmul.f32 %v9684_v7, %v9641_v43  ;;  %v3540_v18 = vmul.f32 %v9684_v7, %v9635_v41 }
 0x9cf   : > { %v3370_v13 = vadd.f32 %v3369_v50, %v9623_v32  ;;  %3644 = vst.msk [vmem:[#allocation5 + $0x110] sm:$0xff] %vm1471_vm0, %v9684_v7  ;;  %v3658_v22 = vmul.f32 %v9684_v7, %v9651_v37  ;;  %v3482_v63 = vmul.f32 %v9684_v7, %v9645_v31  ;;  %v3760_v24 = vmul.f32 %v3757_v6, %v9684_v7 }
 0x9d0   : > { %3613 = vrot.lane.b32.xlu2 %v3596_v9, %s11819_s7  ;;  %3735 = vrot.lane.b32.xlu1 %v3726_v11, %s11815_s15  ;;  %v3759_v32 = vmul.f32 %v3757_v6, %v9673_v45  ;;  %v3424_v51 = vmul.f32 %v9684_v7, %v9655_v48 }
 0x9d1   : > { %v3389_v58 = vadd.f32 %v3388_v8, %v3370_v13  ;;  %3617 = vrot.lane.b32.xlu0 %v3598_v12, %s11819_s7 }
 0x9d3   : > { %vm3394_vm14 = vcmp.gt.f32.partialorder %v3389_v58, 0.0  ;;  %v3398_v4 = vmul.f32 0.05, %v3389_v58 }
 0x9d5   : > { %v9700_v14 = vsel %vm3394_vm14, %v3389_v58, %v3398_v4  ;;  %v9702_v16 = vld [vmem:[#allocation3 + $0x38] sm:$0xff]  ;;  %v3422_v4 = vmul.f32 %v9673_v45, %v9655_v48 }
 0x9d6   : > { %3406 = vst.msk [vmem:[#allocation3 + $0x50] sm:$0xff] %vm1471_vm0, %v9700_v14  ;;  %v3727_v39 = vmul.f32 %v9631_v36, %v9702_v16  ;;  %v3600_v30 = vmul.f32 %v9702_v16, %v9625_v52  ;;  %v3693_v1 = vmul.f32 %v9702_v16, %v9641_v43  ;;  %v3542_v59 = vmul.f32 %v9702_v16, %v9635_v41 }
 0x9d7   : > { %3645 = vst.msk [vmem:[#allocation5 + $0x120] sm:$0xff] %vm1471_vm0, %v9702_v16 }
 0x9d8   : > { %3699 = vrot.lane.b32.xlu2 %v3691_v17, %s11817_s1  ;;  %3701 = vrot.lane.b32.xlu1 %v3692_v46, %s11817_s1 }
 0x9d9   : > { %3559 = vrot.lane.b32.xlu0 %v3540_v18, %s11809_s23 }
 0x9dd   : > { %v3588_v20 = vld [vmem:[#allocation3 + $0x50] sm:$0xff] }
 0x9de   : > { %3646 = vst.msk [vmem:[#allocation5 + $0x130] sm:$0xff] %vm1471_vm0, %v3588_v20  ;;  %v3602_v19 = vmul.f32 %v9625_v52, %v3588_v20  ;;  %v3728_v27 = vmul.f32 %v9631_v36, %v3588_v20  ;;  %v3544_v28 = vmul.f32 %v3588_v20, %v9635_v41  ;;  %v3694_v33 = vmul.f32 %v9641_v43, %v3588_v20  ;;  %v9762_v36 = vpop.permute.xlu0 %3561  ;;  %v9773_v52 = vpop.permute.xlu1 %3565 }
 0x9df   : > { %v3486_v34 = vmul.f32 %v3588_v20, %v9645_v31  ;;  %v3660_v49 = vmul.f32 %v9651_v37, %v3588_v20  ;;  %v3428_v47 = vmul.f32 %v3588_v20, %v9655_v48  ;;  %v3762_v54 = vmul.f32 %v3757_v6, %v3588_v20 }
 0x9e0   : > { %3555 = vrot.lane.b32.xlu2 %v3538_v21, %s11809_s23  ;;  %3667 = vrot.lane.b32.xlu1 %v3658_v22, %s11905_s16  ;;  %v3659_v43 = vmul.f32 %v9702_v16, %v9651_v37  ;;  %v3484_v41 = vmul.f32 %v9702_v16, %v9645_v31  ;;  %v3761_v37 = vmul.f32 %v3757_v6, %v9702_v16 }
 0x9e1   : > { %3501 = vrot.lane.b32.xlu0 %v3482_v63, %s11813_s18  ;;  %v3426_v31 = vmul.f32 %v9702_v16, %v9655_v48 }
 0x9e6   : > { %v3554_v44 = vpop.permute.xlu0 %3553  ;;  %v3558_v61 = vpop.permute.xlu1 %3557 }
 0x9e8   : > { %3665 = vrot.lane.b32.xlu2 %v3657_v23, %s11905_s16  ;;  %3769 = vrot.lane.b32.xlu1 %v3760_v24, %s11811_s0 }
 0x9e9   : > { %3625 = vrot.lane.b32.xlu0 %v3602_v19, %s11819_s7 }
 0x9ee   : > { %v9779_v56 = vpop.permute.xlu0 %3503  ;;  %v9785_v62 = vpop.permute.xlu1 %3507 }
 0x9f0   : > { %3497 = vrot.lane.b32.xlu2 %v3480_v26, %s11813_s18  ;;  %3739 = vrot.lane.b32.xlu1 %v3728_v27, %s11815_s15 }
 0x9f1   : > { %3567 = vrot.lane.b32.xlu0 %v3544_v28, %s11809_s23  ;;  %s11906_s23 = sld [smem:[#allocation20_spill]] }
 0x9f6   : > { %v3496_v0 = vpop.permute.xlu0 %3495  ;;  %v3500_v50 = vpop.permute.xlu1 %3499 }
 0x9f7   : > { %v3847_v57 = vld [vmem:[%s11906_s23 + $0x10] sm:$0xff]  ;;  %v3846_v3 = vld [vmem:[%s11906_s23 + $0x8] sm:$0xff]  ;;  %v3845_v20 = vld [vmem:[%s11906_s23] sm:$0xff] }
 0x9f8   : > { %3767 = vrot.lane.b32.xlu2 %v3759_v32, %s11811_s0  ;;  %3705 = vrot.lane.b32.xlu1 %v3694_v33, %s11817_s1  ;;  %s11907_s0 = smov 9   ;;  %v3848_v6 = vld [vmem:[%s11906_s23 + $0x18] sm:$0xff] }
 0x9f9   : > { %3509 = vrot.lane.b32.xlu0 %v3486_v34, %s11813_s18  ;;  %s11908_s18 = smov 119  }
 0x9fe   : > { %v9793_v8 = vpop.permute.xlu0 %3445  ;;  %v9800_v11 = vpop.permute.xlu1 %3449 }
 0xa00   : > { %3737 = vrot.lane.b32.xlu2 %v3727_v39, %s11815_s15  ;;  %3671 = vrot.lane.b32.xlu1 %v3660_v49, %s11905_s16  ;;  %s11909_s15 = smov 7  }
 0xa01   : > { %3451 = vrot.lane.b32.xlu0 %v3428_v47, %s11907_s0 }
 0xa06   : > { %v9802_v12 = vpop.permute.xlu0 %3437 }
 0xa08   : > { %3621 = vrot.lane.b32.xlu2 %v3600_v30, %s11819_s7  ;;  %3773 = vrot.lane.b32.xlu1 %v3762_v54, %s11908_s18  ;;  %s11911_s7 = sld [smem:[#allocation19_spill]] }
 0xa09   : > { %3443 = vrot.lane.b32.xlu0 %v3424_v51, %s11907_s0 }
 0xa10   : > { %3703 = vrot.lane.b32.xlu2 %v3693_v1, %s11817_s1  ;;  %3441 = vrot.lane.b32.xlu1 %v9659_v25, %s11907_s0  ;;  %s11910_s1 = smov 8  }
 0xa11   : > { %3861 = vperm.xlu0 %8515, %v3847_v57  }
 0xa18   : > { %3563 = vrot.lane.b32.xlu2 %v3542_v59, %s11909_s15  ;;  %3856 = vperm.xlu1 %8513, %v3846_v3  }
 0xa20   : > { %3669 = vrot.lane.b32.xlu2 %v3659_v43, %s11905_s16 }
 0xa22   : > { %v3734_v25 = vpop.permute.xlu2 %3733 }
 0xa23   : > { %3745 = vst.msk [vmem:[#allocation5 + $0x1c0] sm:$0xff] %vm1471_vm0, %v3734_v25 }
 0xa28   : > { %3505 = vrot.lane.b32.xlu2 %v3484_v41, %s11910_s1 }
 0xa2a   : > { %v3614_v2 = vpop.permute.xlu2 %3613 }
 0xa2b   : > { %v3627_v7 = vsel %vm1646_vm4, %v3612_v42, %v3614_v2 }
 0xa2c   : > { %3635 = vst.msk [vmem:[#allocation5 + $0xc0] sm:$0xff] %vm1471_vm0, %v3627_v7 }
 0xa30   : > { %3771 = vrot.lane.b32.xlu2 %v3761_v37, %s11908_s18 }
 0xa32   : > { %v3700_v9 = vpop.permute.xlu2 %3699 }
 0xa33   : > { %3711 = vst.msk [vmem:[#allocation5 + $0x180] sm:$0xff] %vm1471_vm0, %v3700_v9  ;;  %v3803_v25 = vld [vmem:[#allocation5 + $0xc0] sm:$0xff] }
 0xa38   : > { %3447 = vrot.lane.b32.xlu2 %v3426_v31, %s11907_s0 }
 0xa3a   : > { %v3556_v13 = vpop.permute.xlu2 %3555 }
 0xa3b   : > { %v3569_v58 = vsel %vm3151_vm11, %v3554_v44, %v3556_v13 }
 0xa3c   : > { %3577 = vst.msk [vmem:[#allocation5 + $0x80] sm:$0xff] %vm1471_vm0, %v3569_v58  ;;  %v3815_v58 = vld [vmem:[#allocation5 + $0x180] sm:$0xff] }
 0xa40   : > { %3439 = vrot.lane.b32.xlu2 %v3422_v4, %s11907_s0 }
 0xa42   : > { %v3666_v17 = vpop.permute.xlu2 %3665  ;;  %v3736_v46 = vpop.permute.xlu1 %3735 }
 0xa43   : > { %3677 = vst.msk [vmem:[#allocation5 + $0x140] sm:$0xff] %vm1471_vm0, %v3666_v17  ;;  %v3618_v16 = vpop.permute.xlu0 %3617 }
 0xa44   : > { %3746 = vst.msk [vmem:[#allocation5 + $0x1d0] sm:$0xff] %vm1471_vm0, %v3736_v46  ;;  %v3628_v18 = vsel %vm1646_vm4, %v3616_v38, %v3618_v16 }
 0xa45   : > { %3636 = vst.msk [vmem:[#allocation5 + $0xd0] sm:$0xff] %vm1471_vm0, %v3628_v18 }
 0xa48   : > { %3851 = vperm.xlu2 %8514, %v3845_v20  }
 0xa4a   : > { %v3498_v21 = vpop.permute.xlu2 %3497  ;;  %v3702_v22 = vpop.permute.xlu1 %3701 }
 0xa4b   : > { %v3511_v48 = vsel %vm3118_vm15, %v3496_v0, %v3498_v21  ;;  %3712 = vst.msk [vmem:[#allocation5 + $0x190] sm:$0xff] %vm1471_vm0, %v3702_v22  ;;  %v3560_v45 = vpop.permute.xlu0 %3559  ;;  %v3820_v59 = vld [vmem:[#allocation5 + $0x1d0] sm:$0xff] }
 0xa4c   : > { %3519 = vst.msk [vmem:[#allocation5 + $0x40] sm:$0xff] %vm1471_vm0, %v3511_v48  ;;  %v3570_v63 = vsel %vm3151_vm11, %v3558_v61, %v3560_v45  ;;  %v3819_v61 = vld [vmem:[#allocation5 + $0x1c0] sm:$0xff] }
 0xa4d   : > { %3578 = vst.msk [vmem:[#allocation5 + $0x90] sm:$0xff] %vm1471_vm0, %v3570_v63  ;;  %v3841_v43 = vpack.c.bf16 %v3820_v59, %v3819_v61 }
 0xa50   : > { %3866 = vperm.xlu2 %8514, %v3848_v6  }
 0xa52   : > { %v3768_v23 = vpop.permute.xlu2 %3767  ;;  %v3668_v24 = vpop.permute.xlu1 %3667  ;;  %v3816_v13 = vld [vmem:[#allocation5 + $0x190] sm:$0xff] }
 0xa53   : > { %3779 = vst.msk [vmem:[#allocation5 + $0x200] sm:$0xff] %vm1471_vm0, %v3768_v23  ;;  %v3502_v19 = vpop.permute.xlu0 %3501  ;;  %v3839_v4 = vpack.c.bf16 %v3816_v13, %v3815_v58  ;;  %v8391_v13 = vld [vmem:[%s11911_s7 + $0x1c] sm:$0xf]  ;;  %v8179_v58 = vld [vmem:[%s11911_s7 + $0x24] sm:$0xf0] }
 0xa54   : > { %3678 = vst.msk [vmem:[#allocation5 + $0x150] sm:$0xff] %vm1471_vm0, %v3668_v24  ;;  %v3512_v26 = vsel %vm3118_vm15, %v3500_v50, %v3502_v19  ;;  %v3800_v20 = vld [vmem:[#allocation5 + $0x90] sm:$0xff] }
 0xa55   : > { %3520 = vst.msk [vmem:[#allocation5 + $0x50] sm:$0xff] %vm1471_vm0, %v3512_v26 }
 0xa5a   : > { %v3738_v27 = vpop.permute.xlu2 %3737  ;;  %v3770_v28 = vpop.permute.xlu1 %3769 }
 0xa5b   : > { %3747 = vst.msk [vmem:[#allocation5 + $0x1e0] sm:$0xff] %vm1471_vm0, %v3738_v27  ;;  %v3626_v32 = vpop.permute.xlu0 %3625  ;;  %v3812_v26 = vld [vmem:[#allocation5 + $0x150] sm:$0xff]  ;;  %v3811_v27 = vld [vmem:[#allocation5 + $0x140] sm:$0xff] }
 0xa5c   : > { %3780 = vst.msk [vmem:[#allocation5 + $0x210] sm:$0xff] %vm1471_vm0, %v3770_v28  ;;  %v3630_v33 = vsel %vm1646_vm4, %v9749_v40, %v3626_v32  ;;  %v3837_v28 = vpack.c.bf16 %v3812_v26, %v3811_v27  ;;  %v3810_v32 = vld [vmem:[#allocation5 + $0x130] sm:$0xff]  ;;  %v3964_v26 = vld [vmem:[%s11912_s3 + $0x8] sm:$0xff]  ;;  %v3963_v27 = vld [vmem:[%s11912_s3] sm:$0xff] }
 0xa5d   : > { %3638 = vst.msk [vmem:[#allocation5 + $0xf0] sm:$0xff] %vm1471_vm0, %v3630_v33 }
 0xa62   : > { %v3622_v34 = vpop.permute.xlu2 %3621  ;;  %v3740_v42 = vpop.permute.xlu1 %3739  ;;  %v3821_v40 = vld [vmem:[#allocation5 + $0x1e0] sm:$0xff] }
 0xa63   : > { %v3629_v39 = vsel %vm1646_vm4, %v9741_v29, %v3622_v34  ;;  %3748 = vst.msk [vmem:[#allocation5 + $0x1f0] sm:$0xff] %vm1471_vm0, %v3740_v42  ;;  %v3568_v49 = vpop.permute.xlu0 %3567  ;;  %v3809_v34 = vld [vmem:[#allocation5 + $0x120] sm:$0xff] }
 0xa64   : > { %3637 = vst.msk [vmem:[#allocation5 + $0xe0] sm:$0xff] %vm1471_vm0, %v3629_v39  ;;  %v3572_v47 = vsel %vm3151_vm11, %v9773_v52, %v3568_v49  ;;  %v3806_v29 = vld [vmem:[#allocation5 + $0xf0] sm:$0xff] }
 0xa65   : > { %3580 = vst.msk [vmem:[#allocation5 + $0xb0] sm:$0xff] %vm1471_vm0, %v3572_v47  ;;  %v3804_v52 = vld [vmem:[#allocation5 + $0xd0] sm:$0xff] }
 0xa66   : > { %v3833_v0 = vpack.c.bf16 %v3804_v52, %v3803_v25  ;;  %v3808_v47 = vld [vmem:[#allocation5 + $0x110] sm:$0xff]  ;;  %v8173_v25 = vld [vmem:[%s11911_s7 + $0x8] sm:$0xf] }
 0xa6a   : > { %v3704_v30 = vpop.permute.xlu2 %3703  ;;  %v3706_v54 = vpop.permute.xlu1 %3705  ;;  %v3822_v38 = vld [vmem:[#allocation5 + $0x1f0] sm:$0xff] }
 0xa6b   : > { %3713 = vst.msk [vmem:[#allocation5 + $0x1a0] sm:$0xff] %vm1471_vm0, %v3704_v30  ;;  %v3510_v51 = vpop.permute.xlu0 %3509  ;;  %v3842_v1 = vpack.c.bf16 %v3822_v38, %v3821_v40  ;;  %v3805_v57 = vld [vmem:[#allocation5 + $0xe0] sm:$0xff]  ;;  %v3796_v30 = vld [vmem:[#allocation5 + $0x50] sm:$0xff] }
 0xa6c   : > { %3714 = vst.msk [vmem:[#allocation5 + $0x1b0] sm:$0xff] %vm1471_vm0, %v3706_v54  ;;  %v3514_v44 = vsel %vm3118_vm15, %v9785_v62, %v3510_v51  ;;  %v3834_v3 = vpack.c.bf16 %v3806_v29, %v3805_v57  ;;  %v3802_v16 = vld [vmem:[#allocation5 + $0xb0] sm:$0xff]  ;;  %v8388_v54 = vld [vmem:[%s11911_s7 + $0x4] sm:$0xf] }
 0xa6d   : > { %3522 = vst.msk [vmem:[#allocation5 + $0x70] sm:$0xff] %vm1471_vm0, %v3514_v44  ;;  %3925 = vmatpush.bf16.msrb.mxu2 %v3842_v1  ;;  %v8167_v40 = vld [vmem:[%s11911_s7 + $0xc] sm:$0xf0]  ;;  %v3807_v38 = vld [vmem:[#allocation5 + $0x100] sm:$0xff] }
 0xa6e   : > { %3906 = vmatpush.bf16.msrb.mxu1 %v3834_v3  ;;  %v3835_v51 = vpack.c.bf16 %v3808_v47, %v3807_v38  ;;  %v3795_v1 = vld [vmem:[#allocation5 + $0x40] sm:$0xff]  ;;  %v8170_v29 = vor.u32 %v8388_v54, %v8167_v40 }
 0xa6f   : > { %v3829_v57 = vpack.c.bf16 %v3796_v30, %v3795_v1 }
 0xa71   : > { %3926 = vmatpush.bf16.msrb.mxu2 %v3841_v43  ;;  %v3824_v43 = vld [vmem:[#allocation5 + $0x210] sm:$0xff] }
 0xa72   : > { %v3564_v41 = vpop.permute.xlu2 %3563  ;;  %v3672_v2 = vpop.permute.xlu1 %3671  ;;  %3907 = vmatpush.bf16.msrb.mxu1 %v3833_v0  ;;  %v3817_v7 = vld [vmem:[#allocation5 + $0x1a0] sm:$0xff]  ;;  %v8390_v0 = vld [vmem:[%s11911_s7 + $0x10] sm:$0xf0] }
 0xa73   : > { %v3571_v37 = vsel %vm3151_vm11, %v9762_v36, %v3564_v41  ;;  %3680 = vst.msk [vmem:[#allocation5 + $0x170] sm:$0xff] %vm1471_vm0, %v3672_v2  ;;  %v3452_v62 = vpop.permute.xlu0 %3451  ;;  %v3818_v50 = vld [vmem:[#allocation5 + $0x1b0] sm:$0xff]  ;;  %v3823_v41 = vld [vmem:[#allocation5 + $0x200] sm:$0xff] }
 0xa74   : > { %3579 = vst.msk [vmem:[#allocation5 + $0xa0] sm:$0xff] %vm1471_vm0, %v3571_v37  ;;  %v3456_v9 = vsel %vm3085_vm12, %v9800_v11, %v3452_v62  ;;  %v3840_v31 = vpack.c.bf16 %v3818_v50, %v3817_v7  ;;  %v3799_v11 = vld [vmem:[#allocation5 + $0x80] sm:$0xff]  ;;  %v3798_v39 = vld [vmem:[#allocation5 + $0x70] sm:$0xff]  ;;  %v3843_v2 = vpack.c.bf16 %v3824_v43, %v3823_v41  ;;  %v8174_v7 = vor.u32 %v8390_v0, %v8173_v25  ;;  %v3970_v37 = vld [vmem:[%s11912_s3 + $0x38] sm:$0xff] }
 0xa75   : > { %3464 = vst.msk [vmem:[#allocation5 + $0x30] sm:$0xff] %vm1471_vm0, %v3456_v9  ;;  %v3831_v21 = vpack.c.bf16 %v3800_v20, %v3799_v11  ;;  %3991 = vmatpush.msrb.mxu0 %v3970_v37  ;;  %v8185_v20 = vld [vmem:[%s11911_s7 + $0x20] sm:$0xf]  ;;  %v8393_v11 = vld [vmem:[%s11911_s7 + $0x28] sm:$0xf0] }
 0xa76   : > { %3927 = vmatpush.bf16.msrb.mxu2 %v3840_v31 }
 0xa7a   : > { %3928 = vmatpush.bf16.msrb.mxu2 %v3839_v4  ;;  %v3670_v17 = vpop.permute.xlu2 %3669  ;;  %v3774_v46 = vpop.permute.xlu1 %3773  ;;  %v3814_v6 = vld [vmem:[#allocation5 + $0x170] sm:$0xff]  ;;  %v8182_v4 = vor.u32 %v8391_v13, %v8179_v58 }
 0xa7b   : > { %3679 = vst.msk [vmem:[#allocation5 + $0x160] sm:$0xff] %vm1471_vm0, %v3670_v17  ;;  %v3801_v36 = vld [vmem:[#allocation5 + $0xa0] sm:$0xff]  ;;  %v3444_v22 = vpop.permute.xlu0 %3443 }
 0xa7c   : > { %3782 = vst.msk [vmem:[#allocation5 + $0x230] sm:$0xff] %vm1471_vm0, %v3774_v46  ;;  %v3832_v18 = vpack.c.bf16 %v3802_v16, %v3801_v36  ;;  %v3794_v9 = vld [vmem:[#allocation5 + $0x30] sm:$0xff]  ;;  %v8165_v17 = vld [vmem:[%s11911_s7] sm:$0xf]  ;;  %v8389_v46 = vld [vmem:[%s11911_s7 + $0x8] sm:$0xf0] }
 0xa7e   : > { %3908 = vmatpush.bf16.msrb.mxu1 %v3832_v18  ;;  %v8166_v18 = vor.u32 %v8389_v46, %v8165_v17 }
 0xa82   : > { %v3506_v48 = vpop.permute.xlu2 %3505  ;;  %v3442_v45 = vpop.permute.xlu1 %3441  ;;  %3909 = vmatpush.bf16.msrb.mxu1 %v3831_v21  ;;  %v3813_v63 = vld [vmem:[#allocation5 + $0x160] sm:$0xff]  ;;  %v8186_v21 = vor.u32 %v8393_v11, %v8185_v20 }
 0xa83   : > { %v3513_v23 = vsel %vm3118_vm15, %v9779_v56, %v3506_v48  ;;  %v3454_v24 = vsel %vm3085_vm12, %v3442_v45, %v3444_v22  ;;  %v3838_v19 = vpack.c.bf16 %v3814_v6, %v3813_v63  ;;  %v3836_v56 = vpack.c.bf16 %v3810_v32, %v3809_v34  ;;  %v3826_v59 = vld [vmem:[#allocation5 + $0x230] sm:$0xff]  ;;  %v8177_v22 = vld [vmem:[%s11911_s7 + $0x18] sm:$0xf]  ;;  %v8392_v48 = vld [vmem:[%s11911_s7 + $0x20] sm:$0xf0]  ;;  %v3862_v1 = vpop.permute.xlu0 %3861  ;;  %s11915_s7 = sld [smem:[#allocation38_spill]] }
 0xa84   : > { %3521 = vst.msk [vmem:[#allocation5 + $0x60] sm:$0xff] %vm1471_vm0, %v3513_v23  ;;  %v8178_v45 = vor.u32 %v8392_v48, %v8177_v22  ;;  %v3969_v63 = vld [vmem:[%s11912_s3 + $0x30] sm:$0xff]  ;;  %v3968_v6 = vld [vmem:[%s11912_s3 + $0x28] sm:$0xff]  ;;  %v3967_v23 = vld [vmem:[%s11912_s3 + $0x20] sm:$0xff] }
 0xa85   : > { %3462 = vst.msk [vmem:[#allocation5 + $0x10] sm:$0xff] %vm1471_vm0, %v3454_v24  ;;  %3929 = vmatpush.bf16.msrb.mxu2 %v3838_v19  ;;  %3992 = vmatpush.msrb.mxu0 %v3969_v63  ;;  %v3966_v24 = vld [vmem:[%s11912_s3 + $0x18] sm:$0xff]  ;;  %v3965_v19 = vld [vmem:[%s11912_s3 + $0x10] sm:$0xff]  ;;  %s11913_s3 = sld [smem:[#allocation39_spill]] }
 0xa87   : > { %3993 = vmatpush.msrb.mxu0 %v3968_v6 }
 0xa89   : > { %3930 = vmatpush.bf16.msrb.mxu2 %v3837_v28  ;;  %3994 = vmatpush.msrb.mxu0 %v3967_v23 }
 0xa8a   : > { %v3772_v33 = vpop.permute.xlu2 %3771  ;;  %v3857_v47 = vpop.permute.xlu1 %3856 }
 0xa8b   : > { %3781 = vst.msk [vmem:[#allocation5 + $0x220] sm:$0xff] %vm1471_vm0, %v3772_v33  ;;  %v3797_v42 = vld [vmem:[#allocation5 + $0x60] sm:$0xff]  ;;  %3995 = vmatpush.msrb.mxu0 %v3966_v24  ;;  %v4041_v23 = vld [vmem:[%s11913_s3 + $0x8] sm:$0xff] }
 0xa8c   : > { %v3830_v49 = vpack.c.bf16 %v3798_v39, %v3797_v42  ;;  %v4040_v63 = vld [vmem:[%s11913_s3] sm:$0xff]  ;;  %s11834_s3 = smov 124  }
 0xa8d   : > { %3931 = vmatpush.bf16.msrb.mxu2 %v3836_v56  ;;  %3996 = vmatpush.msrb.mxu0 %v3965_v19 }
 0xa8e   : > { %3910 = vmatpush.bf16.msrb.mxu1 %v3830_v49 }
 0xa8f   : > { %3997 = vmatpush.msrb.mxu0 %v3964_v26  ;;  %v8532_v26 = vld [vmem:[%s11914_s5 + $0x3] ss:$0 sm:$0xff] }
 0xa91   : > { %3932 = vmatpush.bf16.msrb.mxu2 %v3835_v51  ;;  %3998 = vmatpush.msrb.mxu0 %v3963_v27  ;;  %v8533_v27 = vld [vmem:[%s11914_s5 + $0x2] ss:$0 sm:$0xff] }
 0xa92   : > { %v3448_v44 = vpop.permute.xlu2 %3447  ;;  %3911 = vmatpush.bf16.msrb.mxu1 %v3829_v57  ;;  %v3825_v3 = vld [vmem:[#allocation5 + $0x220] sm:$0xff] }
 0xa93   : > { %v3455_v52 = vsel %vm3085_vm12, %v9793_v8, %v3448_v44  ;;  %v3844_v61 = vpack.c.bf16 %v3826_v59, %v3825_v3 }
 0xa94   : > { %3463 = vst.msk [vmem:[#allocation5 + $0x20] sm:$0xff] %vm1471_vm0, %v3455_v52  ;;  %3933 = vmatmul.bf16.vlgmr.msrb.gmra.mxu2 %v8170_v29 }
 0xa95   : > { %3950 = vmatpush.bf16.msrb.mxu3 %v3844_v61 }
 0xa99   : > { %3951 = vmatpush.bf16.msrb.mxu3 %v3843_v2 }
 0xa9a   : > { %v3440_v62 = vpop.permute.xlu2 %3439 }
 0xa9b   : > { %v3453_v8 = vsel %vm3085_vm12, %v9802_v12, %v3440_v62  ;;  %v3793_v50 = vld [vmem:[#allocation5 + $0x20] sm:$0xff]  ;;  %v3792_v12 = vld [vmem:[#allocation5 + $0x10] sm:$0xff] }
 0xa9c   : > { %3461 = vst.msk [vmem:[#allocation5] sm:$0xff] %vm1471_vm0, %v3453_v8  ;;  %v3828_v31 = vpack.c.bf16 %v3794_v9, %v3793_v50  ;;  %8187 = vmatmul.msk.bf16.vlgmr.msrb.gmra.mxu3 %vm3899_vm13, %v8174_v7 }
 0xa9e   : > { %3912 = vmatpush.bf16.msrb.mxu1 %v3828_v31 }
 0xaa2   : > { %v3852_v33 = vpop.permute.xlu2 %3851 }
 0xaa3   : > { %v3791_v36 = vld [vmem:[#allocation5] sm:$0xff] }
 0xaa4   : > { %v3827_v16 = vpack.c.bf16 %v3792_v12, %v3791_v36  ;;  %3938 = vmatmul.bf16.gmra.mxu2 %v8182_v4 }
 0xaa6   : > { %3913 = vmatpush.bf16.msrb.mxu1 %v3827_v16 }
 0xaa9   : > { %3914 = vmatmul.bf16.vlgmr.msrb.gmra.mxu1 %v8166_v18 }
 0xaaa   : > { %v3867_v61 = vpop.permute.xlu2 %3866 }
 0xaac   : > { %8188 = vmatmul.msk.bf16.gmra.mxu3 %vm3899_vm13, %v8186_v21 }
 0xab9   : > { %3919 = vmatmul.bf16.gmra.mxu1 %v8178_v45 }
 0xb17   : > { %v3934_v28 = vpop.f32.mrf.mxu2 }
 0xb1f   : > { %v3953_v32 = vpop.f32.mrf.mxu3  ;;  %v3936_v49 = vpop.f32.mrf.mxu2 }
 0xb26   : > { %v3915_v34 = vpop.f32.mrf.mxu1 }
 0xb27   : > { %v3916_v56 = vadd.f32 %v3915_v34, %v3852_v33  ;;  %v3955_v30 = vpop.f32.mrf.mxu3  ;;  %v3939_v57 = vpop.f32.mrf.mxu2 }
 0xb29   : > { %v3935_v42 = vadd.f32 %v3934_v28, %v3916_v56 }
 0xb2b   : > { %v3954_v39 = vadd.f32 %v3953_v32, %v3935_v42 }
 0xb2d   : > { %8189 = vmatmul.msk.f32.vlgmr.msrb.gmra.mxu0 %vm1471_vm0, %v3954_v39 }
 0xb2e   : > { %v3917_v54 = vpop.f32.mrf.mxu1 }
 0xb2f   : > { %v3918_v40 = vadd.f32 %v3917_v54, %v3857_v47  ;;  %v3958_v3 = vpop.f32.mrf.mxu3  ;;  %v3941_v0 = vpop.f32.mrf.mxu2 }
 0xb31   : > { %v3937_v38 = vadd.f32 %v3936_v49, %v3918_v40 }
 0xb33   : > { %v3956_v51 = vadd.f32 %v3955_v30, %v3937_v38  ;;  %v4124_v38 = vld [vmem:[%s11915_s7] sm:$0xff] }
 0xb35   : > { %8190 = vmatmul.msk.f32.gmra.mxu0 %vm1471_vm0, %v3956_v51 }
 0xb36   : > { %v3920_v29 = vpop.f32.mrf.mxu1 }
 0xb37   : > { %v3921_v44 = vadd.f32 %v3920_v29, %v3862_v1  ;;  %v3960_v2 = vpop.f32.mrf.mxu3  ;;  %v8534_v1 = vld [vmem:[%s11914_s5 + $0x7] ss:$0 sm:$0xff] }
 0xb39   : > { %v3940_v59 = vadd.f32 %v3939_v57, %v3921_v44 }
 0xb3b   : > { %v3959_v52 = vadd.f32 %v3958_v3, %v3940_v59  ;;  %v4125_v3 = vld [vmem:[%s11915_s7 + $0x8] sm:$0xff] }
 0xb3d   : > { %8191 = vmatmul.msk.f32.gmra.mxu0 %vm1471_vm0, %v3959_v52  ;;  %v8535_v52 = vld [vmem:[%s11914_s5 + $0x1] ss:$0 sm:$0xff] }
 0xb3e   : > { %v3922_v43 = vpop.f32.mrf.mxu1 }
 0xb3f   : > { %v3923_v25 = vadd.f32 %v3922_v43, %v3867_v61 }
 0xb41   : > { %v3942_v41 = vadd.f32 %v3941_v0, %v3923_v25 }
 0xb43   : > { %v3961_v7 = vadd.f32 %v3960_v2, %v3942_v41  ;;  %v4126_v41 = vld [vmem:[%s11915_s7 + $0x10] sm:$0xff] }
 0xb45   : > { %8192 = vmatmul.msk.f32.gmra.mxu0 %vm1471_vm0, %v3961_v7 }
 0xbaa   : > { %v9888_v37 = vpop.f32.mrf.mxu0 }
 0xbab   : > { %v4024_v36 = vmul.f32 %v9888_v37, %v9888_v37  ;;  %v4012_v12 = vsel %vm1496_vm1, %v9888_v37, 0.0 }
 0xbad   : > { %v4028_v16 = vsel %vm1496_vm1, %v4024_v36, 0.0 }
 0xbb2   : > { %v9890_v62 = vpop.f32.mrf.mxu0 }
 0xbb3   : > { %v4015_v8 = vsel %vm1496_vm1, %v9890_v62, 0.0  ;;  %v4025_v18 = vmul.f32 %v9890_v62, %v9890_v62 }
 0xbb4   : > { %4016 = vadd.xlane.f32.xlu2 %v4015_v8 }
 0xbb5   : > { %v4031_v20 = vsel %vm1496_vm1, %v4025_v18, 0.0 }
 0xbba   : > { %v9894_v50 = vpop.f32.mrf.mxu0 }
 0xbbb   : > { %v4026_v9 = vmul.f32 %v9894_v50, %v9894_v50  ;;  %v4018_v31 = vsel %vm1496_vm1, %v9894_v50, 0.0 }
 0xbbc   : > { %4019 = vadd.xlane.f32.xlu0 %v4018_v31  ;;  %v8537_v31 = vld [vmem:[%s11914_s5 + $0x5] ss:$0 sm:$0xff] }
 0xbbd   : > { %v4034_v13 = vsel %vm1496_vm1, %v4026_v9, 0.0  ;;  %v8536_v9 = vld [vmem:[%s11914_s5] ss:$0 sm:$0xff] }
 0xbbe   : > { %4035 = vadd.xlane.f32.xlu2 %v4034_v13 }
 0xbc2   : > { %v9901_v58 = vpop.f32.mrf.mxu0 }
 0xbc3   : > { %v4021_v4 = vsel %vm1496_vm1, %v9901_v58, 0.0  ;;  %v4027_v17 = vmul.f32 %v9901_v58, %v9901_v58 }
 0xbc4   : > { %4022 = vadd.xlane.f32.xlu1 %v4021_v4 }
 0xbc5   : > { %v4037_v46 = vsel %vm1496_vm1, %v4027_v17, 0.0 }
 0xbc6   : > { %4038 = vadd.xlane.f32.xlu0 %v4037_v46  ;;  %v4127_v46 = vld [vmem:[%s11915_s7 + $0x18] sm:$0xff]  ;;  %s11918_s7 = sld [smem:[#allocation37_spill]] }
 0xbcc   : > { %4013 = vadd.xlane.f32.xlu1 %v4012_v12 }
 0xbce   : > { %4029 = vadd.xlane.f32.xlu0 %v4028_v16  ;;  %v8577_v16 = vld [vmem:[#allocation3] sm:$0xff] }
 0xbd4   : > { %4032 = vadd.xlane.f32.xlu1 %v4031_v20  ;;  %v8538_v20 = vld [vmem:[%s11914_s5 + $0x6] ss:$0 sm:$0xff] }
 0xbe2   : > { %4399 = vrot.lane.b32.xlu0 %v8533_v27, %s11824_s6  ;;  %s11827_s6 = smov 4  }
 0xbe3   : > { %4588 = vrot.lane.b32.xlu2 %v8534_v1, %s11827_s6  ;;  %s11832_s6 = smov 123  }
 0xbea   : > { %4520 = vrot.lane.b32.xlu0 %v8537_v31, %s11916_s8 }
 0xbeb   : > { %4340 = vrot.lane.b32.xlu2 %v8535_v52, %s11834_s3  ;;  %s11917_s3 = sld [smem:[#allocation36_spill]] }
 0xbed   : > { %4458 = vrot.lane.b32.xlu1 %v8532_v26, %s11905_s16  ;;  %v4206_v26 = vld [vmem:[%s11918_s7] sm:$0xff] }
 0xbf3   : > { %4281 = vrot.lane.b32.xlu2 %v8536_v9, %s11832_s6  ;;  %s11842_s6 = smov 3  }
 0xbf5   : > { %4554 = vrot.lane.b32.xlu1 %v8538_v20, %s11842_s6 }
 0xc27   : > { %v4017_v21 = vpop.xlane.xlu2 %4016 }
 0xc2f   : > { %v4020_v11 = vpop.xlane.xlu0 %4019 }
 0xc31   : > { %v4036_v45 = vpop.xlane.xlu2 %4035 }
 0xc37   : > { %v4023_v22 = vpop.xlane.xlu1 %4022 }
 0xc38   : > { %4060 = vmatpush.msra.mxu3 %v4023_v22 }
 0xc39   : > { %v4039_v48 = vpop.xlane.xlu0 %4038 }
 0xc3a   : > { %4061 = vmatpush.msra.mxu3 %v4020_v11  ;;  %4085 = vmatpush.msra.mxu1 %v4039_v48 }
 0xc3c   : > { %4062 = vmatpush.msra.mxu3 %v4017_v21  ;;  %4086 = vmatpush.msra.mxu1 %v4036_v45 }
 0xc3d   : > { %v9960_v22 = vpop.permute.xlu2 %4588 }
 0xc3f   : > { %v4014_v6 = vpop.xlane.xlu1 %4013 }
 0xc40   : > { %4063 = vmatpush.msra.mxu3 %v4014_v6 }
 0xc41   : > { %8193 = vmatmul.msk.f32.vlgmr.msra.gmra.mxu3 %vm3899_vm13, %v4040_v63  ;;  %v4030_v19 = vpop.xlane.xlu0 %4029 }
 0xc45   : > { %v9964_v48 = vpop.permute.xlu2 %4340 }
 0xc46   : > { %v4349_v45 = vmul.f32 %v8577_v16, %v9964_v48 }
 0xc47   : > { %v4033_v24 = vpop.xlane.xlu1 %4032 }
 0xc48   : > { %4087 = vmatpush.msra.mxu1 %v4033_v24 }
 0xc49   : > { %8194 = vmatmul.msk.f32.gmra.mxu3 %vm3899_vm13, %v4041_v23 }
 0xc4a   : > { %4088 = vmatpush.msra.mxu1 %v4030_v19 }
 0xc4b   : > { %8195 = vmatmul.msk.f32.vlgmr.msra.gmra.mxu1 %vm3899_vm13, %v4040_v63  ;;  %v8539_v63 = vld [vmem:[%s11914_s5 + $0x8] ss:$0 sm:$0xff]  ;;  %s11923_s5 = smov 5  }
 0xc4c   : > { %4622 = vrot.lane.b32.xlu1 %v8539_v63, %s11839_s11 }
 0xc53   : > { %8196 = vmatmul.msk.f32.gmra.mxu1 %vm3899_vm13, %v4041_v23  ;;  %v4198_v23 = vld [vmem:[%s11917_s3] sm:$0xff] }
 0xc54   : > { %v9955_v11 = vpop.permute.xlu0 %4399 }
 0xc55   : > { %v4408_v21 = vmul.f32 %v8577_v16, %v9955_v11 }
 0xc5f   : > { %v9946_v12 = vpop.permute.xlu1 %4458 }
 0xc60   : > { %v4467_v18 = vmul.f32 %v8577_v16, %v9946_v12 }
 0xc62   : > { %4489 = vrot.lane.b32.xlu2 %v4467_v18, %s11916_s8  ;;  %4485 = vrot.lane.b32.xlu0 %v4467_v18, %s11916_s8 }
 0xc6a   : > { %4481 = vrot.lane.b32.xlu2 %v4467_v18, %s11916_s8  ;;  %4477 = vrot.lane.b32.xlu0 %v4467_v18, %s11916_s8 }
 0xc72   : > { %4430 = vrot.lane.b32.xlu2 %v4408_v21, %s11842_s6  ;;  %4426 = vrot.lane.b32.xlu0 %v4408_v21, %s11842_s6 }
 0xc7a   : > { %4422 = vrot.lane.b32.xlu2 %v4408_v21, %s11842_s6  ;;  %4418 = vrot.lane.b32.xlu0 %v4408_v21, %s11842_s6 }
 0xc82   : > { %4371 = vrot.lane.b32.xlu2 %v4349_v45, %s11919_s10  ;;  %4367 = vrot.lane.b32.xlu0 %v4349_v45, %s11919_s10 }
 0xc8a   : > { %4363 = vrot.lane.b32.xlu2 %v4349_v45, %s11919_s10  ;;  %4359 = vrot.lane.b32.xlu0 %v4349_v45, %s11919_s10 }
 0xcc4   : > { %v4065_v28 = vpop.f32.mrf.mxu3 }
 0xcc5   : > { %v4071_v32 = vmul.f32 0.03125, %v4065_v28 }
 0xcc7   : > { %v4098_v33 = vmul.f32 %v4071_v32, %v4071_v32 }
 0xcc8   : > { %v4090_v34 = vpop.f32.mrf.mxu1 }
 0xcc9   : > { %v4096_v56 = vmul.f32 0.03125, %v4090_v34 }
 0xccb   : > { %v4100_v42 = vsub.f32 %v4096_v56, %v4098_v33  ;;  %v4199_v33 = vld [vmem:[%s11917_s3 + $0x8] sm:$0xff] }
 0xccc   : > { %v4068_v39 = vpop.f32.mrf.mxu3 }
 0xccd   : > { %v4102_v49 = vadd.f32 1e-05, %v4100_v42  ;;  %v4072_v47 = vmul.f32 0.03125, %v4068_v39  ;;  %v4207_v42 = vld [vmem:[%s11918_s7 + $0x8] sm:$0xff] }
 0xccf   : > { %8556 = vrsqrt.f32 %v4102_v49  ;;  %v4099_v30 = vmul.f32 %v4072_v47, %v4072_v47  ;;  %4154 = vmatpush.msra.mxu2 %v4072_v47  ;;  %vm4110_vm8 = vweird.f32 %v4102_v49  ;;  %v4200_v47 = vld [vmem:[%s11917_s3 + $0x10] sm:$0xff] }
 0xcd0   : > { %v4093_v54 = vpop.f32.mrf.mxu1 }
 0xcd1   : > { %v4097_v40 = vmul.f32 0.03125, %v4093_v54  ;;  %4155 = vmatpush.msra.mxu2 %v4071_v32 }
 0xcd2   : > { %8197 = vmatmul.msk.f32.vlgmr.msra.gmra.mxu2 %vm1496_vm1, %v4124_v38 }
 0xcd3   : > { %v4101_v51 = vsub.f32 %v4097_v40, %v4099_v30 }
 0xcd5   : > { %v8557_v57 = vpop.eup %8556  ;;  %v4103_v29 = vadd.f32 1e-05, %v4101_v51 }
 0xcd6   : > { %v4105_v44 = vmul.f32 %v8557_v57, %v4102_v49  ;;  %vm4111_vm14 = vweird.f32 %v8557_v57 }
 0xcd7   : > { %8558 = vrsqrt.f32 %v4103_v29  ;;  %vm4120_vm10 = vweird.f32 %v4103_v29  ;;  %vm4112_vm2 = vmor %vm4110_vm8, %vm4111_vm14  ;;  %vm4316_vm8 = vcmask 39936  }
 0xcd8   : > { %v4106_v59 = vmul.f32 %v8557_v57, %v4105_v44 }
 0xcda   : > { %8198 = vmatmul.msk.f32.gmra.mxu2 %vm1496_vm1, %v4125_v3  ;;  %v4107_v25 = vmul.f32 0.5, %v4106_v59  ;;  %v4209_v59 = vld [vmem:[%s11918_s7 + $0x18] sm:$0xff] }
 0xcdc   : > { %v4108_v7 = vsub.f32 1.5, %v4107_v25 }
 0xcdd   : > { %v8559_v61 = vpop.eup %8558 }
 0xcde   : > { %v4115_v43 = vmul.f32 %v8559_v61, %v4103_v29  ;;  %vm4121_vm9 = vweird.f32 %v8559_v61  ;;  %v4109_v4 = vmul.f32 %v8557_v57, %v4108_v7 }
 0xcdf   : > { %vm4122_vm7 = vmor %vm4120_vm10, %vm4121_vm9 }
 0xce0   : > { %v4116_v0 = vmul.f32 %v8559_v61, %v4115_v43  ;;  %v4113_v36 = vsel %vm4112_vm2, %v8557_v57, %v4109_v4  ;;  %v4201_v57 = vld [vmem:[%s11917_s3 + $0x18] sm:$0xff]  ;;  %v9981_v43 = vpop.permute.xlu2 %4281  ;;  %s11921_s3 = smov 125   ;;  %vm4434_vm2 = vcmask 23552  }
 0xce1   : > { %v9984_v25 = vmul.f32 %v8577_v16, %v9981_v43 }
 0xce2   : > { %v4117_v2 = vmul.f32 0.5, %v4116_v0  ;;  %8199 = vmatmul.msk.f32.gmra.mxu2 %vm1496_vm1, %v4126_v41  ;;  %v9990_v0 = vpop.permute.xlu0 %4520 }
 0xce4   : > { %v4118_v8 = vsub.f32 1.5, %v4117_v2 }
 0xce6   : > { %v4119_v13 = vmul.f32 %v8559_v61, %v4118_v8 }
 0xce8   : > { %v4123_v17 = vsel %vm4122_vm7, %v8559_v61, %v4119_v13  ;;  %v9994_v2 = vpop.permute.xlu2 %4489  ;;  %vm4375_vm7 = vcmask 31744  }
 0xce9   : > { %4183 = vmatpush.msrb.mxu3 %v4123_v17 }
 0xcea   : > { %8200 = vmatmul.msk.f32.gmra.mxu2 %vm1496_vm1, %v4127_v46 }
 0xceb   : > { %4184 = vmatpush.msrb.mxu3 %v4113_v36  ;;  %v10012_v36 = vpop.permute.xlu1 %4554 }
 0xcec   : > { %8201 = vmatmul.msk.f32.vlgmr.msrb.gmra.mxu3 %vm1496_vm1, %v4124_v38  ;;  %v4208_v38 = vld [vmem:[%s11918_s7 + $0x10] sm:$0xff]  ;;  %s11924_s7 = sld [smem:[#allocation22_spill]] }
 0xcf0   : > { %v9998_v8 = vpop.permute.xlu2 %4481 }
 0xcf3   : > { %v10018_v20 = vpop.permute.xlu1 %4622 }
 0xcf4   : > { %8202 = vmatmul.msk.f32.gmra.mxu3 %vm1496_vm1, %v4125_v3 }
 0xcf8   : > { %v10002_v31 = vpop.permute.xlu2 %4430 }
 0xcfc   : > { %8203 = vmatmul.msk.f32.gmra.mxu3 %vm1496_vm1, %v4126_v41  ;;  %v9992_v41 = vpop.permute.xlu0 %4485 }
 0xd00   : > { %v10006_v4 = vpop.permute.xlu2 %4422 }
 0xd04   : > { %8204 = vmatmul.msk.f32.gmra.mxu3 %vm1496_vm1, %v4127_v46  ;;  %v9996_v7 = vpop.permute.xlu0 %4477 }
 0xd08   : > { %v10010_v46 = vpop.permute.xlu2 %4371 }
 0xd0c   : > { %v10000_v9 = vpop.permute.xlu0 %4426 }
 0xd10   : > { %v10016_v18 = vpop.permute.xlu2 %4363 }
 0xd14   : > { %v10004_v13 = vpop.permute.xlu0 %4418 }
 0xd1c   : > { %v10008_v17 = vpop.permute.xlu0 %4367 }
 0xd24   : > { %v10014_v16 = vpop.permute.xlu0 %4359 }
 0xd55   : > { %v4157_v6 = vpop.f32.mrf.mxu2 }
 0xd5d   : > { %v4160_v28 = vpop.f32.mrf.mxu2 }
 0xd65   : > { %v4163_v30 = vpop.f32.mrf.mxu2 }
 0xd6d   : > { %v4166_v44 = vpop.f32.mrf.mxu2 }
 0xd6f   : > { %v4186_v24 = vpop.f32.mrf.mxu3 }
 0xd70   : > { %v4202_v19 = vmul.f32 %v4198_v23, %v4186_v24 }
 0xd72   : > { %v4210_v27 = vmul.f32 %v4202_v19, %v4157_v6  ;;  %4220 = vperm.xlu0 %8515, %v4202_v19  }
 0xd74   : > { %v4214_v32 = vsub.f32 %v4206_v26, %v4210_v27 }
 0xd76   : > { %4244 = vperm.xlu2 %8514, %v4214_v32  }
 0xd77   : > { %v4189_v34 = vpop.f32.mrf.mxu3 }
 0xd78   : > { %v4203_v56 = vmul.f32 %v4199_v33, %v4189_v34 }
 0xd7a   : > { %v4211_v39 = vmul.f32 %v4203_v56, %v4160_v28  ;;  %4225 = vperm.xlu1 %8513, %v4203_v56  }
 0xd7c   : > { %v4215_v49 = vsub.f32 %v4207_v42, %v4211_v39 }
 0xd7e   : > { %4249 = vperm.xlu0 %8515, %v4215_v49  }
 0xd7f   : > { %v4192_v54 = vpop.f32.mrf.mxu3 }
 0xd80   : > { %v4204_v40 = vmul.f32 %v4200_v47, %v4192_v54 }
 0xd82   : > { %v4212_v51 = vmul.f32 %v4204_v40, %v4163_v30  ;;  %4230 = vperm.xlu2 %8514, %v4204_v40  }
 0xd84   : > { %v4216_v1 = vsub.f32 %v4208_v38, %v4212_v51 }
 0xd86   : > { %4254 = vperm.xlu0 %8515, %v4216_v1  }
 0xd87   : > { %v4195_v29 = vpop.f32.mrf.mxu3 }
 0xd88   : > { %v4205_v3 = vmul.f32 %v4201_v57, %v4195_v29 }
 0xd8a   : > { %v4213_v52 = vmul.f32 %v4205_v3, %v4166_v44  ;;  %4235 = vperm.xlu1 %8513, %v4205_v3  }
 0xd8c   : > { %v4217_v61 = vsub.f32 %v4209_v59, %v4213_v52 }
 0xd8e   : > { %4259 = vperm.xlu2 %8514, %v4217_v61  }
 0xd92   : > { %4312 = vrot.lane.b32.xlu1 %v9984_v25, %s11839_s11 }
 0xd96   : > { %4308 = vrot.lane.b32.xlu2 %v9984_v25, %s11839_s11  ;;  %s11920_s11 = smov 124  }
 0xdd0   : > { %v4245_v63 = vpop.permute.xlu2 %4244 }
 0xde4   : > { %v4221_v21 = vpop.permute.xlu0 %4220 }
 0xde5   : > { %v4238_v45 = vmul.f32 %v4221_v21, %v9888_v37  ;;  %v4231_v37 = vpop.permute.xlu2 %4230 }
 0xde6   : > { %v4240_v32 = vmul.f32 %v4231_v37, %v9894_v50 }
 0xde7   : > { %v4262_v6 = vadd.f32 %v4245_v63, %v4238_v45 }
 0xde9   : > { %4266 = vst.msk [vmem:[#allocation4 + $0x8] sm:$0xff] %vm1496_vm1, %v4262_v6 }
 0xdec   : > { %v4226_v23 = vpop.permute.xlu1 %4225 }
 0xded   : > { %v4239_v24 = vmul.f32 %v4226_v23, %v9890_v62  ;;  %v4260_v47 = vpop.permute.xlu2 %4259 }
 0xdf0   : > { %v4250_v19 = vpop.permute.xlu0 %4249  ;;  %v10023_v26 = vld [vmem:[#allocation4 + $0x8] sm:$0xff] }
 0xdf1   : > { %v4263_v27 = vadd.f32 %v4250_v19, %v4239_v24  ;;  %v4462_v28 = vmul.f32 %v9946_v12, %v10023_v26  ;;  %4509 = vst.msk [vmem:[#allocation5 + $0x100] sm:$0xff] %vm1496_vm1, %v10023_v26  ;;  %v4591_v62 = vmul.f32 %v9960_v22, %v10023_v26  ;;  %v4403_v54 = vmul.f32 %v10023_v26, %v9955_v11 }
 0xdf2   : > { %v4557_v1 = vmul.f32 %v10012_v36, %v10023_v26  ;;  %v4344_v44 = vmul.f32 %v10023_v26, %v9964_v48  ;;  %v4523_v52 = vmul.f32 %v9990_v0, %v10023_v26 }
 0xdf3   : > { %4267 = vst.msk [vmem:[#allocation4 + $0x20] sm:$0xff] %vm1496_vm1, %v4263_v27  ;;  %4479 = vrot.lane.b32.xlu1 %v4462_v28, %s11916_s8 }
 0xdf8   : > { %v4255_v33 = vpop.permute.xlu0 %4254 }
 0xdf9   : > { %v4264_v34 = vadd.f32 %v4255_v33, %v4240_v32  ;;  %v4723_v32 = vld [vmem:[%s11924_s7 + $0x20] sm:$0xff] }
 0xdfa   : > { %v10034_v56 = vld [vmem:[#allocation4 + $0x20] sm:$0xff] }
 0xdfb   : > { %4510 = vst.msk [vmem:[#allocation5 + $0x110] sm:$0xff] %vm1496_vm1, %v10034_v56  ;;  %4599 = vrot.lane.b32.xlu1 %v4591_v62, %s11920_s11  ;;  %v4592_v42 = vmul.f32 %v9960_v22, %v10034_v56  ;;  %v4464_v39 = vmul.f32 %v10034_v56, %v9946_v12  ;;  %v4558_v38 = vmul.f32 %v10012_v36, %v10034_v56  ;;  %v4722_v62 = vld [vmem:[%s11924_s7 + $0x18] sm:$0xff] }
 0xdfc   : > { %4268 = vst.msk [vmem:[#allocation4 + $0x38] sm:$0xff] %vm1496_vm1, %v4264_v34  ;;  %v4236_v50 = vpop.permute.xlu1 %4235  ;;  %v4524_v57 = vmul.f32 %v9990_v0, %v10034_v56  ;;  %v4346_v29 = vmul.f32 %v10034_v56, %v9964_v48  ;;  %v4287_v28 = vmul.f32 %v10034_v56, %v9981_v43  ;;  %v4725_v34 = vld [vmem:[%s11924_s7 + $0x30] sm:$0xff] }
 0xdfd   : > { %v4241_v49 = vmul.f32 %v4236_v50, %v9901_v58  ;;  %4601 = vrot.lane.b32.xlu2 %v4592_v42, %s11920_s11  ;;  %4483 = vrot.lane.b32.xlu0 %v4464_v39, %s11916_s8  ;;  %v4405_v58 = vmul.f32 %v10034_v56, %v9955_v11  ;;  %v4626_v42 = vmul.f32 %v10018_v20, %v10034_v56  ;;  %v4724_v39 = vld [vmem:[%s11924_s7 + $0x28] sm:$0xff]  ;;  %v4719_v50 = vld [vmem:[%s11924_s7] sm:$0xff] }
 0xdff   : > { %v4265_v30 = vadd.f32 %v4260_v47, %v4241_v49 }
 0xe01   : > { %4269 = vst.msk [vmem:[#allocation4 + $0x50] sm:$0xff] %vm1496_vm1, %v4265_v30 }
 0xe03   : > { %v4507_v40 = vld [vmem:[#allocation4 + $0x38] sm:$0xff]  ;;  %4420 = vrot.lane.b32.xlu1 %v4403_v54, %s11842_s6 }
 0xe04   : > { %4511 = vst.msk [vmem:[#allocation5 + $0x120] sm:$0xff] %vm1496_vm1, %v4507_v40  ;;  %v4627_v3 = vmul.f32 %v10018_v20, %v4507_v40  ;;  %v4289_v61 = vmul.f32 %v4507_v40, %v9981_v43  ;;  %v4466_v45 = vmul.f32 %v4507_v40, %v9946_v12  ;;  %v4593_v6 = vmul.f32 %v9960_v22, %v4507_v40  ;;  %v4313_v47 = vpop.permute.xlu1 %4312 }
 0xe05   : > { %4567 = vrot.lane.b32.xlu2 %v4558_v38, %s11921_s3  ;;  %4424 = vrot.lane.b32.xlu0 %v4405_v58, %s11842_s6  ;;  %s11922_s6 = smov 123   ;;  %v4559_v27 = vmul.f32 %v10012_v36, %v4507_v40  ;;  %v4348_v37 = vmul.f32 %v4507_v40, %v9964_v48  ;;  %v4525_v33 = vmul.f32 %v9990_v0, %v4507_v40  ;;  %v4726_v38 = vld [vmem:[%s11924_s7 + $0x38] sm:$0xff] }
 0xe08   : > { %v10058_v51 = vld [vmem:[#allocation4 + $0x50] sm:$0xff] }
 0xe09   : > { %4512 = vst.msk [vmem:[#allocation5 + $0x130] sm:$0xff] %vm1496_vm1, %v10058_v51  ;;  %v4594_v59 = vmul.f32 %v9960_v22, %v10058_v51  ;;  %v4560_v21 = vmul.f32 %v10058_v51, %v10012_v36  ;;  %v4468_v63 = vmul.f32 %v10058_v51, %v9946_v12  ;;  %v4526_v23 = vmul.f32 %v10058_v51, %v9990_v0 }
 0xe0a   : > { %v4409_v24 = vmul.f32 %v10058_v51, %v9955_v11  ;;  %v4407_v12 = vmul.f32 %v4507_v40, %v9955_v11  ;;  %v4350_v22 = vmul.f32 %v10058_v51, %v9964_v48  ;;  %v4291_v19 = vmul.f32 %v10058_v51, %v9981_v43  ;;  %v10128_v48 = vpop.permute.xlu2 %4308 }
 0xe0b   : > { %4565 = vrot.lane.b32.xlu1 %v4557_v1, %s11921_s3  ;;  %v4625_v11 = vmul.f32 %v10018_v20, %v10023_v26  ;;  %v4285_v36 = vmul.f32 %v10023_v26, %v9981_v43  ;;  %v4628_v26 = vmul.f32 %v10018_v20, %v10058_v51 }
 0xe0d   : > { %4533 = vrot.lane.b32.xlu2 %v4524_v57, %s11905_s16  ;;  %4365 = vrot.lane.b32.xlu0 %v4346_v29, %s11919_s10  ;;  %v4721_v57 = vld [vmem:[%s11924_s7 + $0x10] sm:$0xff] }
 0xe13   : > { %4361 = vrot.lane.b32.xlu1 %v4344_v44, %s11919_s10 }
 0xe15   : > { %4637 = vrot.lane.b32.xlu0 %v4627_v3, %s11922_s6  ;;  %4605 = vrot.lane.b32.xlu2 %v4594_v59, %s11920_s11 }
 0xe1b   : > { %4531 = vrot.lane.b32.xlu1 %v4523_v52, %s11905_s16 }
 0xe1d   : > { %4310 = vrot.lane.b32.xlu0 %v4289_v61, %s11923_s5  ;;  %4571 = vrot.lane.b32.xlu2 %v4560_v21, %s11921_s3 }
 0xe23   : > { %4487 = vrot.lane.b32.xlu1 %v4466_v45, %s11916_s8 }
 0xe25   : > { %4300 = vrot.lane.b32.xlu2 %v9984_v25, %s11923_s5  ;;  %4491 = vrot.lane.b32.xlu0 %v4468_v63, %s11916_s8  ;;  %v5075_v63 = vsel %vm1471_vm0, %v9671_v60, 0.0 }
 0xe2b   : > { %4603 = vrot.lane.b32.xlu1 %v4593_v6, %s11920_s11  ;;  %s11931_s11 = smov 120  }
 0xe2d   : > { %4537 = vrot.lane.b32.xlu2 %v4526_v23, %s11905_s16  ;;  %4432 = vrot.lane.b32.xlu0 %v4409_v24, %s11925_s14 }
 0xe33   : > { %4428 = vrot.lane.b32.xlu1 %v4407_v12, %s11925_s14  ;;  %s11926_s14 = sld [smem:[#allocation24_spill]]  ;;  %v5081_v12 = vsel %vm1471_vm0, %v9700_v14, 0.0 }
 0xe35   : > { %4373 = vrot.lane.b32.xlu0 %v4350_v22, %s11919_s10  ;;  %4314 = vrot.lane.b32.xlu2 %v4291_v19, %s11923_s5 }
 0xe39   : > { %v4958_v43 = vld [vmem:[%s11926_s14] sm:$0xff]  ;;  %v4961_v49 = vld [vmem:[%s11926_s14 + $0x18] sm:$0xff]  ;;  %v4959_v30 = vld [vmem:[%s11926_s14 + $0x8] sm:$0xff] }
 0xe3a   : > { %v4960_v45 = vld [vmem:[%s11926_s14 + $0x10] sm:$0xff] }
 0xe3b   : > { %4569 = vrot.lane.b32.xlu1 %v4559_v27, %s11921_s3  ;;  %s11928_s3 = sld [smem:[#allocation23_spill]] }
 0xe3d   : > { %4633 = vrot.lane.b32.xlu0 %v4625_v11, %s11922_s6  ;;  %4306 = vrot.lane.b32.xlu2 %v4287_v28, %s11923_s5 }
 0xe43   : > { %4369 = vrot.lane.b32.xlu1 %v4348_v37, %s11919_s10  ;;  %v5072_v37 = vsel %vm1471_vm0, %v9667_v53, 0.0  ;;  %s11930_s10 = sld [smem:[#allocation43_spill]] }
 0xe45   : > { %4302 = vrot.lane.b32.xlu0 %v4285_v36, %s11923_s5  ;;  %4749 = vperm.xlu2 %8514, %v4723_v32  }
 0xe4b   : > { %4535 = vrot.lane.b32.xlu1 %v4525_v33, %s11905_s16 }
 0xe4d   : > { %4759 = vperm.xlu0 %8515, %v4725_v34   ;;  %4744 = vperm.xlu2 %8514, %v4722_v62  }
 0xe53   : > { %4635 = vrot.lane.b32.xlu1 %v4626_v42, %s11922_s6 }
 0xe55   : > { %4754 = vperm.xlu0 %8515, %v4724_v39   ;;  %4964 = vperm.xlu2 %8514, %v4958_v43  }
 0xe57   : > { %v4602_v0 = vpop.permute.xlu2 %4601 }
 0xe58   : > { %4612 = vst.msk [vmem:[#allocation5 + $0x1d0] sm:$0xff] %vm1496_vm1, %v4602_v0 }
 0xe5b   : > { %4639 = vrot.lane.b32.xlu1 %v4628_v26, %s11922_s6  ;;  %s11929_s6 = sld [smem:[#allocation12_spill]] }
 0xe5d   : > { %4729 = vperm.xlu0 %8515, %v4719_v50   ;;  %4979 = vperm.xlu2 %8514, %v4961_v49  }
 0xe5f   : > { %v4568_v56 = vpop.permute.xlu2 %4567 }
 0xe60   : > { %4578 = vst.msk [vmem:[#allocation5 + $0x190] sm:$0xff] %vm1496_vm1, %v4568_v56 }
 0xe63   : > { %4304 = vrot.lane.b32.xlu1 %v9984_v25, %s11923_s5  ;;  %s11927_s5 = sld [smem:[#allocation21_spill]] }
 0xe65   : > { %4969 = vperm.xlu0 %8515, %v4959_v30   ;;  %v4480_v54 = vpop.permute.xlu1 %4479 }
 0xe66   : > { %v4493_v20 = vsel %vm1646_vm4, %v9996_v7, %v4480_v54  ;;  %v4694_v54 = vld [vmem:[#allocation5 + $0x1d0] sm:$0xff] }
 0xe67   : > { %4501 = vst.msk [vmem:[#allocation5 + $0xc0] sm:$0xff] %vm1496_vm1, %v4493_v20  ;;  %v4534_v40 = vpop.permute.xlu2 %4533 }
 0xe68   : > { %4544 = vst.msk [vmem:[#allocation5 + $0x150] sm:$0xff] %vm1496_vm1, %v4534_v40  ;;  %v5078_v40 = vsel %vm1471_vm0, %v9682_v35, 0.0 }
 0xe6b   : > { %4764 = vperm.xlu1 %8513, %v4726_v38  }
 0xe6d   : > { %v4600_v58 = vpop.permute.xlu1 %4599 }
 0xe6e   : > { %4611 = vst.msk [vmem:[#allocation5 + $0x1c0] sm:$0xff] %vm1496_vm1, %v4600_v58  ;;  %v4677_v43 = vld [vmem:[#allocation5 + $0xc0] sm:$0xff] }
 0xe6f   : > { %v4484_v51 = vpop.permute.xlu0 %4483  ;;  %v4606_v1 = vpop.permute.xlu2 %4605 }
 0xe70   : > { %v4494_v25 = vsel %vm1646_vm4, %v9998_v8, %v4484_v51  ;;  %4614 = vst.msk [vmem:[#allocation5 + $0x1f0] sm:$0xff] %vm1496_vm1, %v4606_v1  ;;  %v4720_v8 = vld [vmem:[%s11924_s7 + $0x8] sm:$0xff] }
 0xe71   : > { %4502 = vst.msk [vmem:[#allocation5 + $0xd0] sm:$0xff] %vm1496_vm1, %v4494_v25 }
 0xe73   : > { %4739 = vperm.xlu1 %8513, %v4721_v57  }
 0xe75   : > { %v4421_v7 = vpop.permute.xlu1 %4420 }
 0xe76   : > { %v4435_v29 = vsel %vm4434_vm2, %v10004_v13, %v4421_v7 }
 0xe77   : > { %4443 = vst.msk [vmem:[#allocation5 + $0x80] sm:$0xff] %vm1496_vm1, %v4435_v29  ;;  %v4425_v44 = vpop.permute.xlu0 %4424  ;;  %v4572_v3 = vpop.permute.xlu2 %4571  ;;  %v4696_v50 = vld [vmem:[#allocation5 + $0x1f0] sm:$0xff] }
 0xe78   : > { %v4436_v59 = vsel %vm4434_vm2, %v10006_v4, %v4425_v44  ;;  %4580 = vst.msk [vmem:[#allocation5 + $0x1b0] sm:$0xff] %vm1496_vm1, %v4572_v3  ;;  %v4678_v39 = vld [vmem:[#allocation5 + $0xd0] sm:$0xff] }
 0xe79   : > { %4444 = vst.msk [vmem:[#allocation5 + $0x90] sm:$0xff] %vm1496_vm1, %v4436_v59  ;;  %v4707_v26 = vpack.c.bf16 %v4678_v39, %v4677_v43  ;;  %v4681_v39 = vld [vmem:[#allocation5 + $0x100] sm:$0xff] }
 0xe7b   : > { %4734 = vperm.xlu1 %8513, %v4720_v8  }
 0xe7d   : > { %v4566_v52 = vpop.permute.xlu1 %4565 }
 0xe7e   : > { %4577 = vst.msk [vmem:[#allocation5 + $0x180] sm:$0xff] %vm1496_vm1, %v4566_v52  ;;  %v4673_v25 = vld [vmem:[#allocation5 + $0x80] sm:$0xff] }
 0xe7f   : > { %v4366_v61 = vpop.permute.xlu0 %4365  ;;  %v10165_v21 = vpop.permute.xlu2 %4300  ;;  %v4692_v44 = vld [vmem:[#allocation5 + $0x1b0] sm:$0xff] }
 0xe80   : > { %v4377_v13 = vsel %vm4375_vm7, %v10016_v18, %v4366_v61 }
 0xe81   : > { %4385 = vst.msk [vmem:[#allocation5 + $0x50] sm:$0xff] %vm1496_vm1, %v4377_v13  ;;  %v4690_v13 = vld [vmem:[#allocation5 + $0x190] sm:$0xff] }
 0xe83   : > { %4974 = vperm.xlu1 %8513, %v4960_v45  }
 0xe85   : > { %v4362_v4 = vpop.permute.xlu1 %4361  ;;  %v4689_v52 = vld [vmem:[#allocation5 + $0x180] sm:$0xff] }
 0xe86   : > { %v4376_v6 = vsel %vm4375_vm7, %v10014_v16, %v4362_v4  ;;  %5076 = vadd.xlane.f32.xlu2 %v5075_v63  ;;  %v4713_v45 = vpack.c.bf16 %v4690_v13, %v4689_v52  ;;  %v8398_v13 = vld [vmem:[%s11927_s5 + $0x20] sm:$0xf0] }
 0xe87   : > { %4384 = vst.msk [vmem:[#allocation5 + $0x40] sm:$0xff] %vm1496_vm1, %v4376_v6  ;;  %v4638_v23 = vpop.permute.xlu0 %4637  ;;  %v4538_v24 = vpop.permute.xlu2 %4537 }
 0xe88   : > { %4647 = vst.msk [vmem:[#allocation5 + $0x220] sm:$0xff] %vm1496_vm1, %v4638_v23 }
 0xe89   : > { %4546 = vst.msk [vmem:[#allocation5 + $0x170] sm:$0xff] %vm1496_vm1, %v4538_v24  ;;  %v4670_v24 = vld [vmem:[#allocation5 + $0x50] sm:$0xff] }
 0xe8d   : > { %v4532_v18 = vpop.permute.xlu1 %4531 }
 0xe8e   : > { %4543 = vst.msk [vmem:[#allocation5 + $0x140] sm:$0xff] %vm1496_vm1, %v4532_v18  ;;  %v4669_v23 = vld [vmem:[#allocation5 + $0x40] sm:$0xff] }
 0xe8f   : > { %v4311_v22 = vpop.permute.xlu0 %4310  ;;  %5082 = vadd.xlane.f32.xlu0 %v5081_v12  ;;  %v4315_v19 = vpop.permute.xlu2 %4314  ;;  %v4703_v18 = vpack.c.bf16 %v4670_v24, %v4669_v23  ;;  %v8239_v23 = vld [vmem:[%s11927_s5 + $0x38] sm:$0xf]  ;;  %v8402_v24 = vld [vmem:[%s11927_s5 + $0x40] sm:$0xf0] }
 0xe90   : > { %v4319_v16 = vsel %vm4316_vm8, %v10128_v48, %v4311_v22  ;;  %v4320_v27 = vsel %vm4316_vm8, %v4313_v47, %v4315_v19 }
 0xe91   : > { %4327 = vst.msk [vmem:[#allocation5 + $0x20] sm:$0xff] %vm1496_vm1, %v4319_v16  ;;  %v4688_v16 = vld [vmem:[#allocation5 + $0x170] sm:$0xff] }
 0xe92   : > { %4328 = vst.msk [vmem:[#allocation5 + $0x30] sm:$0xff] %vm1496_vm1, %v4320_v27 }
 0xe95   : > { %v4488_v11 = vpop.permute.xlu1 %4487 }
 0xe96   : > { %v4495_v28 = vsel %vm1646_vm4, %v9992_v41, %v4488_v11 }
 0xe97   : > { %4503 = vst.msk [vmem:[#allocation5 + $0xe0] sm:$0xff] %vm1496_vm1, %v4495_v28  ;;  %v4492_v32 = vpop.permute.xlu0 %4491  ;;  %5073 = vadd.xlane.f32.xlu0 %v5072_v37  ;;  %v4685_v28 = vld [vmem:[#allocation5 + $0x140] sm:$0xff]  ;;  %v4686_v37 = vld [vmem:[#allocation5 + $0x150] sm:$0xff] }
 0xe98   : > { %v4496_v36 = vsel %vm1646_vm4, %v9994_v2, %v4492_v32  ;;  %v4667_v12 = vld [vmem:[#allocation5 + $0x20] sm:$0xff]  ;;  %v4711_v32 = vpack.c.bf16 %v4686_v37, %v4685_v28  ;;  %v8245_v28 = vld [vmem:[%s11927_s5 + $0x54] sm:$0xf0] }
 0xe99   : > { %4504 = vst.msk [vmem:[#allocation5 + $0xf0] sm:$0xff] %vm1496_vm1, %v4496_v36  ;;  %v4668_v22 = vld [vmem:[#allocation5 + $0x30] sm:$0xff] }
 0xe9a   : > { %v4702_v11 = vpack.c.bf16 %v4668_v22, %v4667_v12  ;;  %v4684_v36 = vld [vmem:[#allocation5 + $0x130] sm:$0xff]  ;;  %v8240_v22 = vor.u32 %v8402_v24, %v8239_v23 }
 0xe9d   : > { %v4604_v33 = vpop.permute.xlu1 %4603 }
 0xe9e   : > { %4613 = vst.msk [vmem:[#allocation5 + $0x1e0] sm:$0xff] %vm1496_vm1, %v4604_v33  ;;  %v4679_v41 = vld [vmem:[#allocation5 + $0xe0] sm:$0xff] }
 0xe9f   : > { %v4433_v34 = vpop.permute.xlu0 %4432 }
 0xea0   : > { %v4438_v62 = vsel %vm4434_vm2, %v10002_v31, %v4433_v34  ;;  %v4680_v48 = vld [vmem:[#allocation5 + $0xf0] sm:$0xff]  ;;  %v4693_v31 = vld [vmem:[#allocation5 + $0x1c0] sm:$0xff] }
 0xea1   : > { %4446 = vst.msk [vmem:[#allocation5 + $0xb0] sm:$0xff] %vm1496_vm1, %v4438_v62  ;;  %v4708_v42 = vpack.c.bf16 %v4680_v48, %v4679_v41  ;;  %v4715_v20 = vpack.c.bf16 %v4694_v54, %v4693_v31  ;;  %v4683_v34 = vld [vmem:[#allocation5 + $0x120] sm:$0xff]  ;;  %v4682_v41 = vld [vmem:[#allocation5 + $0x110] sm:$0xff] }
 0xea2   : > { %v4710_v62 = vpack.c.bf16 %v4684_v36, %v4683_v34  ;;  %v8394_v48 = vld [vmem:[%s11927_s5 + $0x4] sm:$0xf]  ;;  %v4709_v43 = vpack.c.bf16 %v4682_v41, %v4681_v39  ;;  %v8396_v54 = vld [vmem:[%s11927_s5 + $0x10] sm:$0xf0]  ;;  %v8251_v34 = vld [vmem:[%s11927_s5 + $0x50] sm:$0xf] }
 0xea3   : > { %4839 = vmatpush.bf16.msra.mxu0 %v4708_v42  ;;  %v8209_v42 = vld [vmem:[%s11927_s5 + $0xc] sm:$0xf0] }
 0xea5   : > { %v4429_v0 = vpop.permute.xlu1 %4428  ;;  %v4695_v2 = vld [vmem:[#allocation5 + $0x1e0] sm:$0xff] }
 0xea6   : > { %v4437_v49 = vsel %vm4434_vm2, %v10000_v9, %v4429_v0  ;;  %v4716_v47 = vpack.c.bf16 %v4696_v50, %v4695_v2  ;;  %v8212_v0 = vor.u32 %v8394_v48, %v8209_v42  ;;  %v4699_v50 = vld [vmem:[#allocation5 + $0x220] sm:$0xff]  ;;  %v8243_v48 = vld [vmem:[%s11927_s5 + $0x48] sm:$0xf]  ;;  %v8404_v42 = vld [vmem:[%s11927_s5 + $0x50] sm:$0xf0] }
 0xea7   : > { %4445 = vst.msk [vmem:[#allocation5 + $0xa0] sm:$0xff] %vm1496_vm1, %v4437_v49  ;;  %v4374_v56 = vpop.permute.xlu0 %4373  ;;  %4840 = vmatpush.bf16.msra.mxu0 %v4707_v26  ;;  %v4307_v26 = vpop.permute.xlu2 %4306 }
 0xea8   : > { %v4379_v30 = vsel %vm4375_vm7, %v10010_v46, %v4374_v56  ;;  %4868 = vmatpush.bf16.msrb.mxu1 %v4716_v47  ;;  %v4676_v58 = vld [vmem:[#allocation5 + $0xb0] sm:$0xff] }
 0xea9   : > { %4387 = vst.msk [vmem:[#allocation5 + $0x70] sm:$0xff] %vm1496_vm1, %v4379_v30  ;;  %v4674_v46 = vld [vmem:[#allocation5 + $0x90] sm:$0xff]  ;;  %v8215_v30 = vld [vmem:[%s11927_s5 + $0x8] sm:$0xf] }
 0xeaa   : > { %v4705_v57 = vpack.c.bf16 %v4674_v46, %v4673_v25 }
 0xeac   : > { %4869 = vmatpush.bf16.msrb.mxu1 %v4715_v20 }
 0xead   : > { %5079 = vadd.xlane.f32.xlu1 %v5078_v40  ;;  %v4570_v9 = vpop.permute.xlu1 %4569 }
 0xeae   : > { %4579 = vst.msk [vmem:[#allocation5 + $0x1a0] sm:$0xff] %vm1496_vm1, %v4570_v9  ;;  %v4675_v38 = vld [vmem:[#allocation5 + $0xa0] sm:$0xff]  ;;  %v8216_v9 = vor.u32 %v8396_v54, %v8215_v30 }
 0xeaf   : > { %v4634_v51 = vpop.permute.xlu0 %4633  ;;  %v4706_v1 = vpack.c.bf16 %v4676_v58, %v4675_v38  ;;  %v8207_v58 = vld [vmem:[%s11927_s5] sm:$0xf] }
 0xeb0   : > { %4645 = vst.msk [vmem:[#allocation5 + $0x200] sm:$0xff] %vm1496_vm1, %v4634_v51  ;;  %v4672_v6 = vld [vmem:[#allocation5 + $0x70] sm:$0xff]  ;;  %v8395_v51 = vld [vmem:[%s11927_s5 + $0x8] sm:$0xf0] }
 0xeb1   : > { %4841 = vmatpush.bf16.msra.mxu0 %v4706_v1 }
 0xeb5   : > { %4842 = vmatpush.bf16.msra.mxu0 %v4705_v57  ;;  %v4370_v7 = vpop.permute.xlu1 %4369  ;;  %v4691_v29 = vld [vmem:[#allocation5 + $0x1a0] sm:$0xff]  ;;  %v8208_v57 = vor.u32 %v8395_v51, %v8207_v58 }
 0xeb6   : > { %v4378_v3 = vsel %vm4375_vm7, %v10008_v17, %v4370_v7  ;;  %v4714_v59 = vpack.c.bf16 %v4692_v44, %v4691_v29  ;;  %v8397_v7 = vld [vmem:[%s11927_s5 + $0x1c] sm:$0xf]  ;;  %v8221_v29 = vld [vmem:[%s11927_s5 + $0x24] sm:$0xf0] }
 0xeb7   : > { %4386 = vst.msk [vmem:[#allocation5 + $0x60] sm:$0xff] %vm1496_vm1, %v4378_v3  ;;  %v4303_v8 = vpop.permute.xlu0 %4302  ;;  %v4697_v20 = vld [vmem:[#allocation5 + $0x200] sm:$0xff]  ;;  %v8224_v44 = vor.u32 %v8397_v7, %v8221_v29 }
 0xeb8   : > { %v4317_v61 = vsel %vm4316_vm8, %v10165_v21, %v4303_v8  ;;  %4870 = vmatpush.bf16.msrb.mxu1 %v4714_v59  ;;  %v8227_v59 = vld [vmem:[%s11927_s5 + $0x20] sm:$0xf]  ;;  %v8399_v8 = vld [vmem:[%s11927_s5 + $0x28] sm:$0xf0] }
 0xeb9   : > { %4325 = vst.msk [vmem:[#allocation5] sm:$0xff] %vm1496_vm1, %v4317_v61  ;;  %v8228_v52 = vor.u32 %v8399_v8, %v8227_v59  ;;  %v8219_v61 = vld [vmem:[%s11927_s5 + $0x18] sm:$0xf] }
 0xebc   : > { %4871 = vmatpush.bf16.msrb.mxu1 %v4713_v45 }
 0xebd   : > { %v4536_v4 = vpop.permute.xlu1 %4535 }
 0xebe   : > { %4545 = vst.msk [vmem:[#allocation5 + $0x160] sm:$0xff] %vm1496_vm1, %v4536_v4  ;;  %v4671_v63 = vld [vmem:[#allocation5 + $0x60] sm:$0xff]  ;;  %v8220_v4 = vor.u32 %v8398_v13, %v8219_v61 }
 0xebf   : > { %v4704_v17 = vpack.c.bf16 %v4672_v6, %v4671_v63  ;;  %v10223_v38 = vpop.permute.xlu0 %4759  ;;  %v8400_v63 = vld [vmem:[%s11927_s5 + $0x34] sm:$0xf]  ;;  %v8233_v6 = vld [vmem:[%s11927_s5 + $0x3c] sm:$0xf0] }
 0xec0   : > { %v4665_v1 = vld [vmem:[#allocation5] sm:$0xff] }
 0xec1   : > { %4843 = vmatpush.bf16.msra.mxu0 %v4704_v17  ;;  %v8236_v17 = vor.u32 %v8400_v63, %v8233_v6 }
 0xec5   : > { %4844 = vmatpush.bf16.msra.mxu0 %v4703_v18  ;;  %v4636_v21 = vpop.permute.xlu1 %4635  ;;  %v4687_v19 = vld [vmem:[#allocation5 + $0x160] sm:$0xff] }
 0xec6   : > { %4646 = vst.msk [vmem:[#allocation5 + $0x210] sm:$0xff] %vm1496_vm1, %v4636_v21  ;;  %v4712_v27 = vpack.c.bf16 %v4688_v16, %v4687_v19  ;;  %v4750_v21 = vpop.permute.xlu2 %4749  ;;  %v8231_v19 = vld [vmem:[%s11927_s5 + $0x30] sm:$0xf]  ;;  %v8401_v16 = vld [vmem:[%s11927_s5 + $0x38] sm:$0xf0] }
 0xec7   : > { %v10230_v3 = vpop.permute.xlu0 %4754 }
 0xec8   : > { %4872 = vmatpush.bf16.msrb.mxu1 %v4712_v27  ;;  %v8232_v27 = vor.u32 %v8401_v16, %v8231_v19 }
 0xec9   : > { %4845 = vmatpush.bf16.msra.mxu0 %v4702_v11  ;;  %v8403_v11 = vld [vmem:[%s11927_s5 + $0x4c] sm:$0xf] }
 0xecc   : > { %4873 = vmatpush.bf16.msrb.mxu1 %v4711_v32  ;;  %v8248_v32 = vor.u32 %v8403_v11, %v8245_v28 }
 0xecd   : > { %v4640_v33 = vpop.permute.xlu1 %4639  ;;  %v4698_v31 = vld [vmem:[#allocation5 + $0x210] sm:$0xff] }
 0xece   : > { %4648 = vst.msk [vmem:[#allocation5 + $0x230] sm:$0xff] %vm1496_vm1, %v4640_v33  ;;  %v4717_v40 = vpack.c.bf16 %v4698_v31, %v4697_v20  ;;  %v4745_v33 = vpop.permute.xlu2 %4744 }
 0xecf   : > { %v4730_v45 = vpop.permute.xlu0 %4729 }
 0xed0   : > { %4874 = vmatpush.bf16.msrb.mxu1 %v4710_v62  ;;  %v8405_v62 = vld [vmem:[%s11927_s5 + $0x58] sm:$0xf0]  ;;  %s11933_s5 = smov 121  }
 0xed1   : > { %v8252_v41 = vor.u32 %v8405_v62, %v8251_v34 }
 0xed4   : > { %4875 = vmatpush.bf16.msrb.mxu1 %v4709_v43 }
 0xed5   : > { %v4305_v2 = vpop.permute.xlu1 %4304  ;;  %v4700_v49 = vld [vmem:[#allocation5 + $0x230] sm:$0xff] }
 0xed6   : > { %v4318_v47 = vsel %vm4316_vm8, %v4305_v2, %v4307_v26  ;;  %v4718_v56 = vpack.c.bf16 %v4700_v49, %v4699_v50  ;;  %v10255_v43 = vpop.permute.xlu2 %4964 }
 0xed7   : > { %4326 = vst.msk [vmem:[#allocation5 + $0x10] sm:$0xff] %vm1496_vm1, %v4318_v47  ;;  %4876 = vmatmul.bf16.vlgmr.msrb.gmra.mxu1 %v8212_v0  ;;  %v10241_v18 = vpop.permute.xlu0 %4969  ;;  %v8244_v0 = vor.u32 %v8404_v42, %v8243_v48 }
 0xed8   : > { %4903 = vmatpush.bf16.msrb.mxu2 %v4718_v56 }
 0xedc   : > { %4904 = vmatpush.bf16.msrb.mxu2 %v4717_v40 }
 0xedd   : > { %v10243_v12 = vpop.permute.xlu1 %4764 }
 0xede   : > { %v4666_v46 = vld [vmem:[#allocation5 + $0x10] sm:$0xff]  ;;  %v10259_v2 = vpop.permute.xlu2 %4979 }
 0xedf   : > { %8253 = vmatmul.msk.bf16.vlgmr.msrb.gmra.mxu2 %vm3899_vm13, %v8216_v9  ;;  %v4701_v25 = vpack.c.bf16 %v4666_v46, %v4665_v1 }
 0xee1   : > { %4846 = vmatpush.bf16.msra.mxu0 %v4701_v25 }
 0xee4   : > { %4847 = vmatmul.bf16.vlgmr.msra.gmra.mxu0 %v8208_v57 }
 0xee5   : > { %v4740_v36 = vpop.permute.xlu1 %4739 }
 0xee7   : > { %4881 = vmatmul.bf16.gmra.mxu1 %v8224_v44 }
 0xeed   : > { %v4735_v39 = vpop.permute.xlu1 %4734 }
 0xeef   : > { %8254 = vmatmul.msk.bf16.gmra.mxu2 %vm3899_vm13, %v8228_v52 }
 0xef4   : > { %4852 = vmatmul.bf16.gmra.mxu0 %v8220_v4 }
 0xef5   : > { %v10257_v26 = vpop.permute.xlu1 %4974 }
 0xef7   : > { %4886 = vmatmul.bf16.gmra.mxu1 %v8236_v17 }
 0xef9   : > { %v5077_v49 = vpop.xlane.xlu2 %5076 }
 0xeff   : > { %8255 = vmatmul.msk.bf16.gmra.mxu2 %vm3899_vm13, %v8240_v22 }
 0xf02   : > { %v5083_v37 = vpop.xlane.xlu0 %5082 }
 0xf03   : > { %5132 = vmatpush.msrb.mxu0 %v5083_v37 }
 0xf04   : > { %4857 = vmatmul.bf16.gmra.mxu0 %v8232_v27 }
 0xf07   : > { %4891 = vmatmul.bf16.gmra.mxu1 %v8248_v32 }
 0xf0a   : > { %v5074_v47 = vpop.xlane.xlu0 %5073 }
 0xf0f   : > { %8256 = vmatmul.msk.bf16.gmra.mxu2 %vm3899_vm13, %v8252_v41 }
 0xf14   : > { %4862 = vmatmul.bf16.gmra.mxu0 %v8244_v0 }
 0xf20   : > { %v5080_v50 = vpop.xlane.xlu1 %5079 }
 0xf21   : > { %5133 = vmatpush.msrb.mxu0 %v5080_v50 }
 0xf23   : > { %5134 = vmatpush.msrb.mxu0 %v5077_v49 }
 0xf25   : > { %5135 = vmatpush.msrb.mxu0 %v5074_v47 }
 0xf54   : > { %v4877_v56 = vpop.f32.mrf.mxu1 }
 0xf5c   : > { %v4879_v31 = vpop.f32.mrf.mxu1 }
 0xf61   : > { %v4848_v30 = vpop.f32.mrf.mxu0 }
 0xf62   : > { %v4849_v54 = vadd.f32 %v4848_v30, %v4730_v45  ;;  %v4906_v20 = vpop.f32.mrf.mxu2 }
 0xf64   : > { %v4878_v40 = vadd.f32 %v4877_v56, %v4849_v54  ;;  %v4882_v51 = vpop.f32.mrf.mxu1 }
 0xf66   : > { %v10261_v9 = vadd.f32 %v4906_v20, %v4878_v40 }
 0xf69   : > { %v4850_v58 = vpop.f32.mrf.mxu0 }
 0xf6a   : > { %v4908_v1 = vpop.f32.mrf.mxu2  ;;  %v4851_v32 = vadd.f32 %v4850_v58, %v4735_v39 }
 0xf6c   : > { %v4884_v57 = vpop.f32.mrf.mxu1 }
 0xf71   : > { %v4853_v46 = vpop.f32.mrf.mxu0 }
 0xf72   : > { %v4911_v25 = vpop.f32.mrf.mxu2  ;;  %v4854_v27 = vadd.f32 %v4853_v46, %v4740_v36 }
 0xf74   : > { %v4887_v44 = vpop.f32.mrf.mxu1 }
 0xf79   : > { %v4855_v7 = vpop.f32.mrf.mxu0 }
 0xf7a   : > { %v4913_v29 = vpop.f32.mrf.mxu2  ;;  %v4856_v22 = vadd.f32 %v4855_v7, %v4745_v33 }
 0xf7c   : > { %v4889_v52 = vpop.f32.mrf.mxu1  ;;  %v4885_v62 = vadd.f32 %v4884_v57, %v4856_v22 }
 0xf7e   : > { %v4914_v33 = vadd.f32 %v4913_v29, %v4885_v62  ;;  %v5088_v62 = vmul.f32 %v9667_v53, %v9667_v53 }
 0xf80   : > { %v4937_v20 = vmul.f32 0.05, %v4914_v33  ;;  %vm4929_vm7 = vcmp.gt.f32.partialorder %v4914_v33, 0.0 }
 0xf81   : > { %v4858_v59 = vpop.f32.mrf.mxu0 }
 0xf82   : > { %v4916_v8 = vpop.f32.mrf.mxu2  ;;  %v4859_v23 = vadd.f32 %v4858_v59, %v4750_v21  ;;  %v4880_v21 = vadd.f32 %v4879_v31, %v4851_v32  ;;  %v4945_v57 = vsel %vm4929_vm7, %v4914_v33, %v4937_v20 }
 0xf84   : > { %v4892_v4 = vpop.f32.mrf.mxu1  ;;  %v4888_v11 = vadd.f32 %v4887_v44, %v4859_v23  ;;  %v4909_v54 = vadd.f32 %v4908_v1, %v4880_v21 }
 0xf86   : > { %v4917_v0 = vadd.f32 %v4916_v8, %v4888_v11  ;;  %v4935_v46 = vmul.f32 0.05, %v4909_v54  ;;  %vm4927_vm3 = vcmp.gt.f32.partialorder %v4909_v54, 0.0  ;;  %v8406_v8 = vld [vmem:[%s11928_s3] sm:$0xff] }
 0xf88   : > { %v4938_v56 = vmul.f32 0.05, %v4917_v0  ;;  %vm4930_vm2 = vcmp.gt.f32.partialorder %v4917_v0, 0.0  ;;  %v4943_v29 = vsel %vm4927_vm3, %v4909_v54, %v4935_v46  ;;  %v5116_v54 = vld [vmem:[%s11930_s10] sm:$0xff] }
 0xf89   : > { %v4860_v61 = vpop.f32.mrf.mxu0 }
 0xf8a   : > { %v4918_v13 = vpop.f32.mrf.mxu2  ;;  %v4861_v17 = vadd.f32 %v4860_v61, %v10230_v3  ;;  %v4946_v31 = vsel %vm4930_vm2, %v4917_v0, %v4938_v56  ;;  %v5018_v61 = vld [vmem:[%s11929_s6 + $0x8] sm:$0xff] }
 0xf8c   : > { %v4890_v19 = vadd.f32 %v4889_v52, %v4861_v17  ;;  %v4894_v34 = vpop.f32.mrf.mxu1  ;;  %v8407_v52 = vld [vmem:[%s11928_s3 + $0x8] sm:$0xff]  ;;  %s11932_s3 = sld [smem:[#allocation42_spill]] }
 0xf8e   : > { %v4919_v41 = vadd.f32 %v4918_v13, %v4890_v19  ;;  %v5017_v13 = vld [vmem:[%s11929_s6] sm:$0xff]  ;;  %s11935_s6 = sld [smem:[#allocation41_spill]] }
 0xf90   : > { %v4939_v49 = vmul.f32 0.05, %v4919_v41  ;;  %vm4931_vm14 = vcmp.gt.f32.partialorder %v4919_v41, 0.0 }
 0xf91   : > { %v4863_v45 = vpop.f32.mrf.mxu0 }
 0xf92   : > { %v4864_v63 = vadd.f32 %v4863_v45, %v10223_v38  ;;  %v4921_v6 = vpop.f32.mrf.mxu2  ;;  %v4883_v38 = vadd.f32 %v4882_v51, %v4854_v27  ;;  %v4947_v40 = vsel %vm4931_vm14, %v4919_v41, %v4939_v49  ;;  %v5091_v27 = vmul.f32 %v9700_v14, %v9700_v14 }
 0xf93   : > { %v4956_v51 = vpack.c.bf16 %v4947_v40, %v4946_v31  ;;  %v5117_v31 = vld [vmem:[%s11930_s10 + $0x8] sm:$0xff] }
 0xf94   : > { %v4893_v24 = vadd.f32 %v4892_v4, %v4864_v63  ;;  %v4912_v47 = vadd.f32 %v4911_v25, %v4883_v38  ;;  %v4934_v25 = vmul.f32 0.05, %v10261_v9 }
 0xf96   : > { %v4922_v28 = vadd.f32 %v4921_v6, %v4893_v24  ;;  %v4936_v58 = vmul.f32 0.05, %v4912_v47  ;;  %vm4928_vm8 = vcmp.gt.f32.partialorder %v4912_v47, 0.0 }
 0xf98   : > { %v4940_v50 = vmul.f32 0.05, %v4922_v28  ;;  %vm4932_vm9 = vcmp.gt.f32.partialorder %v4922_v28, 0.0  ;;  %v4944_v7 = vsel %vm4928_vm8, %v4912_v47, %v4936_v58  ;;  %v8542_v58 = vld [vmem:[%s8712_s13 + $0x3] ss:$0 sm:$0xff] }
 0xf99   : > { %v4865_v16 = vpop.f32.mrf.mxu0  ;;  %v4955_v1 = vpack.c.bf16 %v4945_v57, %v4944_v7 }
 0xf9a   : > { %v4866_v37 = vadd.f32 %v4865_v16, %v10243_v12  ;;  %v4923_v42 = vpop.f32.mrf.mxu2  ;;  %v4948_v12 = vsel %vm4932_vm9, %v4922_v28, %v4940_v50  ;;  %vm4926_vm9 = vcmp.gt.f32.partialorder %v10261_v9, 0.0  ;;  %v5089_v50 = vmul.f32 %v9671_v60, %v9671_v60 }
 0xf9b   : > { %v4942_v44 = vsel %vm4926_vm9, %v10261_v9, %v4934_v25 }
 0xf9c   : > { %v4895_v48 = vadd.f32 %v4894_v34, %v4866_v37  ;;  %v4954_v59 = vpack.c.bf16 %v4943_v29, %v4942_v44  ;;  %v5113_v37 = vsel %vm1471_vm0, %v5091_v27, 0.0  ;;  %v5107_v21 = vsel %vm1471_vm0, %v5089_v50, 0.0  ;;  %v8543_v29 = vld [vmem:[%s8712_s13 + $0x2] ss:$0 sm:$0xff] }
 0xf9e   : > { %v4924_v3 = vadd.f32 %v4923_v42, %v4895_v48  ;;  %v5104_v48 = vsel %vm1471_vm0, %v5088_v62, 0.0  ;;  %v5202_v62 = vld [vmem:[%s11932_s3 + $0x10] sm:$0xff] }
 0xfa0   : > { %vm4933_vm10 = vcmp.gt.f32.partialorder %v4924_v3, 0.0  ;;  %v4941_v36 = vmul.f32 0.05, %v4924_v3 }
 0xfa2   : > { %v4949_v39 = vsel %vm4933_vm10, %v4924_v3, %v4941_v36 }
 0xfa3   : > { %v4957_v30 = vpack.c.bf16 %v4949_v39, %v4948_v12  ;;  %v8540_v39 = vld [vmem:[%s8712_s13 + $0x1] ss:$0 sm:$0xff] }
 0xfa5   : > { %5002 = vmatpush.bf16.msra.mxu3 %v4957_v30  ;;  %v8541_v30 = vld [vmem:[%s8712_s13] ss:$0 sm:$0xff] }
 0xfa9   : > { %5003 = vmatpush.bf16.msra.mxu3 %v4956_v51 }
 0xfad   : > { %5004 = vmatpush.bf16.msra.mxu3 %v4955_v1 }
 0xfb1   : > { %5005 = vmatpush.bf16.msra.mxu3 %v4954_v59 }
 0xfb4   : > { %8265 = vmatmul.msk.bf16.vlgmr.msra.gmra.mxu3 %vm1471_vm0, %v8406_v8 }
 0xfb5   : > { %5045 = vmatpush.msrb.mxu3 %v5018_v61 }
 0xfb7   : > { %5046 = vmatpush.msrb.mxu3 %v5017_v13 }
 0xfc4   : > { %8266 = vmatmul.msk.bf16.gmra.mxu3 %vm1471_vm0, %v8407_v52 }
0x1037   : > { %v5007_v4 = vpop.f32.mrf.mxu3 }
0x1038   : > { %v5008_v45 = vadd.f32 %v5007_v4, %v10255_v43 }
0x103a   : > { %8267 = vmatmul.msk.f32.vlgmr.msrb.gmra.mxu3 %vm1496_vm1, %v5008_v45 }
0x103f   : > { %v5009_v63 = vpop.f32.mrf.mxu3 }
0x1040   : > { %v5010_v9 = vadd.f32 %v5009_v63, %v10241_v18  ;;  %v5090_v18 = vmul.f32 %v9682_v35, %v9682_v35  ;;  %v5200_v63 = vld [vmem:[%s11932_s3] sm:$0xff] }
0x1042   : > { %8268 = vmatmul.msk.f32.gmra.mxu3 %vm1496_vm1, %v5010_v9  ;;  %v8544_v9 = vld [vmem:[%s8712_s13 + $0x5] ss:$0 sm:$0xff] }
0x1047   : > { %v5012_v6 = vpop.f32.mrf.mxu3 }
0x1048   : > { %v5013_v17 = vadd.f32 %v5012_v6, %v10257_v26  ;;  %v5110_v26 = vsel %vm1471_vm0, %v5090_v18, 0.0 }
0x104a   : > { %8269 = vmatmul.msk.f32.gmra.mxu3 %vm1496_vm1, %v5013_v17 }
0x104f   : > { %v5014_v23 = vpop.f32.mrf.mxu3 }
0x1050   : > { %v5015_v24 = vadd.f32 %v5014_v23, %v10259_v2 }
0x1052   : > { %8270 = vmatmul.msk.f32.gmra.mxu3 %vm1496_vm1, %v5015_v24 }
0x10bd   : > { %v10283_v22 = vpop.f32.mrf.mxu3 }
0x10be   : > { %v5084_v41 = vmul.f32 %v10283_v22, %v10283_v22  ;;  %v5060_v42 = vsel %vm1471_vm0, %v10283_v22, 0.0 }
0x10c0   : > { %v5092_v38 = vsel %vm1471_vm0, %v5084_v41, 0.0  ;;  %v8545_v41 = vld [vmem:[%s8712_s13 + $0x7] ss:$0 sm:$0xff] }
0x10c5   : > { %v10285_v43 = vpop.f32.mrf.mxu3 }
0x10c6   : > { %v5063_v19 = vsel %vm1471_vm0, %v10285_v43, 0.0  ;;  %v5085_v0 = vmul.f32 %v10285_v43, %v10285_v43 }
0x10c7   : > { %5064 = vadd.xlane.f32.xlu0 %v5063_v19 }
0x10c8   : > { %v5095_v3 = vsel %vm1471_vm0, %v5085_v0, 0.0 }
0x10cd   : > { %v10291_v16 = vpop.f32.mrf.mxu3 }
0x10ce   : > { %v5066_v2 = vsel %vm1471_vm0, %v10291_v16, 0.0  ;;  %v5086_v33 = vmul.f32 %v10291_v16, %v10291_v16 }
0x10cf   : > { %5111 = vadd.xlane.f32.xlu0 %v5110_v26  ;;  %5067 = vadd.xlane.f32.xlu2 %v5066_v2  ;;  %v5201_v26 = vld [vmem:[%s11932_s3 + $0x8] sm:$0xff]  ;;  %v10344_v2 = vld [vmem:[#allocation3] sm:$0xff] }
0x10d0   : > { %v5098_v49 = vsel %vm1471_vm0, %v5086_v33, 0.0 }
0x10d5   : > { %v10298_v11 = vpop.f32.mrf.mxu3 }
0x10d6   : > { %v5087_v28 = vmul.f32 %v10298_v11, %v10298_v11  ;;  %v5069_v32 = vsel %vm1471_vm0, %v10298_v11, 0.0 }
0x10d7   : > { %5114 = vadd.xlane.f32.xlu2 %v5113_v37  ;;  %5070 = vadd.xlane.f32.xlu1 %v5069_v32 }
0x10d8   : > { %v5101_v34 = vsel %vm1471_vm0, %v5087_v28, 0.0 }
0x10d9   : > { %5102 = vadd.xlane.f32.xlu0 %v5101_v34 }
0x10df   : > { %5105 = vadd.xlane.f32.xlu2 %v5104_v48  ;;  %5061 = vadd.xlane.f32.xlu1 %v5060_v42 }
0x10e1   : > { %5093 = vadd.xlane.f32.xlu0 %v5092_v38 }
0x10e7   : > { %5096 = vadd.xlane.f32.xlu2 %v5095_v3  ;;  %5108 = vadd.xlane.f32.xlu1 %v5107_v21  ;;  %v5203_v21 = vld [vmem:[%s11932_s3 + $0x18] sm:$0xff] }
0x10ef   : > { %5099 = vadd.xlane.f32.xlu1 %v5098_v49 }
0x10f5   : > { %5477 = vrot.lane.b32.xlu0 %v8541_v30, %s11908_s18 }
0x10ff   : > { %5587 = vrot.lane.b32.xlu2 %v8540_v39, %s11931_s11  ;;  %v5204_v39 = vld [vmem:[%s11932_s3 + $0x20] sm:$0xff] }
0x1107   : > { %5807 = vrot.lane.b32.xlu2 %v8542_v58, %s11905_s16 }
0x1108   : > { %5697 = vrot.lane.b32.xlu1 %v8543_v29, %s11933_s5 }
0x110f   : > { %5925 = vrot.lane.b32.xlu2 %v8544_v9, %s11916_s8 }
0x1110   : > { %6049 = vrot.lane.b32.xlu1 %v8545_v41, %s11910_s1 }
0x113a   : > { %v5065_v47 = vpop.xlane.xlu0 %5064 }
0x1142   : > { %v5068_v36 = vpop.xlane.xlu2 %5067  ;;  %v5112_v40 = vpop.xlane.xlu0 %5111 }
0x114a   : > { %v5071_v56 = vpop.xlane.xlu1 %5070  ;;  %v5115_v12 = vpop.xlane.xlu2 %5114 }
0x114b   : > { %5136 = vmatpush.msrb.mxu0 %v5071_v56 }
0x114c   : > { %v5103_v57 = vpop.xlane.xlu0 %5102 }
0x114d   : > { %5137 = vmatpush.msrb.mxu0 %v5068_v36 }
0x114f   : > { %5138 = vmatpush.msrb.mxu0 %v5065_v47 }
0x1152   : > { %v5062_v20 = vpop.xlane.xlu1 %5061  ;;  %v5106_v51 = vpop.xlane.xlu2 %5105 }
0x1153   : > { %5139 = vmatpush.msrb.mxu0 %v5062_v20 }
0x1154   : > { %8271 = vmatmul.msk.f32.vlgmr.msrb.gmra.mxu0 %vm1471_vm0, %v5116_v54  ;;  %v5094_v1 = vpop.xlane.xlu0 %5093 }
0x1155   : > { %5157 = vmatpush.msra.mxu0 %v5115_v12 }
0x1157   : > { %5158 = vmatpush.msra.mxu0 %v5112_v40  ;;  %v5206_v40 = vld [vmem:[%s11932_s3 + $0x30] sm:$0xff] }
0x115a   : > { %v5109_v46 = vpop.xlane.xlu1 %5108  ;;  %v5097_v7 = vpop.xlane.xlu2 %5096 }
0x115b   : > { %5159 = vmatpush.msra.mxu0 %v5109_v46  ;;  %v8547_v46 = vld [vmem:[%s8712_s13 + $0x8] ss:$0 sm:$0xff] }
0x115c   : > { %8272 = vmatmul.msk.f32.gmra.mxu0 %vm1471_vm0, %v5117_v31 }
0x115d   : > { %5160 = vmatpush.msra.mxu0 %v5106_v51  ;;  %v8546_v51 = vld [vmem:[%s8712_s13 + $0x6] ss:$0 sm:$0xff] }
0x115f   : > { %5161 = vmatpush.msra.mxu0 %v5103_v57 }
0x1162   : > { %v5100_v25 = vpop.xlane.xlu1 %5099  ;;  %v10341_v23 = vpop.permute.xlu2 %5587 }
0x1163   : > { %5162 = vmatpush.msra.mxu0 %v5100_v25  ;;  %v5604_v27 = vmul.f32 %v10344_v2, %v10341_v23 }
0x1165   : > { %5163 = vmatpush.msra.mxu0 %v5097_v7  ;;  %5650 = vrot.lane.b32.xlu2 %v5604_v27, %s11910_s1 }
0x1166   : > { %5646 = vrot.lane.b32.xlu0 %v5604_v27, %s11910_s1  ;;  %5642 = vrot.lane.b32.xlu1 %v5604_v27, %s11910_s1 }
0x1167   : > { %5164 = vmatpush.msra.mxu0 %v5094_v1  ;;  %v10377_v20 = vpop.permute.xlu0 %5477 }
0x1168   : > { %8273 = vmatmul.msk.f32.vlgmr.msra.gmra.mxu0 %vm1471_vm0, %v5116_v54  ;;  %v5205_v54 = vld [vmem:[%s11932_s3 + $0x28] sm:$0xff]  ;;  %v5494_v58 = vmul.f32 %v10344_v2, %v10377_v20 }
0x116a   : > { %v10361_v56 = vpop.permute.xlu2 %5807 }
0x116b   : > { %v5824_v30 = vmul.f32 %v10344_v2, %v10361_v56 }
0x116d   : > { %5638 = vrot.lane.b32.xlu2 %v5604_v27, %s11910_s1 }
0x116e   : > { %5630 = vrot.lane.b32.xlu0 %v5604_v27, %s11910_s1  ;;  %5866 = vrot.lane.b32.xlu1 %v5824_v30, %s11916_s8 }
0x1170   : > { %8274 = vmatmul.msk.f32.gmra.mxu0 %vm1471_vm0, %v5117_v31  ;;  %v5207_v31 = vld [vmem:[%s11932_s3 + $0x38] sm:$0xff]  ;;  %s11934_s3 = sld [smem:[#allocation40_spill]] }
0x1175   : > { %5634 = vrot.lane.b32.xlu2 %v5604_v27, %s11910_s1 }
0x1176   : > { %5870 = vrot.lane.b32.xlu0 %v5824_v30, %s11916_s8  ;;  %5626 = vrot.lane.b32.xlu1 %v5604_v27, %s11910_s1  ;;  %v5314_v29 = vld [vmem:[%s11934_s3] sm:$0xff] }
0x117a   : > { %v10399_v57 = vpop.permute.xlu1 %5697 }
0x117b   : > { %v5712_v25 = vmul.f32 %v10344_v2, %v10399_v57 }
0x117d   : > { %5622 = vrot.lane.b32.xlu2 %v5604_v27, %s11910_s1 }
0x117e   : > { %5858 = vrot.lane.b32.xlu0 %v5824_v30, %s11916_s8  ;;  %5536 = vrot.lane.b32.xlu1 %v5494_v58, %s11907_s0 }
0x1185   : > { %5862 = vrot.lane.b32.xlu2 %v5824_v30, %s11916_s8 }
0x1186   : > { %5540 = vrot.lane.b32.xlu0 %v5494_v58, %s11907_s0  ;;  %5854 = vrot.lane.b32.xlu1 %v5824_v30, %s11916_s8 }
0x118d   : > { %5850 = vrot.lane.b32.xlu2 %v5824_v30, %s11916_s8 }
0x118e   : > { %5987 = vrot.lane.b32.xlu0 %v8546_v51, %s11909_s15  ;;  %6111 = vrot.lane.b32.xlu1 %v8547_v46, %s11907_s0  ;;  %v5319_v46 = vld [vmem:[%s11934_s3 + $0x28] sm:$0xff] }
0x1195   : > { %5528 = vrot.lane.b32.xlu2 %v5494_v58, %s11907_s0 }
0x1196   : > { %5842 = vrot.lane.b32.xlu0 %v5824_v30, %s11916_s8  ;;  %5532 = vrot.lane.b32.xlu1 %v5494_v58, %s11907_s0 }
0x119d   : > { %5846 = vrot.lane.b32.xlu2 %v5824_v30, %s11916_s8 }
0x119e   : > { %5524 = vrot.lane.b32.xlu0 %v5494_v58, %s11907_s0  ;;  %5520 = vrot.lane.b32.xlu1 %v5494_v58, %s11907_s0 }
0x11a5   : > { %5756 = vrot.lane.b32.xlu2 %v5712_v25, %s11909_s15 }
0x11a6   : > { %5512 = vrot.lane.b32.xlu0 %v5494_v58, %s11907_s0  ;;  %5760 = vrot.lane.b32.xlu1 %v5712_v25, %s11909_s15 }
0x11ad   : > { %5516 = vrot.lane.b32.xlu2 %v5494_v58, %s11907_s0 }
0x11ae   : > { %5752 = vrot.lane.b32.xlu0 %v5712_v25, %s11909_s15  ;;  %5748 = vrot.lane.b32.xlu1 %v5712_v25, %s11909_s15 }
0x11b5   : > { %5740 = vrot.lane.b32.xlu2 %v5712_v25, %s11909_s15 }
0x11b6   : > { %5744 = vrot.lane.b32.xlu1 %v5712_v25, %s11909_s15 }
0x11bd   : > { %5732 = vrot.lane.b32.xlu2 %v5712_v25, %s11909_s15 }
0x11be   : > { %5736 = vrot.lane.b32.xlu1 %v5712_v25, %s11909_s15 }
0x11d1   : > { %v5141_v44 = vpop.f32.mrf.mxu0 }
0x11d2   : > { %v5147_v52 = vmul.f32 0.00390625, %v5141_v44  ;;  %v10420_v44 = vpop.permute.xlu1 %6049 }
0x11d4   : > { %v5174_v13 = vmul.f32 %v5147_v52, %v5147_v52 }
0x11d8   : > { %v10435_v41 = vpop.permute.xlu0 %5646 }
0x11d9   : > { %v5144_v59 = vpop.f32.mrf.mxu0 }
0x11da   : > { %v5148_v8 = vmul.f32 0.00390625, %v5144_v59 }
0x11dc   : > { %5246 = vmatpush.msra.mxu1 %v5148_v8  ;;  %v5175_v24 = vmul.f32 %v5148_v8, %v5148_v8 }
0x11de   : > { %5247 = vmatpush.msra.mxu1 %v5147_v52 }
0x11df   : > { %8275 = vmatmul.msk.f32.vlgmr.msra.gmra.mxu1 %vm1496_vm1, %v5200_v63 }
0x11e5   : > { %v5166_v61 = vpop.f32.mrf.mxu0 }
0x11e6   : > { %v5172_v4 = vmul.f32 0.00390625, %v5166_v61  ;;  %v5330_v61 = vld [vmem:[%s11935_s6] sm:$0xff] }
0x11e7   : > { %8276 = vmatmul.msk.f32.gmra.mxu1 %vm1496_vm1, %v5201_v26 }
0x11e8   : > { %v5176_v45 = vsub.f32 %v5172_v4, %v5174_v13  ;;  %v5315_v13 = vld [vmem:[%s11934_s3 + $0x8] sm:$0xff] }
0x11ea   : > { %v5178_v6 = vadd.f32 1e-05, %v5176_v45  ;;  %v10424_v45 = vpop.permute.xlu2 %5925 }
0x11ec   : > { %8560 = vrsqrt.f32 %v5178_v6  ;;  %vm5186_vm7 = vweird.f32 %v5178_v6 }
0x11ed   : > { %v5169_v17 = vpop.f32.mrf.mxu0 }
0x11ee   : > { %v5173_v19 = vmul.f32 0.00390625, %v5169_v17  ;;  %v10426_v17 = vpop.permute.xlu1 %5642 }
0x11ef   : > { %8277 = vmatmul.msk.f32.gmra.mxu1 %vm1496_vm1, %v5202_v62 }
0x11f0   : > { %v5177_v18 = vsub.f32 %v5173_v19, %v5175_v24  ;;  %v5331_v19 = vld [vmem:[%s11935_s6 + $0x8] sm:$0xff] }
0x11f2   : > { %v8561_v28 = vpop.eup %8560  ;;  %v5179_v37 = vadd.f32 1e-05, %v5177_v18  ;;  %v5316_v18 = vld [vmem:[%s11934_s3 + $0x10] sm:$0xff] }
0x11f3   : > { %v5181_v32 = vmul.f32 %v8561_v28, %v5178_v6  ;;  %vm5187_vm14 = vweird.f32 %v8561_v28 }
0x11f4   : > { %8562 = vrsqrt.f32 %v5179_v37  ;;  %vm5196_vm10 = vweird.f32 %v5179_v37  ;;  %vm5188_vm8 = vmor %vm5186_vm7, %vm5187_vm14 }
0x11f5   : > { %v5182_v34 = vmul.f32 %v8561_v28, %v5181_v32 }
0x11f6   : > { %v10432_v32 = vpop.permute.xlu1 %5866 }
0x11f7   : > { %v5183_v38 = vmul.f32 0.5, %v5182_v34  ;;  %8278 = vmatmul.msk.f32.gmra.mxu1 %vm1496_vm1, %v5203_v21 }
0x11f9   : > { %v5184_v3 = vsub.f32 1.5, %v5183_v38 }
0x11fa   : > { %v8563_v48 = vpop.eup %8562 }
0x11fb   : > { %v5191_v42 = vmul.f32 %v8563_v48, %v5179_v37  ;;  %vm5197_vm3 = vweird.f32 %v8563_v48  ;;  %v5185_v36 = vmul.f32 %v8561_v28, %v5184_v3  ;;  %v10430_v37 = vpop.permute.xlu2 %5650 }
0x11fc   : > { %vm5198_vm2 = vmor %vm5196_vm10, %vm5197_vm3 }
0x11fd   : > { %v5192_v0 = vmul.f32 %v8563_v48, %v5191_v42  ;;  %v5189_v12 = vsel %vm5188_vm8, %v8561_v28, %v5185_v36  ;;  %vm11954_vm8 = vcmask 121856  }
0x11ff   : > { %v5193_v50 = vmul.f32 0.5, %v5192_v0  ;;  %8279 = vmatmul.msk.f32.gmra.mxu1 %vm1496_vm1, %v5204_v39 }
0x1201   : > { %v5194_v33 = vsub.f32 1.5, %v5193_v50  ;;  %v5333_v50 = vld [vmem:[%s11935_s6 + $0x18] sm:$0xff] }
0x1203   : > { %v5195_v49 = vmul.f32 %v8563_v48, %v5194_v33  ;;  %v10439_v33 = vpop.permute.xlu2 %5638 }
0x1205   : > { %v5199_v47 = vsel %vm5198_vm2, %v8563_v48, %v5195_v49  ;;  %v5317_v48 = vld [vmem:[%s11934_s3 + $0x18] sm:$0xff]  ;;  %v10441_v49 = vpop.permute.xlu1 %5626 }
0x1206   : > { %5287 = vmatpush.msra.mxu2 %v5199_v47  ;;  %v5318_v47 = vld [vmem:[%s11934_s3 + $0x20] sm:$0xff] }
0x1207   : > { %8280 = vmatmul.msk.f32.gmra.mxu1 %vm1496_vm1, %v5205_v54 }
0x1208   : > { %5288 = vmatpush.msra.mxu2 %v5189_v12  ;;  %v10444_v12 = vpop.permute.xlu0 %5630 }
0x1209   : > { %8283 = vmatmul.msk.f32.vlgmr.msra.gmra.mxu2 %vm1496_vm1, %v5200_v63 }
0x120b   : > { %v10447_v51 = vpop.permute.xlu2 %5634 }
0x120d   : > { %v10450_v25 = vpop.permute.xlu1 %5536 }
0x120f   : > { %8281 = vmatmul.msk.f32.gmra.mxu1 %vm1496_vm1, %v5206_v40 }
0x1211   : > { %8284 = vmatmul.msk.f32.gmra.mxu2 %vm1496_vm1, %v5201_v26 }
0x1217   : > { %8282 = vmatmul.msk.f32.gmra.mxu1 %vm1496_vm1, %v5207_v31 }
0x1219   : > { %8285 = vmatmul.msk.f32.gmra.mxu2 %vm1496_vm1, %v5202_v62  ;;  %v5332_v62 = vld [vmem:[%s11935_s6 + $0x10] sm:$0xff] }
0x1221   : > { %8286 = vmatmul.msk.f32.gmra.mxu2 %vm1496_vm1, %v5203_v21 }
0x1229   : > { %8287 = vmatmul.msk.f32.gmra.mxu2 %vm1496_vm1, %v5204_v39 }
0x1231   : > { %8288 = vmatmul.msk.f32.gmra.mxu2 %vm1496_vm1, %v5205_v54  ;;  %v5334_v54 = vld [vmem:[%s11935_s6 + $0x20] sm:$0xff] }
0x1239   : > { %8289 = vmatmul.msk.f32.gmra.mxu2 %vm1496_vm1, %v5206_v40 }
0x1241   : > { %8290 = vmatmul.msk.f32.gmra.mxu2 %vm1496_vm1, %v5207_v31 }
0x125c   : > { %v5249_v7 = vpop.f32.mrf.mxu1 }
0x1264   : > { %v5252_v1 = vpop.f32.mrf.mxu1 }
0x126c   : > { %v5255_v4 = vpop.f32.mrf.mxu1 }
0x1274   : > { %v5258_v27 = vpop.f32.mrf.mxu1 }
0x127c   : > { %v5261_v3 = vpop.f32.mrf.mxu1 }
0x1284   : > { %v5264_v58 = vpop.f32.mrf.mxu1 }
0x128c   : > { %v5290_v59 = vpop.f32.mrf.mxu2 }
0x128d   : > { %v5322_v8 = vmul.f32 %v5314_v29, %v5290_v59  ;;  %v5335_v59 = vld [vmem:[%s11935_s6 + $0x28] sm:$0xff] }
0x128f   : > { %5356 = vperm.xlu0 %8515, %v5322_v8   ;;  %v5338_v52 = vmul.f32 %v5322_v8, %v5249_v7 }
0x1291   : > { %v5346_v9 = vsub.f32 %v5330_v61, %v5338_v52  ;;  %v5320_v61 = vld [vmem:[%s11934_s3 + $0x30] sm:$0xff] }
0x1294   : > { %v5293_v63 = vpop.f32.mrf.mxu2 }
0x1295   : > { %v5323_v6 = vmul.f32 %v5315_v13, %v5293_v63  ;;  %v5267_v13 = vpop.f32.mrf.mxu1 }
0x1297   : > { %v5339_v24 = vmul.f32 %v5323_v6, %v5252_v1  ;;  %5404 = vperm.xlu0 %8515, %v5346_v9   ;;  %5361 = vperm.xlu1 %8513, %v5323_v6   ;;  %v10452_v1 = vpop.permute.xlu0 %5870  ;;  %v10458_v9 = vpop.permute.xlu1 %5854 }
0x1299   : > { %v5347_v26 = vsub.f32 %v5331_v19, %v5339_v24  ;;  %v5336_v24 = vld [vmem:[%s11935_s6 + $0x30] sm:$0xff] }
0x129c   : > { %v5296_v2 = vpop.f32.mrf.mxu2 }
0x129d   : > { %v5324_v28 = vmul.f32 %v5316_v18, %v5296_v2  ;;  %v5321_v2 = vld [vmem:[%s11934_s3 + $0x38] sm:$0xff]  ;;  %s11945_s3 = smov 15  }
0x129f   : > { %v5340_v34 = vmul.f32 %v5324_v28, %v5255_v4  ;;  %5409 = vperm.xlu1 %8513, %v5347_v26   ;;  %5366 = vperm.xlu2 %8514, %v5324_v28   ;;  %v10456_v4 = vpop.permute.xlu2 %5622  ;;  %v10461_v19 = vpop.permute.xlu0 %5858 }
0x12a0   : > { %v5270_v28 = vpop.f32.mrf.mxu1 }
0x12a1   : > { %v5348_v42 = vsub.f32 %v5332_v62, %v5340_v34 }
0x12a4   : > { %v5299_v38 = vpop.f32.mrf.mxu2 }
0x12a5   : > { %v5325_v0 = vmul.f32 %v5317_v48, %v5299_v38  ;;  %v5337_v48 = vld [vmem:[%s11935_s6 + $0x38] sm:$0xff]  ;;  %s11947_s6 = sld [smem:[#allocation44_spill]] }
0x12a7   : > { %v5341_v21 = vmul.f32 %v5325_v0, %v5258_v27  ;;  %5371 = vperm.xlu0 %8515, %v5325_v0   ;;  %5414 = vperm.xlu1 %8513, %v5348_v42   ;;  %v10464_v62 = vpop.permute.xlu2 %5862  ;;  %v10467_v42 = vpop.permute.xlu1 %6111 }
0x12a8   : > { %v10469_v0 = vpop.permute.xlu0 %5540 }
0x12a9   : > { %v5349_v36 = vsub.f32 %v5333_v50, %v5341_v21 }
0x12ab   : > { %5419 = vperm.xlu2 %8514, %v5349_v36  }
0x12ac   : > { %v5302_v39 = vpop.f32.mrf.mxu2 }
0x12ad   : > { %v5326_v30 = vmul.f32 %v5318_v47, %v5302_v39 }
0x12af   : > { %v5342_v40 = vmul.f32 %v5326_v30, %v5261_v3  ;;  %5376 = vperm.xlu1 %8513, %v5326_v30   ;;  %v10471_v3 = vpop.permute.xlu2 %5850  ;;  %v10473_v21 = vpop.permute.xlu1 %5532 }
0x12b0   : > { %v10475_v36 = vpop.permute.xlu0 %5987 }
0x12b1   : > { %v5350_v31 = vsub.f32 %v5334_v54, %v5342_v40 }
0x12b3   : > { %5424 = vperm.xlu0 %8515, %v5350_v31  }
0x12b4   : > { %v5305_v7 = vpop.f32.mrf.mxu2 }
0x12b5   : > { %v5327_v29 = vmul.f32 %v5319_v46, %v5305_v7 }
0x12b7   : > { %v5343_v8 = vmul.f32 %v5327_v29, %v5264_v58  ;;  %5381 = vperm.xlu2 %8514, %v5327_v29   ;;  %v10477_v47 = vpop.permute.xlu2 %5528  ;;  %v10479_v39 = vpop.permute.xlu1 %5520 }
0x12b8   : > { %v10481_v30 = vpop.permute.xlu0 %5842 }
0x12b9   : > { %v5351_v52 = vsub.f32 %v5335_v59, %v5343_v8 }
0x12bb   : > { %5429 = vperm.xlu1 %8513, %v5351_v52  }
0x12bc   : > { %v5308_v63 = vpop.f32.mrf.mxu2 }
0x12bd   : > { %v5328_v6 = vmul.f32 %v5320_v61, %v5308_v63 }
0x12bf   : > { %v5344_v18 = vmul.f32 %v5328_v6, %v5267_v13  ;;  %v10483_v54 = vpop.permute.xlu1 %5760  ;;  %v10485_v40 = vpop.permute.xlu2 %5846 }
0x12c0   : > { %v10487_v58 = vpop.permute.xlu0 %5524 }
0x12c1   : > { %v5352_v26 = vsub.f32 %v5336_v24, %v5344_v18 }
0x12c3   : > { %5434 = vperm.xlu0 %8515, %v5352_v26   ;;  %5386 = vperm.xlu1 %8513, %v5328_v6  }
0x12c4   : > { %v5311_v27 = vpop.f32.mrf.mxu2 }
0x12c5   : > { %v5329_v34 = vmul.f32 %v5321_v2, %v5311_v27 }
0x12c7   : > { %v5345_v38 = vmul.f32 %v5329_v34, %v5270_v28  ;;  %5391 = vperm.xlu2 %8514, %v5329_v34   ;;  %v10489_v31 = vpop.permute.xlu1 %5748  ;;  %v10491_v46 = vpop.permute.xlu2 %5756 }
0x12c8   : > { %v10493_v7 = vpop.permute.xlu0 %5512 }
0x12c9   : > { %v5353_v50 = vsub.f32 %v5337_v48, %v5345_v38 }
0x12cb   : > { %5439 = vperm.xlu0 %8515, %v5353_v50  }
0x12cf   : > { %v10495_v29 = vpop.permute.xlu1 %5744  ;;  %v10497_v59 = vpop.permute.xlu2 %5516 }
0x12d0   : > { %v10499_v8 = vpop.permute.xlu0 %5752 }
0x12d7   : > { %v10501_v52 = vpop.permute.xlu2 %5740  ;;  %v10503_v61 = vpop.permute.xlu1 %5736 }
0x12df   : > { %v10506_v26 = vpop.permute.xlu2 %5732 }
0x12f9   : > { %v5367_v34 = vpop.permute.xlu2 %5366 }
0x1301   : > { %v5357_v13 = vpop.permute.xlu0 %5356 }
0x1302   : > { %v5394_v63 = vmul.f32 %v5357_v13, %v10283_v22 }
0x1309   : > { %v5405_v6 = vpop.permute.xlu0 %5404  ;;  %v5362_v24 = vpop.permute.xlu1 %5361 }
0x130a   : > { %v5442_v18 = vadd.f32 %v5405_v6, %v5394_v63  ;;  %v5395_v2 = vmul.f32 %v5362_v24, %v10285_v43  ;;  %v5396_v43 = vmul.f32 %v5367_v34, %v10291_v16 }
0x130c   : > { %5450 = vst.msk [vmem:[#allocation3 + $0x8] sm:$0xff] %vm1471_vm0, %v5442_v18  ;;  %v5420_v18 = vpop.permute.xlu2 %5419 }
0x1311   : > { %v5410_v27 = vpop.permute.xlu1 %5409 }
0x1312   : > { %v5443_v28 = vadd.f32 %v5410_v27, %v5395_v2 }
0x1313   : > { %v10510_v48 = vld [vmem:[#allocation3 + $0x8] sm:$0xff] }
0x1314   : > { %v5898_v38 = vld [vmem:[#allocation3 + $0x8] sm:$0xff]  ;;  %5451 = vst.msk [vmem:[#allocation3 + $0x20] sm:$0xff] %vm1471_vm0, %v5443_v28  ;;  %v5591_v22 = vmul.f32 %v10341_v23, %v10510_v48  ;;  %v5811_v50 = vmul.f32 %v10361_v56, %v10510_v48 }
0x1315   : > { %5906 = vst.msk [vmem:[#allocation5 + $0x200] sm:$0xff] %vm1471_vm0, %v5898_v38  ;;  %v5701_v38 = vmul.f32 %v10399_v57, %v10510_v48 }
0x1316   : > { %5624 = vrot.lane.b32.xlu0 %v5591_v22, %s11910_s1  ;;  %5844 = vrot.lane.b32.xlu1 %v5811_v50, %s11916_s8  ;;  %v5481_v22 = vmul.f32 %v10510_v48, %v10377_v20 }
0x1319   : > { %v5372_v13 = vpop.permute.xlu0 %5371  ;;  %v5415_v63 = vpop.permute.xlu1 %5414 }
0x131a   : > { %v5397_v6 = vmul.f32 %v5372_v13, %v10298_v11  ;;  %v5444_v24 = vadd.f32 %v5415_v63, %v5396_v43 }
0x131b   : > { %v10522_v2 = vld [vmem:[#allocation3 + $0x20] sm:$0xff] }
0x131c   : > { %v5899_v27 = vld [vmem:[#allocation3 + $0x20] sm:$0xff]  ;;  %v5445_v28 = vadd.f32 %v5420_v18, %v5397_v6  ;;  %5452 = vst.msk [vmem:[#allocation3 + $0x38] sm:$0xff] %vm1471_vm0, %v5444_v24  ;;  %v5593_v16 = vmul.f32 %v10341_v23, %v10522_v2  ;;  %v5813_v43 = vmul.f32 %v10361_v56, %v10522_v2  ;;  %v5703_v6 = vmul.f32 %v10399_v57, %v10522_v2 }
0x131d   : > { %5907 = vst.msk [vmem:[#allocation5 + $0x210] sm:$0xff] %vm1471_vm0, %v5899_v27 }
0x131e   : > { %5453 = vst.msk [vmem:[#allocation3 + $0x50] sm:$0xff] %vm1471_vm0, %v5445_v28  ;;  %5734 = vrot.lane.b32.xlu0 %v5701_v38, %s11909_s15  ;;  %5514 = vrot.lane.b32.xlu1 %v5481_v22, %s11907_s0  ;;  %v5483_v28 = vmul.f32 %v10522_v2, %v10377_v20 }
0x131f   : > { %5628 = vrot.lane.b32.xlu2 %v5593_v16, %s11910_s1 }
0x1321   : > { %v5377_v11 = vpop.permute.xlu1 %5376 }
0x1322   : > { %v5398_v50 = vmul.f32 %v5377_v11, %v9667_v53  ;;  %v5382_v53 = vpop.permute.xlu2 %5381 }
0x1323   : > { %v10536_v34 = vld [vmem:[#allocation3 + $0x38] sm:$0xff]  ;;  %v5399_v27 = vmul.f32 %v5382_v53, %v9671_v60 }
0x1324   : > { %v5595_v13 = vmul.f32 %v10341_v23, %v10536_v34  ;;  %5908 = vst.msk [vmem:[#allocation5 + $0x220] sm:$0xff] %vm1471_vm0, %v10536_v34  ;;  %v5485_v16 = vmul.f32 %v10536_v34, %v10377_v20  ;;  %v5815_v60 = vmul.f32 %v10361_v56, %v10536_v34 }
0x1325   : > { %v5425_v63 = vpop.permute.xlu0 %5424  ;;  %v10547_v24 = vld [vmem:[#allocation3 + $0x50] sm:$0xff] }
0x1326   : > { %v5446_v18 = vadd.f32 %v5425_v63, %v5398_v50  ;;  %5848 = vrot.lane.b32.xlu0 %v5813_v43, %s11916_s8  ;;  %5632 = vrot.lane.b32.xlu1 %v5595_v13, %s11910_s1  ;;  %5909 = vst.msk [vmem:[#allocation5 + $0x230] sm:$0xff] %vm1471_vm0, %v10547_v24  ;;  %v5487_v38 = vmul.f32 %v10377_v20, %v10547_v24 }
0x1327   : > { %5738 = vrot.lane.b32.xlu2 %v5703_v6, %s11909_s15  ;;  %v5930_v6 = vmul.f32 %v10424_v45, %v10536_v34 }
0x1328   : > { %5454 = vst.msk [vmem:[#allocation3 + $0x68] sm:$0xff] %vm1471_vm0, %v5446_v18 }
0x132d   : > { %v5430_v22 = vpop.permute.xlu1 %5429 }
0x132e   : > { %v5447_v11 = vadd.f32 %v5430_v22, %v5399_v27  ;;  %5518 = vrot.lane.b32.xlu0 %v5483_v28, %s11907_s0  ;;  %5526 = vrot.lane.b32.xlu1 %v5487_v38, %s11907_s0  ;;  %v5392_v28 = vpop.permute.xlu2 %5391 }
0x132f   : > { %5522 = vrot.lane.b32.xlu2 %v5485_v16, %s11907_s0  ;;  %v10565_v50 = vld [vmem:[#allocation3 + $0x68] sm:$0xff]  ;;  %v5401_v38 = vmul.f32 %v5392_v28, %v9700_v14 }
0x1330   : > { %5455 = vst.msk [vmem:[#allocation3 + $0x80] sm:$0xff] %vm1471_vm0, %v5447_v11  ;;  %v5819_v43 = vmul.f32 %v10361_v56, %v10565_v50  ;;  %v5817_v11 = vmul.f32 %v10361_v56, %v10547_v24  ;;  %v5709_v28 = vmul.f32 %v10565_v50, %v10399_v57 }
0x1331   : > { %5910 = vst.msk [vmem:[#allocation5 + $0x240] sm:$0xff] %vm1471_vm0, %v10565_v50 }
0x1335   : > { %v5435_v13 = vpop.permute.xlu0 %5434  ;;  %v5387_v63 = vpop.permute.xlu1 %5386 }
0x1336   : > { %v5400_v18 = vmul.f32 %v5387_v63, %v9682_v35  ;;  %5852 = vrot.lane.b32.xlu0 %v5815_v60, %s11916_s8  ;;  %5860 = vrot.lane.b32.xlu1 %v5819_v43, %s11916_s8  ;;  %v5705_v35 = vmul.f32 %v10399_v57, %v10536_v34  ;;  %v5597_v43 = vmul.f32 %v10341_v23, %v10547_v24 }
0x1337   : > { %5948 = vrot.lane.b32.xlu2 %v5930_v6, %s11905_s16  ;;  %v10580_v53 = vld [vmem:[#allocation3 + $0x80] sm:$0xff]  ;;  %v5707_v63 = vmul.f32 %v10399_v57, %v10547_v24 }
0x1338   : > { %v5448_v27 = vadd.f32 %v5435_v13, %v5400_v18  ;;  %5911 = vst.msk [vmem:[#allocation5 + $0x250] sm:$0xff] %vm1471_vm0, %v10580_v53  ;;  %v5711_v22 = vmul.f32 %v10399_v57, %v10580_v53  ;;  %v5933_v13 = vmul.f32 %v10424_v45, %v10580_v53  ;;  %v5599_v18 = vmul.f32 %v10565_v50, %v10341_v23 }
0x133a   : > { %5456 = vst.msk [vmem:[#allocation3 + $0x98] sm:$0xff] %vm1471_vm0, %v5448_v27 }
0x133d   : > { %v5440_v16 = vpop.permute.xlu0 %5439 }
0x133e   : > { %v5449_v60 = vadd.f32 %v5440_v16, %v5401_v38  ;;  %5742 = vrot.lane.b32.xlu0 %v5705_v35, %s11909_s15  ;;  %5754 = vrot.lane.b32.xlu1 %v5711_v22, %s11909_s15  ;;  %v5489_v38 = vmul.f32 %v10565_v50, %v10377_v20  ;;  %v5601_v22 = vmul.f32 %v10580_v53, %v10341_v23 }
0x133f   : > { %5856 = vrot.lane.b32.xlu2 %v5817_v11, %s11916_s8  ;;  %v5932_v16 = vmul.f32 %v10424_v45, %v10565_v50  ;;  %v5929_v11 = vmul.f32 %v10424_v45, %v10522_v2 }
0x1340   : > { %5457 = vst.msk [vmem:[#allocation3 + $0xb0] sm:$0xff] %vm1471_vm0, %v5449_v60  ;;  %v5491_v60 = vmul.f32 %v10580_v53, %v10377_v20 }
0x1341   : > { %v10596_v14 = vld [vmem:[#allocation3 + $0x98] sm:$0xff] }
0x1342   : > { %5912 = vst.msk [vmem:[#allocation5 + $0x260] sm:$0xff] %vm1471_vm0, %v10596_v14  ;;  %v5603_v27 = vmul.f32 %v10341_v23, %v10596_v14  ;;  %v6058_v35 = vmul.f32 %v10420_v44, %v10596_v14 }
0x1346   : > { %5636 = vrot.lane.b32.xlu0 %v5597_v43, %s11910_s1  ;;  %5954 = vrot.lane.b32.xlu1 %v5933_v13, %s11905_s16  ;;  %v5821_v43 = vmul.f32 %v10361_v56, %v10580_v53  ;;  %v6054_v13 = vmul.f32 %v10420_v44, %v10536_v34 }
0x1347   : > { %5746 = vrot.lane.b32.xlu2 %v5707_v63, %s11909_s15  ;;  %v10609_v6 = vld [vmem:[#allocation3 + $0xb0] sm:$0xff]  ;;  %v5823_v63 = vmul.f32 %v10361_v56, %v10596_v14 }
0x1348   : > { %5913 = vst.msk [vmem:[#allocation5 + $0x270] sm:$0xff] %vm1471_vm0, %v10609_v6 }
0x134e   : > { %5640 = vrot.lane.b32.xlu0 %v5599_v18, %s11910_s1  ;;  %5648 = vrot.lane.b32.xlu1 %v5603_v27, %s11910_s1  ;;  %v5713_v18 = vmul.f32 %v10399_v57, %v10596_v14  ;;  %v5825_v27 = vmul.f32 %v10361_v56, %v10609_v6 }
0x134f   : > { %5750 = vrot.lane.b32.xlu2 %v5709_v28, %s11909_s15  ;;  %v5493_v28 = vmul.f32 %v10596_v14, %v10377_v20 }
0x1356   : > { %5530 = vrot.lane.b32.xlu0 %v5489_v38, %s11907_s0  ;;  %6080 = vrot.lane.b32.xlu1 %v6058_v35, %s11931_s11  ;;  %v5934_v38 = vmul.f32 %v10424_v45, %v10596_v14  ;;  %v5495_v35 = vmul.f32 %v10609_v6, %v10377_v20  ;;  %v6053_v20 = vmul.f32 %v10420_v44, %v10522_v2 }
0x1357   : > { %5644 = vrot.lane.b32.xlu2 %v5601_v22, %s11910_s1  ;;  %v6056_v22 = vmul.f32 %v10420_v44, %v10565_v50 }
0x135e   : > { %5952 = vrot.lane.b32.xlu0 %v5932_v16, %s11905_s16  ;;  %5946 = vrot.lane.b32.xlu1 %v5929_v11, %s11905_s16  ;;  %v5605_v11 = vmul.f32 %v10609_v6, %v10341_v23  ;;  %v5931_v23 = vmul.f32 %v10424_v45, %v10547_v24 }
0x135f   : > { %5534 = vrot.lane.b32.xlu2 %v5491_v60, %s11907_s0  ;;  %v6055_v60 = vmul.f32 %v10420_v44, %v10547_v24 }
0x1366   : > { %5864 = vrot.lane.b32.xlu0 %v5821_v43, %s11916_s8  ;;  %6072 = vrot.lane.b32.xlu1 %v6054_v13, %s11931_s11  ;;  %v5935_v13 = vmul.f32 %v10424_v45, %v10609_v6 }
0x1367   : > { %5868 = vrot.lane.b32.xlu2 %v5823_v63, %s11916_s8  ;;  %v5996_v63 = vmul.f32 %v10475_v36, %v10596_v14 }
0x136e   : > { %5758 = vrot.lane.b32.xlu0 %v5713_v18, %s11909_s15  ;;  %5872 = vrot.lane.b32.xlu1 %v5825_v27, %s11916_s8 }
0x136f   : > { %5538 = vrot.lane.b32.xlu2 %v5493_v28, %s11907_s0 }
0x1376   : > { %5956 = vrot.lane.b32.xlu0 %v5934_v38, %s11905_s16  ;;  %5542 = vrot.lane.b32.xlu1 %v5495_v35, %s11907_s0  ;;  %s11937_s0 = sld [smem:[#allocation28_spill]] }
0x1377   : > { %6076 = vrot.lane.b32.xlu2 %v6056_v22, %s11931_s11  ;;  %v5928_v22 = vmul.f32 %v10424_v45, %v10510_v48 }
0x1379   : > { %v5629_v56 = vpop.permute.xlu2 %5628 }
0x137a   : > { %v5655_v16 = vsel %vm3118_vm15, %v10441_v49, %v5629_v56  ;;  %v6120_v56 = vmul.f32 %v10467_v42, %v10596_v14  ;;  %v5995_v14 = vmul.f32 %v10475_v36, %v10580_v53 }
0x137b   : > { %5671 = vst.msk [vmem:[#allocation5 + $0x90] sm:$0xff] %vm1471_vm0, %v5655_v16 }
0x137e   : > { %5652 = vrot.lane.b32.xlu0 %v5605_v11, %s11910_s1  ;;  %6070 = vrot.lane.b32.xlu1 %v6053_v20, %s11931_s11  ;;  %v6118_v20 = vmul.f32 %v10467_v42, %v10565_v50  ;;  %s11936_s1 = sld [smem:[#allocation26_spill]] }
0x137f   : > { %6074 = vrot.lane.b32.xlu2 %v6055_v60, %s11931_s11 }
0x1381   : > { %v5739_v43 = vpop.permute.xlu2 %5738 }
0x1382   : > { %v5765_v49 = vsel %vm3151_vm11, %v10503_v61, %v5739_v43 }
0x1383   : > { %5781 = vst.msk [vmem:[#allocation5 + $0x110] sm:$0xff] %vm1471_vm0, %v5765_v49 }
0x1386   : > { %5950 = vrot.lane.b32.xlu0 %v5931_v23, %s11905_s16  ;;  %5958 = vrot.lane.b32.xlu1 %v5935_v13, %s11905_s16  ;;  %v6052_v13 = vmul.f32 %v10420_v44, %v10510_v48 }
0x1387   : > { %6018 = vrot.lane.b32.xlu2 %v5996_v63, %s11933_s5  ;;  %v5992_v63 = vmul.f32 %v10475_v36, %v10536_v34 }
0x1388   : > { %v5625_v18 = vpop.permute.xlu0 %5624  ;;  %v5845_v27 = vpop.permute.xlu1 %5844 }
0x1389   : > { %v5654_v61 = vsel %vm3118_vm15, %v10456_v4, %v5625_v18  ;;  %v5523_v28 = vpop.permute.xlu2 %5522  ;;  %v5874_v38 = vsel %vm1646_vm4, %v10481_v30, %v5845_v27  ;;  %v5715_v4 = vmul.f32 %v10609_v6, %v10399_v57  ;;  %v6057_v57 = vmul.f32 %v10420_v44, %v10580_v53 }
0x138a   : > { %5670 = vst.msk [vmem:[#allocation5 + $0x80] sm:$0xff] %vm1471_vm0, %v5654_v61  ;;  %v5546_v35 = vsel %vm3085_vm12, %v10479_v39, %v5523_v28  ;;  %v5994_v28 = vmul.f32 %v10475_v36, %v10565_v50 }
0x138b   : > { %5562 = vst.msk [vmem:[#allocation5 + $0x20] sm:$0xff] %vm1471_vm0, %v5546_v35 }
0x138c   : > { %5890 = vst.msk [vmem:[#allocation5 + $0x180] sm:$0xff] %vm1471_vm0, %v5874_v38  ;;  %v6117_v38 = vmul.f32 %v10467_v42, %v10547_v24 }
0x138e   : > { %5944 = vrot.lane.b32.xlu0 %v5928_v22, %s11905_s16  ;;  %6142 = vrot.lane.b32.xlu1 %v6120_v56, %s11908_s18  ;;  %v6119_v56 = vmul.f32 %v10467_v42, %v10580_v53 }
0x138f   : > { %5762 = vrot.lane.b32.xlu2 %v5715_v4, %s11909_s15  ;;  %v6121_v4 = vmul.f32 %v10467_v42, %v10609_v6  ;;  %s11938_s15 = sld [smem:[#allocation25_spill]] }
0x1390   : > { %v5735_v39 = vpop.permute.xlu0 %5734  ;;  %v5515_v30 = vpop.permute.xlu1 %5514 }
0x1391   : > { %v5764_v16 = vsel %vm3151_vm11, %v10506_v26, %v5735_v39  ;;  %v5949_v11 = vpop.permute.xlu2 %5948  ;;  %v5544_v45 = vsel %vm3085_vm12, %v10493_v7, %v5515_v30 }
0x1392   : > { %5780 = vst.msk [vmem:[#allocation5 + $0x100] sm:$0xff] %vm1471_vm0, %v5764_v16 }
0x1393   : > { %5970 = vst.msk [vmem:[#allocation5 + $0x2a0] sm:$0xff] %vm1471_vm0, %v5949_v11  ;;  %v6285_v11 = vld [vmem:[%s11936_s1 + $0x18] sm:$0xff] }
0x1394   : > { %5560 = vst.msk [vmem:[#allocation5] sm:$0xff] %vm1471_vm0, %v5544_v45  ;;  %v5997_v45 = vmul.f32 %v10475_v36, %v10609_v6 }
0x1396   : > { %6078 = vrot.lane.b32.xlu0 %v6057_v57, %s11931_s11  ;;  %6016 = vrot.lane.b32.xlu1 %v5995_v14, %s11933_s5 }
0x1397   : > { %6138 = vrot.lane.b32.xlu2 %v6118_v20, %s11908_s18  ;;  %v6116_v20 = vmul.f32 %v10467_v42, %v10536_v34  ;;  %v5991_v34 = vmul.f32 %v10475_v36, %v10522_v2 }
0x1398   : > { %v5849_v7 = vpop.permute.xlu0 %5848  ;;  %v5633_v26 = vpop.permute.xlu1 %5632 }
0x1399   : > { %v5875_v60 = vsel %vm1646_vm4, %v10485_v40, %v5849_v7  ;;  %v5857_v43 = vpop.permute.xlu2 %5856  ;;  %v5656_v49 = vsel %vm3118_vm15, %v10444_v12, %v5633_v26  ;;  %v6059_v40 = vmul.f32 %v10420_v44, %v10609_v6  ;;  %v6115_v7 = vmul.f32 %v10467_v42, %v10522_v2  ;;  %v6474_v2 = vld [vmem:[%s11937_s0 + $0x8] sm:$0xff] }
0x139a   : > { %5891 = vst.msk [vmem:[#allocation5 + $0x190] sm:$0xff] %vm1471_vm0, %v5875_v60  ;;  %v5877_v23 = vsel %vm1646_vm4, %v10458_v9, %v5857_v43 }
0x139b   : > { %5893 = vst.msk [vmem:[#allocation5 + $0x1b0] sm:$0xff] %vm1471_vm0, %v5877_v23 }
0x139c   : > { %5672 = vst.msk [vmem:[#allocation5 + $0xa0] sm:$0xff] %vm1471_vm0, %v5656_v49  ;;  %v6282_v49 = vld [vmem:[%s11936_s1] sm:$0xff] }
0x139e   : > { %6068 = vrot.lane.b32.xlu0 %v6052_v13, %s11931_s11  ;;  %6010 = vrot.lane.b32.xlu1 %v5992_v63, %s11933_s5 }
0x139f   : > { %6082 = vrot.lane.b32.xlu2 %v6059_v40, %s11931_s11  ;;  %s11941_s11 = smov 113  }
0x13a0   : > { %v5519_v12 = vpop.permute.xlu0 %5518  ;;  %v5527_v9 = vpop.permute.xlu1 %5526 }
0x13a1   : > { %v5545_v18 = vsel %vm3085_vm12, %v10497_v59, %v5519_v12  ;;  %v5747_v27 = vpop.permute.xlu2 %5746  ;;  %v5547_v61 = vsel %vm3085_vm12, %v10487_v58, %v5527_v9  ;;  %v5993_v59 = vmul.f32 %v10475_v36, %v10547_v24  ;;  %v6283_v12 = vld [vmem:[%s11936_s1 + $0x8] sm:$0xff] }
0x13a2   : > { %5561 = vst.msk [vmem:[#allocation5 + $0x10] sm:$0xff] %vm1471_vm0, %v5545_v18  ;;  %v5767_v44 = vsel %vm3151_vm11, %v10495_v29, %v5747_v27 }
0x13a3   : > { %5783 = vst.msk [vmem:[#allocation5 + $0x130] sm:$0xff] %vm1471_vm0, %v5767_v44 }
0x13a4   : > { %5563 = vst.msk [vmem:[#allocation5 + $0x30] sm:$0xff] %vm1471_vm0, %v5547_v61 }
0x13a6   : > { %6014 = vrot.lane.b32.xlu0 %v5994_v28, %s11933_s5  ;;  %6136 = vrot.lane.b32.xlu1 %v6117_v38, %s11908_s18 }
0x13a7   : > { %6012 = vrot.lane.b32.xlu2 %v5993_v59, %s11933_s5 }
0x13a8   : > { %v5853_v58 = vpop.permute.xlu0 %5852  ;;  %v5861_v29 = vpop.permute.xlu1 %5860 }
0x13a9   : > { %v5876_v35 = vsel %vm1646_vm4, %v10471_v3, %v5853_v58  ;;  %v5751_v22 = vpop.permute.xlu2 %5750  ;;  %v5878_v50 = vsel %vm1646_vm4, %v10461_v19, %v5861_v29  ;;  %v6114_v3 = vmul.f32 %v10467_v42, %v10510_v48 }
0x13aa   : > { %5892 = vst.msk [vmem:[#allocation5 + $0x1a0] sm:$0xff] %vm1471_vm0, %v5876_v35  ;;  %v5768_v24 = vsel %vm3151_vm11, %v10489_v31, %v5751_v22  ;;  %v6591_v22 = vmul.f32 %v9295_v5, %v9295_v5 }
0x13ab   : > { %5784 = vst.msk [vmem:[#allocation5 + $0x140] sm:$0xff] %vm1471_vm0, %v5768_v24 }
0x13ac   : > { %5894 = vst.msk [vmem:[#allocation5 + $0x1c0] sm:$0xff] %vm1471_vm0, %v5878_v50 }
0x13ae   : > { %6140 = vrot.lane.b32.xlu0 %v6119_v56, %s11908_s18  ;;  %6130 = vrot.lane.b32.xlu1 %v6114_v3, %s11908_s18  ;;  %v6592_v3 = vmul.f32 %v9273_v55, %v9273_v55 }
0x13af   : > { %6144 = vrot.lane.b32.xlu2 %v6121_v4, %s11908_s18 }
0x13b0   : > { %v5743_v19 = vpop.permute.xlu0 %5742  ;;  %v5755_v31 = vpop.permute.xlu1 %5754 }
0x13b1   : > { %v5766_v39 = vsel %vm3151_vm11, %v10501_v52, %v5743_v19  ;;  %v5645_v30 = vpop.permute.xlu2 %5644  ;;  %v5769_v53 = vsel %vm3151_vm11, %v10499_v8, %v5755_v31  ;;  %v5990_v52 = vmul.f32 %v10475_v36, %v10510_v48  ;;  %v6473_v48 = vld [vmem:[%s11937_s0] sm:$0xff]  ;;  %v6284_v36 = vld [vmem:[%s11936_s1 + $0x10] sm:$0xff]  ;;  %v6601_v19 = vadd.f32 %v6592_v3, %v6591_v22  ;;  %s11943_s0 = smov 112   ;;  %s11944_s1 = smov 111  }
0x13b2   : > { %5782 = vst.msk [vmem:[#allocation5 + $0x120] sm:$0xff] %vm1471_vm0, %v5766_v39  ;;  %v5659_v16 = vsel %vm3118_vm15, %v10426_v17, %v5645_v30 }
0x13b3   : > { %5675 = vst.msk [vmem:[#allocation5 + $0xd0] sm:$0xff] %vm1471_vm0, %v5659_v16  ;;  %v6200_v16 = vld [vmem:[#allocation5 + $0x1a0] sm:$0xff] }
0x13b4   : > { %5785 = vst.msk [vmem:[#allocation5 + $0x150] sm:$0xff] %vm1471_vm0, %v5769_v53 }
0x13b6   : > { %6020 = vrot.lane.b32.xlu0 %v5997_v45, %s11933_s5  ;;  %6303 = vperm.xlu1 %8513, %v6285_v11   ;;  %v6201_v11 = vld [vmem:[#allocation5 + $0x1b0] sm:$0xff] }
0x13b7   : > { %6006 = vrot.lane.b32.xlu2 %v5990_v52, %s11933_s5  ;;  %v6259_v45 = vpack.c.bf16 %v6201_v11, %v6200_v16  ;;  %v6199_v52 = vld [vmem:[#allocation5 + $0x190] sm:$0xff] }
0x13b8   : > { %v5637_v8 = vpop.permute.xlu0 %5636  ;;  %v5955_v57 = vpop.permute.xlu1 %5954 }
0x13b9   : > { %v5657_v17 = vsel %vm3118_vm15, %v10447_v51, %v5637_v8  ;;  %v5535_v14 = vpop.permute.xlu2 %5534  ;;  %5973 = vst.msk [vmem:[#allocation5 + $0x2d0] sm:$0xff] %vm1471_vm0, %v5955_v57  ;;  %v6198_v8 = vld [vmem:[#allocation5 + $0x180] sm:$0xff] }
0x13ba   : > { %5673 = vst.msk [vmem:[#allocation5 + $0xb0] sm:$0xff] %vm1471_vm0, %v5657_v17  ;;  %v5549_v6 = vsel %vm3085_vm12, %v10473_v21, %v5535_v14  ;;  %v6258_v17 = vpack.c.bf16 %v6199_v52, %v6198_v8  ;;  %v6176_v8 = vld [vmem:[#allocation5 + $0x20] sm:$0xff] }
0x13bb   : > { %5565 = vst.msk [vmem:[#allocation5 + $0x50] sm:$0xff] %vm1471_vm0, %v5549_v6 }
0x13be   : > { %6134 = vrot.lane.b32.xlu0 %v6116_v20, %s11908_s18  ;;  %6477 = vperm.xlu1 %8513, %v6473_v48  }
0x13bf   : > { %6132 = vrot.lane.b32.xlu2 %v6115_v7, %s11908_s18  ;;  %s11939_s18 = sld [smem:[#allocation13_spill]] }
0x13c0   : > { %v5641_v51 = vpop.permute.xlu0 %5640  ;;  %v5649_v26 = vpop.permute.xlu1 %5648 }
0x13c1   : > { %v5658_v21 = vsel %vm3118_vm15, %v10439_v33, %v5641_v51  ;;  %v5869_v60 = vpop.permute.xlu2 %5868  ;;  %v5660_v43 = vsel %vm3118_vm15, %v10435_v41, %v5649_v26 }
0x13c2   : > { %5674 = vst.msk [vmem:[#allocation5 + $0xc0] sm:$0xff] %vm1471_vm0, %v5658_v21  ;;  %v5880_v42 = vsel %vm1646_vm4, %v10432_v32, %v5869_v60  ;;  %v6187_v60 = vld [vmem:[#allocation5 + $0xd0] sm:$0xff] }
0x13c3   : > { %5896 = vst.msk [vmem:[#allocation5 + $0x1e0] sm:$0xff] %vm1471_vm0, %v5880_v42  ;;  %v6584_v42 = vadd.f32 %v9305_v10, %v9313_v15 }
0x13c4   : > { %5676 = vst.msk [vmem:[#allocation5 + $0xe0] sm:$0xff] %vm1471_vm0, %v5660_v43  ;;  %v6195_v43 = vld [vmem:[#allocation5 + $0x150] sm:$0xff] }
0x13c6   : > { %6008 = vrot.lane.b32.xlu0 %v5991_v34, %s11933_s5  ;;  %s11940_s5 = sld [smem:[#allocation27_spill]] }
0x13c7   : > { %6288 = vperm.xlu2 %8514, %v6282_v49   ;;  %v6194_v49 = vld [vmem:[#allocation5 + $0x140] sm:$0xff] }
0x13c8   : > { %v5531_v33 = vpop.permute.xlu0 %5530  ;;  %v6081_v41 = vpop.permute.xlu1 %6080 }
0x13c9   : > { %v5548_v23 = vsel %vm3085_vm12, %v10477_v47, %v5531_v33  ;;  %v5539_v13 = vpop.permute.xlu2 %5538  ;;  %6098 = vst.msk [vmem:[#allocation5 + $0x3e0] sm:$0xff] %vm1471_vm0, %v6081_v41  ;;  %v6186_v26 = vld [vmem:[#allocation5 + $0xc0] sm:$0xff]  ;;  %v6185_v33 = vld [vmem:[#allocation5 + $0xb0] sm:$0xff] }
0x13ca   : > { %5564 = vst.msk [vmem:[#allocation5 + $0x40] sm:$0xff] %vm1471_vm0, %v5548_v23  ;;  %v5550_v32 = vsel %vm3085_vm12, %v10450_v25, %v5539_v13  ;;  %v6204_v50 = vld [vmem:[#allocation5 + $0x1e0] sm:$0xff]  ;;  %v6252_v34 = vpack.c.bf16 %v6187_v60, %v6186_v26  ;;  %v6256_v23 = vpack.c.bf16 %v6195_v43, %v6194_v49  ;;  %v8413_v43 = vld [vmem:[%s11938_s15 + $0x2c] sm:$0xf] }
0x13cb   : > { %5566 = vst.msk [vmem:[#allocation5 + $0x60] sm:$0xff] %vm1471_vm0, %v5550_v32  ;;  %v6188_v6 = vld [vmem:[#allocation5 + $0xe0] sm:$0xff] }
0x13cc   : > { %v6174_v26 = vld [vmem:[#allocation5] sm:$0xff] }
0x13ce   : > { %6298 = vperm.xlu0 %8515, %v6284_v36   ;;  %v6184_v36 = vld [vmem:[#allocation5 + $0xa0] sm:$0xff] }
0x13cf   : > { %6482 = vperm.xlu2 %8514, %v6474_v2   ;;  %v6192_v2 = vld [vmem:[#allocation5 + $0x120] sm:$0xff] }
0x13d0   : > { %v5953_v63 = vpop.permute.xlu0 %5952  ;;  %v5947_v40 = vpop.permute.xlu1 %5946 }
0x13d1   : > { %5972 = vst.msk [vmem:[#allocation5 + $0x2c0] sm:$0xff] %vm1471_vm0, %v5953_v63  ;;  %v6077_v47 = vpop.permute.xlu2 %6076  ;;  %v6251_v63 = vpack.c.bf16 %v6185_v33, %v6184_v36 }
0x13d2   : > { %6096 = vst.msk [vmem:[#allocation5 + $0x3c0] sm:$0xff] %vm1471_vm0, %v6077_v47  ;;  %v6193_v47 = vld [vmem:[#allocation5 + $0x130] sm:$0xff] }
0x13d3   : > { %5969 = vst.msk [vmem:[#allocation5 + $0x290] sm:$0xff] %vm1471_vm0, %v5947_v40  ;;  %v6593_v40 = vmul.f32 %v9313_v15, %v9313_v15 }
0x13d6   : > { %6293 = vperm.xlu0 %8515, %v6283_v12   ;;  %v6182_v12 = vld [vmem:[#allocation5 + $0x80] sm:$0xff] }
0x13d8   : > { %v5865_v9 = vpop.permute.xlu0 %5864  ;;  %v6073_v18 = vpop.permute.xlu1 %6072 }
0x13d9   : > { %v5879_v25 = vsel %vm1646_vm4, %v10464_v62, %v5865_v9  ;;  %v6075_v27 = vpop.permute.xlu2 %6074  ;;  %6094 = vst.msk [vmem:[#allocation5 + $0x3a0] sm:$0xff] %vm1471_vm0, %v6073_v18  ;;  %v6581_v62 = vadd.f32 %v9273_v55, %v9295_v5  ;;  %v6255_v9 = vpack.c.bf16 %v6193_v47, %v6192_v2  ;;  %v6594_v18 = vmul.f32 %v9305_v10, %v9305_v10 }
0x13da   : > { %5895 = vst.msk [vmem:[#allocation5 + $0x1d0] sm:$0xff] %vm1471_vm0, %v5879_v25  ;;  %v6183_v25 = vld [vmem:[#allocation5 + $0x90] sm:$0xff] }
0x13db   : > { %6095 = vst.msk [vmem:[#allocation5 + $0x3b0] sm:$0xff] %vm1471_vm0, %v6075_v27  ;;  %v6190_v27 = vld [vmem:[#allocation5 + $0x100] sm:$0xff] }
0x13e0   : > { %v5759_v61 = vpop.permute.xlu0 %5758  ;;  %v5873_v44 = vpop.permute.xlu1 %5872 }
0x13e1   : > { %v5770_v28 = vsel %vm3151_vm11, %v10491_v46, %v5759_v61  ;;  %v6019_v38 = vpop.permute.xlu2 %6018  ;;  %v5881_v59 = vsel %vm1646_vm4, %v10452_v1, %v5873_v44  ;;  %v6203_v4 = vld [vmem:[#allocation5 + $0x1d0] sm:$0xff]  ;;  %v6604_v61 = vadd.f32 %v6594_v18, %v6593_v40  ;;  %v6250_v44 = vpack.c.bf16 %v6183_v25, %v6182_v12 }
0x13e2   : > { %5786 = vst.msk [vmem:[#allocation5 + $0x160] sm:$0xff] %vm1471_vm0, %v5770_v28  ;;  %v6219_v40 = vld [vmem:[#allocation5 + $0x2d0] sm:$0xff] }
0x13e3   : > { %6036 = vst.msk [vmem:[#allocation5 + $0x360] sm:$0xff] %vm1471_vm0, %v6019_v38  ;;  %v8408_v38 = vld [vmem:[%s11938_s15 + $0x4] sm:$0xf] }
0x13e4   : > { %5897 = vst.msk [vmem:[#allocation5 + $0x1f0] sm:$0xff] %vm1471_vm0, %v5881_v59  ;;  %v8295_v59 = vld [vmem:[%s11938_s15 + $0x14] sm:$0xf0] }
0x13e8   : > { %v5957_v58 = vpop.permute.xlu0 %5956  ;;  %6582 = vadd.xlane.f32.xlu1 %v6581_v62  ;;  %v5543_v29 = vpop.permute.xlu1 %5542  ;;  %v6191_v62 = vld [vmem:[#allocation5 + $0x110] sm:$0xff] }
0x13e9   : > { %5974 = vst.msk [vmem:[#allocation5 + $0x2e0] sm:$0xff] %vm1471_vm0, %v5957_v58  ;;  %v5763_v35 = vpop.permute.xlu2 %5762  ;;  %v5551_v46 = vsel %vm3085_vm12, %v10469_v0, %v5543_v29  ;;  %v6202_v0 = vld [vmem:[#allocation5 + $0x1c0] sm:$0xff] }
0x13ea   : > { %v5771_v1 = vsel %vm3151_vm11, %v10483_v54, %v5763_v35  ;;  %5567 = vst.msk [vmem:[#allocation5 + $0x70] sm:$0xff] %vm1471_vm0, %v5551_v46  ;;  %v6260_v54 = vpack.c.bf16 %v6203_v4, %v6202_v0  ;;  %v6196_v51 = vld [vmem:[#allocation5 + $0x160] sm:$0xff]  ;;  %v6254_v35 = vpack.c.bf16 %v6191_v62, %v6190_v27  ;;  %v8415_v62 = vld [vmem:[%s11938_s15 + $0x38] sm:$0xf0] }
0x13eb   : > { %5787 = vst.msk [vmem:[#allocation5 + $0x170] sm:$0xff] %vm1471_vm0, %v5771_v1  ;;  %v6205_v24 = vld [vmem:[#allocation5 + $0x1f0] sm:$0xff]  ;;  %v6236_v1 = vld [vmem:[#allocation5 + $0x3e0] sm:$0xff] }
0x13ec   : > { %v6261_v56 = vpack.c.bf16 %v6205_v24, %v6204_v50  ;;  %v6180_v24 = vld [vmem:[#allocation5 + $0x60] sm:$0xff] }
0x13ed   : > { %v6178_v4 = vld [vmem:[#allocation5 + $0x40] sm:$0xff] }
0x13ee   : > { %6381 = vmatpush.bf16.msrb.mxu0 %v6261_v56  ;;  %v8298_v56 = vor.u32 %v8408_v38, %v8295_v59  ;;  %v6213_v38 = vld [vmem:[#allocation5 + $0x270] sm:$0xff]  ;;  %v8313_v59 = vld [vmem:[%s11938_s15 + $0x28] sm:$0xf] }
0x13f0   : > { %v5653_v31 = vpop.permute.xlu0 %5652  ;;  %6602 = vadd.xlane.f32.xlu1 %v6601_v19  ;;  %v6071_v39 = vpop.permute.xlu1 %6070  ;;  %v6179_v19 = vld [vmem:[#allocation5 + $0x50] sm:$0xff]  ;;  %v6220_v60 = vld [vmem:[#allocation5 + $0x2e0] sm:$0xff] }
0x13f1   : > { %v5661_v30 = vsel %vm3118_vm15, %v10430_v37, %v5653_v31  ;;  %v6139_v53 = vpop.permute.xlu2 %6138  ;;  %6093 = vst.msk [vmem:[#allocation5 + $0x390] sm:$0xff] %vm1471_vm0, %v6071_v39  ;;  %v6181_v58 = vld [vmem:[#allocation5 + $0x70] sm:$0xff]  ;;  %v6248_v0 = vpack.c.bf16 %v6179_v19, %v6178_v4  ;;  %v6208_v19 = vld [vmem:[#allocation5 + $0x220] sm:$0xff] }
0x13f2   : > { %5677 = vst.msk [vmem:[#allocation5 + $0xf0] sm:$0xff] %vm1471_vm0, %v5661_v30  ;;  %6382 = vmatpush.bf16.msrb.mxu0 %v6260_v54  ;;  %v6197_v20 = vld [vmem:[#allocation5 + $0x170] sm:$0xff]  ;;  %v6249_v3 = vpack.c.bf16 %v6181_v58, %v6180_v24  ;;  %v6234_v30 = vld [vmem:[#allocation5 + $0x3c0] sm:$0xff] }
0x13f3   : > { %6158 = vst.msk [vmem:[#allocation5 + $0x440] sm:$0xff] %vm1471_vm0, %v6139_v53  ;;  %v6257_v21 = vpack.c.bf16 %v6197_v20, %v6196_v51  ;;  %v6177_v31 = vld [vmem:[#allocation5 + $0x30] sm:$0xff]  ;;  %v8293_v20 = vld [vmem:[%s11938_s15] sm:$0xf] }
0x13f4   : > { %v6212_v58 = vld [vmem:[#allocation5 + $0x260] sm:$0xff]  ;;  %v6209_v4 = vld [vmem:[#allocation5 + $0x230] sm:$0xff] }
0x13f6   : > { %6383 = vmatpush.bf16.msrb.mxu0 %v6259_v45 }
0x13f8   : > { %v5951_v57 = vpop.permute.xlu0 %5950  ;;  %v5959_v14 = vpop.permute.xlu1 %5958 }
0x13f9   : > { %5971 = vst.msk [vmem:[#allocation5 + $0x2b0] sm:$0xff] %vm1471_vm0, %v5951_v57  ;;  %v6083_v37 = vpop.permute.xlu2 %6082  ;;  %v6189_v48 = vld [vmem:[#allocation5 + $0xf0] sm:$0xff] }
0x13fa   : > { %6099 = vst.msk [vmem:[#allocation5 + $0x3f0] sm:$0xff] %vm1471_vm0, %v6083_v37  ;;  %6384 = vmatpush.bf16.msrb.mxu0 %v6258_v17  ;;  %v6253_v7 = vpack.c.bf16 %v6189_v48, %v6188_v6  ;;  %v6247_v17 = vpack.c.bf16 %v6177_v31, %v6176_v8  ;;  %v6233_v37 = vld [vmem:[#allocation5 + $0x3b0] sm:$0xff]  ;;  %v8301_v8 = vld [vmem:[%s11938_s15 + $0x8] sm:$0xf] }
0x13fb   : > { %5975 = vst.msk [vmem:[#allocation5 + $0x2f0] sm:$0xff] %vm1471_vm0, %v5959_v14  ;;  %v6232_v14 = vld [vmem:[#allocation5 + $0x3a0] sm:$0xff]  ;;  %v6175_v6 = vld [vmem:[#allocation5 + $0x10] sm:$0xff] }
0x13fc   : > { %6362 = vmatpush.bf16.msra.mxu3 %v6253_v7  ;;  %v8410_v7 = vld [vmem:[%s11938_s15 + $0x10] sm:$0xf0]  ;;  %v6275_v51 = vpack.c.bf16 %v6233_v37, %v6232_v14 }
0x13fd   : > { %v8294_v49 = vor.u32 %v8410_v7, %v8293_v20 }
0x13fe   : > { %6385 = vmatpush.bf16.msrb.mxu0 %v6257_v21  ;;  %v6246_v21 = vpack.c.bf16 %v6175_v6, %v6174_v26 }
0x1400   : > { %6585 = vadd.xlane.f32.xlu0 %v6584_v42  ;;  %v5945_v41 = vpop.permute.xlu0 %5944  ;;  %6363 = vmatpush.bf16.msra.mxu3 %v6252_v34  ;;  %v6143_v13 = vpop.permute.xlu1 %6142  ;;  %v8315_v42 = vld [vmem:[%s11938_s15 + $0x3c] sm:$0xf0]  ;;  %v6217_v12 = vld [vmem:[#allocation5 + $0x2b0] sm:$0xff] }
0x1401   : > { %5968 = vst.msk [vmem:[#allocation5 + $0x280] sm:$0xff] %vm1471_vm0, %v5945_v41  ;;  %v6013_v32 = vpop.permute.xlu2 %6012  ;;  %v6237_v28 = vld [vmem:[#allocation5 + $0x3f0] sm:$0xff] }
0x1402   : > { %6033 = vst.msk [vmem:[#allocation5 + $0x330] sm:$0xff] %vm1471_vm0, %v6013_v32  ;;  %6386 = vmatpush.bf16.msrb.mxu0 %v6256_v23  ;;  %v6277_v50 = vpack.c.bf16 %v6237_v28, %v6236_v1  ;;  %v6221_v48 = vld [vmem:[#allocation5 + $0x2f0] sm:$0xff]  ;;  %v6218_v32 = vld [vmem:[#allocation5 + $0x2c0] sm:$0xff] }
0x1403   : > { %6160 = vst.msk [vmem:[#allocation5 + $0x460] sm:$0xff] %vm1471_vm0, %v6143_v13  ;;  %v6269_v34 = vpack.c.bf16 %v6221_v48, %v6220_v60  ;;  %v6231_v13 = vld [vmem:[#allocation5 + $0x390] sm:$0xff]  ;;  %v6268_v47 = vpack.c.bf16 %v6219_v40, %v6218_v32  ;;  %v6242_v1 = vld [vmem:[#allocation5 + $0x440] sm:$0xff] }
0x1404   : > { %6364 = vmatpush.bf16.msra.mxu3 %v6251_v63  ;;  %v8318_v63 = vor.u32 %v8413_v43, %v8315_v42  ;;  %v8309_v60 = vld [vmem:[%s11938_s15 + $0x10] sm:$0xf]  ;;  %v8412_v43 = vld [vmem:[%s11938_s15 + $0x20] sm:$0xf0] }
0x1405   : > { %v8321_v40 = vld [vmem:[%s11938_s15 + $0x30] sm:$0xf] }
0x1406   : > { %6387 = vmatpush.bf16.msrb.mxu0 %v6255_v9  ;;  %v6216_v9 = vld [vmem:[#allocation5 + $0x2a0] sm:$0xff] }
0x1407   : > { %v6267_v18 = vpack.c.bf16 %v6217_v12, %v6216_v9  ;;  %v6517_v12 = vld [vmem:[%s11939_s18 + $0x50] sm:$0xff] }
0x1408   : > { %6605 = vadd.xlane.f32.xlu0 %v6604_v61  ;;  %v6079_v29 = vpop.permute.xlu0 %6078  ;;  %6365 = vmatpush.bf16.msra.mxu3 %v6250_v44  ;;  %v6017_v46 = vpop.permute.xlu1 %6016  ;;  %v6214_v61 = vld [vmem:[#allocation5 + $0x280] sm:$0xff]  ;;  %v6215_v44 = vld [vmem:[#allocation5 + $0x290] sm:$0xff] }
0x1409   : > { %6097 = vst.msk [vmem:[#allocation5 + $0x3d0] sm:$0xff] %vm1471_vm0, %v6079_v29  ;;  %v6145_v22 = vpop.permute.xlu2 %6144  ;;  %v6266_v28 = vpack.c.bf16 %v6215_v44, %v6214_v61  ;;  %v6265_v29 = vpack.c.bf16 %v6213_v38, %v6212_v58  ;;  %v6225_v48 = vld [vmem:[#allocation5 + $0x330] sm:$0xff]  ;;  %v8329_v61 = vld [vmem:[%s11938_s15 + $0x38] sm:$0xf]  ;;  %v8417_v44 = vld [vmem:[%s11938_s15 + $0x48] sm:$0xf0] }
0x140a   : > { %6161 = vst.msk [vmem:[#allocation5 + $0x470] sm:$0xff] %vm1471_vm0, %v6145_v22  ;;  %6388 = vmatpush.bf16.msrb.mxu0 %v6254_v35  ;;  %v6244_v45 = vld [vmem:[#allocation5 + $0x460] sm:$0xff]  ;;  %v8314_v35 = vor.u32 %v8415_v62, %v8313_v59  ;;  %v8330_v38 = vor.u32 %v8417_v44, %v8329_v61  ;;  %v8414_v59 = vld [vmem:[%s11938_s15 + $0x34] sm:$0xf]  ;;  %v8323_v62 = vld [vmem:[%s11938_s15 + $0x44] sm:$0xf0] }
0x140b   : > { %6035 = vst.msk [vmem:[#allocation5 + $0x350] sm:$0xff] %vm1471_vm0, %v6017_v46  ;;  %v8326_v58 = vor.u32 %v8414_v59, %v8323_v62 }
0x140c   : > { %6366 = vmatpush.bf16.msra.mxu3 %v6249_v3 }
0x140d   : > { %6389 = vmatmul.bf16.vlgmr.msrb.gmra.mxu0 %v8298_v56  ;;  %v6210_v56 = vld [vmem:[#allocation5 + $0x240] sm:$0xff] }
0x140e   : > { %6419 = vmatpush.bf16.msra.mxu0 %v6277_v50  ;;  %v6211_v50 = vld [vmem:[#allocation5 + $0x250] sm:$0xff] }
0x140f   : > { %v6264_v3 = vpack.c.bf16 %v6211_v50, %v6210_v56 }
0x1410   : > { %v6069_v54 = vpop.permute.xlu0 %6068  ;;  %6367 = vmatpush.bf16.msra.mxu3 %v6248_v0  ;;  %v6011_v39 = vpop.permute.xlu1 %6010  ;;  %v6235_v53 = vld [vmem:[#allocation5 + $0x3d0] sm:$0xff]  ;;  %v6263_v0 = vpack.c.bf16 %v6209_v4, %v6208_v19 }
0x1411   : > { %6092 = vst.msk [vmem:[#allocation5 + $0x380] sm:$0xff] %vm1471_vm0, %v6069_v54  ;;  %v6007_v16 = vpop.permute.xlu2 %6006  ;;  %v6276_v11 = vpack.c.bf16 %v6235_v53, %v6234_v30  ;;  %v6245_v52 = vld [vmem:[#allocation5 + $0x470] sm:$0xff]  ;;  %v6228_v54 = vld [vmem:[#allocation5 + $0x360] sm:$0xff] }
0x1412   : > { %6030 = vst.msk [vmem:[#allocation5 + $0x300] sm:$0xff] %vm1471_vm0, %v6007_v16  ;;  %v6281_v57 = vpack.c.bf16 %v6245_v52, %v6244_v45  ;;  %v6207_v30 = vld [vmem:[#allocation5 + $0x210] sm:$0xff]  ;;  %v6206_v16 = vld [vmem:[#allocation5 + $0x200] sm:$0xff] }
0x1413   : > { %6032 = vst.msk [vmem:[#allocation5 + $0x320] sm:$0xff] %vm1471_vm0, %v6011_v39  ;;  %6420 = vmatpush.bf16.msra.mxu0 %v6276_v11  ;;  %v6262_v45 = vpack.c.bf16 %v6207_v30, %v6206_v16  ;;  %v6227_v52 = vld [vmem:[#allocation5 + $0x350] sm:$0xff] }
0x1414   : > { %6442 = vmatpush.bf16.msrb.mxu1 %v6281_v57  ;;  %6368 = vmatpush.bf16.msra.mxu3 %v6247_v17  ;;  %v8411_v57 = vld [vmem:[%s11938_s15 + $0x18] sm:$0xf0] }
0x1415   : > { %v8302_v37 = vor.u32 %v8411_v57, %v8301_v8 }
0x1417   : > { %6421 = vmatpush.bf16.msra.mxu0 %v6275_v51 }
0x1418   : > { %v6015_v33 = vpop.permute.xlu0 %6014  ;;  %6369 = vmatpush.bf16.msra.mxu3 %v6246_v21  ;;  %v6137_v41 = vpop.permute.xlu1 %6136  ;;  %v6230_v23 = vld [vmem:[#allocation5 + $0x380] sm:$0xff] }
0x1419   : > { %6034 = vst.msk [vmem:[#allocation5 + $0x340] sm:$0xff] %vm1471_vm0, %v6015_v33  ;;  %v6133_v36 = vpop.permute.xlu2 %6132  ;;  %v6274_v2 = vpack.c.bf16 %v6231_v13, %v6230_v23  ;;  %v8409_v33 = vld [vmem:[%s11938_s15 + $0xc] sm:$0xf]  ;;  %v6222_v23 = vld [vmem:[#allocation5 + $0x300] sm:$0xff] }
0x141a   : > { %6155 = vst.msk [vmem:[#allocation5 + $0x410] sm:$0xff] %vm1471_vm0, %v6133_v36  ;;  %v6224_v14 = vld [vmem:[#allocation5 + $0x320] sm:$0xff] }
0x141b   : > { %6157 = vst.msk [vmem:[#allocation5 + $0x430] sm:$0xff] %vm1471_vm0, %v6137_v41  ;;  %6370 = vmatmul.bf16.vlgmr.msra.gmra.mxu3 %v8294_v49  ;;  %6422 = vmatpush.bf16.msra.mxu0 %v6274_v2  ;;  %v6271_v51 = vpack.c.bf16 %v6225_v48, %v6224_v14  ;;  %v8310_v49 = vor.u32 %v8412_v43, %v8309_v60  ;;  %v8303_v41 = vld [vmem:[%s11938_s15 + $0x1c] sm:$0xf0]  ;;  %v6521_v2 = vld [vmem:[%s11939_s18 + $0x70] sm:$0xff] }
0x141c   : > { %6400 = vmatpush.bf16.msrb.mxu3 %v6269_v34  ;;  %v8306_v36 = vor.u32 %v8409_v33, %v8303_v41 }
0x141d   : > { %6394 = vmatmul.bf16.gmra.mxu0 %v8318_v63  ;;  %v6519_v63 = vld [vmem:[%s11939_s18 + $0x60] sm:$0xff] }
0x1420   : > { %6401 = vmatpush.bf16.msrb.mxu3 %v6268_v47  ;;  %v6141_v25 = vpop.permute.xlu0 %6140  ;;  %v6131_v27 = vpop.permute.xlu1 %6130  ;;  %v6226_v11 = vld [vmem:[#allocation5 + $0x340] sm:$0xff] }
0x1421   : > { %6159 = vst.msk [vmem:[#allocation5 + $0x450] sm:$0xff] %vm1471_vm0, %v6141_v25  ;;  %v6272_v17 = vpack.c.bf16 %v6227_v52, %v6226_v11  ;;  %v6239_v42 = vld [vmem:[#allocation5 + $0x410] sm:$0xff]  ;;  %v8416_v47 = vld [vmem:[%s11938_s15 + $0x40] sm:$0xf0] }
0x1422   : > { %6154 = vst.msk [vmem:[#allocation5 + $0x400] sm:$0xff] %vm1471_vm0, %v6131_v27  ;;  %v6241_v7 = vld [vmem:[#allocation5 + $0x430] sm:$0xff]  ;;  %v8322_v9 = vor.u32 %v8416_v47, %v8321_v40  ;;  %v6511_v27 = vld [vmem:[%s11939_s18 + $0x20] sm:$0xff] }
0x1423   : > { %v6513_v25 = vld [vmem:[%s11939_s18 + $0x30] sm:$0xff] }
0x1424   : > { %6402 = vmatpush.bf16.msrb.mxu3 %v6267_v18  ;;  %v6515_v18 = vld [vmem:[%s11939_s18 + $0x40] sm:$0xff] }
0x1428   : > { %6403 = vmatpush.bf16.msrb.mxu3 %v6266_v28  ;;  %v6021_v46 = vpop.permute.xlu0 %6020  ;;  %v6243_v22 = vld [vmem:[#allocation5 + $0x450] sm:$0xff] }
0x1429   : > { %6037 = vst.msk [vmem:[#allocation5 + $0x370] sm:$0xff] %vm1471_vm0, %v6021_v46  ;;  %v6280_v24 = vpack.c.bf16 %v6243_v22, %v6242_v1  ;;  %v6238_v21 = vld [vmem:[#allocation5 + $0x400] sm:$0xff]  ;;  %v6509_v28 = vld [vmem:[%s11939_s18 + $0x10] sm:$0xff] }
0x142a   : > { %v6278_v34 = vpack.c.bf16 %v6239_v42, %v6238_v21 }
0x142b   : > { %6375 = vmatmul.bf16.gmra.mxu3 %v8314_v35  ;;  %6443 = vmatpush.bf16.msrb.mxu1 %v6280_v24  ;;  %v6304_v35 = vpop.permute.xlu1 %6303 }
0x142c   : > { %6404 = vmatpush.bf16.msrb.mxu3 %v6265_v29  ;;  %v6507_v29 = vld [vmem:[%s11939_s18] sm:$0xff] }
0x1430   : > { %6405 = vmatpush.bf16.msrb.mxu3 %v6264_v3  ;;  %v6135_v31 = vpop.permute.xlu0 %6134  ;;  %v6229_v39 = vld [vmem:[#allocation5 + $0x370] sm:$0xff] }
0x1431   : > { %6156 = vst.msk [vmem:[#allocation5 + $0x420] sm:$0xff] %vm1471_vm0, %v6135_v31  ;;  %v6273_v53 = vpack.c.bf16 %v6229_v39, %v6228_v54 }
0x1433   : > { %6423 = vmatpush.bf16.msra.mxu0 %v6273_v53  ;;  %v10921_v1 = vpop.permute.xlu1 %6477 }
0x1434   : > { %6406 = vmatpush.bf16.msrb.mxu3 %v6263_v0 }
0x1437   : > { %6424 = vmatpush.bf16.msra.mxu0 %v6272_v17 }
0x1438   : > { %6407 = vmatpush.bf16.msrb.mxu3 %v6262_v45  ;;  %v6009_v6 = vpop.permute.xlu0 %6008  ;;  %v6240_v20 = vld [vmem:[#allocation5 + $0x420] sm:$0xff] }
0x1439   : > { %6031 = vst.msk [vmem:[#allocation5 + $0x310] sm:$0xff] %vm1471_vm0, %v6009_v6  ;;  %v6279_v26 = vpack.c.bf16 %v6241_v7, %v6240_v20  ;;  %v6289_v6 = vpop.permute.xlu2 %6288 }
0x143b   : > { %6408 = vmatmul.bf16.vlgmr.msrb.gmra.mxu3 %v8302_v37  ;;  %6425 = vmatpush.bf16.msra.mxu0 %v6271_v51 }
0x143c   : > { %6444 = vmatpush.bf16.msrb.mxu1 %v6279_v26  ;;  %6537 = vmatpush.msra.mxu3 %v6521_v2 }
0x143e   : > { %6538 = vmatpush.msra.mxu3 %v6519_v63 }
0x1440   : > { %6445 = vmatpush.bf16.msrb.mxu1 %v6278_v34  ;;  %v6223_v13 = vld [vmem:[#allocation5 + $0x310] sm:$0xff]  ;;  %6539 = vmatpush.msra.mxu3 %v6517_v12  ;;  %v6299_v46 = vpop.permute.xlu0 %6298 }
0x1441   : > { %v6270_v32 = vpack.c.bf16 %v6223_v13, %v6222_v23 }
0x1442   : > { %6540 = vmatpush.msra.mxu3 %v6515_v18 }
0x1443   : > { %6426 = vmatpush.bf16.msra.mxu0 %v6270_v32  ;;  %8331 = vmatmul.msk.bf16.vlgmr.msrb.gmra.mxu1 %vm1471_vm0, %v8310_v49 }
0x1444   : > { %6541 = vmatpush.msra.mxu3 %v6513_v25 }
0x1446   : > { %6427 = vmatmul.bf16.vlgmr.msra.gmra.mxu0 %v8306_v36  ;;  %6542 = vmatpush.msra.mxu3 %v6511_v27 }
0x1448   : > { %6543 = vmatpush.msra.mxu3 %v6509_v28  ;;  %v6294_v22 = vpop.permute.xlu0 %6293 }
0x144a   : > { %6544 = vmatpush.msra.mxu3 %v6507_v29  ;;  %v6522_v29 = vld [vmem:[%s11939_s18 + $0x78] sm:$0xff] }
0x144b   : > { %6413 = vmatmul.bf16.gmra.mxu3 %v8322_v9 }
0x1453   : > { %8332 = vmatmul.msk.bf16.gmra.mxu1 %vm1471_vm0, %v8330_v38 }
0x1456   : > { %6432 = vmatmul.bf16.gmra.mxu0 %v8326_v58 }
0x145b   : > { %v6583_v50 = vpop.xlane.xlu1 %6582 }
0x1463   : > { %v6603_v3 = vpop.xlane.xlu1 %6602 }
0x1473   : > { %v6586_v24 = vpop.xlane.xlu0 %6585 }
0x1474   : > { %6627 = vmatpush.msrb.mxu3 %v6586_v24  ;;  %v6514_v24 = vld [vmem:[%s11939_s18 + $0x38] sm:$0xff] }
0x1476   : > { %6628 = vmatpush.msrb.mxu3 %v6583_v50  ;;  %v6516_v50 = vld [vmem:[%s11939_s18 + $0x48] sm:$0xff] }
0x147b   : > { %v6606_v56 = vpop.xlane.xlu0 %6605 }
0x147c   : > { %6652 = vmatpush.msrb.mxu0 %v6606_v56  ;;  %v6512_v56 = vld [vmem:[%s11939_s18 + $0x28] sm:$0xff] }
0x147e   : > { %6653 = vmatpush.msrb.mxu0 %v6603_v3  ;;  %v6510_v3 = vld [vmem:[%s11939_s18 + $0x18] sm:$0xff] }
0x148a   : > { %v6390_v4 = vpop.f32.mrf.mxu0 }
0x1492   : > { %v6392_v31 = vpop.f32.mrf.mxu0 }
0x149a   : > { %v6395_v39 = vpop.f32.mrf.mxu0 }
0x149e   : > { %v6371_v19 = vpop.f32.mrf.mxu3 }
0x149f   : > { %v6372_v48 = vadd.f32 %v6371_v19, %v6289_v6  ;;  %v8356_v6 = vld [vmem:[%s8707_s9 + $0x3] ss:$8 sm:$0x3] }
0x14a1   : > { %v6391_v43 = vadd.f32 %v6390_v4, %v6372_v48  ;;  %v6508_v4 = vld [vmem:[%s11939_s18 + $0x8] sm:$0xff]  ;;  %v7151_v48 = vperm.slane %v8356_v6, 0 }
0x14a2   : > { %v6397_v53 = vpop.f32.mrf.mxu0 }
0x14a6   : > { %v6373_v0 = vpop.f32.mrf.mxu3 }
0x14a7   : > { %v6374_v37 = vadd.f32 %v6373_v0, %v6294_v22  ;;  %v6518_v22 = vld [vmem:[%s11939_s18 + $0x58] sm:$0xff] }
0x14a9   : > { %v6393_v26 = vadd.f32 %v6392_v31, %v6374_v37  ;;  %v6483_v31 = vpop.permute.xlu2 %6482 }
0x14ae   : > { %v6376_v54 = vpop.f32.mrf.mxu3 }
0x14af   : > { %v6377_v17 = vadd.f32 %v6376_v54, %v6299_v46  ;;  %v6520_v46 = vld [vmem:[%s11939_s18 + $0x68] sm:$0xff] }
0x14b1   : > { %v6396_v20 = vadd.f32 %v6395_v39, %v6377_v17 }
0x14b6   : > { %v6378_v30 = vpop.f32.mrf.mxu3 }
0x14b7   : > { %v6379_v21 = vadd.f32 %v6378_v30, %v6304_v35  ;;  %v8418_v35 = vld [vmem:[%s11940_s5] sm:$0xff]  ;;  %s11942_s5 = smov 16  }
0x14b9   : > { %v6398_v33 = vadd.f32 %v6397_v53, %v6379_v21 }
0x14be   : > { %v6409_v16 = vpop.f32.mrf.mxu3 }
0x14bf   : > { %v6410_v41 = vadd.f32 %v6409_v16, %v6391_v43  ;;  %v6607_v43 = vld [vmem:[%s11893_s4] sm:$0xff] }
0x14c0   : > { %v6447_v11 = vpop.f32.mrf.mxu1 }
0x14c3   : > { %v6428_v45 = vpop.f32.mrf.mxu0 }
0x14c4   : > { %v6429_v13 = vadd.f32 %v6428_v45, %v6410_v41 }
0x14c6   : > { %v6411_v52 = vpop.f32.mrf.mxu3  ;;  %v6448_v12 = vadd.f32 %v6447_v11, %v6429_v13  ;;  %v8354_v13 = vld [vmem:[%s8707_s9 + $0x1] ss:$8 sm:$0x3] }
0x14c7   : > { %v6412_v42 = vadd.f32 %v6411_v52, %v6393_v26 }
0x14c8   : > { %v6449_v8 = vpop.f32.mrf.mxu1  ;;  %v6461_v61 = vmul.f32 0.05, %v6448_v12  ;;  %vm6457_vm9 = vcmp.gt.f32.partialorder %v6448_v12, 0.0 }
0x14ca   : > { %v6465_v62 = vsel %vm6457_vm9, %v6448_v12, %v6461_v61  ;;  %vm11958_vm9 = vmmov %vm11954_vm8 }
0x14cb   : > { %v6430_v57 = vpop.f32.mrf.mxu0 }
0x14cc   : > { %v6431_v23 = vadd.f32 %v6430_v57, %v6412_v42 }
0x14ce   : > { %v6414_v14 = vpop.f32.mrf.mxu3  ;;  %v6450_v63 = vadd.f32 %v6449_v8, %v6431_v23 }
0x14cf   : > { %v6415_v60 = vadd.f32 %v6414_v14, %v6396_v20  ;;  %v7152_v20 = vperm.slane %v8356_v6, 1 }
0x14d0   : > { %v6452_v7 = vpop.f32.mrf.mxu1  ;;  %v6462_v25 = vmul.f32 0.05, %v6450_v63  ;;  %vm6458_vm12 = vcmp.gt.f32.partialorder %v6450_v63, 0.0 }
0x14d2   : > { %v6466_v59 = vsel %vm6458_vm12, %v6450_v63, %v6462_v25  ;;  %vm11957_vm12 = vcmask 908288  }
0x14d3   : > { %v6433_v51 = vpop.f32.mrf.mxu0  ;;  %v6471_v58 = vpack.c.bf16 %v6466_v59, %v6465_v62 }
0x14d4   : > { %v6434_v34 = vadd.f32 %v6433_v51, %v6415_v60  ;;  %v8355_v51 = vld [vmem:[%s8707_s9 + $0x2] ss:$8 sm:$0x3]  ;;  %v8359_v60 = vld [vmem:[%s8707_s9 + $0x7] ss:$8 sm:$0x3] }
0x14d5   : > { %v7055_v26 = vperm.slane %v8355_v51, 0  ;;  %v7456_v42 = vperm.slane %v8359_v60, 1  ;;  %v7455_v41 = vperm.slane %v8359_v60, 0  ;;  %v7056_v23 = vperm.slane %v8355_v51, 1 }
0x14d6   : > { %v6416_v49 = vpop.f32.mrf.mxu3  ;;  %v6453_v32 = vadd.f32 %v6452_v7, %v6434_v34 }
0x14d7   : > { %v6417_v36 = vadd.f32 %v6416_v49, %v6398_v33  ;;  %v6608_v49 = vld [vmem:[%s11893_s4 + $0x8] sm:$0xff]  ;;  %7457 = vrot.lane.b32.xlu1 %v7455_v41, %s11942_s5  ;;  %s11946_s4 = smov 17  }
0x14d8   : > { %v6454_v47 = vpop.f32.mrf.mxu1  ;;  %v6463_v9 = vmul.f32 0.05, %v6453_v32  ;;  %vm6459_vm15 = vcmp.gt.f32.partialorder %v6453_v32, 0.0 }
0x14da   : > { %v6467_v44 = vsel %vm6459_vm15, %v6453_v32, %v6463_v9  ;;  %v6960_v32 = vperm.slane %v8354_v13, 1  ;;  %v8357_v9 = vld [vmem:[%s8707_s9 + $0x5] ss:$8 sm:$0x3]  ;;  %vm11955_vm15 = vcmask 138240  }
0x14db   : > { %v6435_v2 = vpop.f32.mrf.mxu0  ;;  %v7264_v25 = vperm.slane %v8357_v9, 1 }
0x14dc   : > { %v6436_v40 = vadd.f32 %v6435_v2, %v6417_v36  ;;  %v6959_v36 = vperm.slane %v8354_v13, 0  ;;  %v6861_v2 = vld [vmem:[%s8707_s9] ss:$8 sm:$0x3] }
0x14dd   : > { %v6863_v63 = vperm.slane %v6861_v2, 0 }
0x14de   : > { %v6455_v18 = vadd.f32 %v6454_v47, %v6436_v40  ;;  %v8358_v40 = vld [vmem:[%s8707_s9 + $0x6] ss:$8 sm:$0x3] }
0x14df   : > { %6963 = vrot.lane.b32.xlu1 %v6960_v32, %s11943_s0  ;;  %v7359_v47 = vperm.slane %v8358_v40, 0 }
0x14e0   : > { %vm6460_vm11 = vcmp.gt.f32.partialorder %v6455_v18, 0.0  ;;  %v6464_v27 = vmul.f32 0.05, %v6455_v18 }
0x14e2   : > { %v6468_v28 = vsel %vm6460_vm11, %v6455_v18, %v6464_v27  ;;  %v6864_v27 = vperm.slane %v6861_v2, 1  ;;  %vm11956_vm11 = vcmask 916480  }
0x14e3   : > { %v6472_v38 = vpack.c.bf16 %v6468_v28, %v6467_v44 }
0x14e5   : > { %6499 = vmatpush.bf16.msrb.mxu2 %v6472_v38 }
0x14e7   : > { %6865 = vrot.lane.b32.xlu1 %v6863_v63, %s11944_s1 }
0x14e9   : > { %6500 = vmatpush.bf16.msrb.mxu2 %v6471_v58 }
0x14ec   : > { %8337 = vmatmul.msk.bf16.vlgmr.msrb.gmra.mxu2 %vm3899_vm13, %v8418_v35 }
0x14ed   : > { %6560 = vmatpush.msra.mxu2 %v6522_v29  ;;  %v7360_v29 = vperm.slane %v8358_v40, 1 }
0x14ef   : > { %6561 = vmatpush.msra.mxu2 %v6520_v46  ;;  %7267 = vrot.lane.b32.xlu1 %v7264_v25, %s11916_s8 }
0x14f1   : > { %6562 = vmatpush.msra.mxu2 %v6518_v22 }
0x14f3   : > { %6563 = vmatpush.msra.mxu2 %v6516_v50 }
0x14f5   : > { %6564 = vmatpush.msra.mxu2 %v6514_v24  ;;  %v6691_v24 = vld [vmem:[%s8932_s27] sm:$0xff] }
0x14f7   : > { %6565 = vmatpush.msra.mxu2 %v6512_v56 }
0x14f9   : > { %6566 = vmatpush.msra.mxu2 %v6510_v3 }
0x14fb   : > { %6567 = vmatpush.msra.mxu2 %v6508_v4 }
0x1549   : > { %v11028_v32 = vpop.permute.xlu1 %7457 }
0x156f   : > { %v6502_v19 = vpop.f32.mrf.mxu2 }
0x1570   : > { %v6503_v0 = vadd.f32 %v6502_v19, %v10921_v1 }
0x1572   : > { %8338 = vmatmul.msk.f32.vlgmr.msra.gmra.mxu3 %vm1471_vm0, %v6503_v0  ;;  %8340 = vmatmul.msk.f32.vlgmr.msra.gmra.mxu2 %vm1471_vm0, %v6503_v0  ;;  %v6692_v0 = vld [vmem:[%s8932_s27 + $0x8] sm:$0xff] }
0x1577   : > { %v6504_v54 = vpop.f32.mrf.mxu2 }
0x1578   : > { %v6505_v39 = vadd.f32 %v6504_v54, %v6483_v31 }
0x157a   : > { %8339 = vmatmul.msk.f32.gmra.mxu3 %vm1471_vm0, %v6505_v39  ;;  %8341 = vmatmul.msk.f32.gmra.mxu2 %vm1471_vm0, %v6505_v39 }
0x15f5   : > { %v10938_v30 = vpop.f32.mrf.mxu3  ;;  %v10940_v53 = vpop.f32.mrf.mxu2 }
0x15f6   : > { %v6587_v16 = vmul.f32 %v10938_v30, %v10938_v30  ;;  %v6575_v1 = vadd.f32 %v10940_v53, %v10938_v30  ;;  %v6588_v11 = vmul.f32 %v10940_v53, %v10940_v53 }
0x15f8   : > { %6576 = vadd.xlane.f32.xlu2 %v6575_v1  ;;  %v6595_v45 = vadd.f32 %v6588_v11, %v6587_v16 }
0x15fa   : > { %6596 = vadd.xlane.f32.xlu0 %v6595_v45 }
0x15fd   : > { %v10948_v52 = vpop.f32.mrf.mxu3  ;;  %v10950_v8 = vpop.f32.mrf.mxu2 }
0x15fe   : > { %v6578_v57 = vadd.f32 %v10950_v8, %v10948_v52  ;;  %v6589_v17 = vmul.f32 %v10948_v52, %v10948_v52  ;;  %v6590_v14 = vmul.f32 %v10950_v8, %v10950_v8 }
0x1600   : > { %6579 = vadd.xlane.f32.xlu2 %v6578_v57  ;;  %v6598_v37 = vadd.f32 %v6590_v14, %v6589_v17  ;;  %v6693_v17 = vld [vmem:[%s8932_s27 + $0x10] sm:$0xff] }
0x1608   : > { %6599 = vadd.xlane.f32.xlu2 %v6598_v37  ;;  %v7263_v37 = vperm.slane %v8357_v9, 0 }
0x160e   : > { %7153 = vrot.lane.b32.xlu0 %v7151_v48, %s11905_s16 }
0x1616   : > { %7057 = vrot.lane.b32.xlu0 %v7055_v26, %s11941_s11 }
0x161e   : > { %7459 = vrot.lane.b32.xlu0 %v7456_v42, %s11942_s5 }
0x1620   : > { %7155 = vrot.lane.b32.xlu2 %v7152_v20, %s11905_s16  ;;  %v8360_v20 = vld [vmem:[%s8707_s9 + $0x10] ss:$8 sm:$0x3] }
0x1621   : > { %v7552_v26 = vperm.slane %v8360_v20, 1  ;;  %v7551_v41 = vperm.slane %v8360_v20, 0 }
0x1626   : > { %7361 = vrot.lane.b32.xlu0 %v7359_v47, %s11945_s3 }
0x1628   : > { %7059 = vrot.lane.b32.xlu2 %v7056_v23, %s11941_s11 }
0x162e   : > { %6867 = vrot.lane.b32.xlu0 %v6864_v27, %s11944_s1 }
0x1630   : > { %6961 = vrot.lane.b32.xlu2 %v6959_v36, %s11943_s0  ;;  %v11032_v36 = vpop.permute.xlu1 %6963 }
0x1638   : > { %7363 = vrot.lane.b32.xlu2 %v7360_v29, %s11945_s3  ;;  %v11036_v2 = vpop.permute.xlu1 %6865 }
0x1639   : > { %v6873_v63 = vmul.f32 0.0, %v11036_v2 }
0x1640   : > { %7265 = vrot.lane.b32.xlu2 %v7263_v37, %s11916_s8  ;;  %v6768_v37 = vld [vmem:[%s11947_s6 + $0x18] sm:$0xff] }
0x166b   : > { %v6577_v7 = vpop.xlane.xlu2 %6576 }
0x166d   : > { %v6597_v33 = vpop.xlane.xlu0 %6596 }
0x1673   : > { %v6580_v21 = vpop.xlane.xlu2 %6579 }
0x1674   : > { %6629 = vmatpush.msrb.mxu3 %v6580_v21  ;;  %v6694_v21 = vld [vmem:[%s8932_s27 + $0x18] sm:$0xff] }
0x1676   : > { %6630 = vmatpush.msrb.mxu3 %v6577_v7 }
0x1677   : > { %8342 = vmatmul.msk.f32.vlgmr.msrb.gmra.mxu3 %vm3899_vm13, %v6607_v43 }
0x167b   : > { %v6600_v34 = vpop.xlane.xlu2 %6599 }
0x167c   : > { %6654 = vmatpush.msrb.mxu0 %v6600_v34 }
0x167e   : > { %6655 = vmatpush.msrb.mxu0 %v6597_v33 }
0x167f   : > { %8343 = vmatmul.msk.f32.gmra.mxu3 %vm3899_vm13, %v6608_v49  ;;  %8344 = vmatmul.msk.f32.vlgmr.msrb.gmra.mxu0 %vm3899_vm13, %v6607_v43 }
0x1680   : > { %v10987_v31 = vpop.permute.xlu0 %7153 }
0x1681   : > { %v7161_v54 = vmul.f32 0.0, %v10987_v31 }
0x1683   : > { %7197 = vrot.lane.b32.xlu0 %v7161_v54, %s11916_s8  ;;  %7203 = vrot.lane.b32.xlu1 %v7161_v54, %s11916_s8  ;;  %v11005_v43 = vpop.permute.xlu2 %7155 }
0x1684   : > { %7185 = vrot.lane.b32.xlu2 %v7161_v54, %s11916_s8 }
0x1687   : > { %8345 = vmatmul.msk.f32.gmra.mxu0 %vm3899_vm13, %v6608_v49 }
0x1688   : > { %v11003_v60 = vpop.permute.xlu0 %7057 }
0x1689   : > { %v7065_v42 = vmul.f32 0.0, %v11003_v60 }
0x168b   : > { %7191 = vrot.lane.b32.xlu0 %v7161_v54, %s11916_s8  ;;  %v11011_v34 = vpop.permute.xlu2 %7059  ;;  %7553 = vrot.lane.b32.xlu1 %v7551_v41, %s11946_s4  ;;  %v6767_v54 = vld [vmem:[%s11947_s6 + $0x10] sm:$0xff] }
0x168c   : > { %7101 = vrot.lane.b32.xlu2 %v7065_v42, %s11945_s3 }
0x1690   : > { %v11021_v23 = vpop.permute.xlu0 %7459 }
0x1691   : > { %v7467_v13 = vmul.f32 0.0, %v11021_v23 }
0x1693   : > { %7555 = vrot.lane.b32.xlu0 %v7552_v26, %s11946_s4  ;;  %v11015_v49 = vpop.permute.xlu2 %6961  ;;  %7095 = vrot.lane.b32.xlu1 %v7065_v42, %s11945_s3 }
0x1694   : > { %v6969_v33 = vmul.f32 0.0, %v11015_v49 }
0x1696   : > { %7005 = vrot.lane.b32.xlu2 %v6969_v33, %s11942_s5 }
0x169b   : > { %7107 = vrot.lane.b32.xlu0 %v7065_v42, %s11945_s3  ;;  %v11041_v40 = vpop.permute.xlu2 %7363 }
0x169c   : > { %v7371_v47 = vmul.f32 0.0, %v11041_v40 }
0x169e   : > { %7511 = vrot.lane.b32.xlu2 %v7467_v13, %s11943_s0 }
0x16a3   : > { %7089 = vrot.lane.b32.xlu0 %v7065_v42, %s11945_s3 }
0x16a6   : > { %6993 = vrot.lane.b32.xlu2 %v6969_v33, %s11942_s5 }
0x16ab   : > { %7011 = vrot.lane.b32.xlu0 %v6969_v33, %s11942_s5 }
0x16ae   : > { %7499 = vrot.lane.b32.xlu2 %v7467_v13, %s11943_s0 }
0x16b3   : > { %7505 = vrot.lane.b32.xlu0 %v7467_v13, %s11943_s0 }
0x16b6   : > { %6909 = vrot.lane.b32.xlu2 %v6873_v63, %s11946_s4 }
0x16bb   : > { %6999 = vrot.lane.b32.xlu0 %v6969_v33, %s11942_s5 }
0x16be   : > { %7415 = vrot.lane.b32.xlu2 %v7371_v47, %s11941_s11 }
0x16c3   : > { %7493 = vrot.lane.b32.xlu0 %v7467_v13, %s11943_s0 }
0x16c6   : > { %6897 = vrot.lane.b32.xlu2 %v6873_v63, %s11946_s4 }
0x16cb   : > { %6915 = vrot.lane.b32.xlu0 %v6873_v63, %s11946_s4 }
0x16ce   : > { %7403 = vrot.lane.b32.xlu2 %v7371_v47, %s11941_s11 }
0x16d3   : > { %7409 = vrot.lane.b32.xlu0 %v7371_v47, %s11941_s11 }
0x16db   : > { %6903 = vrot.lane.b32.xlu0 %v6873_v63, %s11946_s4 }
0x16e3   : > { %7397 = vrot.lane.b32.xlu0 %v7371_v47, %s11941_s11 }
0x16fa   : > { %v6632_v12 = vpop.f32.mrf.mxu3 }
0x16fb   : > { %v6638_v18 = vmul.f32 0.001953125, %v6632_v12  ;;  %v11048_v12 = vpop.permute.xlu1 %7267 }
0x16fc   : > { %v6657_v61 = vpop.f32.mrf.mxu0  ;;  %v7275_v9 = vmul.f32 0.0, %v11048_v12 }
0x16fd   : > { %v6665_v44 = vmul.f32 %v6638_v18, %v6638_v18  ;;  %v6663_v28 = vmul.f32 0.001953125, %v6657_v61 }
0x16fe   : > { %7319 = vrot.lane.b32.xlu1 %v7275_v9, %s11905_s16  ;;  %7313 = vrot.lane.b32.xlu2 %v7275_v9, %s11905_s16 }
0x16ff   : > { %v6667_v38 = vsub.f32 %v6663_v28, %v6665_v44  ;;  %7307 = vrot.lane.b32.xlu0 %v7275_v9, %s11905_s16  ;;  %v6765_v28 = vld [vmem:[%s11947_s6] sm:$0xff] }
0x1701   : > { %v6669_v59 = vadd.f32 1e-05, %v6667_v38 }
0x1702   : > { %v6635_v62 = vpop.f32.mrf.mxu3 }
0x1703   : > { %8564 = vrsqrt.f32 %v6669_v59  ;;  %v6639_v58 = vmul.f32 0.001953125, %v6635_v62  ;;  %vm6677_vm2 = vweird.f32 %v6669_v59  ;;  %v6773_v62 = vld [vmem:[%s8927_s20] sm:$0xff] }
0x1704   : > { %v6660_v35 = vpop.f32.mrf.mxu0 }
0x1705   : > { %v6666_v46 = vmul.f32 %v6639_v58, %v6639_v58  ;;  %v6664_v22 = vmul.f32 0.001953125, %v6660_v35  ;;  %6721 = vmatpush.msra.mxu1 %v6639_v58  ;;  %v11067_v58 = vpop.permute.xlu2 %7265 }
0x1706   : > { %7301 = vrot.lane.b32.xlu1 %v7275_v9, %s11905_s16 }
0x1707   : > { %v6668_v50 = vsub.f32 %v6664_v22, %v6666_v46  ;;  %6722 = vmatpush.msra.mxu1 %v6638_v18  ;;  %v11057_v18 = vpop.permute.xlu0 %7361  ;;  %v6766_v22 = vld [vmem:[%s11947_s6 + $0x8] sm:$0xff] }
0x1708   : > { %8346 = vmatmul.msk.f32.vlgmr.msra.gmra.mxu1 %vm1496_vm1, %v6691_v24 }
0x1709   : > { %v8565_v56 = vpop.eup %8564  ;;  %v6670_v3 = vadd.f32 1e-05, %v6668_v50 }
0x170a   : > { %v6672_v4 = vmul.f32 %v8565_v56, %v6669_v59  ;;  %vm6678_vm10 = vweird.f32 %v8565_v56 }
0x170b   : > { %8566 = vrsqrt.f32 %v6670_v3  ;;  %vm6687_vm3 = vweird.f32 %v6670_v3  ;;  %vm6679_vm7 = vmor %vm6677_vm2, %vm6678_vm10 }
0x170c   : > { %v6673_v19 = vmul.f32 %v8565_v56, %v6672_v4  ;;  %vm11963_vm2 = vmmov %vm11955_vm15 }
0x170d   : > { %v11073_v4 = vpop.permute.xlu2 %7185 }
0x170e   : > { %v6674_v1 = vmul.f32 0.5, %v6673_v19 }
0x170f   : > { %v11059_v25 = vpop.permute.xlu0 %6867 }
0x1710   : > { %8347 = vmatmul.msk.f32.gmra.mxu1 %vm1496_vm1, %v6692_v0  ;;  %v6675_v57 = vsub.f32 1.5, %v6674_v1 }
0x1711   : > { %v8567_v39 = vpop.eup %8566 }
0x1712   : > { %v6682_v16 = vmul.f32 %v8567_v39, %v6670_v3  ;;  %vm6688_vm0 = vweird.f32 %v8567_v39  ;;  %v6676_v48 = vmul.f32 %v8565_v56, %v6675_v57  ;;  %v6774_v3 = vld [vmem:[%s8927_s20 + $0x8] sm:$0xff] }
0x1713   : > { %vm6689_vm14 = vmor %vm6687_vm3, %vm6688_vm0 }
0x1714   : > { %v6683_v11 = vmul.f32 %v8567_v39, %v6682_v16  ;;  %v6680_v51 = vsel %vm6679_vm7, %v8565_v56, %v6676_v48  ;;  %vm11959_vm0 = vmmov %vm11956_vm11 }
0x1715   : > { %vm11960_vm3 = vmmov %vm11959_vm0 }
0x1716   : > { %v6684_v45 = vmul.f32 0.5, %v6683_v11  ;;  %vm11961_vm10 = vmmov %vm11959_vm0 }
0x1717   : > { %v11061_v27 = vpop.permute.xlu0 %7197  ;;  %vm11965_vm7 = vmmov %vm11959_vm0 }
0x1718   : > { %v6685_v14 = vsub.f32 1.5, %v6684_v45  ;;  %8348 = vmatmul.msk.f32.gmra.mxu1 %vm1496_vm1, %v6693_v17  ;;  %v6775_v45 = vld [vmem:[%s8927_s20 + $0x10] sm:$0xff] }
0x171a   : > { %v6686_v6 = vmul.f32 %v8567_v39, %v6685_v14 }
0x171c   : > { %v6690_v7 = vsel %vm6689_vm14, %v8567_v39, %v6686_v6  ;;  %vm11962_vm14 = vmmov %vm11954_vm8 }
0x171d   : > { %6750 = vmatpush.msrb.mxu2 %v6690_v7  ;;  %v6776_v7 = vld [vmem:[%s8927_s20 + $0x18] sm:$0xff] }
0x171f   : > { %6751 = vmatpush.msrb.mxu2 %v6680_v51  ;;  %v11063_v44 = vpop.permute.xlu0 %7191 }
0x1720   : > { %8350 = vmatmul.msk.f32.vlgmr.msrb.gmra.mxu2 %vm1496_vm1, %v6691_v24  ;;  %8349 = vmatmul.msk.f32.gmra.mxu1 %vm1496_vm1, %v6694_v21 }
0x1727   : > { %v11070_v50 = vpop.permute.xlu0 %7555 }
0x1728   : > { %8351 = vmatmul.msk.f32.gmra.mxu2 %vm1496_vm1, %v6692_v0 }
0x172f   : > { %v11076_v11 = vpop.permute.xlu0 %7107 }
0x1730   : > { %8352 = vmatmul.msk.f32.gmra.mxu2 %vm1496_vm1, %v6693_v17  ;;  %v11079_v17 = vpop.permute.xlu2 %7101 }
0x1737   : > { %v11083_v26 = vpop.permute.xlu0 %7089 }
0x1738   : > { %8353 = vmatmul.msk.f32.gmra.mxu2 %vm1496_vm1, %v6694_v21  ;;  %v11085_v42 = vpop.permute.xlu2 %7005 }
0x1739   : > { %11948 = vst [vmem:[#allocation46_spill] sm:$0xff] %v11085_v42 }
0x173f   : > { %v11087_v33 = vpop.permute.xlu0 %7011 }
0x1740   : > { %v11089_v41 = vpop.permute.xlu2 %7511 }
0x1741   : > { %11949 = vst [vmem:[#allocation47_spill] sm:$0xff] %v11089_v41 }
0x1747   : > { %v11091_v13 = vpop.permute.xlu0 %7505 }
0x1748   : > { %v11093_v63 = vpop.permute.xlu2 %6993 }
0x174f   : > { %v11095_v47 = vpop.permute.xlu0 %6999 }
0x1750   : > { %v11097_v9 = vpop.permute.xlu2 %7499 }
0x1785   : > { %v6724_v61 = vpop.f32.mrf.mxu1 }
0x178d   : > { %v6727_v35 = vpop.f32.mrf.mxu1 }
0x1795   : > { %v6730_v39 = vpop.f32.mrf.mxu1 }
0x179d   : > { %v6733_v48 = vpop.f32.mrf.mxu1 }
0x17a3   : > { %v6753_v38 = vpop.f32.mrf.mxu2 }
0x17a4   : > { %v6769_v59 = vmul.f32 %v6765_v28, %v6753_v38  ;;  %v11101_v28 = vpop.permute.xlu2 %6909  ;;  %v11103_v38 = vpop.permute.xlu1 %7203 }
0x17a5   : > { %11950 = vst [vmem:[#allocation48_spill] sm:$0xff] %v11101_v28 }
0x17a6   : > { %v6777_v29 = vmul.f32 %v6769_v59, %v6724_v61  ;;  %6787 = vperm.xlu1 %8513, %v6769_v59   ;;  %v11099_v61 = vpop.permute.xlu0 %7493 }
0x17a8   : > { %v6781_v46 = vsub.f32 %v6773_v62, %v6777_v29 }
0x17aa   : > { %6815 = vperm.xlu2 %8514, %v6781_v46  }
0x17ab   : > { %v6756_v24 = vpop.f32.mrf.mxu2 }
0x17ac   : > { %v6770_v56 = vmul.f32 %v6766_v22, %v6756_v24  ;;  %v11107_v62 = vpop.permute.xlu2 %7415  ;;  %v11109_v29 = vpop.permute.xlu1 %7553 }
0x17ad   : > { %11952 = vst [vmem:[#allocation50_spill] sm:$0xff] %v11107_v62 }
0x17ae   : > { %v6778_v19 = vmul.f32 %v6770_v56, %v6727_v35  ;;  %6792 = vperm.xlu0 %8515, %v6770_v56   ;;  %v11105_v59 = vpop.permute.xlu0 %6915 }
0x17af   : > { %11951 = vst [vmem:[#allocation49_spill] sm:$0xff] %v11105_v59 }
0x17b0   : > { %v6782_v0 = vsub.f32 %v6774_v3, %v6778_v19 }
0x17b2   : > { %6820 = vperm.xlu1 %8513, %v6782_v0  }
0x17b3   : > { %v6759_v16 = vpop.f32.mrf.mxu2 }
0x17b4   : > { %v6771_v1 = vmul.f32 %v6767_v54, %v6759_v16  ;;  %v11113_v46 = vpop.permute.xlu2 %6897  ;;  %v11115_v22 = vpop.permute.xlu1 %7095 }
0x17b6   : > { %v6779_v57 = vmul.f32 %v6771_v1, %v6730_v39  ;;  %v11111_v35 = vpop.permute.xlu0 %7409 }
0x17b8   : > { %v6783_v14 = vsub.f32 %v6775_v45, %v6779_v57 }
0x17ba   : > { %6825 = vperm.xlu0 %8515, %v6783_v14   ;;  %6797 = vperm.xlu1 %8513, %v6771_v1  }
0x17bb   : > { %v6762_v6 = vpop.f32.mrf.mxu2 }
0x17bc   : > { %v6772_v20 = vmul.f32 %v6768_v37, %v6762_v6  ;;  %v11119_v56 = vpop.permute.xlu1 %7319  ;;  %v11121_v3 = vpop.permute.xlu2 %7403  ;;  %v11140_v6 = vsel %vm1629_vm6, %v10987_v31, %v11005_v43 }
0x17bd   : > { %11953 = vst [vmem:[#allocation51_spill] sm:$0xff] %v11119_v56 }
0x17be   : > { %v6780_v51 = vmul.f32 %v6772_v20, %v6733_v48  ;;  %6802 = vperm.xlu2 %8514, %v6772_v20   ;;  %v11117_v24 = vpop.permute.xlu0 %6903  ;;  %v11145_v48 = vsel %vm1593_vm5, %v11003_v60, %v11011_v34  ;;  %v7557_v60 = vsel %vm11955_vm15, %v11109_v29, %v11070_v50  ;;  %vm11966_vm15 = vmmov %vm11954_vm8 }
0x17c0   : > { %v6784_v21 = vsub.f32 %v6776_v7, %v6780_v51 }
0x17c2   : > { %6830 = vperm.xlu1 %8513, %v6784_v21  }
0x17c4   : > { %v11125_v0 = vpop.permute.xlu1 %7301  ;;  %v11127_v54 = vpop.permute.xlu2 %7313 }
0x17c6   : > { %v11123_v19 = vpop.permute.xlu0 %7397 }
0x17ce   : > { %v11129_v39 = vpop.permute.xlu0 %7307 }
0x1804   : > { %v6816_v57 = vpop.permute.xlu2 %6815 }
0x1818   : > { %v6788_v16 = vpop.permute.xlu1 %6787 }
0x1819   : > { %v6805_v1 = vmul.f32 %v6788_v16, %v10938_v30  ;;  %v6806_v45 = vmul.f32 %v6788_v16, %v10940_v53  ;;  %v11150_v30 = vsel %vm11954_vm8, %v11057_v18, %v11041_v40  ;;  %v11173_v16 = vsel %vm1496_vm1, %v11028_v32, %v11021_v23 }
0x181b   : > { %v11133_v14 = vadd.f32 %v6816_v57, %v6805_v1  ;;  %v11135_v37 = vadd.f32 %v6816_v57, %v6806_v45  ;;  %v11178_v1 = vsel %vm1646_vm4, %v11067_v58, %v11048_v12 }
0x181d   : > { %7241 = vst [vmem:[#allocation5 + $0x100] sm:$0xff] %v11133_v14  ;;  %v7370_v53 = vmul.f32 %v11150_v30, %v11135_v37  ;;  %v7162_v20 = vmul.f32 %v11140_v6, %v11133_v14  ;;  %v7066_v31 = vmul.f32 %v11145_v48, %v11133_v14  ;;  %v11166_v7 = vmul.f32 %v7557_v60, %v11135_v37 }
0x181e   : > { %v7465_v23 = vmul.f32 %v11028_v32, %v11133_v14  ;;  %v7369_v28 = vmul.f32 %v11057_v18, %v11133_v14 }
0x181f   : > { %7395 = vrot.lane.b32.xlu0 %v7370_v53, %s11941_s11  ;;  %7187 = vrot.lane.b32.xlu1 %v7162_v20, %s11916_s8 }
0x1820   : > { %7091 = vrot.lane.b32.xlu2 %v7066_v31, %s11945_s3  ;;  %v6793_v40 = vpop.permute.xlu0 %6792 }
0x1821   : > { %v6807_v51 = vmul.f32 %v6793_v40, %v10948_v52  ;;  %v6808_v21 = vmul.f32 %v6793_v40, %v10950_v8  ;;  %v7274_v52 = vmul.f32 %v11178_v1, %v11135_v37  ;;  %v7466_v8 = vmul.f32 %v11173_v16, %v11135_v37 }
0x1824   : > { %v6821_v45 = vpop.permute.xlu1 %6820 }
0x1825   : > { %v11180_v57 = vadd.f32 %v6821_v45, %v6807_v51  ;;  %v11182_v53 = vadd.f32 %v6821_v45, %v6808_v21  ;;  %v6971_v45 = vmul.f32 %v11032_v36, %v11135_v37 }
0x1827   : > { %7243 = vst [vmem:[#allocation5 + $0x110] sm:$0xff] %v11180_v57  ;;  %7299 = vrot.lane.b32.xlu0 %v7274_v52, %s11905_s16  ;;  %7491 = vrot.lane.b32.xlu1 %v7466_v8, %s11943_s0  ;;  %v11195_v12 = vmul.f32 %v7557_v60, %v11182_v53  ;;  %v7163_v52 = vmul.f32 %v11005_v43, %v11135_v37 }
0x1828   : > { %7489 = vrot.lane.b32.xlu2 %v7465_v23, %s11943_s0  ;;  %v7165_v23 = vmul.f32 %v11140_v6, %v11180_v57  ;;  %v7166_v41 = vmul.f32 %v11005_v43, %v11182_v53  ;;  %v7372_v59 = vmul.f32 %v11057_v18, %v11180_v57 }
0x182c   : > { %v6798_v40 = vpop.permute.xlu1 %6797  ;;  %v6826_v8 = vpop.permute.xlu0 %6825 }
0x182d   : > { %v6809_v51 = vmul.f32 %v6798_v40, %v9295_v5  ;;  %v6810_v21 = vmul.f32 %v6798_v40, %v9273_v55  ;;  %v6803_v5 = vpop.permute.xlu2 %6802  ;;  %v6965_v55 = vsel %vm11956_vm11, %v11015_v49, %v11032_v36  ;;  %v6869_v40 = vsel %vm11957_vm12, %v11036_v2, %v11059_v25  ;;  %vm11967_vm11 = vmmov %vm11963_vm2 }
0x182e   : > { %v6970_v2 = vmul.f32 %v6965_v55, %v11133_v14  ;;  %v6973_v42 = vmul.f32 %v6965_v55, %v11180_v57  ;;  %vm11969_vm12 = vmmov %vm11959_vm0 }
0x182f   : > { %v11209_v56 = vadd.f32 %v6826_v8, %v6809_v51  ;;  %v11211_v20 = vadd.f32 %v6826_v8, %v6810_v21  ;;  %6997 = vrot.lane.b32.xlu0 %v6971_v45, %s11942_s5  ;;  %7189 = vrot.lane.b32.xlu1 %v7163_v52, %s11916_s8  ;;  %v6811_v51 = vmul.f32 %v6803_v5, %v9313_v15 }
0x1830   : > { %7193 = vrot.lane.b32.xlu2 %v7165_v23, %s11916_s8  ;;  %v6812_v21 = vmul.f32 %v6803_v5, %v9305_v10  ;;  %v7069_v15 = vmul.f32 %v11145_v48, %v11180_v57  ;;  %v7469_v10 = vmul.f32 %v11173_v16, %v11182_v53 }
0x1831   : > { %7245 = vst [vmem:[#allocation5 + $0x120] sm:$0xff] %v11209_v56  ;;  %v11226_v45 = vmul.f32 %v6965_v55, %v11209_v56  ;;  %v11229_v52 = vmul.f32 %v6869_v40, %v11209_v56  ;;  %v11232_v23 = vmul.f32 %v7557_v60, %v11211_v20 }
0x1834   : > { %v6831_v8 = vpop.permute.xlu1 %6830 }
0x1835   : > { %v11234_v31 = vadd.f32 %v6831_v8, %v6811_v51  ;;  %v11236_v49 = vadd.f32 %v6831_v8, %v6812_v21 }
0x1837   : > { %7247 = vst [vmem:[#allocation5 + $0x130] sm:$0xff] %v11234_v31  ;;  %6995 = vrot.lane.b32.xlu1 %v6970_v2, %s11942_s5  ;;  %7097 = vrot.lane.b32.xlu0 %v7069_v15, %s11945_s3  ;;  %v7075_v5 = vmul.f32 %v11145_v48, %v11234_v31  ;;  %v11250_v51 = vmul.f32 %v6965_v55, %v11234_v31 }
0x1838   : > { %7497 = vrot.lane.b32.xlu2 %v7469_v10, %s11943_s0  ;;  %v11253_v21 = vmul.f32 %v6869_v40, %v11234_v31  ;;  %v11257_v8 = vmul.f32 %v11173_v16, %v11236_v49  ;;  %v11260_v62 = vmul.f32 %v7557_v60, %v11236_v49  ;;  %v11264_v2 = vmul.f32 %v11150_v30, %v11236_v49 }
0x1839   : > { %v11268_v15 = vmul.f32 %v11178_v1, %v11236_v49  ;;  %v7468_v60 = vmul.f32 %v11028_v32, %v11180_v57  ;;  %v7067_v10 = vmul.f32 %v11011_v34, %v11135_v37  ;;  %v6877_v55 = vmul.f32 %v6869_v40, %v11180_v57 }
0x183f   : > { %7393 = vrot.lane.b32.xlu1 %v7369_v28, %s11941_s11  ;;  %7495 = vrot.lane.b32.xlu0 %v7468_v60, %s11943_s0  ;;  %v6874_v28 = vmul.f32 %v6869_v40, %v11133_v14  ;;  %v7373_v40 = vmul.f32 %v11150_v30, %v11182_v53  ;;  %v7376_v60 = vmul.f32 %v11150_v30, %v11211_v20 }
0x1840   : > { %7001 = vrot.lane.b32.xlu2 %v6973_v42, %s11942_s5  ;;  %v7070_v42 = vmul.f32 %v11011_v34, %v11182_v53  ;;  %v7072_v30 = vmul.f32 %v11145_v48, %v11209_v56 }
0x1847   : > { %7093 = vrot.lane.b32.xlu1 %v7067_v10, %s11945_s3  ;;  %7195 = vrot.lane.b32.xlu0 %v7166_v41, %s11916_s8  ;;  %v7273_v10 = vmul.f32 %v11067_v58, %v11133_v14  ;;  %v7472_v41 = vmul.f32 %v11173_v16, %v11211_v20  ;;  %v7277_v16 = vmul.f32 %v11178_v1, %v11182_v53 }
0x1848   : > { %7399 = vrot.lane.b32.xlu2 %v7372_v59, %s11941_s11  ;;  %v7276_v59 = vmul.f32 %v11067_v58, %v11180_v57 }
0x184f   : > { %6899 = vrot.lane.b32.xlu1 %v6874_v28, %s11946_s4  ;;  %7099 = vrot.lane.b32.xlu0 %v7070_v42, %s11945_s3  ;;  %v6974_v28 = vmul.f32 %v11032_v36, %v11182_v53  ;;  %v7280_v42 = vmul.f32 %v11178_v1, %v11211_v20  ;;  %v7471_v1 = vmul.f32 %v11028_v32, %v11209_v56 }
0x1850   : > { %6905 = vrot.lane.b32.xlu2 %v6877_v55, %s11946_s4  ;;  %v7168_v55 = vmul.f32 %v11140_v6, %v11209_v56 }
0x1857   : > { %7297 = vrot.lane.b32.xlu1 %v7273_v10, %s11905_s16  ;;  %7503 = vrot.lane.b32.xlu0 %v7472_v41, %s11943_s0  ;;  %v7171_v10 = vmul.f32 %v11140_v6, %v11234_v31  ;;  %v6881_v41 = vmul.f32 %v11059_v25, %v11211_v20 }
0x1858   : > { %7303 = vrot.lane.b32.xlu2 %v7276_v59, %s11905_s16  ;;  %v6875_v59 = vmul.f32 %v11059_v25, %v11135_v37 }
0x185f   : > { %7401 = vrot.lane.b32.xlu1 %v7373_v40, %s11941_s11  ;;  %7407 = vrot.lane.b32.xlu0 %v7376_v60, %s11941_s11  ;;  %v7169_v40 = vmul.f32 %v11005_v43, %v11211_v20  ;;  %v7172_v60 = vmul.f32 %v11005_v43, %v11236_v49 }
0x1860   : > { %7003 = vrot.lane.b32.xlu2 %v6974_v28, %s11942_s5  ;;  %v7474_v28 = vmul.f32 %v11028_v32, %v11234_v31 }
0x1867   : > { %7305 = vrot.lane.b32.xlu1 %v7277_v16, %s11905_s16  ;;  %7311 = vrot.lane.b32.xlu0 %v7280_v42, %s11905_s16  ;;  %v7375_v16 = vmul.f32 %v11057_v18, %v11209_v56  ;;  %v7378_v42 = vmul.f32 %v11057_v18, %v11234_v31 }
0x1868   : > { %7199 = vrot.lane.b32.xlu2 %v7168_v55, %s11916_s8 }
0x186f   : > { %7103 = vrot.lane.b32.xlu1 %v7072_v30, %s11945_s3  ;;  %7205 = vrot.lane.b32.xlu0 %v7171_v10, %s11916_s8 }
0x1870   : > { %6913 = vrot.lane.b32.xlu2 %v6881_v41, %s11946_s4 }
0x1877   : > { %7501 = vrot.lane.b32.xlu1 %v7471_v1, %s11943_s0  ;;  %6901 = vrot.lane.b32.xlu0 %v6875_v59, %s11946_s4  ;;  %v11397_v1 = vmul.f32 0.0, %v11070_v50 }
0x1878   : > { %7109 = vrot.lane.b32.xlu2 %v7075_v5, %s11945_s3 }
0x187a   : > { %v11341_v6 = vpop.permute.xlu2 %7091 }
0x187b   : > { %v11346_v48 = vsel %vm11958_vm9, %v11083_v26, %v11341_v6  ;;  %v7076_v26 = vmul.f32 %v11011_v34, %v11236_v49  ;;  %vm11970_vm9 = vmmov %vm11954_vm8 }
0x187c   : > { %7129 = vst [vmem:[#allocation5 + $0x80] sm:$0xff] %v11346_v48 }
0x187f   : > { %7201 = vrot.lane.b32.xlu1 %v7169_v40, %s11916_s8  ;;  %7207 = vrot.lane.b32.xlu0 %v7172_v60, %s11916_s8  ;;  %s11964_s8 = sld [smem:[#allocation30_spill]] }
0x1880   : > { %7507 = vrot.lane.b32.xlu2 %v7474_v28, %s11943_s0 }
0x1882   : > { %v7490_v5 = vpop.permute.xlu2 %7489 }
0x1887   : > { %7007 = vrot.lane.b32.xlu1 %v11226_v45, %s11942_s5  ;;  %7111 = vrot.lane.b32.xlu0 %v7076_v26, %s11945_s3  ;;  %v6980_v45 = vmul.f32 %v11032_v36, %v11236_v49  ;;  %v7279_v26 = vmul.f32 %v11067_v58, %v11209_v56 }
0x1888   : > { %7013 = vrot.lane.b32.xlu2 %v11250_v51, %s11942_s5 }
0x188a   : > { %v11365_v43 = vpop.permute.xlu2 %7193 }
0x188b   : > { %v11370_v32 = vsel %vm1646_vm4, %v11063_v44, %v11365_v43 }
0x188c   : > { %7227 = vst [vmem:[#allocation5 + $0xd0] sm:$0xff] %v11370_v32 }
0x188f   : > { %7405 = vrot.lane.b32.xlu1 %v7375_v16, %s11941_s11  ;;  %7015 = vrot.lane.b32.xlu0 %v6980_v45, %s11942_s5  ;;  %v6878_v16 = vmul.f32 %v11059_v25, %v11182_v53 }
0x1890   : > { %7411 = vrot.lane.b32.xlu2 %v7378_v42, %s11941_s11 }
0x1891   : > { %v7396_v51 = vpop.permute.xlu0 %7395  ;;  %v7188_v44 = vpop.permute.xlu1 %7187 }
0x1892   : > { %v11384_v55 = vsel %vm1593_vm5, %v7396_v51, %v11123_v19  ;;  %v7498_v30 = vpop.permute.xlu2 %7497  ;;  %v11388_v10 = vsel %vm1646_vm4, %v11073_v4, %v7188_v44  ;;  %v7073_v19 = vmul.f32 %v11011_v34, %v11211_v20 }
0x1893   : > { %v11392_v18 = vsel %vm11959_vm0, %v7498_v30, %v11097_v9  ;;  %v7721_v41 = vpack.c.bf16 %v11370_v32, %v11388_v10  ;;  %7225 = vst [vmem:[#allocation5 + $0xc0] sm:$0xff] %v11388_v10  ;;  %vm11971_vm0 = vmmov %vm11954_vm8 }
0x1897   : > { %7105 = vrot.lane.b32.xlu1 %v7073_v19, %s11945_s3  ;;  %7601 = vrot.lane.b32.xlu0 %v11397_v1, %s11944_s1  ;;  %s11968_s3 = sld [smem:[#allocation32_spill]] }
0x1898   : > { %6917 = vrot.lane.b32.xlu2 %v11253_v21, %s11946_s4 }
0x1899   : > { %v11407_v4 = vpop.permute.xlu0 %7299  ;;  %v7492_v9 = vpop.permute.xlu1 %7491 }
0x189a   : > { %v11412_v50 = vsel %vm1629_vm6, %v11407_v4, %v11125_v0  ;;  %v7002_v59 = vpop.permute.xlu2 %7001  ;;  %v11415_v40 = vsel %vm11960_vm3, %v7490_v5, %v7492_v9  ;;  %v11419_v34 = vsel %vm11961_vm10, %v7492_v9, %v11099_v61  ;;  %v7282_v0 = vmul.f32 %v11067_v58, %v11234_v31  ;;  %vm11972_vm3 = vmmov %vm11963_vm2 }
0x189b   : > { %v11423_v60 = vsel %vm1496_vm1, %v11095_v47, %v7002_v59  ;;  %7529 = vst [vmem:[#allocation5 + $0x1c0] sm:$0xff] %v11415_v40  ;;  %vm11973_vm10 = vmmov %vm11965_vm7 }
0x189c   : > { %7035 = vst [vmem:[#allocation5 + $0x50] sm:$0xff] %v11423_v60 }
0x189f   : > { %6911 = vrot.lane.b32.xlu1 %v11229_v52, %s11946_s4  ;;  %7587 = vrot.lane.b32.xlu0 %v11166_v7, %s11944_s1 }
0x18a0   : > { %7315 = vrot.lane.b32.xlu2 %v7282_v0, %s11905_s16 }
0x18a1   : > { %v6998_v47 = vpop.permute.xlu0 %6997  ;;  %v7190_v61 = vpop.permute.xlu1 %7189 }
0x18a2   : > { %v11436_v28 = vpop.permute.xlu2 %7399  ;;  %v11439_v5 = vsel %vm1646_vm4, %v7188_v44, %v7190_v61 }
0x18a7   : > { %7309 = vrot.lane.b32.xlu1 %v7279_v26, %s11905_s16  ;;  %7595 = vrot.lane.b32.xlu0 %v11397_v1, %s11944_s1 }
0x18a8   : > { %6907 = vrot.lane.b32.xlu2 %v6878_v16, %s11946_s4 }
0x18a9   : > { %v7098_v7 = vpop.permute.xlu0 %7097  ;;  %v6996_v52 = vpop.permute.xlu1 %6995 }
0x18aa   : > { %v11451_v45 = vsel %vm11962_vm14, %v11115_v22, %v7098_v7  ;;  %v11453_v42 = vpop.permute.xlu2 %6905  ;;  %v11457_v58 = vsel %vm1496_vm1, %v11093_v63, %v6996_v52  ;;  %v11466_v19 = vsel %vm1496_vm1, %v6996_v52, %v6998_v47  ;;  %v6977_v63 = vmul.f32 %v11032_v36, %v11211_v20  ;;  %v7746_v52 = vld [vmem:[%s11964_s8 + $0x8] sm:$0xff]  ;;  %v7874_v36 = vld [vmem:[%s11968_s3] sm:$0x3]  ;;  %vm11975_vm14 = vmmov %vm11963_vm2 }
0x18ab   : > { %7131 = vst [vmem:[#allocation5 + $0x90] sm:$0xff] %v11451_v45  ;;  %v11463_v44 = vsel %vm11963_vm2, %v11117_v24, %v11453_v42  ;;  %v7717_v22 = vpack.c.bf16 %v11451_v45, %v11346_v48  ;;  %v7561_v24 = vmul.f32 %v11109_v29, %v11133_v14  ;;  %vm11976_vm2 = vmmov %vm11971_vm0 }
0x18ac   : > { %6939 = vst [vmem:[#allocation5 + $0x10] sm:$0xff] %v11463_v44 }
0x18ad   : > { %7033 = vst [vmem:[#allocation5 + $0x40] sm:$0xff] %v11457_v58 }
0x18af   : > { %7009 = vrot.lane.b32.xlu1 %v6977_v63, %s11942_s5  ;;  %7585 = vrot.lane.b32.xlu0 %v7561_v24, %s11944_s1 }
0x18b0   : > { %7589 = vrot.lane.b32.xlu2 %v11397_v1, %s11944_s1 }
0x18b1   : > { %v7496_v0 = vpop.permute.xlu0 %7495  ;;  %v7394_v47 = vpop.permute.xlu1 %7393 }
0x18b2   : > { %v11483_v61 = vsel %vm11965_vm7, %v7496_v0, %v7498_v30  ;;  %v7304_v26 = vpop.permute.xlu2 %7303  ;;  %v11486_v16 = vsel %vm1593_vm5, %v7394_v47, %v7396_v51  ;;  %vm11981_vm7 = vmmov %vm11971_vm0 }
0x18b3   : > { %7531 = vst [vmem:[#allocation5 + $0x1d0] sm:$0xff] %v11483_v61 }
0x18b4   : > { %7433 = vst [vmem:[#allocation5 + $0x180] sm:$0xff] %v11486_v16 }
0x18b7   : > { %7509 = vrot.lane.b32.xlu1 %v11257_v8, %s11943_s0  ;;  %7754 = vperm.xlu0 %8515, %v7746_v52  }
0x18b8   : > { %7605 = vrot.lane.b32.xlu2 %v11260_v62, %s11944_s1  ;;  %v7567_v62 = vmul.f32 %v11109_v29, %v11209_v56 }
0x18b9   : > { %v7196_v30 = vpop.permute.xlu0 %7195  ;;  %v7094_v63 = vpop.permute.xlu1 %7093 }
0x18ba   : > { %v11499_v51 = vsel %vm1646_vm4, %v11365_v43, %v7196_v30  ;;  %v7004_v24 = vpop.permute.xlu2 %7003  ;;  %v11503_v0 = vsel %vm11954_vm8, %v11341_v6, %v7094_v63  ;;  %vm11983_vm8 = vcmask 908288  }
0x18bb   : > { %v11506_v47 = vsel %vm1496_vm1, %v7002_v59, %v7004_v24  ;;  %v7722_v48 = vpack.c.bf16 %v11499_v51, %v11439_v5 }
0x18bf   : > { %7413 = vrot.lane.b32.xlu1 %v11264_v2, %s11941_s11 }
0x18c0   : > { %7597 = vrot.lane.b32.xlu2 %v7567_v62, %s11944_s1 }
0x18c1   : > { %v7100_v43 = vpop.permute.xlu0 %7099  ;;  %v6900_v52 = vpop.permute.xlu1 %6899 }
0x18c2   : > { %v11516_v30 = vsel %vm11966_vm15, %v7098_v7, %v7100_v43  ;;  %v11518_v6 = vpop.permute.xlu2 %7199  ;;  %v11522_v59 = vsel %vm11967_vm11, %v11113_v46, %v6900_v52  ;;  %v7564_v7 = vmul.f32 %v11109_v29, %v11180_v57  ;;  %vm11985_vm15 = vmmov %vm11972_vm3 }
0x18c3   : > { %v7213_v63 = vsel %vm1646_vm4, %v11061_v27, %v11518_v6  ;;  %6937 = vst [vmem:[#allocation5] sm:$0xff] %v11522_v59  ;;  %vm11986_vm11 = vmmov %vm11972_vm3 }
0x18c4   : > { %7229 = vst [vmem:[#allocation5 + $0xe0] sm:$0xff] %v7213_v63 }
0x18c7   : > { %7599 = vrot.lane.b32.xlu1 %v11232_v23, %s11944_s1 }
0x18c8   : > { %7591 = vrot.lane.b32.xlu2 %v7564_v7, %s11944_s1 }
0x18c9   : > { %v7504_v46 = vpop.permute.xlu0 %7503  ;;  %v7298_v62 = vpop.permute.xlu1 %7297 }
0x18ca   : > { %v11539_v27 = vsel %vm11969_vm12, %v7504_v46, %v11091_v13  ;;  %v11541_v43 = vpop.permute.xlu2 %6913  ;;  %v11545_v21 = vsel %vm1629_vm6, %v7298_v62, %v11407_v4  ;;  %vm11988_vm12 = vmmov %vm11983_vm8 }
0x18cb   : > { %7337 = vst [vmem:[#allocation5 + $0x140] sm:$0xff] %v11545_v21 }
0x18cf   : > { %7317 = vrot.lane.b32.xlu1 %v11268_v15, %s11905_s16  ;;  %s12012_s16 = sld [smem:[#allocation31_spill]] }
0x18d0   : > { %7877 = vperm.xlu2 %8514, %v7874_v36  }
0x18d1   : > { %v11551_v23 = vpop.permute.xlu0 %7407  ;;  %v7402_v7 = vpop.permute.xlu1 %7401 }
0x18d2   : > { %v11556_v13 = vsel %vm1593_vm5, %v11551_v23, %v11111_v35  ;;  %v7110_v8 = vpop.permute.xlu2 %7109  ;;  %v11560_v4 = vsel %vm1593_vm5, %v11436_v28, %v7402_v7  ;;  %v11564_v62 = vsel %vm1593_vm5, %v7402_v7, %v11121_v3  ;;  %v6884_v35 = vmul.f32 %v11059_v25, %v11236_v49 }
0x18d3   : > { %v7119_v15 = vsel %vm11970_vm9, %v11076_v11, %v7110_v8  ;;  %7435 = vst [vmem:[#allocation5 + $0x190] sm:$0xff] %v11560_v4  ;;  %vm11990_vm9 = vmmov %vm11973_vm10 }
0x18d4   : > { %7135 = vst [vmem:[#allocation5 + $0xb0] sm:$0xff] %v7119_v15 }
0x18d7   : > { %6919 = vrot.lane.b32.xlu1 %v6884_v35, %s11946_s4  ;;  %s11980_s4 = sld [smem:[#allocation29_spill]] }
0x18d9   : > { %v11576_v28 = vpop.permute.xlu0 %7311  ;;  %v7306_v3 = vpop.permute.xlu1 %7305 }
0x18da   : > { %v11581_v11 = vsel %vm1629_vm6, %v11576_v28, %v11127_v54  ;;  %v11583_v7 = vpop.permute.xlu2 %7507  ;;  %v11586_v24 = vsel %vm1629_vm6, %v7304_v26, %v7306_v3  ;;  %v11590_v36 = vsel %vm1629_vm6, %v7306_v3, %v11129_v39 }
0x18db   : > { %7339 = vst [vmem:[#allocation5 + $0x150] sm:$0xff] %v11586_v24 }
0x18df   : > { %7607 = vrot.lane.b32.xlu1 %v11397_v1, %s11944_s1 }
0x18e1   : > { %v7206_v54 = vpop.permute.xlu0 %7205  ;;  %v7104_v2 = vpop.permute.xlu1 %7103 }
0x18e2   : > { %v7215_v26 = vsel %vm1646_vm4, %v11103_v38, %v7206_v54  ;;  %v7014_v9 = vpop.permute.xlu2 %7013  ;;  %v7117_v39 = vsel %vm11971_vm0, %v11079_v17, %v7104_v2  ;;  %vm11992_vm0 = vmmov %vm11990_vm9 }
0x18e3   : > { %7231 = vst [vmem:[#allocation5 + $0xf0] sm:$0xff] %v7215_v26  ;;  %v7023_v3 = vsel %vm1496_vm1, %v11087_v33, %v7014_v9  ;;  %v7723_v25 = vpack.c.bf16 %v7215_v26, %v7213_v63  ;;  %v7719_v63 = vpack.c.bf16 %v7119_v15, %v7117_v39  ;;  %v11974_v15 = vld [vmem:[#allocation49_spill] sm:$0xff] }
0x18e4   : > { %7039 = vst [vmem:[#allocation5 + $0x70] sm:$0xff] %v7023_v3 }
0x18e5   : > { %7133 = vst [vmem:[#allocation5 + $0xa0] sm:$0xff] %v7117_v39  ;;  %7775 = vmatpush.bf16.msra.mxu3 %v7723_v25 }
0x18e7   : > { %7593 = vrot.lane.b32.xlu1 %v11195_v12, %s11944_s1  ;;  %v7570_v12 = vmul.f32 %v11109_v29, %v11234_v31 }
0x18e9   : > { %v6902_v1 = vpop.permute.xlu0 %6901  ;;  %v7502_v35 = vpop.permute.xlu1 %7501  ;;  %7776 = vmatpush.bf16.msra.mxu3 %v7721_v41 }
0x18ea   : > { %v11611_v38 = vsel %vm11972_vm3, %v6900_v52, %v6902_v1  ;;  %v11613_v17 = vpop.permute.xlu2 %7411  ;;  %v11616_v33 = vsel %vm11973_vm10, %v7502_v35, %v7504_v46  ;;  %v7745_v35 = vld [vmem:[%s11964_s8] sm:$0xff] }
0x18eb   : > { %7533 = vst [vmem:[#allocation5 + $0x1e0] sm:$0xff] %v11616_v33 }
0x18ed   : > { %7777 = vmatpush.bf16.msra.mxu3 %v7719_v63 }
0x18ef   : > { %7603 = vrot.lane.b32.xlu1 %v7570_v12, %s11944_s1  ;;  %s8380_s1 = sshll.u32 %s12014_s2, 2 }
0x18f0   : > { %s1451_s0 = scalar_lea.vmem %s8942_s12, %s8380_s1 }
0x18f1   : > { %v7208_v32 = vpop.permute.xlu0 %7207  ;;  %v7202_v10 = vpop.permute.xlu1 %7201  ;;  %7778 = vmatpush.bf16.msra.mxu3 %v7717_v22 }
0x18f2   : > { %v7216_v41 = vsel %vm1646_vm4, %v7206_v54, %v7208_v32  ;;  %v11626_v52 = vpop.permute.xlu2 %6917  ;;  %v7214_v46 = vsel %vm1646_vm4, %v11518_v6, %v7202_v10  ;;  %v11977_v6 = vld [vmem:[#allocation46_spill] sm:$0xff]  ;;  %v11978_v32 = vpack.c.bf16 %v11423_v60, %v11457_v58  ;;  %vm11979_vm4 = vmmov %vm11972_vm3 }
0x18f3   : > { %v6927_v29 = vsel %vm11975_vm14, %v11974_v15, %v11626_v52  ;;  %v7724_v25 = vpack.c.bf16 %v7216_v41, %v7214_v46  ;;  %vm11998_vm3 = vmmov %vm11983_vm8 }
0x18f4   : > { %6943 = vst [vmem:[#allocation5 + $0x30] sm:$0xff] %v6927_v29  ;;  %vm11999_vm10 = vmmov %vm11998_vm3 }
0x18f5   : > { %7817 = vmatpush.bf16.msra.mxu2 %v7724_v25  ;;  %vm12009_vm14 = vmmov %vm11998_vm3 }
0x18f7   : > { %7749 = vperm.xlu1 %8513, %v7745_v35   ;;  %v11984_v35 = vld [vmem:[#allocation48_spill] sm:$0xff] }
0x18f9   : > { %v7112_v45 = vpop.permute.xlu0 %7111  ;;  %v7008_v22 = vpop.permute.xlu1 %7007  ;;  %7818 = vmatpush.bf16.msra.mxu2 %v7722_v48 }
0x18fa   : > { %v7120_v54 = vsel %vm11976_vm2, %v7110_v8, %v7112_v45  ;;  %v11637_v26 = vpop.permute.xlu2 %7315  ;;  %v7021_v39 = vsel %vm1496_vm1, %v11977_v6, %v7008_v22  ;;  %vm12010_vm2 = vmmov %vm11998_vm3 }
0x18fb   : > { %v7715_v1 = vpack.c.bf16 %v7023_v3, %v7021_v39  ;;  %7037 = vst [vmem:[#allocation5 + $0x60] sm:$0xff] %v7021_v39 }
0x18fd   : > { %7779 = vmatpush.bf16.msra.mxu3 %v7715_v1 }
0x1901   : > { %v7016_v63 = vpop.permute.xlu0 %7015  ;;  %v7406_v12 = vpop.permute.xlu1 %7405  ;;  %7780 = vmatpush.bf16.msra.mxu3 %v11978_v32 }
0x1902   : > { %v7024_v5 = vsel %vm1496_vm1, %v7014_v9, %v7016_v63  ;;  %v6908_v51 = vpop.permute.xlu2 %6907  ;;  %v7421_v8 = vsel %vm1593_vm5, %v7406_v12, %v11551_v23  ;;  %v11982_v23 = vpack.c.bf16 %v11516_v30, %v11503_v0  ;;  %v11987_v30 = vpack.c.bf16 %v11463_v44, %v11522_v59 }
0x1903   : > { %v11649_v10 = vsel %vm11979_vm4, %v11453_v42, %v6908_v51  ;;  %7437 = vst [vmem:[#allocation5 + $0x1a0] sm:$0xff] %v7421_v8  ;;  %v11989_v44 = vpack.c.bf16 %v11506_v47, %v11466_v19  ;;  %v11994_v19 = vpack.c.bf16 %v11392_v18, %v11419_v34  ;;  %v11997_v18 = vpack.c.bf16 %v11564_v62, %v11384_v55 }
0x1904   : > { %v7710_v3 = vpack.c.bf16 %v11649_v10, %v11611_v38  ;;  %v12001_v62 = vpack.c.bf16 %v11586_v24, %v11545_v21 }
0x1909   : > { %v7602_v41 = vpop.permute.xlu0 %7601  ;;  %v7106_v46 = vpop.permute.xlu1 %7105 }
0x190a   : > { %v7118_v60 = vsel %vm11981_vm7, %v7104_v2, %v7106_v46  ;;  %v7590_v9 = vpop.permute.xlu2 %7589  ;;  %v8363_v2 = vld [vmem:[%s11980_s4] sm:$0xf] }
0x190b   : > { %v7720_v58 = vpack.c.bf16 %v7120_v54, %v7118_v60  ;;  %v8420_v54 = vld [vmem:[%s11980_s4 + $0x8] sm:$0xf0] }
0x190c   : > { %v11666_v39 = vor.u32 %v8420_v54, %v8363_v2  ;;  %v12004_v2 = vpack.c.bf16 %v11234_v31, %v11209_v56  ;;  %v8365_v54 = vld [vmem:[%s11980_s4 + $0xc] sm:$0xf0]  ;;  %v12008_v31 = vpack.c.bf16 %v11182_v53, %v11135_v37  ;;  %v8421_v37 = vld [vmem:[%s11980_s4 + $0x10] sm:$0xf0] }
0x190d   : > { %7819 = vmatpush.bf16.msra.mxu2 %v7720_v58 }
0x1911   : > { %v7588_v15 = vpop.permute.xlu0 %7587  ;;  %v6912_v25 = vpop.permute.xlu1 %6911  ;;  %7820 = vmatpush.bf16.msra.mxu2 %v11982_v23 }
0x1912   : > { %v11658_v42 = vsel %vm11983_vm8, %v7588_v15, %v7590_v9  ;;  %v6925_v48 = vsel %vm11985_vm15, %v11984_v35, %v6912_v25  ;;  %v6926_v45 = vsel %vm11986_vm11, %v6912_v25, %v11541_v43  ;;  %vm7909_vm11 = vcmask 1041408  }
0x1913   : > { %v7711_v6 = vpack.c.bf16 %v6927_v29, %v6925_v48  ;;  %6941 = vst [vmem:[#allocation5 + $0x20] sm:$0xff] %v6925_v48 }
0x1915   : > { %7781 = vmatpush.bf16.msra.mxu3 %v7711_v6 }
0x1919   : > { %v11668_v1 = vpop.permute.xlu0 %7595  ;;  %v7310_v0 = vpop.permute.xlu1 %7309  ;;  %7782 = vmatpush.bf16.msra.mxu3 %v11987_v30 }
0x191a   : > { %v7325_v63 = vsel %vm1629_vm6, %v7310_v0, %v11576_v28  ;;  %v11991_v28 = vld [vmem:[#allocation47_spill] sm:$0xff]  ;;  %v12005_v0 = vpack.c.bf16 %v11236_v49, %v11211_v20 }
0x191b   : > { %7341 = vst [vmem:[#allocation5 + $0x160] sm:$0xff] %v7325_v63 }
0x191c   : > { %7783 = vmatmul.bf16.vlgmr.msra.gmra.mxu3 %v11666_v39 }
0x1921   : > { %v7586_v43 = vpop.permute.xlu0 %7585  ;;  %v7010_v29 = vpop.permute.xlu1 %7009 }
0x1922   : > { %v11677_v12 = vsel %vm11988_vm12, %v7586_v43, %v7588_v15  ;;  %v7022_v32 = vsel %vm1496_vm1, %v7008_v22, %v7010_v29  ;;  %v11993_v15 = vpack.c.bf16 %v11483_v61, %v11415_v40  ;;  %v11996_v40 = vpack.c.bf16 %v11560_v4, %v11486_v16 }
0x1923   : > { %7625 = vst [vmem:[#allocation5 + $0x200] sm:$0xff] %v11677_v12  ;;  %v7716_v51 = vpack.c.bf16 %v7024_v5, %v7022_v32  ;;  %v7606_v5 = vpop.permute.xlu2 %7605 }
0x1925   : > { %7821 = vmatpush.bf16.msra.mxu2 %v7716_v51 }
0x1929   : > { %v7510_v46 = vpop.permute.xlu1 %7509  ;;  %7822 = vmatpush.bf16.msra.mxu2 %v11989_v44 }
0x192a   : > { %v7519_v59 = vsel %vm11990_vm9, %v11583_v7, %v7510_v46  ;;  %v7520_v60 = vsel %vm11992_vm0, %v7510_v46, %v11991_v28  ;;  %v11995_v7 = vld [vmem:[#allocation50_spill] sm:$0xff] }
0x192b   : > { %7535 = vst [vmem:[#allocation5 + $0x1f0] sm:$0xff] %v7519_v59  ;;  %v7739_v58 = vpack.c.bf16 %v7519_v59, %v11616_v33  ;;  %v7740_v22 = vpack.c.bf16 %v7520_v60, %v11539_v27  ;;  %v7598_v23 = vpop.permute.xlu2 %7597  ;;  %v7755_v59 = vpop.permute.xlu0 %7754 }
0x192d   : > { %7789 = vmatpush.bf16.msra.mxu0 %v7739_v58  ;;  %7831 = vmatpush.bf16.msrb.mxu3 %v7740_v22 }
0x1931   : > { %v7414_v9 = vpop.permute.xlu1 %7413  ;;  %7790 = vmatpush.bf16.msra.mxu0 %v11993_v15  ;;  %7832 = vmatpush.bf16.msrb.mxu3 %v11994_v19 }
0x1932   : > { %v7423_v47 = vsel %vm1593_vm5, %v11613_v17, %v7414_v9  ;;  %v7424_v33 = vsel %vm1593_vm5, %v7414_v9, %v11995_v7  ;;  %vm12003_vm5 = vmmov %vm11979_vm4 }
0x1933   : > { %7439 = vst [vmem:[#allocation5 + $0x1b0] sm:$0xff] %v7423_v47  ;;  %v7735_v27 = vpack.c.bf16 %v7423_v47, %v7421_v8  ;;  %v7736_v25 = vpack.c.bf16 %v7424_v33, %v11556_v13  ;;  %v12000_v8 = vld [vmem:[#allocation51_spill] sm:$0xff]  ;;  %vm12011_vm4 = vmmov %vm12010_vm2 }
0x1935   : > { %7791 = vmatpush.bf16.msra.mxu0 %v7735_v27  ;;  %7833 = vmatpush.bf16.msrb.mxu3 %v7736_v25 }
0x1939   : > { %v7600_v35 = vpop.permute.xlu1 %7599  ;;  %7792 = vmatpush.bf16.msra.mxu0 %v11996_v40  ;;  %7834 = vmatpush.bf16.msrb.mxu3 %v11997_v18 }
0x193a   : > { %v7613_v34 = vsel %vm11998_vm3, %v7598_v23, %v7600_v35  ;;  %v7614_v61 = vsel %vm11999_vm10, %v7600_v35, %v7602_v41  ;;  %v12002_v41 = vpack.c.bf16 %v11590_v36, %v11412_v50  ;;  %v12006_v50 = vpack.c.bf16 %v11180_v57, %v11133_v14  ;;  %v7592_v14 = vpop.permute.xlu2 %7591 }
0x193b   : > { %7629 = vst [vmem:[#allocation5 + $0x220] sm:$0xff] %v7613_v34 }
0x1941   : > { %v7318_v17 = vpop.permute.xlu1 %7317 }
0x1942   : > { %v7327_v13 = vsel %vm1629_vm6, %v11637_v26, %v7318_v17  ;;  %v7328_v48 = vsel %vm1629_vm6, %v7318_v17, %v12000_v8  ;;  %vm12007_vm6 = vmmov %vm11998_vm3 }
0x1943   : > { %7343 = vst [vmem:[#allocation5 + $0x170] sm:$0xff] %v7327_v13  ;;  %v7731_v16 = vpack.c.bf16 %v7327_v13, %v7325_v63  ;;  %v7732_v4 = vpack.c.bf16 %v7328_v48, %v11581_v11  ;;  %v8419_v11 = vld [vmem:[%s11980_s4 + $0x4] sm:$0xf] }
0x1944   : > { %v8368_v21 = vor.u32 %v8419_v11, %v8365_v54 }
0x1945   : > { %7793 = vmatpush.bf16.msra.mxu0 %v7731_v16  ;;  %7835 = vmatpush.bf16.msrb.mxu3 %v7732_v4 }
0x1949   : > { %v6920_v55 = vpop.permute.xlu1 %6919  ;;  %7794 = vmatpush.bf16.msra.mxu0 %v12001_v62  ;;  %7836 = vmatpush.bf16.msrb.mxu3 %v12002_v41 }
0x194a   : > { %v6928_v26 = vsel %vm12003_vm5, %v11626_v52, %v6920_v55  ;;  %v8371_v52 = vld [vmem:[%s11980_s4 + $0x8] sm:$0xf]  ;;  %v7878_v55 = vpop.permute.xlu2 %7877 }
0x194b   : > { %v7712_v6 = vpack.c.bf16 %v6928_v26, %v6926_v45  ;;  %v8372_v53 = vor.u32 %v8421_v37, %v8371_v52 }
0x194d   : > { %7795 = vmatpush.bf16.msra.mxu0 %v12004_v2  ;;  %7823 = vmatpush.bf16.msra.mxu2 %v7712_v6 }
0x194e   : > { %7837 = vmatpush.bf16.msrb.mxu3 %v12005_v0 }
0x1951   : > { %v7608_v24 = vpop.permute.xlu1 %7607  ;;  %7796 = vmatpush.bf16.msra.mxu0 %v12006_v50  ;;  %7824 = vmatpush.bf16.msra.mxu2 %v7710_v3 }
0x1952   : > { %v7616_v56 = vsel %vm12007_vm6, %v7606_v5, %v7608_v24  ;;  %7838 = vmatpush.bf16.msrb.mxu3 %v12008_v31 }
0x1953   : > { %v7744_v20 = vpack.c.bf16 %v7616_v56, %v7614_v61  ;;  %v7871_v61 = vld [vmem:[%s12012_s16] sm:$0x1] }
0x1954   : > { %7797 = vmatmul.bf16.vlgmr.msra.gmra.mxu0 %v8368_v21  ;;  %7825 = vmatmul.bf16.vlgmr.msra.gmra.mxu2 %v11666_v39 }
0x1955   : > { %7851 = vmatpush.bf16.msrb.mxu0 %v7744_v20  ;;  %7839 = vmatmul.bf16.vlgmr.msrb.gmra.mxu3 %v8368_v21 }
0x1959   : > { %v7594_v57 = vpop.permute.xlu1 %7593 }
0x195a   : > { %v7611_v49 = vsel %vm12009_vm14, %v7592_v14, %v7594_v57  ;;  %v7612_v36 = vsel %vm12010_vm2, %v7594_v57, %v11668_v1 }
0x195b   : > { %7627 = vst [vmem:[#allocation5 + $0x210] sm:$0xff] %v7611_v49  ;;  %v7742_v38 = vpack.c.bf16 %v7612_v36, %v11658_v42  ;;  %v7741_v39 = vpack.c.bf16 %v7611_v49, %v11677_v12 }
0x195d   : > { %7852 = vmatpush.bf16.msrb.mxu0 %v7742_v38 }
0x1961   : > { %v7604_v10 = vpop.permute.xlu1 %7603 }
0x1962   : > { %v7615_v3 = vsel %vm12011_vm4, %v7604_v10, %v7606_v5 }
0x1963   : > { %7631 = vst [vmem:[#allocation5 + $0x230] sm:$0xff] %v7615_v3  ;;  %v7743_v45 = vpack.c.bf16 %v7615_v3, %v7613_v34 }
0x1964   : > { %8374 = vmatmul.msk.bf16.vlgmr.msrb.gmra.mxu0 %vm3899_vm13, %v8372_v53 }
0x1965   : > { %7809 = vmatpush.bf16.msrb.mxu1 %v7743_v45 }
0x1969   : > { %7810 = vmatpush.bf16.msrb.mxu1 %v7741_v39  ;;  %v7750_v32 = vpop.permute.xlu1 %7749 }
0x196c   : > { %8373 = vmatmul.msk.bf16.vlgmr.msrb.gmra.mxu1 %vm3899_vm13, %v8372_v53 }
0x199f   : > { %v7784_v1 = vpop.f32.mrf.mxu3 }
0x19a0   : > { %v7785_v15 = vadd.f32 %v7784_v1, %v7750_v32 }
0x19a7   : > { %v7786_v42 = vpop.f32.mrf.mxu3 }
0x19a8   : > { %v7787_v27 = vadd.f32 %v7786_v42, %v7755_v59 }
0x19d1   : > { %v7798_v30 = vpop.f32.mrf.mxu0 }
0x19d2   : > { %v7799_v7 = vadd.f32 %v7798_v30, %v7785_v15 }
0x19d7   : > { %v7826_v63 = vpop.f32.mrf.mxu2 }
0x19d8   : > { %v7840_v29 = vpop.f32.mrf.mxu3  ;;  %v7827_v51 = vadd.f32 %v7826_v63, %v7750_v32 }
0x19d9   : > { %v7800_v43 = vpop.f32.mrf.mxu0 }
0x19da   : > { %v7841_v28 = vadd.f32 %v7840_v29, %v7827_v51  ;;  %v7801_v18 = vadd.f32 %v7800_v43, %v7787_v27 }
0x19df   : > { %v7828_v46 = vpop.f32.mrf.mxu2 }
0x19e0   : > { %v7829_v60 = vadd.f32 %v7828_v46, %v7755_v59  ;;  %v7842_v22 = vpop.f32.mrf.mxu3 }
0x19e1   : > { %v7854_v44 = vpop.f32.mrf.mxu0 }
0x19e2   : > { %v7855_v58 = vadd.f32 %v7854_v44, %v7841_v28  ;;  %v7843_v5 = vadd.f32 %v7842_v22, %v7829_v60 }
0x19e4   : > { %v7864_v19 = vmul.f32 0.05, %v7855_v58  ;;  %vm7860_vm13 = vcmp.gt.f32.partialorder %v7855_v58, 0.0 }
0x19e6   : > { %v7868_v25 = vsel %vm7860_vm13, %v7855_v58, %v7864_v19 }
0x19e9   : > { %v7812_v12 = vpop.f32.mrf.mxu1  ;;  %v7856_v9 = vpop.f32.mrf.mxu0 }
0x19ea   : > { %v7857_v47 = vadd.f32 %v7856_v9, %v7843_v5  ;;  %v7813_v23 = vadd.f32 %v7812_v12, %v7799_v7 }
0x19ec   : > { %vm7862_vm7 = vcmp.gt.f32.partialorder %v7857_v47, 0.0  ;;  %v7866_v33 = vmul.f32 0.05, %v7857_v47  ;;  %v7863_v17 = vmul.f32 0.05, %v7813_v23  ;;  %vm7859_vm8 = vcmp.gt.f32.partialorder %v7813_v23, 0.0 }
0x19ee   : > { %v7870_v35 = vsel %vm7862_vm7, %v7857_v47, %v7866_v33  ;;  %v7867_v48 = vsel %vm7859_vm8, %v7813_v23, %v7863_v17 }
0x19ef   : > { %v7873_v40 = vpack.c.bf16 %v7870_v35, %v7868_v25 }
0x19f1   : > { %v7814_v34 = vpop.f32.mrf.mxu1  ;;  %7903 = vmatpush.bf16.msrb.mxu2 %v7873_v40 }
0x19f2   : > { %v7815_v13 = vadd.f32 %v7814_v34, %v7801_v18 }
0x19f4   : > { %vm7861_vm15 = vcmp.gt.f32.partialorder %v7815_v13, 0.0  ;;  %v7865_v8 = vmul.f32 0.05, %v7815_v13  ;;  %8376 = vmatmul.msk.bf16.vlgmr.msrb.gmra.mxu2 %vm1496_vm1, %v7871_v61 }
0x19f6   : > { %v7869_v16 = vsel %vm7861_vm15, %v7815_v13, %v7865_v8 }
0x19f7   : > { %v7872_v4 = vpack.c.bf16 %v7869_v16, %v7867_v48 }
0x19f9   : > { %7890 = vmatpush.bf16.msra.mxu1 %v7872_v4 }
0x19fc   : > { %8375 = vmatmul.msk.bf16.vlgmr.msra.gmra.mxu1 %vm1496_vm1, %v7871_v61 }
0x1a77   : > { %v7905_v62 = vpop.f32.mrf.mxu2 }
0x1a78   : > { %v7906_v41 = vadd.f32 %v7905_v62, %v7878_v55 }
0x1a79   : > { %v7892_v26 = vpop.f32.mrf.mxu1 }
0x1a7a   : > { %v7917_v6 = vsel %vm7909_vm11, %v7906_v41, -inf  ;;  %v7893_v2 = vadd.f32 %v7892_v26, %v7878_v55 }
0x1a7b   : > { %v7918_v11 = vrot.slane %v7917_v6, 4 }
0x1a7c   : > { %v7910_v54 = vsel %vm7909_vm11, %v7893_v2, -inf }
0x1a7d   : > { %v7919_v0 = vmax.f32 %v7917_v6, %v7918_v11  ;;  %v7911_v21 = vrot.slane %v7910_v54, 4 }
0x1a7f   : > { %v7920_v24 = vrot.slane %v7919_v0, 2  ;;  %v7912_v50 = vmax.f32 %v7910_v54, %v7911_v21  ;;  %v7907_v56 = vpop.f32.mrf.mxu2 }
0x1a81   : > { %v7921_v31 = vmax.f32 %v7919_v0, %v7920_v24  ;;  %v7913_v20 = vrot.slane %v7912_v50, 2  ;;  %v7894_v14 = vpop.f32.mrf.mxu1 }
0x1a83   : > { %v7922_v57 = vrot.slane %v7921_v31, 1  ;;  %v7914_v49 = vmax.f32 %v7912_v50, %v7913_v20 }
0x1a85   : > { %v7923_v36 = vmax.f32 %v7921_v31, %v7922_v57  ;;  %v7915_v38 = vrot.slane %v7914_v49, 1 }
0x1a87   : > { %v7925_v52 = vsub.f32 %v7906_v41, %v7923_v36  ;;  %v7916_v37 = vmax.f32 %v7914_v49, %v7915_v38 }
0x1a89   : > { %v7928_v53 = vmul.f32 1.442695, %v7925_v52  ;;  %v7924_v10 = vsub.f32 %v7893_v2, %v7916_v37 }
0x1a8b   : > { %8568 = vpow2.f32 %v7928_v53  ;;  %v7926_v3 = vmul.f32 1.442695, %v7924_v10 }
0x1a8d   : > { %8570 = vpow2.f32 %v7926_v3 }
0x1a91   : > { %v8569_v45 = vpop.eup %8568 }
0x1a92   : > { %v7937_v39 = vsel %vm7909_vm11, %v8569_v45, 0.0 }
0x1a93   : > { %v8571_v1 = vpop.eup %8570  ;;  %v7938_v30 = vrot.slane %v7937_v39, 4 }
0x1a94   : > { %v7930_v42 = vsel %vm7909_vm11, %v8571_v1, 0.0 }
0x1a95   : > { %v7939_v63 = vadd.f32 %v7938_v30, %v7937_v39  ;;  %v7931_v43 = vrot.slane %v7930_v42, 4 }
0x1a97   : > { %v7940_v29 = vrot.slane %v7939_v63, 2  ;;  %v7932_v32 = vadd.f32 %v7931_v43, %v7930_v42 }
0x1a99   : > { %v7941_v51 = vadd.f32 %v7940_v29, %v7939_v63  ;;  %v7933_v46 = vrot.slane %v7932_v32, 2 }
0x1a9b   : > { %v7942_v44 = vrot.slane %v7941_v51, 1  ;;  %v7934_v59 = vadd.f32 %v7933_v46, %v7932_v32 }
0x1a9d   : > { %v7943_v28 = vadd.f32 %v7942_v44, %v7941_v51  ;;  %v7935_v60 = vrot.slane %v7934_v59, 1 }
0x1a9f   : > { %8572 = vrcp.f32 %v7943_v28  ;;  %v7936_v58 = vadd.f32 %v7935_v60, %v7934_v59  ;;  %v7970_v15 = vand.u32 2147483648, %v7943_v28  ;;  %v7968_v7 = vand.u32 2147483647, %v7943_v28 }
0x1aa0   : > { %vm7964_vm12 = vweird.f32 %v7943_v28 }
0x1aa1   : > { %8574 = vrcp.f32 %v7936_v58  ;;  %v7955_v25 = vand.u32 2147483648, %v7936_v58  ;;  %v7971_v23 = vor.u32 1.1754944e-38, %v7970_v15  ;;  %v7953_v40 = vand.u32 2147483647, %v7936_v58 }
0x1aa2   : > { %vm7969_vm3 = vcmp.eq.f32.partialorder %v7968_v7, 8.507059e+37  ;;  %vm7949_vm10 = vweird.f32 %v7936_v58 }
0x1aa3   : > { %v7956_v13 = vor.u32 1.1754944e-38, %v7955_v25  ;;  %vm7954_vm6 = vcmp.eq.f32.partialorder %v7953_v40, 8.507059e+37 }
0x1aa5   : > { %v8573_v22 = vpop.eup %8572 }
0x1aa6   : > { %v7960_v5 = vmul.f32 %v8573_v22, %v7943_v28  ;;  %vm7965_vm1 = vweird.f32 %v8573_v22 }
0x1aa7   : > { %v8575_v12 = vpop.eup %8574  ;;  %vm7966_vm9 = vmor %vm7964_vm12, %vm7965_vm1 }
0x1aa8   : > { %v7961_v9 = vsub.f32 1.0, %v7960_v5  ;;  %v7945_v19 = vmul.f32 %v8575_v12, %v7936_v58  ;;  %vm7950_vm0 = vweird.f32 %v8575_v12 }
0x1aa9   : > { %vm7951_vm5 = vmor %vm7949_vm10, %vm7950_vm0 }
0x1aaa   : > { %v7962_v47 = vmul.f32 %v8573_v22, %v7961_v9  ;;  %v7946_v33 = vsub.f32 1.0, %v7945_v19 }
0x1aac   : > { %v7963_v27 = vadd.f32 %v8573_v22, %v7962_v47  ;;  %v7947_v35 = vmul.f32 %v8575_v12, %v7946_v33 }
0x1aae   : > { %v7967_v18 = vsel %vm7966_vm9, %v8573_v22, %v7963_v27  ;;  %v7948_v61 = vadd.f32 %v8575_v12, %v7947_v35 }
0x1aaf   : > { %v7972_v34 = vsel %vm7969_vm3, %v7971_v23, %v7967_v18 }
0x1ab0   : > { %v7973_v17 = vmul.f32 %v8569_v45, %v7972_v34  ;;  %v7952_v8 = vsel %vm7951_vm5, %v8575_v12, %v7948_v61 }
0x1ab1   : > { %v7957_v16 = vsel %vm7954_vm6, %v7956_v13, %v7952_v8 }
0x1ab2   : > { %v7976_v48 = vrot.slane %v7973_v17, 6  ;;  %v7958_v4 = vmul.f32 %v8571_v1, %v7957_v16 }
0x1ab4   : > { %v7977_v55 = vsel %vm7909_vm11, %v7958_v4, %v7976_v48 }
0x1ab5   : > { %7979 = vst [vmem:[%s1451_s0] sm:$0xf] %v7977_v55 }
0x1ab6 PF: > { %s108_s28 = sadd.s32 1, %s8619_s28  }
0x1ab7   : > { %p105_p1 = scmp.ge.s32.totalorder %s108_s28, 4  }
0x1ab9   :  { %107 = sbr.rel (!%p105_p1) target bundleno = 103 (0x67), region = 302 }
0x1abe   :  { %8001 = vsyncpa [#allocation7], 1 }
0x1abf   :  { %8003 = vsyncpa [#allocation7 + $0x1], 1 }

</bundles_post_ra>
